<compile_context>
chip_gen: v7x
topology: tpu7x:2x2x1
jax: 0.10.0
libtpu: 0.0.40
codegen_flags: <defaults>
</compile_context>

<pallas_src>
import jax
import jax.numpy as jnp
from jax.experimental import pallas as pl
from jax.experimental.pallas import tpu as pltpu


_LANES = 512                            # lane-dim tile width (multiple of 128)
_TARGET_BLOCK_BYTES = 4 * 1024 * 1024   # ~4 MiB per block (review: 4-8 MiB)
_SMALL_THRESHOLD = 256 * 1024           # elements; below this, XLA fused sigmoid wins
_MIN_PROGRAMS = 2                       # keep >= 2 grid steps for the v7x 2-TC split


def _round_up(x: int, m: int) -> int:
    return ((x + m - 1) // m) * m


def _round_down(x: int, m: int) -> int:
    return (x // m) * m


def _sublane_align(itemsize: int) -> int:
    # Native packing: (8,128) for 4-byte, (16,128) for 2-byte, (32,128) for 1-byte.
    return max(8, 32 // itemsize)


def _vmem_limit_bytes() -> int:
    # Per-generation scoped-VMEM limit: 3/4 of physical, capped at 96 MiB.
    # (v7x: 48 MiB of 64; v5e/v6e: 96 MiB of 128.)  Falls back to a value
    # that is safe on every generation.
    try:
        cap = int(pltpu.get_tpu_info().vmem_capacity_bytes)
        return int(min(cap * 3 // 4, 96 * 1024 * 1024))
    except Exception:
        return 48 * 1024 * 1024


def _sigmoid_kernel(x_ref, o_ref):
    # Explicit f32 compute (v5e EUP/VPU have no bf16 path), stable logistic:
    #   sigmoid(x) = 1/(1+e)  if x >= 0,   e = exp(-|x|)
    #              = e/(1+e)  if x <  0
    x = x_ref[...].astype(jnp.float32)
    e = jnp.exp(-jnp.abs(x))                 # EUP
    denom_inv = 1.0 / (1.0 + e)              # memory-bound: exact recip is free
    y = jnp.where(x >= 0, denom_inv, e * denom_inv)
    o_ref[...] = y.astype(o_ref.dtype)


def _pick_row_tile(rows: int, cols: int, itemsize: int) -> int:
    """Row tile targeting ~4 MiB blocks, dtype-scaled, grid kept >= 2 programs."""
    align = _sublane_align(itemsize)
    target = max(align, _round_down(_TARGET_BLOCK_BYTES // (cols * itemsize), align))
    if rows > target:
        return target                         # grid already >= 2 programs
    row_tile = rows                           # full extent (always legal)
    if pl.cdiv(rows, row_tile) < _MIN_PROGRAMS and rows >= _MIN_PROGRAMS * align:
        # Split so both TensorCores (v7x) stream half the array each.
        row_tile = _round_up(pl.cdiv(rows, _MIN_PROGRAMS), align)
    return row_tile


def _pallas_sigmoid_2d(x2: jax.Array, row_tile: int) -> jax.Array:
    rows, cols = x2.shape
    n = x2.size
    itemsize = jnp.dtype(x2.dtype).itemsize
    cost = pl.CostEstimate(
        flops=5 * n,
        transcendentals=n,
        bytes_accessed=2 * n * itemsize,
    )
    return pl.pallas_call(
        _sigmoid_kernel,
        out_shape=jax.ShapeDtypeStruct((rows, cols), x2.dtype),
        grid=(pl.cdiv(rows, row_tile),),
        in_specs=[pl.BlockSpec((row_tile, cols), lambda i: (i, 0))],
        out_specs=pl.BlockSpec((row_tile, cols), lambda i: (i, 0)),
        compiler_params=pltpu.CompilerParams(
            dimension_semantics=("parallel",),   # megacore sharding on v7x
            vmem_limit_bytes=_vmem_limit_bytes(),
        ),
        cost_estimate=cost,
    )(x2)


def sigmoid_pallas(x: jax.Array) -> jax.Array:
    """Elementwise sigmoid via a tiled, pipelined Pallas TPU kernel."""
    # Tiny inputs: dispatch + wrapper cost exceeds the work; XLA fuses it.
    if x.size < _SMALL_THRESHOLD:
        return jax.nn.sigmoid(x)

    orig_shape = x.shape
    itemsize = jnp.dtype(x.dtype).itemsize
    n = x.size

    # Fast path: lane-aligned total size -> free reshape to a (rows, 512)
    # lane-dense view.  No pad, no slice, fully unmasked stores.
    if n % _LANES == 0:
        rows = n // _LANES
        x2 = x.reshape(rows, _LANES)
        row_tile = _pick_row_tile(rows, _LANES, itemsize)
        return _pallas_sigmoid_2d(x2, row_tile).reshape(orig_shape)

    # Ragged total size but a usable trailing dim: collapse leading dims
    # (free reshape) and tile with a full-extent last-dim block.  Zero extra
    # HBM traffic; only the lane tail of each store is masked.
    if x.ndim >= 2:
        cols = orig_shape[-1]
        rows = n // cols
        align = _sublane_align(itemsize)
        if (cols >= 128 and rows >= align
                and align * cols * itemsize <= 2 * _TARGET_BLOCK_BYTES):
            x2 = x.reshape(rows, cols)
            row_tile = _pick_row_tile(rows, cols, itemsize)
            return _pallas_sigmoid_2d(x2, row_tile).reshape(orig_shape)

    # Awkward shapes (large 1-D ragged, tiny last dim): a pad+unpad round trip
    # would add up to 2 extra full HBM passes -- slower than XLA's fused
    # elementwise sigmoid, so fall back.
    return jax.nn.sigmoid(x)


class Net:
    """JAX/Pallas mirror of the PyTorch Net module (no parameters; ReLU unused)."""

    def __call__(self, x: jax.Array) -> jax.Array:
        return sigmoid_pallas(x)


if __name__ == "__main__":
    net = Net()
    key = jax.random.PRNGKey(0)
    k1, k2, k3 = jax.random.split(key, 3)

    # 1) The literal tensor from the PyTorch script (tiny -> fused fallback).
    x_literal = jnp.array([[1.0, -0.5], [-1.0, 3.0]], dtype=jnp.float32)
    # 2) Large aligned f32 -> lane-dense Pallas path; row tile split so the
    #    grid has 2 programs (exercises the v7x two-TensorCore path).
    x_large = jax.random.normal(k1, (1024, 1024), dtype=jnp.float32)
    # 3) Ragged shape -> native 2-D Pallas path (full-extent last-dim block,
    #    no pad / slice HBM round trips).
    x_ragged = jax.random.normal(k2, (513, 1025), dtype=jnp.float32)
    # 4) bf16 -> dtype-scaled row tile + f32 in-kernel compute.
    x_bf16 = jax.random.normal(k3, (1024, 512), dtype=jnp.bfloat16)

    outs = {
        "literal": jax.block_until_ready(net(x_literal)),
        "large": jax.block_until_ready(net(x_large)),
        "ragged": jax.block_until_ready(net(x_ragged)),
        "bf16": jax.block_until_ready(net(x_bf16)),
    }

    # Correctness vs the pure-JAX reference.
    assert outs["literal"].shape == x_literal.shape
    assert jnp.allclose(outs["literal"], jax.nn.sigmoid(x_literal), atol=1e-6), "literal mismatch"
    assert outs["large"].shape == x_large.shape
    assert jnp.allclose(outs["large"], jax.nn.sigmoid(x_large), atol=1e-6), "large mismatch"
    assert outs["ragged"].shape == x_ragged.shape
    assert jnp.allclose(outs["ragged"], jax.nn.sigmoid(x_ragged), atol=1e-6), "ragged mismatch"
    assert outs["bf16"].dtype == jnp.bfloat16
    assert jnp.allclose(outs["bf16"].astype(jnp.float32),
                        jax.nn.sigmoid(x_bf16).astype(jnp.float32),
                        atol=1e-2), "bf16 mismatch"

    print("KERNEL_OK")
</pallas_src>

<mosaic_0001>
module attributes {stable_mosaic.version = 11 : i64} {
  func.func @_sigmoid_kernel(%arg0: i32, %arg1: memref<1024x512xf32, #tpu.memory_space<vmem>>, %arg2: memref<1024x512xf32, #tpu.memory_space<vmem>>) attributes {dimension_semantics = [#tpu.dimension_semantics<parallel>], iteration_bounds = array<i64: 2>, scalar_prefetch = 0 : i64, scratch_operands = 0 : i64, tpu.core_type = #tpu.core_type<tc>, window_params = [{transform_indices = @transform_0, window_bounds = array<i64: 1024, 512>}, {transform_indices = @transform_1, window_bounds = array<i64: 1024, 512>}]} {
    %c0 = arith.constant 0 : index
    %c0_0 = arith.constant 0 : index
    %0 = vector.load %arg1[%c0, %c0_0] : memref<1024x512xf32, #tpu.memory_space<vmem>>, vector<1024x512xf32>
    %1 = math.absf %0 : vector<1024x512xf32>
    %cst = arith.constant 0.000000e+00 : f32
    %2 = vector.broadcast %cst : f32 to vector<1024x512xf32>
    %3 = arith.subf %2, %1 : vector<1024x512xf32>
    %4 = math.exp %3 : vector<1024x512xf32>
    %cst_1 = arith.constant 1.000000e+00 : f32
    %5 = vector.broadcast %cst_1 : f32 to vector<1024x512xf32>
    %6 = arith.addf %5, %4 : vector<1024x512xf32>
    %cst_2 = arith.constant 1.000000e+00 : f32
    %7 = vector.broadcast %cst_2 : f32 to vector<1024x512xf32>
    %8 = arith.divf %7, %6 : vector<1024x512xf32>
    %cst_3 = arith.constant 0.000000e+00 : f32
    %9 = vector.broadcast %cst_3 : f32 to vector<1024x512xf32>
    %10 = arith.cmpf oge, %0, %9 : vector<1024x512xf32>
    %11 = arith.mulf %4, %8 : vector<1024x512xf32>
    %12 = arith.select %10, %8, %11 : vector<1024x512xi1>, vector<1024x512xf32>
    %c0_4 = arith.constant 0 : index
    %c0_5 = arith.constant 0 : index
    %13 = vector.load %arg2[%c0_4, %c0_5] : memref<1024x512xf32, #tpu.memory_space<vmem>>, vector<1024x512xf32>
    tpu.vector_store %arg2[%c0_4, %c0_5], %12 {strides = array<i32>} : memref<1024x512xf32, #tpu.memory_space<vmem>>, vector<1024x512xf32>,
    return
  }
  func.func @transform_0(%arg0: i32) -> (i32, i32) {
    %c0_i32 = arith.constant 0 : i32
    %c0_i32_0 = arith.constant 0 : i32
    return %arg0, %c0_i32 : i32, i32
  }
  func.func @transform_1(%arg0: i32) -> (i32, i32) {
    %c0_i32 = arith.constant 0 : i32
    %c0_i32_0 = arith.constant 0 : i32
    return %arg0, %c0_i32 : i32, i32
  }
}

</mosaic_0001>

<bundles_post_ra>
// kernel: tpu_custom_call.1
= control target key start
LH: loop header
LB: loop body
LE: loop exit
PB: predicated region body
PF: predicated region fallthrough
CT: control target
= control target key end

     0   :  { %6 = vsyncpa [#allocation3], 0  ;;  %s14847_s0 = inlined_call_operand.hbm [shape: f32[2048,512], index: 0, kind: input, shape index: {}]   ;;  %s14848_s1 = inlined_call_operand.hbm [shape: f32[2048,512], index: 1, kind: output, shape index: {}]  }
   0x1   :  { %8 = vsyncpa [#allocation3 + $0x1], 0 }
   0x2   :  { %9 = vsyncpa [#allocation4], 0 }
   0x3   :  { %11 = vsyncpa [#allocation4 + $0x1], 0  ;;  %s8602_s6 = smov 0   ;;  %s8604_s7 = smov 0  }
   0x4   :  { %s8606_s8 = smov 0   ;;  %s8608_s9 = smov 0  }
   0x5 LB: > { %s8623_s10 = sadd.s32 4294967295, %s8584_s9   ;;  %s6370_s11 = sadd.s32 4294967294, %s8584_s9   ;;  %s8584_s9 = sphi %s8608_s9, %s14861_s9   ;;  %s8580_s8 = sphi %s8606_s8, %s14860_s8   ;;  %s8576_s7 = sphi %s8604_s7, %s14859_s7   ;;  %s8572_s6 = sphi %s8602_s6, %s14858_s6  }
   0x6   : > { %s8627_s12 = sadd.s32 1, %s8584_s9   ;;  %s24_s13 = sadd.s32 1, %s8580_s8 }
   0x7   : > { %s21_s14 = ssub.s32 %s8584_s9, %s8627_s12  ;;  %p31_p0 = scmp.ne.s32.totalorder %s8580_s8, %s8576_s7 }
   0x8   : > { %p22_p1 = scmp.eq.s32.totalorder %s21_s14, 0  ;;  %p32_p2 = scmp.eq.s32.totalorder %s8584_s9, 0 }
   0x9   : > { %p37_p3 = scmp.ne.s32.totalorder %s8576_s7, %s8572_s6  ;;  %p38_p4 = scmp.eq.s32.totalorder %s8623_s10, 0 }
   0xa   : > { %s8639_s15 = scalar_select %p22_p1, %s8580_s8, %s24_s13  }
   0xb   : > { %p8641_p5 = por %p32_p2, %p31_p0  ;;  %p8645_p6 = por %p38_p4, %p37_p3 }
   0xc   : > { %p61_p7 = scmp.eq.s32.totalorder %s8623_s10, 1  ;;  %p67_p8 = scmp.eq.s32.totalorder %s6370_s11, 1 }
   0xd   : > { %p6402_p10 = scmp.lt.s32.totalorder %s8584_s9, 2  ;;  %s87_s20 = sand.u32 1, %s8580_s8  }
   0xe   : > { %p8652_p11 = por %p61_p7, %p31_p0  ;;  %p8656_p12 = por %p67_p8, %p37_p3 }
   0xf   : > { %s6387_s21 = sshll.u32 %s8584_s9, 16  ;;  %s6373_s22 = sshll.u32 %s87_s20, 12 }
  0x10   : > { %s14852_s18 = scalar_select %p8652_p11, 1, 0 }
  0x11   : > { %s14853_s19 = scalar_select %p8656_p12, 1, 0 }
  0x12   : > { %s8665_s25 = scalar_lea.hbm %s14847_s0, %s6387_s21  ;;  %s91_s26 = scalar_lea.vmem [#allocation2], %s6373_s22 }
  0x13   : > { %s99_s27 = sshll.u32 %s91_s26, 4  ;;  %p8669_p13 = pnand %p6402_p10, %p8641_p5  ;;  %s8673_s27 = int_to_ptr.vmem [resolvable:$true] %s99_s27 }
  0x14   : > { %s8675_s29 = scalar_lea.sflag [#allocation3], %s87_s20  ;;  %s8488_s30 = scalar_lea.hbm %s8665_s25, 65536 }
  0x15   : > { %p8489_p0 = scmp.ne.s32.totalorder %s8665_s25, %s8488_s30  ;;  %p8490_p1 = pneg %p8669_p13 }
  0x16   : > { %s8493_s4 = scalar_lea.hbm %s14847_s0, 131072  ;;  %p8494_p4 = scmp.lt.u32.totalorder %s8665_s25, %s14847_s0 }
  0x17   : > { %p8491_p2 = pnand %p8490_p1, %p8489_p0  ;;  %p8495_p5 = scmp.lt.u32.totalorder %s8493_s4, %s8488_s30 }
  0x18   : > { %p8497_p8 = scmp.lt.u32.totalorder %s8488_s30, %s8665_s25 }
  0x19   : > { %p8492_p3 = pneg %p8491_p2  ;;  %p8496_p7 = por %p8495_p5, %p8494_p4 }
  0x1b   : > { %p8498_p10 = por %p8497_p8, %p8496_p7 }
  0x1d   : > { %p8499_p9 = pnand %p8498_p10, %p8492_p3 }
  0x1f   : > { %8502 = shalt.err (!%p8499_p9)
}
  0x20   : > { %s8503_s13 = scalar_lea.vmem %s8673_s27, 65536  ;;  %s8586_s14 = smov [#allocation2]  }
  0x21   : > { %p8504_p0 = scmp.ne.s32.totalorder %s8673_s27, %s8503_s13  ;;  %s8508_s16 = sshll.u32 %s8586_s14, 4  ;;  %s8509_s16 = int_to_ptr.vmem [resolvable:$false] %s8508_s16 }
  0x22   : > { %s8510_s20 = scalar_lea.vmem %s8509_s16, 131072  ;;  %p8511_p11 = scmp.lt.s32.totalorder %s8673_s27, %s8509_s16 }
  0x23   : > { %p8506_p2 = pnand %p8504_p0, %p8490_p1  ;;  %p8512_p4 = scmp.lt.s32.totalorder %s8510_s20, %s8503_s13 }
  0x25   : > { %p8507_p12 = pneg %p8506_p2  ;;  %p8513_p5 = por %p8512_p4, %p8511_p11 }
  0x27   : > { %p8514_p7 = pnand %p8513_p5, %p8507_p12 }
  0x29   : > { %8517 = shalt.err (!%p8514_p7)
}
  0x2a   : > { %s8587_s21 = smov 512   ;;  %s8588_s22 = smov 32  }
  0x2b   : > { %6397 = dma.hbm_to_vmem [thread:$0]  (!%p8669_p13), %s8665_s25, 65536, %s8673_s27, %s8675_s29, %s8587_s21, %s8587_s21, %s8588_s22  }
  0x2c   : > { %p6377_p9 = scmp.ge.s32.totalorder %s8584_s9, 1  ;;  %p107_p1 = scmp.lt.s32.totalorder %s8584_s9, 3 }
  0x2e   : > { %p108_p3 = pnand %p6377_p9, %p107_p1 }
  0x2f   : > { %s8706_s23 = sand.u32 (!%p108_p3), 1, %s8576_s7  }
  0x30   : > { %111 = sbr.rel (%p108_p3) target bundleno = 1243 (0x4db), region = 24  ;;  %s6378_s24 = sshll.u32 (!%p108_p3), %s8706_s23, 12 }
  0x31   : > { %s114_s26 = scalar_lea.sflag (!%p108_p3), [#allocation3], %s8706_s23  ;;  %s8712_s30 = scalar_lea.vmem (!%p108_p3), [#allocation2], %s6378_s24 }
  0x37   : > { %8563 = dma.done.wait (%p8645_p6), %s114_s26, 65536  }
  0x38   : > { %8565 = vsyncadd (%p8645_p6), %s114_s26, 4294901760  ;;  %v8719_v0 = vld [vmem:[%s8712_s30] sm:$0xff]  ;;  %v8722_v1 = vld [vmem:[%s8712_s30 + $0x8] sm:$0xff]  ;;  %s8863_s17 = scalar_lea.vmem [#allocation5], %s6378_s24  ;;  %s6389_s25 = sshll.u32 %s8623_s10, 16 }
  0x39   : > { %v8725_v2 = vld [vmem:[%s8712_s30 + $0x10] sm:$0xff]  ;;  %v650_v3 = vand.u32 2147483647, %v8719_v0  ;;  %v651_v4 = vand.u32 2147483647, %v8722_v1  ;;  %v8731_v6 = vld [vmem:[%s8712_s30 + $0x18] sm:$0xff]  ;;  %s14799_s2 = scalar_lea.hbm %s14848_s1, %s6389_s25 }
  0x3a   : > { %v652_v5 = vand.u32 2147483647, %v8725_v2  ;;  %v8734_v7 = vld [vmem:[%s8712_s30 + $0x20] sm:$0xff]  ;;  %v8737_v8 = vld [vmem:[%s8712_s30 + $0x28] sm:$0xff]  ;;  %v653_v11 = vand.u32 2147483647, %v8731_v6 }
  0x3b   : > { %v1162_v9 = vsub.f32 0.0, %v650_v3  ;;  %v1163_v10 = vsub.f32 0.0, %v651_v4  ;;  %v8741_v12 = vld [vmem:[%s8712_s30 + $0x30] sm:$0xff]  ;;  %v654_v14 = vand.u32 2147483647, %v8734_v7  ;;  %v8747_v24 = vld [vmem:[%s8712_s30 + $0x38] sm:$0xff] }
  0x3c   : > { %v1164_v13 = vsub.f32 0.0, %v652_v5  ;;  %v655_v15 = vand.u32 2147483647, %v8737_v8  ;;  %v1165_v18 = vsub.f32 0.0, %v653_v11  ;;  %v656_v22 = vand.u32 2147483647, %v8741_v12 }
  0x3d   : > { %v1674_v16 = vmul.f32 1.442695, %v1162_v9  ;;  %v1676_v17 = vmul.f32 1.442695, %v1163_v10  ;;  %v1166_v20 = vsub.f32 0.0, %v654_v14  ;;  %v8750_v25 = vld [vmem:[%s8712_s30 + $0x40] sm:$0xff] }
  0x3e   : > { %v1678_v19 = vmul.f32 1.442695, %v1164_v13  ;;  %v1167_v21 = vsub.f32 0.0, %v655_v15  ;;  %v1680_v23 = vmul.f32 1.442695, %v1165_v18  ;;  %v8753_v26 = vld [vmem:[%s8712_s30 + $0x48] sm:$0xff] }
  0x3f   : > { %6440 = vpow2.f32 %v1674_v16  ;;  %v1682_v27 = vmul.f32 1.442695, %v1166_v20  ;;  %v1168_v29 = vsub.f32 0.0, %v656_v22  ;;  %v657_v30 = vand.u32 2147483647, %v8747_v24  ;;  %v8758_v32 = vld [vmem:[%s8712_s30 + $0x50] sm:$0xff] }
  0x40   : > { %6442 = vpow2.f32 %v1676_v17  ;;  %v1684_v28 = vmul.f32 1.442695, %v1167_v21  ;;  %v658_v31 = vand.u32 2147483647, %v8750_v25  ;;  %v659_v34 = vand.u32 2147483647, %v8753_v26 }
  0x41   : > { %6444 = vpow2.f32 %v1678_v19  ;;  %v1686_v33 = vmul.f32 1.442695, %v1168_v29  ;;  %v8762_v35 = vld [vmem:[%s8712_s30 + $0x58] sm:$0xff]  ;;  %v1169_v36 = vsub.f32 0.0, %v657_v30  ;;  %v660_v39 = vand.u32 2147483647, %v8758_v32 }
  0x42   : > { %6446 = vpow2.f32 %v1680_v23  ;;  %v1170_v37 = vsub.f32 0.0, %v658_v31  ;;  %v1171_v38 = vsub.f32 0.0, %v659_v34  ;;  %v8766_v40 = vld [vmem:[%s8712_s30 + $0x60] sm:$0xff]  ;;  %v661_v43 = vand.u32 2147483647, %v8762_v35  ;;  %v8771_v48 = vld [vmem:[%s8712_s30 + $0x68] sm:$0xff] }
  0x43   : > { %6448 = vpow2.f32 %v1682_v27  ;;  %v1688_v41 = vmul.f32 1.442695, %v1169_v36  ;;  %v1172_v45 = vsub.f32 0.0, %v660_v39  ;;  %v662_v47 = vand.u32 2147483647, %v8766_v40  ;;  %v8776_v52 = vld [vmem:[%s8712_s30 + $0x70] sm:$0xff] }
  0x44   : > { %6450 = vpow2.f32 %v1684_v28  ;;  %v1690_v42 = vmul.f32 1.442695, %v1170_v37  ;;  %v1692_v44 = vmul.f32 1.442695, %v1171_v38  ;;  %v1173_v46 = vsub.f32 0.0, %v661_v43  ;;  %v8779_v53 = vld [vmem:[%s8712_s30 + $0x78] sm:$0xff] }
  0x45   : > { %6452 = vpow2.f32 %v1686_v33  ;;  %v1694_v49 = vmul.f32 1.442695, %v1172_v45  ;;  %v663_v56 = vand.u32 2147483647, %v8771_v48  ;;  %v8786_v57 = vld [vmem:[%s8712_s30 + $0x80] sm:$0xff]  ;;  %v1174_v60 = vsub.f32 0.0, %v662_v47 }
  0x46   : > { %6454 = vpow2.f32 %v1688_v41  ;;  %v1696_v51 = vmul.f32 1.442695, %v1173_v46  ;;  %v664_v63 = vand.u32 2147483647, %v8776_v52  ;;  %v665_v3 = vand.u32 2147483647, %v8779_v53 }
  0x47   : > { %6456 = vpow2.f32 %v1690_v42  ;;  %v8797_v4 = vld [vmem:[%s8712_s30 + $0x88] sm:$0xff]  ;;  %v666_v10 = vand.u32 2147483647, %v8786_v57  ;;  %vm4234_vm0 = vcmp.ge.f32.partialorder %v8719_v0, 0.0  ;;  %v1175_v14 = vsub.f32 0.0, %v663_v56  ;;  %v8808_v15 = vld [vmem:[%s8712_s30 + $0x90] sm:$0xff] }
  0x48   : > { %6458 = vpow2.f32 %v1692_v44  ;;  %vm4235_vm1 = vcmp.ge.f32.partialorder %v8722_v1, 0.0  ;;  %v1698_v18 = vmul.f32 1.442695, %v1174_v60  ;;  %v667_v19 = vand.u32 2147483647, %v8797_v4  ;;  %v8816_v20 = vld [vmem:[%s8712_s30 + $0x98] sm:$0xff] }
  0x49   : > { %v8773_v50 = vpop.eup %6440  ;;  %6460 = vpow2.f32 %v1694_v49  ;;  %vm4236_vm2 = vcmp.ge.f32.partialorder %v8725_v2, 0.0  ;;  %v1176_v22 = vsub.f32 0.0, %v664_v63  ;;  %v1177_v23 = vsub.f32 0.0, %v665_v3  ;;  %v8830_v36 = vld [vmem:[%s8712_s30 + $0xa0] sm:$0xff]  ;;  %v8841_v46 = vld [vmem:[%s8712_s30 + $0xa8] sm:$0xff]  ;;  %v8848_v56 = vld [vmem:[%s8712_s30 + $0xb0] sm:$0xff] }
  0x4a   : > { %v8781_v54 = vpop.eup %6442  ;;  %v2698_v55 = vadd.f32 1.0, %v8773_v50  ;;  %6462 = vpow2.f32 %v1696_v51  ;;  %vm4237_vm3 = vcmp.ge.f32.partialorder %v8731_v6, 0.0  ;;  %v1178_v28 = vsub.f32 0.0, %v666_v10  ;;  %v8887_v6 = vld [vmem:[%s8712_s30 + $0xc0] sm:$0xff]  ;;  %s6297_s27 = sshll.u32 %s8863_s17, 4  ;;  %s6283_s10 = scalar_lea.sflag [#allocation4], %s8706_s23  ;;  %s14801_s27 = int_to_ptr.vmem [resolvable:$true] %s6297_s27 }
  0x4b   : > { %v8788_v58 = vpop.eup %6444  ;;  %v2699_v59 = vadd.f32 1.0, %v8781_v54  ;;  %v668_v29 = vand.u32 2147483647, %v8808_v15  ;;  %vm4238_vm4 = vcmp.ge.f32.partialorder %v8734_v7, 0.0  ;;  %v1179_v33 = vsub.f32 0.0, %v667_v19  ;;  %s8518_s3 = scalar_lea.vmem %s14801_s27, 65536 }
  0x4c   : > { %v8791_v61 = vpop.eup %6446  ;;  %6464 = vrcp.f32 %v2698_v55  ;;  %v2700_v62 = vadd.f32 1.0, %v8788_v58  ;;  %v669_v34 = vand.u32 2147483647, %v8816_v20  ;;  %vm4239_vm5 = vcmp.ge.f32.partialorder %v8737_v8, 0.0  ;;  %p8519_p6 = scmp.ne.s32.totalorder %s14801_s27, %s8518_s3  ;;  %p14855_p11 = scmp.ne.s32.totalorder %s14852_s18, 0 }
  0x4d   : > { %v8799_v5 = vpop.eup %6448  ;;  %6466 = vrcp.f32 %v2699_v59  ;;  %v2701_v9 = vadd.f32 1.0, %v8791_v61  ;;  %v1700_v39 = vmul.f32 1.442695, %v1175_v14  ;;  %v1180_v41 = vsub.f32 0.0, %v668_v29  ;;  %s8589_s4 = smov [#allocation5]  }
  0x4e   : > { %v8803_v11 = vpop.eup %6450  ;;  %6468 = vrcp.f32 %v2700_v62  ;;  %v2702_v13 = vadd.f32 1.0, %v8799_v5  ;;  %vm4240_vm6 = vcmp.ge.f32.partialorder %v8741_v12, 0.0  ;;  %v1702_v44 = vmul.f32 1.442695, %v1176_v22  ;;  %p8520_p12 = pnand %p8519_p6, %p14855_p11  ;;  %s8522_s5 = sshll.u32 %s8589_s4, 4  ;;  %s8523_s5 = int_to_ptr.vmem [resolvable:$false] %s8522_s5 }
  0x4f   : > { %v8810_v16 = vpop.eup %6452  ;;  %6470 = vrcp.f32 %v2701_v9  ;;  %v2703_v17 = vadd.f32 1.0, %v8803_v11  ;;  %v1704_v45 = vmul.f32 1.442695, %v1177_v23  ;;  %v1181_v51 = vsub.f32 0.0, %v669_v34  ;;  %s8524_s11 = scalar_lea.vmem %s8523_s5, 131072  ;;  %p8525_p8 = scmp.lt.s32.totalorder %s14801_s27, %s8523_s5 }
  0x50   : > { %6472 = vrcp.f32 %v2702_v13  ;;  %v2704_v21 = vadd.f32 1.0, %v8810_v16  ;;  %v8820_v27 = vpop.eup %6454  ;;  %v670_v55 = vand.u32 2147483647, %v8830_v36  ;;  %vm4241_vm7 = vcmp.ge.f32.partialorder %v8747_v24, 0.0  ;;  %p8521_p13 = pneg %p8520_p12  ;;  %p8526_p10 = scmp.lt.s32.totalorder %s8524_s11, %s8518_s3 }
  0x51   : > { %6474 = vrcp.f32 %v2703_v17  ;;  %v8824_v30 = vpop.eup %6456  ;;  %v2705_v31 = vadd.f32 1.0, %v8820_v27  ;;  %v1706_v62 = vmul.f32 1.442695, %v1178_v28  ;;  %v1708_v63 = vmul.f32 1.442695, %v1179_v33 }
  0x52   : > { %6476 = vrcp.f32 %v2704_v21  ;;  %v8832_v37 = vpop.eup %6458  ;;  %v2706_v38 = vadd.f32 1.0, %v8824_v30  ;;  %vm4242_vm8 = vcmp.ge.f32.partialorder %v8750_v25, 0.0  ;;  %v1710_v10 = vmul.f32 1.442695, %v1180_v41  ;;  %v8878_v41 = vld [vmem:[%s8712_s30 + $0xb8] sm:$0xff]  ;;  %p8527_p0 = por %p8526_p10, %p8525_p8 }
  0x53   : > { %6478 = vpow2.f32 %v1698_v18  ;;  %v8836_v42 = vpop.eup %6460  ;;  %v2707_v43 = vadd.f32 1.0, %v8832_v37  ;;  %v671_v13 = vand.u32 2147483647, %v8841_v46  ;;  %vm4243_vm9 = vcmp.ge.f32.partialorder %v8753_v26, 0.0 }
  0x54   : > { %6480 = vrcp.f32 %v2705_v31  ;;  %v8843_v47 = vpop.eup %6462  ;;  %v2708_v49 = vadd.f32 1.0, %v8836_v42  ;;  %v1182_v18 = vsub.f32 0.0, %v670_v55  ;;  %v672_v19 = vand.u32 2147483647, %v8848_v56  ;;  %p8528_p2 = pnand %p8527_p0, %p8521_p13 }
  0x55   : > { %6482 = vrcp.f32 %v2706_v38  ;;  %v2709_v60 = vadd.f32 1.0, %v8843_v47  ;;  %v1712_v23 = vmul.f32 1.442695, %v1181_v51  ;;  %v1183_v0 = vsub.f32 0.0, %v671_v13  ;;  %v8911_v13 = vld [vmem:[%s8712_s30 + $0xc8] sm:$0xff] }
  0x56   : > { %v6465_v59 = vpop.eup %6464  ;;  %6484 = vrcp.f32 %v2707_v43  ;;  %v1184_v34 = vsub.f32 0.0, %v672_v19  ;;  %vm4244_vm10 = vcmp.ge.f32.partialorder %v8758_v32, 0.0  ;;  %vm4245_vm11 = vcmp.ge.f32.partialorder %v8762_v35, 0.0 }
  0x57   : > { %v6467_v3 = vpop.eup %6466  ;;  %v4746_v9 = vmul.f32 %v6465_v59, %v8773_v50  ;;  %6486 = vrcp.f32 %v2708_v49  ;;  %vm4246_vm12 = vcmp.ge.f32.partialorder %v8766_v40, 0.0  ;;  %vm4247_vm13 = vcmp.ge.f32.partialorder %v8771_v48, 0.0 }
  0x58   : > { %v6469_v14 = vpop.eup %6468  ;;  %v4747_v17 = vmul.f32 %v6467_v3, %v8781_v54  ;;  %6488 = vrcp.f32 %v2709_v60  ;;  %v1718_v51 = vmul.f32 1.442695, %v1184_v34  ;;  %v8953_v34 = vld [vmem:[%s8712_s30 + $0xe0] sm:$0xff]  ;;  %vm4248_vm14 = vcmp.ge.f32.partialorder %v8776_v52, 0.0 }
  0x59   : > { %v6471_v21 = vpop.eup %6470  ;;  %v5258_v50 = vsel %vm4234_vm0, %v6465_v59, %v4746_v9  ;;  %v4748_v22 = vmul.f32 %v6469_v14, %v8788_v58  ;;  %6490 = vpow2.f32 %v1700_v39  ;;  %v1714_v39 = vmul.f32 1.442695, %v1182_v18 }
  0x5a   : > { %v6473_v28 = vpop.eup %6472  ;;  %5770 = vst [vmem:[%s8863_s17] sm:$0xff] %v5258_v50  ;;  %v5259_v54 = vsel %vm4235_vm1, %v6467_v3, %v4747_v17  ;;  %v4749_v29 = vmul.f32 %v6471_v21, %v8791_v61  ;;  %6492 = vpow2.f32 %v1702_v44  ;;  %v1716_v44 = vmul.f32 1.442695, %v1183_v0  ;;  %v8920_v17 = vld [vmem:[%s8712_s30 + $0xd0] sm:$0xff] }
  0x5b   : > { %v6475_v58 = vpop.eup %6474  ;;  %5771 = vst [vmem:[%s8863_s17 + $0x8] sm:$0xff] %v5259_v54  ;;  %v5260_v31 = vsel %vm4236_vm2, %v6469_v14, %v4748_v22  ;;  %v4750_v33 = vmul.f32 %v6473_v28, %v8799_v5  ;;  %6494 = vpow2.f32 %v1704_v45  ;;  %v673_v59 = vand.u32 2147483647, %v8878_v41 }
  0x5c   : > { %v6477_v38 = vpop.eup %6476  ;;  %5772 = vst [vmem:[%s8863_s17 + $0x10] sm:$0xff] %v5260_v31  ;;  %v5261_v1 = vsel %vm4237_vm3, %v6471_v21, %v4749_v29  ;;  %v4751_v61 = vmul.f32 %v6475_v58, %v8803_v11  ;;  %6496 = vpow2.f32 %v1706_v62  ;;  %v674_v62 = vand.u32 2147483647, %v8887_v6 }
  0x5d   : > { %v8880_v2 = vpop.eup %6478  ;;  %5773 = vst [vmem:[%s8863_s17 + $0x18] sm:$0xff] %v5261_v1  ;;  %v5262_v5 = vsel %vm4238_vm4, %v6473_v28, %v4750_v33  ;;  %v4752_v43 = vmul.f32 %v6477_v38, %v8810_v16  ;;  %6498 = vpow2.f32 %v1708_v63  ;;  %v1185_v3 = vsub.f32 0.0, %v673_v59 }
  0x5e   : > { %v6481_v45 = vpop.eup %6480  ;;  %5774 = vst [vmem:[%s8863_s17 + $0x20] sm:$0xff] %v5262_v5  ;;  %v5263_v11 = vsel %vm4239_vm5, %v6475_v58, %v4751_v61  ;;  %v2710_v49 = vadd.f32 1.0, %v8880_v2  ;;  %6500 = vpow2.f32 %v1710_v10  ;;  %v1186_v21 = vsub.f32 0.0, %v674_v62 }
  0x5f   : > { %v6483_v55 = vpop.eup %6482  ;;  %5775 = vst [vmem:[%s8863_s17 + $0x28] sm:$0xff] %v5263_v11  ;;  %v5264_v7 = vsel %vm4240_vm6, %v6477_v38, %v4752_v43  ;;  %v4753_v16 = vmul.f32 %v6481_v45, %v8820_v27  ;;  %6502 = vpow2.f32 %v1712_v23  ;;  %v1720_v25 = vmul.f32 1.442695, %v1185_v3  ;;  %v8936_v23 = vld [vmem:[%s8712_s30 + $0xd8] sm:$0xff] }
  0x60   : > { %v6485_v60 = vpop.eup %6484  ;;  %5776 = vst [vmem:[%s8863_s17 + $0x30] sm:$0xff] %v5264_v7  ;;  %v4754_v8 = vmul.f32 %v6483_v55, %v8824_v30  ;;  %6504 = vrcp.f32 %v2710_v49  ;;  %v675_v22 = vand.u32 2147483647, %v8911_v13  ;;  %v676_v54 = vand.u32 2147483647, %v8920_v17 }
  0x61   : > { %v6487_v63 = vpop.eup %6486  ;;  %v5265_v12 = vsel %vm4241_vm7, %v6481_v45, %v4753_v16  ;;  %v4755_v27 = vmul.f32 %v6485_v60, %v8832_v37  ;;  %6506 = vpow2.f32 %v1714_v39  ;;  %v677_v33 = vand.u32 2147483647, %v8936_v23  ;;  %v8960_v39 = vld [vmem:[%s8712_s30 + $0xe8] sm:$0xff] }
  0x62   : > { %v6489_v9 = vpop.eup %6488  ;;  %5777 = vst [vmem:[%s8863_s17 + $0x38] sm:$0xff] %v5265_v12  ;;  %v5266_v30 = vsel %vm4242_vm8, %v6483_v55, %v4754_v8  ;;  %v4756_v10 = vmul.f32 %v6487_v63, %v8836_v42  ;;  %6508 = vpow2.f32 %v1716_v44  ;;  %v1187_v31 = vsub.f32 0.0, %v675_v22  ;;  %v8984_v12 = vld [vmem:[%s8712_s30 + $0xf8] sm:$0xff] }
  0x63   : > { %v8913_v24 = vpop.eup %6490  ;;  %5778 = vst [vmem:[%s8863_s17 + $0x40] sm:$0xff] %v5266_v30  ;;  %v5267_v37 = vsel %vm4243_vm9, %v6485_v60, %v4755_v27  ;;  %v4757_v14 = vmul.f32 %v6489_v9, %v8843_v47  ;;  %6510 = vpow2.f32 %v1718_v51  ;;  %v1722_v61 = vmul.f32 1.442695, %v1186_v21 }
  0x64   : > { %v8922_v42 = vpop.eup %6492  ;;  %5779 = vst [vmem:[%s8863_s17 + $0x48] sm:$0xff] %v5267_v37  ;;  %v5268_v18 = vsel %vm4244_vm10, %v6487_v63, %v4756_v10  ;;  %v2711_v19 = vadd.f32 1.0, %v8913_v24  ;;  %6512 = vpow2.f32 %v1720_v25  ;;  %vm4249_vm15 = vcmp.ge.f32.partialorder %v8779_v53, 0.0 }
  0x65   : > { %v8928_v50 = vpop.eup %6494  ;;  %5780 = vst [vmem:[%s8863_s17 + $0x50] sm:$0xff] %v5268_v18  ;;  %v5269_v26 = vsel %vm4245_vm11, %v6489_v9, %v4757_v14  ;;  %v2712_v47 = vadd.f32 1.0, %v8922_v42  ;;  %v1188_v44 = vsub.f32 0.0, %v676_v54  ;;  %vm4250_vm0 = vcmp.ge.f32.partialorder %v8786_v57, 0.0  ;;  %v8990_v9 = vld [vmem:[%s8712_s30 + $0x100] sm:$0xff]  ;;  %v9027_v57 = vld [vmem:[%s8712_s30 + $0x110] sm:$0xff] }
  0x66   : > { %v8938_v28 = vpop.eup %6496  ;;  %5781 = vst [vmem:[%s8863_s17 + $0x58] sm:$0xff] %v5269_v26  ;;  %6514 = vrcp.f32 %v2711_v19  ;;  %v2713_v32 = vadd.f32 1.0, %v8928_v50  ;;  %v1189_v49 = vsub.f32 0.0, %v677_v33  ;;  %v678_v51 = vand.u32 2147483647, %v8953_v34 }
  0x67   : > { %v8943_v29 = vpop.eup %6498  ;;  %6516 = vrcp.f32 %v2712_v47  ;;  %v2714_v35 = vadd.f32 1.0, %v8938_v28  ;;  %vm4251_vm1 = vcmp.ge.f32.partialorder %v8797_v4, 0.0  ;;  %v1724_v16 = vmul.f32 1.442695, %v1187_v31 }
  0x68   : > { %v8947_v0 = vpop.eup %6500  ;;  %6518 = vrcp.f32 %v2713_v32  ;;  %v2715_v58 = vadd.f32 1.0, %v8943_v29  ;;  %v679_v59 = vand.u32 2147483647, %v8960_v39  ;;  %vm4252_vm2 = vcmp.ge.f32.partialorder %v8808_v15, 0.0 }
  0x69   : > { %v8955_v38 = vpop.eup %6502  ;;  %6520 = vrcp.f32 %v2714_v35  ;;  %v2716_v1 = vadd.f32 1.0, %v8947_v0  ;;  %v1190_v63 = vsub.f32 0.0, %v678_v51  ;;  %vm4253_vm3 = vcmp.ge.f32.partialorder %v8816_v20, 0.0 }
  0x6a   : > { %v6505_v5 = vpop.eup %6504  ;;  %6522 = vrcp.f32 %v2715_v58  ;;  %v2717_v43 = vadd.f32 1.0, %v8955_v38  ;;  %v1191_v3 = vsub.f32 0.0, %v679_v59  ;;  %v1726_v40 = vmul.f32 1.442695, %v1188_v44 }
  0x6b   : > { %v8964_v45 = vpop.eup %6506  ;;  %v4758_v11 = vmul.f32 %v6505_v5, %v8880_v2  ;;  %6524 = vrcp.f32 %v2716_v1  ;;  %v8975_v2 = vld [vmem:[%s8712_s30 + $0xf0] sm:$0xff]  ;;  %v1728_v10 = vmul.f32 1.442695, %v1189_v49  ;;  %vm4254_vm4 = vcmp.ge.f32.partialorder %v8830_v36, 0.0  ;;  %v9013_v49 = vld [vmem:[%s8712_s30 + $0x108] sm:$0xff] }
  0x6c   : > { %v8969_v55 = vpop.eup %6508  ;;  %6526 = vrcp.f32 %v2717_v43  ;;  %v2718_v7 = vadd.f32 1.0, %v8964_v45  ;;  %v680_v37 = vand.u32 2147483647, %v8975_v2  ;;  %v1730_v18 = vmul.f32 1.442695, %v1190_v63  ;;  %v9035_v63 = vld [vmem:[%s8712_s30 + $0x118] sm:$0xff] }
  0x6d   : > { %v8977_v60 = vpop.eup %6510  ;;  %v5270_v8 = vsel %vm4246_vm12, %v6505_v5, %v4758_v11  ;;  %v2719_v62 = vadd.f32 1.0, %v8969_v55  ;;  %6528 = vpow2.f32 %v1722_v61  ;;  %v681_v19 = vand.u32 2147483647, %v8984_v12 }
  0x6e   : > { %5782 = vst [vmem:[%s8863_s17 + $0x60] sm:$0xff] %v5270_v8  ;;  %6530 = vrcp.f32 %v2718_v7  ;;  %v2720_v27 = vadd.f32 1.0, %v8977_v60  ;;  %v8992_v30 = vpop.eup %6512  ;;  %v1732_v47 = vmul.f32 1.442695, %v1191_v3  ;;  %v1192_v22 = vsub.f32 0.0, %v680_v37 }
  0x6f   : > { %6532 = vrcp.f32 %v2719_v62  ;;  %v2721_v25 = vadd.f32 1.0, %v8992_v30  ;;  %v1193_v35 = vsub.f32 0.0, %v681_v19  ;;  %v682_v58 = vand.u32 2147483647, %v8990_v9 }
  0x70   : > { %v6515_v14 = vpop.eup %6514  ;;  %6534 = vrcp.f32 %v2720_v27  ;;  %vm4255_vm5 = vcmp.ge.f32.partialorder %v8841_v46, 0.0  ;;  %v683_v62 = vand.u32 2147483647, %v9013_v49  ;;  %vm4256_vm6 = vcmp.ge.f32.partialorder %v8848_v56, 0.0 }
  0x71   : > { %v6517_v21 = vpop.eup %6516  ;;  %v4759_v26 = vmul.f32 %v6515_v14, %v8913_v24  ;;  %6536 = vpow2.f32 %v1724_v16  ;;  %v1734_v24 = vmul.f32 1.442695, %v1192_v22  ;;  %v1736_v43 = vmul.f32 1.442695, %v1193_v35 }
  0x72   : > { %v6519_v32 = vpop.eup %6518  ;;  %v4760_v54 = vmul.f32 %v6517_v21, %v8922_v42  ;;  %6538 = vrcp.f32 %v2721_v25  ;;  %v1194_v11 = vsub.f32 0.0, %v682_v58  ;;  %v9052_v25 = vld [vmem:[%s8712_s30 + $0x120] sm:$0xff]  ;;  %vm4257_vm7 = vcmp.ge.f32.partialorder %v8878_v41, 0.0 }
  0x73   : > { %v6521_v31 = vpop.eup %6520  ;;  %v5271_v33 = vsel %vm4247_vm13, %v6515_v14, %v4759_v26  ;;  %v4761_v1 = vmul.f32 %v6519_v32, %v8928_v50  ;;  %6540 = vpow2.f32 %v1726_v40  ;;  %v1195_v40 = vsub.f32 0.0, %v683_v62 }
  0x74   : > { %v6523_v61 = vpop.eup %6522  ;;  %5783 = vst [vmem:[%s8863_s17 + $0x68] sm:$0xff] %v5271_v33  ;;  %v5272_v42 = vsel %vm4248_vm14, %v6517_v21, %v4760_v54  ;;  %v4762_v5 = vmul.f32 %v6521_v31, %v8938_v28  ;;  %6542 = vpow2.f32 %v1728_v10  ;;  %v1738_v16 = vmul.f32 1.442695, %v1194_v11 }
  0x75   : > { %v6525_v44 = vpop.eup %6524  ;;  %5784 = vst [vmem:[%s8863_s17 + $0x70] sm:$0xff] %v5272_v42  ;;  %v5273_v48 = vsel %vm4249_vm15, %v6519_v32, %v4761_v1  ;;  %v4763_v50 = vmul.f32 %v6523_v61, %v8943_v29  ;;  %6544 = vpow2.f32 %v1730_v18  ;;  %v684_v10 = vand.u32 2147483647, %v9027_v57  ;;  %v9071_v32 = vld [vmem:[%s8712_s30 + $0x128] sm:$0xff] }
  0x76   : > { %v6527_v52 = vpop.eup %6526  ;;  %5785 = vst [vmem:[%s8863_s17 + $0x78] sm:$0xff] %v5273_v48  ;;  %v5274_v28 = vsel %vm4250_vm0, %v6521_v31, %v4762_v5  ;;  %v4764_v51 = vmul.f32 %v6525_v44, %v8947_v0  ;;  %6546 = vpow2.f32 %v1732_v47  ;;  %v685_v14 = vand.u32 2147483647, %v9035_v63  ;;  %v9090_v5 = vld [vmem:[%s8712_s30 + $0x138] sm:$0xff] }
  0x77   : > { %v9020_v53 = vpop.eup %6528  ;;  %5786 = vst [vmem:[%s8863_s17 + $0x80] sm:$0xff] %v5274_v28  ;;  %v5275_v29 = vsel %vm4251_vm1, %v6523_v61, %v4763_v50  ;;  %v4765_v7 = vmul.f32 %v6527_v52, %v8955_v38  ;;  %6548 = vpow2.f32 %v1734_v24  ;;  %v1740_v21 = vmul.f32 1.442695, %v1195_v40 }
  0x78   : > { %v6531_v59 = vpop.eup %6530  ;;  %5787 = vst [vmem:[%s8863_s17 + $0x88] sm:$0xff] %v5275_v29  ;;  %v5276_v0 = vsel %vm4252_vm2, %v6525_v44, %v4764_v51  ;;  %v2722_v8 = vadd.f32 1.0, %v9020_v53  ;;  %6550 = vpow2.f32 %v1736_v43  ;;  %v1196_v41 = vsub.f32 0.0, %v684_v10  ;;  %v9102_v29 = vld [vmem:[%s8712_s30 + $0x140] sm:$0xff] }
  0x79   : > { %v6533_v4 = vpop.eup %6532  ;;  %5788 = vst [vmem:[%s8863_s17 + $0x90] sm:$0xff] %v5276_v0  ;;  %v5277_v38 = vsel %vm4253_vm3, %v6527_v52, %v4765_v7  ;;  %v4766_v27 = vmul.f32 %v6531_v59, %v8964_v45  ;;  %6552 = vpow2.f32 %v1738_v16  ;;  %v686_v22 = vand.u32 2147483647, %v9052_v25 }
  0x7a   : > { %v6535_v15 = vpop.eup %6534  ;;  %5789 = vst [vmem:[%s8863_s17 + $0x98] sm:$0xff] %v5277_v38  ;;  %v4767_v3 = vmul.f32 %v6533_v4, %v8969_v55  ;;  %6554 = vrcp.f32 %v2722_v8  ;;  %v1197_v58 = vsub.f32 0.0, %v685_v14  ;;  %vm4258_vm8 = vcmp.ge.f32.partialorder %v8887_v6, 0.0  ;;  %v9108_v8 = vld [vmem:[%s8712_s30 + $0x148] sm:$0xff] }
  0x7b   : > { %v9045_v37 = vpop.eup %6536  ;;  %v5278_v20 = vsel %vm4254_vm4, %v6531_v59, %v4766_v27  ;;  %v4768_v45 = vmul.f32 %v6535_v15, %v8977_v60  ;;  %vm4259_vm9 = vcmp.ge.f32.partialorder %v8911_v13, 0.0  ;;  %v1198_v61 = vsub.f32 0.0, %v686_v22 }
  0x7c   : > { %v6539_v18 = vpop.eup %6538  ;;  %5790 = vst [vmem:[%s8863_s17 + $0xa0] sm:$0xff] %v5278_v20  ;;  %v5279_v55 = vsel %vm4255_vm5, %v6533_v4, %v4767_v3  ;;  %v2723_v19 = vadd.f32 1.0, %v9045_v37  ;;  %v687_v42 = vand.u32 2147483647, %v9071_v32  ;;  %vm4260_vm10 = vcmp.ge.f32.partialorder %v8920_v17, 0.0  ;;  %v9114_v3 = vld [vmem:[%s8712_s30 + $0x150] sm:$0xff] }
  0x7d   : > { %v9059_v36 = vpop.eup %6540  ;;  %5791 = vst [vmem:[%s8863_s17 + $0xa8] sm:$0xff] %v5279_v55  ;;  %v5280_v60 = vsel %vm4256_vm6, %v6535_v15, %v4768_v45  ;;  %v4769_v26 = vmul.f32 %v6539_v18, %v8992_v30  ;;  %v9077_v30 = vld [vmem:[%s8712_s30 + $0x130] sm:$0xff]  ;;  %v1742_v48 = vmul.f32 1.442695, %v1196_v41  ;;  %vm4261_vm11 = vcmp.ge.f32.partialorder %v8936_v23, 0.0 }
  0x7e   : > { %v9065_v47 = vpop.eup %6542  ;;  %5792 = vst [vmem:[%s8863_s17 + $0xb0] sm:$0xff] %v5280_v60  ;;  %6556 = vrcp.f32 %v2723_v19  ;;  %v2724_v46 = vadd.f32 1.0, %v9059_v36  ;;  %v688_v50 = vand.u32 2147483647, %v9077_v30  ;;  %v1744_v28 = vmul.f32 1.442695, %v1197_v58 }
  0x7f   : > { %v9073_v54 = vpop.eup %6544  ;;  %v5281_v35 = vsel %vm4257_vm7, %v6539_v18, %v4769_v26  ;;  %v2725_v56 = vadd.f32 1.0, %v9065_v47  ;;  %6558 = vpow2.f32 %v1740_v21  ;;  %v1199_v51 = vsub.f32 0.0, %v687_v42  ;;  %v9126_v21 = vld [vmem:[%s8712_s30 + $0x158] sm:$0xff] }
  0x80   : > { %v9079_v31 = vpop.eup %6546  ;;  %5793 = vst [vmem:[%s8863_s17 + $0xb8] sm:$0xff] %v5281_v35  ;;  %6560 = vrcp.f32 %v2724_v46  ;;  %v2726_v33 = vadd.f32 1.0, %v9073_v54  ;;  %vm4262_vm12 = vcmp.ge.f32.partialorder %v8953_v34, 0.0  ;;  %v1200_v59 = vsub.f32 0.0, %v688_v50 }
  0x81   : > { %v9085_v1 = vpop.eup %6548  ;;  %6562 = vrcp.f32 %v2725_v56  ;;  %v2727_v24 = vadd.f32 1.0, %v9079_v31  ;;  %v689_v0 = vand.u32 2147483647, %v9090_v5  ;;  %vm4263_vm13 = vcmp.ge.f32.partialorder %v8960_v39, 0.0 }
  0x82   : > { %v9092_v43 = vpop.eup %6550  ;;  %6564 = vrcp.f32 %v2726_v33  ;;  %v2728_v44 = vadd.f32 1.0, %v9085_v1  ;;  %v1746_v4 = vmul.f32 1.442695, %v1198_v61  ;;  %v1748_v38 = vmul.f32 1.442695, %v1199_v51  ;;  %v9152_v51 = vld [vmem:[%s8712_s30 + $0x168] sm:$0xff] }
  0x83   : > { %v9097_v11 = vpop.eup %6552  ;;  %6566 = vrcp.f32 %v2727_v24  ;;  %v2729_v52 = vadd.f32 1.0, %v9092_v43  ;;  %v1201_v27 = vsub.f32 0.0, %v689_v0  ;;  %v690_v15 = vand.u32 2147483647, %v9102_v29 }
  0x84   : > { %v6555_v7 = vpop.eup %6554  ;;  %6568 = vrcp.f32 %v2728_v44  ;;  %v2730_v16 = vadd.f32 1.0, %v9097_v11  ;;  %v1750_v10 = vmul.f32 1.442695, %v1200_v59  ;;  %v691_v20 = vand.u32 2147483647, %v9108_v8 }
  0x85   : > { %v4770_v62 = vmul.f32 %v6555_v7, %v9020_v53  ;;  %6570 = vrcp.f32 %v2729_v52  ;;  %vm4264_vm14 = vcmp.ge.f32.partialorder %v8975_v2, 0.0  ;;  %v1752_v45 = vmul.f32 1.442695, %v1201_v27  ;;  %v9173_v27 = vld [vmem:[%s8712_s30 + $0x170] sm:$0xff] }
  0x86   : > { %6572 = vrcp.f32 %v2730_v16  ;;  %v1202_v14 = vsub.f32 0.0, %v690_v15  ;;  %v1203_v6 = vsub.f32 0.0, %v691_v20  ;;  %v692_v19 = vand.u32 2147483647, %v9114_v3 }
  0x87   : > { %v5282_v40 = vsel %vm4258_vm8, %v6555_v7, %v4770_v62  ;;  %6574 = vpow2.f32 %v1742_v48  ;;  %vm4265_vm15 = vcmp.ge.f32.partialorder %v8984_v12, 0.0  ;;  %v693_v24 = vand.u32 2147483647, %v9126_v21 }
  0x88   : > { %v6557_v53 = vpop.eup %6556  ;;  %5794 = vst [vmem:[%s8863_s17 + $0xc0] sm:$0xff] %v5282_v40  ;;  %6576 = vpow2.f32 %v1744_v28  ;;  %v1754_v46 = vmul.f32 1.442695, %v1202_v14  ;;  %v1756_v35 = vmul.f32 1.442695, %v1203_v6  ;;  %v1204_v33 = vsub.f32 0.0, %v692_v19 }
  0x89   : > { %v9121_v18 = vpop.eup %6558  ;;  %v4771_v55 = vmul.f32 %v6557_v53, %v9045_v37  ;;  %6578 = vpow2.f32 %v1746_v4  ;;  %vm4266_vm0 = vcmp.ge.f32.partialorder %v8990_v9, 0.0  ;;  %v1205_v28 = vsub.f32 0.0, %v693_v24  ;;  %v9182_v40 = vld [vmem:[%s8712_s30 + $0x178] sm:$0xff]  ;;  %v9194_v14 = vld [vmem:[%s8712_s30 + $0x180] sm:$0xff] }
  0x8a   : > { %v6561_v60 = vpop.eup %6560  ;;  %v2731_v26 = vadd.f32 1.0, %v9121_v18  ;;  %6580 = vpow2.f32 %v1748_v38  ;;  %v1758_v17 = vmul.f32 1.442695, %v1204_v33  ;;  %v695_v38 = vand.u32 2147483647, %v9152_v51 }
  0x8b   : > { %v6563_v41 = vpop.eup %6562  ;;  %v5283_v22 = vsel %vm4259_vm9, %v6557_v53, %v4771_v55  ;;  %v4772_v37 = vmul.f32 %v6561_v60, %v9059_v36  ;;  %6582 = vpow2.f32 %v1750_v10  ;;  %v9141_v36 = vld [vmem:[%s8712_s30 + $0x160] sm:$0xff]  ;;  %v1760_v0 = vmul.f32 1.442695, %v1205_v28 }
  0x8c   : > { %v6565_v56 = vpop.eup %6564  ;;  %5795 = vst [vmem:[%s8863_s17 + $0xc8] sm:$0xff] %v5283_v22  ;;  %v4773_v58 = vmul.f32 %v6563_v41, %v9065_v47  ;;  %6584 = vrcp.f32 %v2731_v26  ;;  %v694_v34 = vand.u32 2147483647, %v9141_v36  ;;  %vm4267_vm1 = vcmp.ge.f32.partialorder %v9013_v49, 0.0 }
  0x8d   : > { %v6567_v61 = vpop.eup %6566  ;;  %v5284_v13 = vsel %vm4260_vm10, %v6561_v60, %v4772_v37  ;;  %v4774_v42 = vmul.f32 %v6565_v56, %v9073_v54  ;;  %6586 = vpow2.f32 %v1752_v45  ;;  %v696_v45 = vand.u32 2147483647, %v9173_v27 }
  0x8e   : > { %v6569_v44 = vpop.eup %6568  ;;  %5796 = vst [vmem:[%s8863_s17 + $0xd0] sm:$0xff] %v5284_v13  ;;  %v5285_v47 = vsel %vm4261_vm11, %v6563_v41, %v4773_v58  ;;  %v4775_v48 = vmul.f32 %v6567_v61, %v9079_v31  ;;  %6588 = vpow2.f32 %v1754_v46  ;;  %v1206_v4 = vsub.f32 0.0, %v694_v34 }
  0x8f   : > { %v6571_v50 = vpop.eup %6570  ;;  %5797 = vst [vmem:[%s8863_s17 + $0xd8] sm:$0xff] %v5285_v47  ;;  %v5286_v54 = vsel %vm4262_vm12, %v6565_v56, %v4774_v42  ;;  %v4776_v52 = vmul.f32 %v6569_v44, %v9085_v1  ;;  %6590 = vpow2.f32 %v1756_v35  ;;  %vm4268_vm2 = vcmp.ge.f32.partialorder %v9027_v57, 0.0  ;;  %v9209_v56 = vld [vmem:[%s8712_s30 + $0x188] sm:$0xff] }
  0x90   : > { %v6573_v7 = vpop.eup %6572  ;;  %5798 = vst [vmem:[%s8863_s17 + $0xe0] sm:$0xff] %v5286_v54  ;;  %v5287_v23 = vsel %vm4263_vm13, %v6567_v61, %v4775_v48  ;;  %v4777_v31 = vmul.f32 %v6571_v50, %v9092_v43  ;;  %6592 = vpow2.f32 %v1758_v17  ;;  %v1762_v9 = vmul.f32 1.442695, %v1206_v4  ;;  %v9218_v61 = vld [vmem:[%s8712_s30 + $0x190] sm:$0xff]  ;;  %v9225_v48 = vld [vmem:[%s8712_s30 + $0x198] sm:$0xff] }
  0x91   : > { %v9159_v16 = vpop.eup %6574  ;;  %5799 = vst [vmem:[%s8863_s17 + $0xe8] sm:$0xff] %v5287_v23  ;;  %v5288_v1 = vsel %vm4264_vm14, %v6569_v44, %v4776_v52  ;;  %v4778_v59 = vmul.f32 %v6573_v7, %v9097_v11  ;;  %6594 = vpow2.f32 %v1760_v0  ;;  %v1207_v19 = vsub.f32 0.0, %v695_v38 }
  0x92   : > { %v9165_v39 = vpop.eup %6576  ;;  %5800 = vst [vmem:[%s8863_s17 + $0xf0] sm:$0xff] %v5288_v1  ;;  %v5289_v43 = vsel %vm4265_vm15, %v6571_v50, %v4777_v31  ;;  %v2732_v62 = vadd.f32 1.0, %v9159_v16  ;;  %v697_v60 = vand.u32 2147483647, %v9182_v40  ;;  %vm4269_vm3 = vcmp.ge.f32.partialorder %v9035_v63, 0.0  ;;  %v9237_v31 = vld [vmem:[%s8712_s30 + $0x1a0] sm:$0xff] }
  0x93   : > { %v9175_v2 = vpop.eup %6578  ;;  %5801 = vst [vmem:[%s8863_s17 + $0xf8] sm:$0xff] %v5289_v43  ;;  %v5290_v11 = vsel %vm4266_vm0, %v6573_v7, %v4778_v59  ;;  %v2733_v15 = vadd.f32 1.0, %v9165_v39  ;;  %v1208_v41 = vsub.f32 0.0, %v696_v45  ;;  %vm4270_vm4 = vcmp.ge.f32.partialorder %v9052_v25, 0.0  ;;  %v9261_v63 = vld [vmem:[%s8712_s30 + $0x1b0] sm:$0xff] }
  0x94   : > { %v9184_v12 = vpop.eup %6580  ;;  %5802 = vst [vmem:[%s8863_s17 + $0x100] sm:$0xff] %v5290_v11  ;;  %6596 = vrcp.f32 %v2732_v62  ;;  %v2734_v10 = vadd.f32 1.0, %v9175_v2  ;;  %v698_v35 = vand.u32 2147483647, %v9194_v14  ;;  %vm4271_vm5 = vcmp.ge.f32.partialorder %v9071_v32, 0.0 }
  0x95   : > { %v9189_v20 = vpop.eup %6582  ;;  %6598 = vrcp.f32 %v2733_v15  ;;  %v2735_v53 = vadd.f32 1.0, %v9184_v12  ;;  %v1209_v24 = vsub.f32 0.0, %v697_v60  ;;  %v1764_v44 = vmul.f32 1.442695, %v1207_v19 }
  0x96   : > { %v6585_v55 = vpop.eup %6584  ;;  %6600 = vrcp.f32 %v2734_v10  ;;  %v2736_v6 = vadd.f32 1.0, %v9189_v20  ;;  %v1210_v47 = vsub.f32 0.0, %v698_v35  ;;  %v1766_v17 = vmul.f32 1.442695, %v1208_v41 }
  0x97   : > { %v9199_v26 = vpop.eup %6586  ;;  %v4779_v46 = vmul.f32 %v6585_v55, %v9121_v18  ;;  %6602 = vrcp.f32 %v2735_v53  ;;  %v699_v50 = vand.u32 2147483647, %v9209_v56  ;;  %vm4272_vm6 = vcmp.ge.f32.partialorder %v9077_v30, 0.0 }
  0x98   : > { %v9203_v22 = vpop.eup %6588  ;;  %6604 = vrcp.f32 %v2736_v6  ;;  %v2737_v37 = vadd.f32 1.0, %v9199_v26  ;;  %vm4273_vm7 = vcmp.ge.f32.partialorder %v9090_v5, 0.0  ;;  %v700_v54 = vand.u32 2147483647, %v9218_v61 }
  0x99   : > { %v9211_v58 = vpop.eup %6590  ;;  %v5291_v18 = vsel %vm4267_vm1, %v6585_v55, %v4779_v46  ;;  %v2738_v33 = vadd.f32 1.0, %v9203_v22  ;;  %6606 = vpow2.f32 %v1762_v9  ;;  %vm4274_vm8 = vcmp.ge.f32.partialorder %v9102_v29, 0.0  ;;  %v9251_v46 = vld [vmem:[%s8712_s30 + $0x1a8] sm:$0xff] }
  0x9a   : > { %v9220_v13 = vpop.eup %6592  ;;  %5803 = vst [vmem:[%s8863_s17 + $0x108] sm:$0xff] %v5291_v18  ;;  %6608 = vrcp.f32 %v2737_v37  ;;  %v2739_v42 = vadd.f32 1.0, %v9211_v58  ;;  %v1768_v28 = vmul.f32 1.442695, %v1209_v24  ;;  %v1211_v7 = vsub.f32 0.0, %v699_v50 }
  0x9b   : > { %6610 = vrcp.f32 %v2738_v33  ;;  %v2740_v49 = vadd.f32 1.0, %v9220_v13  ;;  %v9232_v52 = vpop.eup %6594  ;;  %v701_v23 = vand.u32 2147483647, %v9225_v48  ;;  %v1770_v59 = vmul.f32 1.442695, %v1210_v47  ;;  %v9277_v47 = vld [vmem:[%s8712_s30 + $0x1b8] sm:$0xff] }
  0x9c   : > { %6612 = vrcp.f32 %v2739_v42  ;;  %v2741_v1 = vadd.f32 1.0, %v9232_v52  ;;  %v1212_v0 = vsub.f32 0.0, %v700_v54  ;;  %v1772_v4 = vmul.f32 1.442695, %v1211_v7 }
  0x9d   : > { %6614 = vrcp.f32 %v2740_v49  ;;  %v1213_v38 = vsub.f32 0.0, %v701_v23  ;;  %v702_v53 = vand.u32 2147483647, %v9237_v31  ;;  %vm4275_vm9 = vcmp.ge.f32.partialorder %v9108_v8, 0.0 }
  0x9e   : > { %v6597_v34 = vpop.eup %6596  ;;  %6616 = vpow2.f32 %v1764_v44  ;;  %v1774_v10 = vmul.f32 1.442695, %v1212_v0  ;;  %v703_v24 = vand.u32 2147483647, %v9251_v46  ;;  %vm4276_vm10 = vcmp.ge.f32.partialorder %v9114_v3, 0.0 }
  0x9f   : > { %v6599_v43 = vpop.eup %6598  ;;  %v4780_v62 = vmul.f32 %v6597_v34, %v9159_v16  ;;  %6618 = vpow2.f32 %v1766_v17  ;;  %v1776_v16 = vmul.f32 1.442695, %v1213_v38  ;;  %v1214_v60 = vsub.f32 0.0, %v702_v53  ;;  %v9317_v38 = vld [vmem:[%s8712_s30 + $0x1d0] sm:$0xff] }
  0xa0   : > { %v6601_v11 = vpop.eup %6600  ;;  %v4781_v15 = vmul.f32 %v6599_v43, %v9165_v39  ;;  %6620 = vrcp.f32 %v2741_v1  ;;  %v704_v44 = vand.u32 2147483647, %v9261_v63  ;;  %v1215_v17 = vsub.f32 0.0, %v703_v24  ;;  %v9299_v1 = vld [vmem:[%s8712_s30 + $0x1c8] sm:$0xff] }
  0xa1   : > { %v6603_v9 = vpop.eup %6602  ;;  %v5292_v45 = vsel %vm4268_vm2, %v6597_v34, %v4780_v62  ;;  %v4782_v55 = vmul.f32 %v6601_v11, %v9175_v2  ;;  %6622 = vpow2.f32 %v1768_v28  ;;  %v1778_v18 = vmul.f32 1.442695, %v1214_v60  ;;  %v9289_v28 = vld [vmem:[%s8712_s30 + $0x1c0] sm:$0xff]  ;;  %v9332_v60 = vld [vmem:[%s8712_s30 + $0x1d8] sm:$0xff] }
  0xa2   : > { %v6605_v6 = vpop.eup %6604  ;;  %5804 = vst [vmem:[%s8863_s17 + $0x110] sm:$0xff] %v5292_v45  ;;  %v5293_v39 = vsel %vm4269_vm3, %v6599_v43, %v4781_v15  ;;  %v4783_v19 = vmul.f32 %v6603_v9, %v9184_v12  ;;  %6624 = vpow2.f32 %v1770_v59  ;;  %v1780_v23 = vmul.f32 1.442695, %v1215_v17 }
  0xa3   : > { %v9253_v57 = vpop.eup %6606  ;;  %5805 = vst [vmem:[%s8863_s17 + $0x118] sm:$0xff] %v5293_v39  ;;  %v5294_v2 = vsel %vm4270_vm4, %v6601_v11, %v4782_v55  ;;  %v4784_v41 = vmul.f32 %v6605_v6, %v9189_v20  ;;  %6626 = vpow2.f32 %v1772_v4  ;;  %v705_v34 = vand.u32 2147483647, %v9277_v47 }
  0xa4   : > { %v6609_v12 = vpop.eup %6608  ;;  %5806 = vst [vmem:[%s8863_s17 + $0x120] sm:$0xff] %v5294_v2  ;;  %v5295_v37 = vsel %vm4271_vm5, %v6603_v9, %v4783_v19  ;;  %v2742_v35 = vadd.f32 1.0, %v9253_v57  ;;  %6628 = vpow2.f32 %v1774_v10  ;;  %vm4277_vm11 = vcmp.ge.f32.partialorder %v9126_v21, 0.0 }
  0xa5   : > { %v6611_v25 = vpop.eup %6610  ;;  %5807 = vst [vmem:[%s8863_s17 + $0x128] sm:$0xff] %v5295_v37  ;;  %v5296_v20 = vsel %vm4272_vm6, %v6605_v6, %v4784_v41  ;;  %v4785_v33 = vmul.f32 %v6609_v12, %v9199_v26  ;;  %6630 = vpow2.f32 %v1776_v16  ;;  %v1216_v0 = vsub.f32 0.0, %v704_v44 }
  0xa6   : > { %v6613_v42 = vpop.eup %6612  ;;  %5808 = vst [vmem:[%s8863_s17 + $0x130] sm:$0xff] %v5296_v20  ;;  %v4786_v32 = vmul.f32 %v6611_v25, %v9203_v22  ;;  %6632 = vrcp.f32 %v2742_v35  ;;  %v706_v62 = vand.u32 2147483647, %v9289_v28  ;;  %vm4278_vm12 = vcmp.ge.f32.partialorder %v9141_v36, 0.0  ;;  %v9345_v20 = vld [vmem:[%s8712_s30 + $0x1e8] sm:$0xff] }
  0xa7   : > { %v6615_v30 = vpop.eup %6614  ;;  %v5297_v26 = vsel %vm4273_vm7, %v6609_v12, %v4785_v33  ;;  %v4787_v49 = vmul.f32 %v6613_v42, %v9211_v58  ;;  %6634 = vpow2.f32 %v1778_v18  ;;  %v707_v21 = vand.u32 2147483647, %v9299_v1  ;;  %v9338_v12 = vld [vmem:[%s8712_s30 + $0x1e0] sm:$0xff] }
  0xa8   : > { %v9282_v50 = vpop.eup %6616  ;;  %5809 = vst [vmem:[%s8863_s17 + $0x138] sm:$0xff] %v5297_v26  ;;  %v5298_v22 = vsel %vm4274_vm8, %v6611_v25, %v4786_v32  ;;  %v4788_v54 = vmul.f32 %v6615_v30, %v9220_v13  ;;  %vm4279_vm13 = vcmp.ge.f32.partialorder %v9152_v51, 0.0  ;;  %v1217_v10 = vsub.f32 0.0, %v705_v34  ;;  %v9350_v32 = vld [vmem:[%s8712_s30 + $0x1f0] sm:$0xff] }
  0xa9   : > { %v9291_v7 = vpop.eup %6618  ;;  %5810 = vst [vmem:[%s8863_s17 + $0x140] sm:$0xff] %v5298_v22  ;;  %v5299_v5 = vsel %vm4275_vm9, %v6613_v42, %v4787_v49  ;;  %v2743_v58 = vadd.f32 1.0, %v9282_v50  ;;  %v1782_v45 = vmul.f32 1.442695, %v1216_v0  ;;  %v1218_v55 = vsub.f32 0.0, %v706_v62 }
  0xaa   : > { %v6621_v29 = vpop.eup %6620  ;;  %5811 = vst [vmem:[%s8863_s17 + $0x148] sm:$0xff] %v5299_v5  ;;  %v5300_v13 = vsel %vm4276_vm10, %v6615_v30, %v4788_v54  ;;  %v2744_v59 = vadd.f32 1.0, %v9291_v7  ;;  %v1219_v39 = vsub.f32 0.0, %v707_v21  ;;  %v708_v19 = vand.u32 2147483647, %v9317_v38 }
  0xab   : > { %v9306_v8 = vpop.eup %6622  ;;  %5812 = vst [vmem:[%s8863_s17 + $0x150] sm:$0xff] %v5300_v13  ;;  %v4789_v43 = vmul.f32 %v6621_v29, %v9232_v52  ;;  %6636 = vrcp.f32 %v2743_v58  ;;  %vm4280_vm14 = vcmp.ge.f32.partialorder %v9173_v27, 0.0  ;;  %vm4281_vm15 = vcmp.ge.f32.partialorder %v9182_v40, 0.0 }
  0xac   : > { %v9311_v4 = vpop.eup %6624  ;;  %6638 = vrcp.f32 %v2744_v59  ;;  %v2745_v3 = vadd.f32 1.0, %v9306_v8  ;;  %vm4282_vm0 = vcmp.ge.f32.partialorder %v9194_v14, 0.0  ;;  %v1784_v18 = vmul.f32 1.442695, %v1217_v10 }
  0xad   : > { %v9319_v11 = vpop.eup %6626  ;;  %v5301_v15 = vsel %vm4277_vm11, %v6621_v29, %v4789_v43  ;;  %v2746_v52 = vadd.f32 1.0, %v9311_v4  ;;  %6640 = vpow2.f32 %v1780_v23  ;;  %v1220_v25 = vsub.f32 0.0, %v708_v19  ;;  %v9364_v43 = vld [vmem:[%s8712_s30 + $0x1f8] sm:$0xff] }
  0xae   : > { %v9323_v53 = vpop.eup %6628  ;;  %5813 = vst [vmem:[%s8863_s17 + $0x158] sm:$0xff] %v5301_v15  ;;  %6642 = vrcp.f32 %v2745_v3  ;;  %v2747_v9 = vadd.f32 1.0, %v9319_v11  ;;  %v1786_v24 = vmul.f32 1.442695, %v1218_v55  ;;  %v709_v42 = vand.u32 2147483647, %v9332_v60 }
  0xaf   : > { %v9327_v16 = vpop.eup %6630  ;;  %6644 = vrcp.f32 %v2746_v52  ;;  %v2748_v6 = vadd.f32 1.0, %v9323_v53  ;;  %v710_v30 = vand.u32 2147483647, %v9338_v12  ;;  %v1790_v26 = vmul.f32 1.442695, %v1220_v25  ;;  %v9378_v55 = vld [vmem:[%s8712_s30 + $0x200] sm:$0xff] }
  0xb0   : > { %v6633_v2 = vpop.eup %6632  ;;  %6646 = vrcp.f32 %v2747_v9  ;;  %v2749_v41 = vadd.f32 1.0, %v9327_v16  ;;  %v1221_v49 = vsub.f32 0.0, %v709_v42  ;;  %v711_v17 = vand.u32 2147483647, %v9345_v20 }
  0xb1   : > { %v9340_v37 = vpop.eup %6634  ;;  %v4790_v35 = vmul.f32 %v6633_v2, %v9253_v57  ;;  %6648 = vrcp.f32 %v2748_v6  ;;  %v1788_v57 = vmul.f32 1.442695, %v1219_v39  ;;  %vm4283_vm1 = vcmp.ge.f32.partialorder %v9209_v56, 0.0 }
  0xb2   : > { %6650 = vrcp.f32 %v2749_v41  ;;  %v2750_v33 = vadd.f32 1.0, %v9340_v37  ;;  %v1222_v54 = vsub.f32 0.0, %v710_v30  ;;  %v712_v5 = vand.u32 2147483647, %v9350_v32  ;;  %v9389_v41 = vld [vmem:[%s8712_s30 + $0x208] sm:$0xff] }
  0xb3   : > { %v5302_v44 = vsel %vm4278_vm12, %v6633_v2, %v4790_v35  ;;  %6652 = vpow2.f32 %v1782_v45  ;;  %v1792_v23 = vmul.f32 1.442695, %v1221_v49  ;;  %v1223_v34 = vsub.f32 0.0, %v711_v17  ;;  %v9419_v49 = vld [vmem:[%s8712_s30 + $0x218] sm:$0xff] }
  0xb4   : > { %5814 = vst [vmem:[%s8863_s17 + $0x160] sm:$0xff] %v5302_v44  ;;  %6654 = vrcp.f32 %v2750_v33  ;;  %v1794_v59 = vmul.f32 1.442695, %v1222_v54  ;;  %v1224_v0 = vsub.f32 0.0, %v712_v5  ;;  %vm4284_vm2 = vcmp.ge.f32.partialorder %v9218_v61, 0.0 }
  0xb5   : > { %v6637_v22 = vpop.eup %6636  ;;  %6656 = vpow2.f32 %v1784_v18  ;;  %v1796_v21 = vmul.f32 1.442695, %v1223_v34  ;;  %v713_v45 = vand.u32 2147483647, %v9364_v43  ;;  %vm4285_vm3 = vcmp.ge.f32.partialorder %v9225_v48, 0.0  ;;  %v9399_v18 = vld [vmem:[%s8712_s30 + $0x210] sm:$0xff] }
  0xb6   : > { %v6639_v36 = vpop.eup %6638  ;;  %v4791_v58 = vmul.f32 %v6637_v22, %v9282_v50  ;;  %6658 = vpow2.f32 %v1786_v24  ;;  %v1798_v10 = vmul.f32 1.442695, %v1224_v0  ;;  %v714_v14 = vand.u32 2147483647, %v9378_v55 }
  0xb7   : > { %v9360_v29 = vpop.eup %6640  ;;  %v4792_v13 = vmul.f32 %v6639_v36, %v9291_v7  ;;  %6660 = vpow2.f32 %v1788_v57  ;;  %v1225_v2 = vsub.f32 0.0, %v713_v45  ;;  %vm4286_vm4 = vcmp.ge.f32.partialorder %v9237_v31, 0.0 }
  0xb8   : > { %v6643_v62 = vpop.eup %6642  ;;  %v5303_v3 = vsel %vm4279_vm13, %v6637_v22, %v4791_v58  ;;  %v2751_v50 = vadd.f32 1.0, %v9360_v29  ;;  %6662 = vpow2.f32 %v1790_v26  ;;  %v1226_v44 = vsub.f32 0.0, %v714_v14 }
  0xb9   : > { %v6645_v15 = vpop.eup %6644  ;;  %5815 = vst [vmem:[%s8863_s17 + $0x168] sm:$0xff] %v5303_v3  ;;  %v5304_v7 = vsel %vm4280_vm14, %v6639_v36, %v4792_v13  ;;  %v4793_v52 = vmul.f32 %v6643_v62, %v9306_v8  ;;  %6664 = vpow2.f32 %v1792_v23  ;;  %v1800_v56 = vmul.f32 1.442695, %v1225_v2  ;;  %v9436_v13 = vld [vmem:[%s8712_s30 + $0x220] sm:$0xff] }
  0xba   : > { %v6647_v9 = vpop.eup %6646  ;;  %5816 = vst [vmem:[%s8863_s17 + $0x170] sm:$0xff] %v5304_v7  ;;  %v4794_v51 = vmul.f32 %v6645_v15, %v9311_v4  ;;  %6666 = vrcp.f32 %v2751_v50  ;;  %v715_v57 = vand.u32 2147483647, %v9389_v41  ;;  %v716_v26 = vand.u32 2147483647, %v9399_v18 }
  0xbb   : > { %v6649_v27 = vpop.eup %6648  ;;  %v5305_v8 = vsel %vm4281_vm15, %v6643_v62, %v4793_v52  ;;  %v4795_v6 = vmul.f32 %v6647_v9, %v9319_v11  ;;  %6668 = vpow2.f32 %v1794_v59  ;;  %vm4287_vm5 = vcmp.ge.f32.partialorder %v9251_v46, 0.0 }
  0xbc   : > { %v6651_v4 = vpop.eup %6650  ;;  %5817 = vst [vmem:[%s8863_s17 + $0x178] sm:$0xff] %v5305_v8  ;;  %v5306_v39 = vsel %vm4282_vm0, %v6645_v15, %v4794_v51  ;;  %v4796_v19 = vmul.f32 %v6649_v27, %v9323_v53  ;;  %6670 = vpow2.f32 %v1796_v21  ;;  %v1802_v5 = vmul.f32 1.442695, %v1226_v44  ;;  %v9446_v21 = vld [vmem:[%s8712_s30 + $0x228] sm:$0xff]  ;;  %v9462_v8 = vld [vmem:[%s8712_s30 + $0x238] sm:$0xff] }
  0xbd   : > { %v9391_v40 = vpop.eup %6652  ;;  %5818 = vst [vmem:[%s8863_s17 + $0x180] sm:$0xff] %v5306_v39  ;;  %v5307_v11 = vsel %vm4283_vm1, %v6647_v9, %v4795_v6  ;;  %v4797_v35 = vmul.f32 %v6651_v4, %v9327_v16  ;;  %6672 = vpow2.f32 %v1798_v10  ;;  %v1227_v36 = vsub.f32 0.0, %v715_v57  ;;  %v9454_v9 = vld [vmem:[%s8712_s30 + $0x230] sm:$0xff] }
  0xbe   : > { %v6655_v53 = vpop.eup %6654  ;;  %5819 = vst [vmem:[%s8863_s17 + $0x188] sm:$0xff] %v5307_v11  ;;  %v5308_v25 = vsel %vm4284_vm2, %v6649_v27, %v4796_v19  ;;  %v2752_v33 = vadd.f32 1.0, %v9391_v40  ;;  %v1228_v23 = vsub.f32 0.0, %v716_v26  ;;  %v717_v34 = vand.u32 2147483647, %v9419_v49 }
  0xbf   : > { %v9406_v24 = vpop.eup %6656  ;;  %5820 = vst [vmem:[%s8863_s17 + $0x190] sm:$0xff] %v5308_v25  ;;  %v5309_v16 = vsel %vm4285_vm3, %v6651_v4, %v4797_v35  ;;  %v4798_v42 = vmul.f32 %v6655_v53, %v9340_v37  ;;  %vm4288_vm6 = vcmp.ge.f32.partialorder %v9261_v63, 0.0  ;;  %vm4289_vm7 = vcmp.ge.f32.partialorder %v9277_v47, 0.0 }
  0xc0   : > { %v9413_v61 = vpop.eup %6658  ;;  %5821 = vst [vmem:[%s8863_s17 + $0x198] sm:$0xff] %v5309_v16  ;;  %6674 = vrcp.f32 %v2752_v33  ;;  %v2753_v30 = vadd.f32 1.0, %v9406_v24  ;;  %vm4290_vm8 = vcmp.ge.f32.partialorder %v9289_v28, 0.0  ;;  %v1229_v50 = vsub.f32 0.0, %v717_v34  ;;  %v9503_v28 = vld [vmem:[%s8712_s30 + $0x250] sm:$0xff] }
  0xc1   : > { %v9421_v17 = vpop.eup %6660  ;;  %v5310_v48 = vsel %vm4286_vm4, %v6655_v53, %v4798_v42  ;;  %v2754_v37 = vadd.f32 1.0, %v9413_v61  ;;  %6676 = vpow2.f32 %v1800_v56  ;;  %vm4291_vm9 = vcmp.ge.f32.partialorder %v9299_v1, 0.0  ;;  %v9475_v56 = vld [vmem:[%s8712_s30 + $0x240] sm:$0xff] }
  0xc2   : > { %v9427_v22 = vpop.eup %6662  ;;  %5822 = vst [vmem:[%s8863_s17 + $0x1a0] sm:$0xff] %v5310_v48  ;;  %6678 = vrcp.f32 %v2753_v30  ;;  %v2755_v54 = vadd.f32 1.0, %v9421_v17  ;;  %v1804_v52 = vmul.f32 1.442695, %v1227_v36  ;;  %v718_v10 = vand.u32 2147483647, %v9436_v13 }
  0xc3   : > { %v9431_v58 = vpop.eup %6664  ;;  %6680 = vrcp.f32 %v2754_v37  ;;  %v2756_v31 = vadd.f32 1.0, %v9427_v22  ;;  %v1806_v27 = vmul.f32 1.442695, %v1228_v23  ;;  %v719_v39 = vand.u32 2147483647, %v9446_v21 }
  0xc4   : > { %v6667_v59 = vpop.eup %6666  ;;  %6682 = vrcp.f32 %v2755_v54  ;;  %v2757_v0 = vadd.f32 1.0, %v9431_v58  ;;  %v1230_v4 = vsub.f32 0.0, %v718_v10  ;;  %vm4292_vm10 = vcmp.ge.f32.partialorder %v9317_v38, 0.0 }
  0xc5   : > { %v9441_v62 = vpop.eup %6668  ;;  %v4799_v3 = vmul.f32 %v6667_v59, %v9360_v29  ;;  %6684 = vrcp.f32 %v2756_v31  ;;  %v1808_v19 = vmul.f32 1.442695, %v1229_v50  ;;  %v720_v46 = vand.u32 2147483647, %v9454_v9  ;;  %v9485_v31 = vld [vmem:[%s8712_s30 + $0x248] sm:$0xff] }
  0xc6   : > { %v9448_v15 = vpop.eup %6670  ;;  %6686 = vrcp.f32 %v2757_v0  ;;  %v2758_v7 = vadd.f32 1.0, %v9441_v62  ;;  %vm4293_vm11 = vcmp.ge.f32.partialorder %v9332_v60, 0.0  ;;  %v1231_v11 = vsub.f32 0.0, %v719_v39 }
  0xc7   : > { %v9456_v29 = vpop.eup %6672  ;;  %v5311_v51 = vsel %vm4287_vm5, %v6667_v59, %v4799_v3  ;;  %v2759_v45 = vadd.f32 1.0, %v9448_v15  ;;  %6688 = vpow2.f32 %v1802_v5  ;;  %v721_v35 = vand.u32 2147483647, %v9462_v8 }
  0xc8   : > { %5823 = vst [vmem:[%s8863_s17 + $0x1a8] sm:$0xff] %v5311_v51  ;;  %6690 = vrcp.f32 %v2758_v7  ;;  %v2760_v6 = vadd.f32 1.0, %v9456_v29  ;;  %v1810_v25 = vmul.f32 1.442695, %v1230_v4  ;;  %v1232_v33 = vsub.f32 0.0, %v720_v46 }
  0xc9   : > { %6692 = vrcp.f32 %v2759_v45  ;;  %v1812_v44 = vmul.f32 1.442695, %v1231_v11  ;;  %v1233_v57 = vsub.f32 0.0, %v721_v35  ;;  %v722_v36 = vand.u32 2147483647, %v9475_v56 }
  0xca   : > { %v6675_v2 = vpop.eup %6674  ;;  %6694 = vrcp.f32 %v2760_v6  ;;  %vm4294_vm12 = vcmp.ge.f32.partialorder %v9338_v12, 0.0  ;;  %v723_v50 = vand.u32 2147483647, %v9485_v31  ;;  %vm4295_vm13 = vcmp.ge.f32.partialorder %v9345_v20, 0.0  ;;  %v9544_v20 = vld [vmem:[%s8712_s30 + $0x268] sm:$0xff] }
  0xcb   : > { %v9471_v14 = vpop.eup %6676  ;;  %v4800_v53 = vmul.f32 %v6675_v2, %v9391_v40  ;;  %6696 = vpow2.f32 %v1804_v52  ;;  %v1814_v40 = vmul.f32 1.442695, %v1232_v33  ;;  %v1816_v5 = vmul.f32 1.442695, %v1233_v57 }
  0xcc   : > { %v6679_v16 = vpop.eup %6678  ;;  %v2761_v42 = vadd.f32 1.0, %v9471_v14  ;;  %6698 = vpow2.f32 %v1806_v27  ;;  %v1234_v0 = vsub.f32 0.0, %v722_v36  ;;  %v1235_v45 = vsub.f32 0.0, %v723_v50  ;;  %v9515_v27 = vld [vmem:[%s8712_s30 + $0x258] sm:$0xff] }
  0xcd   : > { %v6681_v30 = vpop.eup %6680  ;;  %v5312_v26 = vsel %vm4288_vm6, %v6675_v2, %v4800_v53  ;;  %v4801_v48 = vmul.f32 %v6679_v16, %v9406_v24  ;;  %6700 = vpow2.f32 %v1808_v19  ;;  %vm4296_vm14 = vcmp.ge.f32.partialorder %v9350_v32, 0.0  ;;  %v9534_v53 = vld [vmem:[%s8712_s30 + $0x260] sm:$0xff] }
  0xce   : > { %v6683_v37 = vpop.eup %6682  ;;  %5824 = vst [vmem:[%s8863_s17 + $0x1b0] sm:$0xff] %v5312_v26  ;;  %v4802_v54 = vmul.f32 %v6681_v30, %v9413_v61  ;;  %6702 = vrcp.f32 %v2761_v42  ;;  %v1818_v10 = vmul.f32 1.442695, %v1234_v0  ;;  %v724_v60 = vand.u32 2147483647, %v9503_v28 }
  0xcf   : > { %v6685_v23 = vpop.eup %6684  ;;  %v5313_v63 = vsel %vm4289_vm7, %v6679_v16, %v4801_v48  ;;  %v4803_v24 = vmul.f32 %v6683_v37, %v9421_v17  ;;  %6704 = vpow2.f32 %v1810_v25  ;;  %v1820_v19 = vmul.f32 1.442695, %v1235_v45  ;;  %v9588_v45 = vld [vmem:[%s8712_s30 + $0x288] sm:$0xff] }
  0xd0   : > { %v6687_v34 = vpop.eup %6686  ;;  %5825 = vst [vmem:[%s8863_s17 + $0x1b8] sm:$0xff] %v5313_v63  ;;  %v5314_v61 = vsel %vm4290_vm8, %v6681_v30, %v4802_v54  ;;  %v4804_v59 = vmul.f32 %v6685_v23, %v9427_v22  ;;  %6706 = vpow2.f32 %v1812_v44  ;;  %v1236_v11 = vsub.f32 0.0, %v724_v60  ;;  %v9596_v60 = vld [vmem:[%s8712_s30 + $0x290] sm:$0xff] }
  0xd1   : > { %v9495_v3 = vpop.eup %6688  ;;  %5826 = vst [vmem:[%s8863_s17 + $0x1c0] sm:$0xff] %v5314_v61  ;;  %v5315_v47 = vsel %vm4291_vm9, %v6683_v37, %v4803_v24  ;;  %v4805_v17 = vmul.f32 %v6687_v34, %v9431_v58  ;;  %6708 = vpow2.f32 %v1814_v40  ;;  %v725_v35 = vand.u32 2147483647, %v9515_v27  ;;  %v9559_v37 = vld [vmem:[%s8712_s30 + $0x270] sm:$0xff] }
  0xd2   : > { %v6691_v7 = vpop.eup %6690  ;;  %5827 = vst [vmem:[%s8863_s17 + $0x1c8] sm:$0xff] %v5315_v47  ;;  %v5316_v22 = vsel %vm4292_vm10, %v6685_v23, %v4804_v59  ;;  %v2762_v52 = vadd.f32 1.0, %v9495_v3  ;;  %6710 = vpow2.f32 %v1816_v5  ;;  %vm4297_vm15 = vcmp.ge.f32.partialorder %v9364_v43, 0.0  ;;  %v9568_v23 = vld [vmem:[%s8712_s30 + $0x278] sm:$0xff]  ;;  %v9577_v47 = vld [vmem:[%s8712_s30 + $0x280] sm:$0xff] }
  0xd3   : > { %v6693_v1 = vpop.eup %6692  ;;  %5828 = vst [vmem:[%s8863_s17 + $0x1d0] sm:$0xff] %v5316_v22  ;;  %v5317_v58 = vsel %vm4293_vm11, %v6687_v34, %v4805_v17  ;;  %v4806_v51 = vmul.f32 %v6691_v7, %v9441_v62  ;;  %v1822_v42 = vmul.f32 1.442695, %v1236_v11  ;;  %v1237_v44 = vsub.f32 0.0, %v725_v35 }
  0xd4   : > { %v6695_v6 = vpop.eup %6694  ;;  %5829 = vst [vmem:[%s8863_s17 + $0x1d8] sm:$0xff] %v5317_v58  ;;  %v4807_v38 = vmul.f32 %v6693_v1, %v9448_v15  ;;  %6712 = vrcp.f32 %v2762_v52  ;;  %vm4298_vm0 = vcmp.ge.f32.partialorder %v9378_v55, 0.0  ;;  %v726_v30 = vand.u32 2147483647, %v9534_v53 }
  0xd5   : > { %v9521_v4 = vpop.eup %6696  ;;  %v5318_v62 = vsel %vm4294_vm12, %v6691_v7, %v4806_v51  ;;  %v4808_v39 = vmul.f32 %v6695_v6, %v9456_v29  ;;  %6714 = vpow2.f32 %v1818_v10  ;;  %vm4299_vm1 = vcmp.ge.f32.partialorder %v9389_v41, 0.0 }
  0xd6   : > { %v9526_v46 = vpop.eup %6698  ;;  %5830 = vst [vmem:[%s8863_s17 + $0x1e0] sm:$0xff] %v5318_v62  ;;  %v5319_v15 = vsel %vm4295_vm13, %v6693_v1, %v4807_v38  ;;  %v2763_v2 = vadd.f32 1.0, %v9521_v4  ;;  %6716 = vpow2.f32 %v1820_v19  ;;  %v727_v40 = vand.u32 2147483647, %v9544_v20 }
  0xd7   : > { %v9536_v12 = vpop.eup %6700  ;;  %5831 = vst [vmem:[%s8863_s17 + $0x1e8] sm:$0xff] %v5319_v15  ;;  %v5320_v29 = vsel %vm4296_vm14, %v6695_v6, %v4808_v39  ;;  %v2764_v25 = vadd.f32 1.0, %v9526_v46  ;;  %vm4300_vm2 = vcmp.ge.f32.partialorder %v9399_v18, 0.0  ;;  %v1238_v36 = vsub.f32 0.0, %v726_v30 }
  0xd8   : > { %v6703_v33 = vpop.eup %6702  ;;  %5832 = vst [vmem:[%s8863_s17 + $0x1f0] sm:$0xff] %v5320_v29  ;;  %6718 = vrcp.f32 %v2763_v2  ;;  %v2765_v16 = vadd.f32 1.0, %v9536_v12  ;;  %v1824_v34 = vmul.f32 1.442695, %v1237_v44  ;;  %v1239_v61 = vsub.f32 0.0, %v727_v40  ;;  %v9615_v40 = vld [vmem:[%s8712_s30 + $0x298] sm:$0xff] }
  0xd9   : > { %v9548_v57 = vpop.eup %6704  ;;  %v4809_v32 = vmul.f32 %v6703_v33, %v9471_v14  ;;  %6720 = vrcp.f32 %v2764_v25  ;;  %v1826_v59 = vmul.f32 1.442695, %v1238_v36  ;;  %v728_v0 = vand.u32 2147483647, %v9559_v37 }
  0xda   : > { %v9553_v26 = vpop.eup %6706  ;;  %6722 = vrcp.f32 %v2765_v16  ;;  %v2766_v48 = vadd.f32 1.0, %v9548_v57  ;;  %vm4301_vm3 = vcmp.ge.f32.partialorder %v9419_v49, 0.0  ;;  %vm4302_vm4 = vcmp.ge.f32.partialorder %v9436_v13, 0.0 }
  0xdb   : > { %v9561_v54 = vpop.eup %6708  ;;  %v5321_v14 = vsel %vm4297_vm15, %v6703_v33, %v4809_v32  ;;  %v2767_v5 = vadd.f32 1.0, %v9553_v26  ;;  %6724 = vpow2.f32 %v1822_v42  ;;  %v729_v50 = vand.u32 2147483647, %v9568_v23 }
  0xdc   : > { %v9570_v63 = vpop.eup %6710  ;;  %5833 = vst [vmem:[%s8863_s17 + $0x1f8] sm:$0xff] %v5321_v14  ;;  %6726 = vrcp.f32 %v2766_v48  ;;  %v2768_v24 = vadd.f32 1.0, %v9561_v54  ;;  %v1828_v52 = vmul.f32 1.442695, %v1239_v61  ;;  %v1240_v10 = vsub.f32 0.0, %v728_v0 }
  0xdd   : > { %6728 = vrcp.f32 %v2767_v5  ;;  %v2769_v43 = vadd.f32 1.0, %v9570_v63  ;;  %v1241_v58 = vsub.f32 0.0, %v729_v50  ;;  %v730_v51 = vand.u32 2147483647, %v9577_v47 }
  0xde   : > { %v6713_v17 = vpop.eup %6712  ;;  %6730 = vrcp.f32 %v2768_v24  ;;  %vm4303_vm5 = vcmp.ge.f32.partialorder %v9446_v21, 0.0  ;;  %vm4304_vm6 = vcmp.ge.f32.partialorder %v9454_v9, 0.0  ;;  %v731_v55 = vand.u32 2147483647, %v9588_v45 }
  0xdf   : > { %v9582_v7 = vpop.eup %6714  ;;  %v4810_v22 = vmul.f32 %v6713_v17, %v9495_v3  ;;  %6732 = vrcp.f32 %v2769_v43  ;;  %v1830_v3 = vmul.f32 1.442695, %v1240_v10  ;;  %v1832_v19 = vmul.f32 1.442695, %v1241_v58 }
  0xe0   : > { %v2770_v1 = vadd.f32 1.0, %v9582_v7  ;;  %6734 = vpow2.f32 %v1824_v34  ;;  %v9590_v6 = vpop.eup %6716  ;;  %v1242_v15 = vsub.f32 0.0, %v730_v51  ;;  %v732_v33 = vand.u32 2147483647, %v9596_v60  ;;  %v9625_v34 = vld [vmem:[%s8712_s30 + $0x2a0] sm:$0xff] }
  0xe1   : > { %v5322_v38 = vsel %vm4298_vm0, %v6713_v17, %v4810_v22  ;;  %6736 = vpow2.f32 %v1826_v59  ;;  %v2771_v39 = vadd.f32 1.0, %v9590_v6  ;;  %v1243_v44 = vsub.f32 0.0, %v731_v55  ;;  %v9632_v59 = vld [vmem:[%s8712_s30 + $0x2a8] sm:$0xff] }
  0xe2   : > { %v6719_v62 = vpop.eup %6718  ;;  %5834 = vst [vmem:[%s8863_s17 + $0x200] sm:$0xff] %v5322_v38  ;;  %6738 = vrcp.f32 %v2770_v1  ;;  %v1834_v25 = vmul.f32 1.442695, %v1242_v15  ;;  %v1244_v48 = vsub.f32 0.0, %v732_v33  ;;  %vm4305_vm7 = vcmp.ge.f32.partialorder %v9462_v8, 0.0 }
  0xe3   : > { %v6721_v2 = vpop.eup %6720  ;;  %v4811_v11 = vmul.f32 %v6719_v62, %v9521_v4  ;;  %6740 = vpow2.f32 %v1828_v52  ;;  %v1836_v5 = vmul.f32 1.442695, %v1243_v44  ;;  %v733_v43 = vand.u32 2147483647, %v9615_v40 }
  0xe4   : > { %v6723_v35 = vpop.eup %6722  ;;  %v4812_v29 = vmul.f32 %v6721_v2, %v9526_v46  ;;  %6742 = vrcp.f32 %v2771_v39  ;;  %v1838_v24 = vmul.f32 1.442695, %v1244_v48  ;;  %vm4306_vm8 = vcmp.ge.f32.partialorder %v9475_v56, 0.0 }
  0xe5   : > { %v9605_v16 = vpop.eup %6724  ;;  %v5323_v42 = vsel %vm4299_vm1, %v6719_v62, %v4811_v11  ;;  %v4813_v4 = vmul.f32 %v6723_v35, %v9536_v12  ;;  %6744 = vpow2.f32 %v1830_v3  ;;  %v1245_v22 = vsub.f32 0.0, %v733_v43  ;;  %v9659_v3 = vld [vmem:[%s8712_s30 + $0x2b0] sm:$0xff]  ;;  %v9669_v11 = vld [vmem:[%s8712_s30 + $0x2b8] sm:$0xff] }
  0xe6   : > { %v6727_v32 = vpop.eup %6726  ;;  %5835 = vst [vmem:[%s8863_s17 + $0x208] sm:$0xff] %v5323_v42  ;;  %v5324_v46 = vsel %vm4300_vm2, %v6721_v2, %v4812_v29  ;;  %v2772_v30 = vadd.f32 1.0, %v9605_v16  ;;  %6746 = vpow2.f32 %v1832_v19  ;;  %v734_v52 = vand.u32 2147483647, %v9625_v34  ;;  %v9709_v43 = vld [vmem:[%s8712_s30 + $0x2d8] sm:$0xff] }
  0xe7   : > { %v6729_v14 = vpop.eup %6728  ;;  %5836 = vst [vmem:[%s8863_s17 + $0x210] sm:$0xff] %v5324_v46  ;;  %v5325_v41 = vsel %vm4301_vm3, %v6723_v35, %v4813_v4  ;;  %v4814_v12 = vmul.f32 %v6727_v32, %v9548_v57  ;;  %6748 = vpow2.f32 %v1834_v25  ;;  %vm4307_vm9 = vcmp.ge.f32.partialorder %v9485_v31, 0.0  ;;  %v9678_v25 = vld [vmem:[%s8712_s30 + $0x2c0] sm:$0xff] }
  0xe8   : > { %v6731_v18 = vpop.eup %6730  ;;  %5837 = vst [vmem:[%s8863_s17 + $0x218] sm:$0xff] %v5325_v41  ;;  %v4815_v36 = vmul.f32 %v6729_v14, %v9553_v26  ;;  %6750 = vrcp.f32 %v2772_v30  ;;  %v735_v1 = vand.u32 2147483647, %v9632_v59  ;;  %v1840_v51 = vmul.f32 1.442695, %v1245_v22 }
  0xe9   : > { %v6733_v61 = vpop.eup %6732  ;;  %v5326_v49 = vsel %vm4302_vm4, %v6727_v32, %v4814_v12  ;;  %v4816_v57 = vmul.f32 %v6731_v18, %v9561_v54  ;;  %6752 = vpow2.f32 %v1836_v5  ;;  %v1246_v38 = vsub.f32 0.0, %v734_v52 }
  0xea   : > { %v9634_v26 = vpop.eup %6734  ;;  %5838 = vst [vmem:[%s8863_s17 + $0x220] sm:$0xff] %v5326_v49  ;;  %v5327_v0 = vsel %vm4303_vm5, %v6729_v14, %v4815_v36  ;;  %v4817_v17 = vmul.f32 %v6733_v61, %v9570_v63  ;;  %6754 = vpow2.f32 %v1838_v24  ;;  %vm4308_vm10 = vcmp.ge.f32.partialorder %v9503_v28, 0.0  ;;  %v9694_v14 = vld [vmem:[%s8712_s30 + $0x2c8] sm:$0xff]  ;;  %v9700_v36 = vld [vmem:[%s8712_s30 + $0x2d0] sm:$0xff] }
  0xeb   : > { %v9641_v13 = vpop.eup %6736  ;;  %5839 = vst [vmem:[%s8863_s17 + $0x228] sm:$0xff] %v5327_v0  ;;  %v5328_v54 = vsel %vm4304_vm6, %v6731_v18, %v4816_v57  ;;  %v2773_v50 = vadd.f32 1.0, %v9634_v26  ;;  %v1247_v39 = vsub.f32 0.0, %v735_v1  ;;  %v1842_v2 = vmul.f32 1.442695, %v1246_v38  ;;  %v9720_v1 = vld [vmem:[%s8712_s30 + $0x2e0] sm:$0xff] }
  0xec   : > { %v6739_v21 = vpop.eup %6738  ;;  %5840 = vst [vmem:[%s8863_s17 + $0x230] sm:$0xff] %v5328_v54  ;;  %v5329_v63 = vsel %vm4305_vm7, %v6733_v61, %v4817_v17  ;;  %v2774_v10 = vadd.f32 1.0, %v9641_v13  ;;  %vm4309_vm11 = vcmp.ge.f32.partialorder %v9515_v27, 0.0  ;;  %v736_v29 = vand.u32 2147483647, %v9659_v3 }
  0xed   : > { %v9654_v58 = vpop.eup %6740  ;;  %5841 = vst [vmem:[%s8863_s17 + $0x238] sm:$0xff] %v5329_v63  ;;  %v4818_v9 = vmul.f32 %v6739_v21, %v9582_v7  ;;  %6756 = vrcp.f32 %v2773_v50  ;;  %v1844_v42 = vmul.f32 1.442695, %v1247_v39  ;;  %v737_v46 = vand.u32 2147483647, %v9669_v11 }
  0xee   : > { %v6743_v8 = vpop.eup %6742  ;;  %6758 = vrcp.f32 %v2774_v10  ;;  %v2775_v62 = vadd.f32 1.0, %v9654_v58  ;;  %v1248_v32 = vsub.f32 0.0, %v736_v29  ;;  %vm4310_vm12 = vcmp.ge.f32.partialorder %v9534_v53, 0.0 }
  0xef   : > { %v9663_v19 = vpop.eup %6744  ;;  %v5330_v15 = vsel %vm4306_vm8, %v6739_v21, %v4818_v9  ;;  %v4819_v7 = vmul.f32 %v6743_v8, %v9590_v6  ;;  %6760 = vpow2.f32 %v1840_v51  ;;  %v738_v48 = vand.u32 2147483647, %v9678_v25 }
  0xf0   : > { %v9671_v55 = vpop.eup %6746  ;;  %5842 = vst [vmem:[%s8863_s17 + $0x240] sm:$0xff] %v5330_v15  ;;  %6762 = vrcp.f32 %v2775_v62  ;;  %v2776_v35 = vadd.f32 1.0, %v9663_v19  ;;  %v1846_v5 = vmul.f32 1.442695, %v1248_v32  ;;  %v1249_v18 = vsub.f32 0.0, %v737_v46  ;;  %v9751_v46 = vld [vmem:[%s8712_s30 + $0x2f0] sm:$0xff] }
  0xf1   : > { %v9680_v56 = vpop.eup %6748  ;;  %v5331_v6 = vsel %vm4307_vm9, %v6743_v8, %v4819_v7  ;;  %v2777_v33 = vadd.f32 1.0, %v9671_v55  ;;  %6764 = vpow2.f32 %v1842_v2  ;;  %v1250_v61 = vsub.f32 0.0, %v738_v48 }
  0xf2   : > { %v6751_v4 = vpop.eup %6750  ;;  %5843 = vst [vmem:[%s8863_s17 + $0x248] sm:$0xff] %v5331_v6  ;;  %6766 = vrcp.f32 %v2776_v35  ;;  %v2778_v44 = vadd.f32 1.0, %v9680_v56  ;;  %vm4311_vm13 = vcmp.ge.f32.partialorder %v9544_v20, 0.0  ;;  %v1848_v49 = vmul.f32 1.442695, %v1249_v18  ;;  %v9736_v35 = vld [vmem:[%s8712_s30 + $0x2e8] sm:$0xff] }
  0xf3   : > { %v9688_v30 = vpop.eup %6752  ;;  %v4820_v31 = vmul.f32 %v6751_v4, %v9605_v16  ;;  %6768 = vrcp.f32 %v2777_v33  ;;  %v739_v57 = vand.u32 2147483647, %v9694_v14  ;;  %vm4312_vm14 = vcmp.ge.f32.partialorder %v9559_v37, 0.0 }
  0xf4   : > { %v9696_v41 = vpop.eup %6754  ;;  %6770 = vrcp.f32 %v2778_v44  ;;  %v2779_v12 = vadd.f32 1.0, %v9688_v30  ;;  %v1850_v28 = vmul.f32 1.442695, %v1250_v61  ;;  %v740_v17 = vand.u32 2147483647, %v9700_v36 }
  0xf5   : > { %v5332_v16 = vsel %vm4308_vm10, %v6751_v4, %v4820_v31  ;;  %v2780_v24 = vadd.f32 1.0, %v9696_v41  ;;  %6772 = vpow2.f32 %v1844_v42  ;;  %vm4313_vm15 = vcmp.ge.f32.partialorder %v9568_v23, 0.0 }
  0xf6   : > { %5844 = vst [vmem:[%s8863_s17 + $0x250] sm:$0xff] %v5332_v16  ;;  %6774 = vrcp.f32 %v2779_v12  ;;  %v1251_v22 = vsub.f32 0.0, %v739_v57  ;;  %v1252_v63 = vsub.f32 0.0, %v740_v17  ;;  %v741_v10 = vand.u32 2147483647, %v9709_v43  ;;  %v9763_v16 = vld [vmem:[%s8712_s30 + $0x2f8] sm:$0xff] }
  0xf7   : > { %v6757_v0 = vpop.eup %6756  ;;  %6776 = vrcp.f32 %v2780_v24  ;;  %vm4314_vm0 = vcmp.ge.f32.partialorder %v9577_v47, 0.0  ;;  %v742_v2 = vand.u32 2147483647, %v9720_v1  ;;  %vm4315_vm1 = vcmp.ge.f32.partialorder %v9588_v45, 0.0  ;;  %v9771_v47 = vld [vmem:[%s8712_s30 + $0x300] sm:$0xff] }
  0xf8   : > { %v6759_v54 = vpop.eup %6758  ;;  %v4821_v50 = vmul.f32 %v6757_v0, %v9634_v26  ;;  %6778 = vpow2.f32 %v1846_v5  ;;  %v1852_v38 = vmul.f32 1.442695, %v1251_v22  ;;  %v1854_v39 = vmul.f32 1.442695, %v1252_v63  ;;  %v9786_v22 = vld [vmem:[%s8712_s30 + $0x308] sm:$0xff] }
  0xf9   : > { %v9715_v52 = vpop.eup %6760  ;;  %v4822_v21 = vmul.f32 %v6759_v54, %v9641_v13  ;;  %6780 = vpow2.f32 %v1848_v49  ;;  %v1253_v15 = vsub.f32 0.0, %v741_v10  ;;  %v1254_v4 = vsub.f32 0.0, %v742_v2 }
  0xfa   : > { %v6763_v9 = vpop.eup %6762  ;;  %v5333_v26 = vsel %vm4309_vm11, %v6757_v0, %v4821_v50  ;;  %v2781_v51 = vadd.f32 1.0, %v9715_v52  ;;  %6782 = vpow2.f32 %v1850_v28  ;;  %vm4316_vm2 = vcmp.ge.f32.partialorder %v9596_v60, 0.0 }
  0xfb   : > { %v9725_v8 = vpop.eup %6764  ;;  %5845 = vst [vmem:[%s8863_s17 + $0x258] sm:$0xff] %v5333_v26  ;;  %v5334_v13 = vsel %vm4310_vm12, %v6759_v54, %v4822_v21  ;;  %v4823_v62 = vmul.f32 %v6763_v9, %v9654_v58  ;;  %v1856_v6 = vmul.f32 1.442695, %v1253_v15  ;;  %v1858_v37 = vmul.f32 1.442695, %v1254_v4 }
  0xfc   : > { %v6767_v7 = vpop.eup %6766  ;;  %5846 = vst [vmem:[%s8863_s17 + $0x260] sm:$0xff] %v5334_v13  ;;  %6784 = vrcp.f32 %v2781_v51  ;;  %v2782_v27 = vadd.f32 1.0, %v9725_v8  ;;  %v744_v61 = vand.u32 2147483647, %v9751_v46  ;;  %v745_v50 = vand.u32 2147483647, %v9763_v16 }
  0xfd   : > { %v6769_v29 = vpop.eup %6768  ;;  %v5335_v53 = vsel %vm4311_vm13, %v6763_v9, %v4823_v62  ;;  %v4824_v58 = vmul.f32 %v6767_v7, %v9663_v19  ;;  %6786 = vpow2.f32 %v1852_v38  ;;  %v743_v19 = vand.u32 2147483647, %v9736_v35  ;;  %v9798_v13 = vld [vmem:[%s8712_s30 + $0x310] sm:$0xff] }
  0xfe   : > { %v6771_v33 = vpop.eup %6770  ;;  %5847 = vst [vmem:[%s8863_s17 + $0x268] sm:$0xff] %v5335_v53  ;;  %v4825_v42 = vmul.f32 %v6769_v29, %v9671_v55  ;;  %6788 = vrcp.f32 %v2782_v27  ;;  %v1256_v54 = vsub.f32 0.0, %v744_v61  ;;  %vm4317_vm3 = vcmp.ge.f32.partialorder %v9615_v40, 0.0 }
  0xff   : > { %v9744_v44 = vpop.eup %6772  ;;  %v5336_v20 = vsel %vm4312_vm14, %v6767_v7, %v4824_v58  ;;  %v4826_v32 = vmul.f32 %v6771_v33, %v9680_v56  ;;  %6790 = vpow2.f32 %v1854_v39  ;;  %v1255_v18 = vsub.f32 0.0, %v743_v19 }
 0x100   : > { %v6775_v55 = vpop.eup %6774  ;;  %5848 = vst [vmem:[%s8863_s17 + $0x270] sm:$0xff] %v5336_v20  ;;  %v5337_v31 = vsel %vm4313_vm15, %v6769_v29, %v4825_v42  ;;  %v2783_v48 = vadd.f32 1.0, %v9744_v44  ;;  %6792 = vpow2.f32 %v1856_v6  ;;  %v746_v21 = vand.u32 2147483647, %v9771_v47  ;;  %v9808_v29 = vld [vmem:[%s8712_s30 + $0x318] sm:$0xff]  ;;  %v9816_v42 = vld [vmem:[%s8712_s30 + $0x320] sm:$0xff] }
 0x101   : > { %v6777_v12 = vpop.eup %6776  ;;  %5849 = vst [vmem:[%s8863_s17 + $0x278] sm:$0xff] %v5337_v31  ;;  %v5338_v56 = vsel %vm4314_vm0, %v6771_v33, %v4826_v32  ;;  %v4827_v5 = vmul.f32 %v6775_v55, %v9688_v30  ;;  %v1860_v0 = vmul.f32 1.442695, %v1255_v18  ;;  %vm4318_vm4 = vcmp.ge.f32.partialorder %v9625_v34, 0.0 }
 0x102   : > { %v9765_v23 = vpop.eup %6778  ;;  %5850 = vst [vmem:[%s8863_s17 + $0x280] sm:$0xff] %v5338_v56  ;;  %v4828_v24 = vmul.f32 %v6777_v12, %v9696_v41  ;;  %6794 = vrcp.f32 %v2783_v48  ;;  %v1862_v60 = vmul.f32 1.442695, %v1256_v54  ;;  %v1257_v10 = vsub.f32 0.0, %v745_v50  ;;  %v9830_v48 = vld [vmem:[%s8712_s30 + $0x328] sm:$0xff] }
 0x103   : > { %v9773_v49 = vpop.eup %6780  ;;  %v5339_v30 = vsel %vm4315_vm1, %v6775_v55, %v4827_v5  ;;  %v2784_v57 = vadd.f32 1.0, %v9765_v23  ;;  %6796 = vpow2.f32 %v1858_v37  ;;  %v1258_v51 = vsub.f32 0.0, %v746_v21  ;;  %v9850_v21 = vld [vmem:[%s8712_s30 + $0x338] sm:$0xff] }
 0x104   : > { %v9778_v28 = vpop.eup %6782  ;;  %5851 = vst [vmem:[%s8863_s17 + $0x288] sm:$0xff] %v5339_v30  ;;  %v5340_v41 = vsel %vm4316_vm2, %v6777_v12, %v4828_v24  ;;  %v2785_v17 = vadd.f32 1.0, %v9773_v49  ;;  %v747_v38 = vand.u32 2147483647, %v9786_v22  ;;  %vm4319_vm5 = vcmp.ge.f32.partialorder %v9632_v59, 0.0 }
 0x105   : > { %5852 = vst [vmem:[%s8863_s17 + $0x290] sm:$0xff] %v5340_v41  ;;  %6798 = vrcp.f32 %v2784_v57  ;;  %v2786_v45 = vadd.f32 1.0, %v9778_v28  ;;  %v1864_v15 = vmul.f32 1.442695, %v1257_v10  ;;  %v1866_v2 = vmul.f32 1.442695, %v1258_v51 }
 0x106   : > { %v6785_v63 = vpop.eup %6784  ;;  %6800 = vrcp.f32 %v2785_v17  ;;  %v1259_v6 = vsub.f32 0.0, %v747_v38  ;;  %v748_v33 = vand.u32 2147483647, %v9798_v13  ;;  %vm4320_vm6 = vcmp.ge.f32.partialorder %v9659_v3, 0.0  ;;  %v9860_v3 = vld [vmem:[%s8712_s30 + $0x340] sm:$0xff] }
 0x107   : > { %v9793_v9 = vpop.eup %6786  ;;  %v4829_v26 = vmul.f32 %v6785_v63, %v9715_v52  ;;  %6802 = vrcp.f32 %v2786_v45  ;;  %v749_v19 = vand.u32 2147483647, %v9808_v29  ;;  %vm4321_vm7 = vcmp.ge.f32.partialorder %v9669_v11, 0.0 }
 0x108   : > { %v6789_v62 = vpop.eup %6788  ;;  %v2787_v39 = vadd.f32 1.0, %v9793_v9  ;;  %6804 = vpow2.f32 %v1860_v0  ;;  %v1868_v20 = vmul.f32 1.442695, %v1259_v6  ;;  %v1260_v32 = vsub.f32 0.0, %v748_v33  ;;  %v9840_v0 = vld [vmem:[%s8712_s30 + $0x330] sm:$0xff] }
 0x109   : > { %v9802_v7 = vpop.eup %6790  ;;  %v5341_v52 = vsel %vm4317_vm3, %v6785_v63, %v4829_v26  ;;  %v4830_v27 = vmul.f32 %v6789_v62, %v9725_v8  ;;  %6806 = vpow2.f32 %v1862_v60  ;;  %v750_v34 = vand.u32 2147483647, %v9816_v42 }
 0x10a   : > { %v9810_v53 = vpop.eup %6792  ;;  %5853 = vst [vmem:[%s8863_s17 + $0x298] sm:$0xff] %v5341_v52  ;;  %6808 = vrcp.f32 %v2787_v39  ;;  %v2788_v58 = vadd.f32 1.0, %v9802_v7  ;;  %v1870_v12 = vmul.f32 1.442695, %v1260_v32  ;;  %v1261_v56 = vsub.f32 0.0, %v749_v19  ;;  %v9892_v19 = vld [vmem:[%s8712_s30 + $0x350] sm:$0xff] }
 0x10b   : > { %v5342_v40 = vsel %vm4318_vm4, %v6789_v62, %v4830_v27  ;;  %v2789_v8 = vadd.f32 1.0, %v9810_v53  ;;  %6810 = vpow2.f32 %v1864_v15  ;;  %vm4322_vm8 = vcmp.ge.f32.partialorder %v9678_v25, 0.0 }
 0x10c   : > { %v6795_v4 = vpop.eup %6794  ;;  %5854 = vst [vmem:[%s8863_s17 + $0x2a0] sm:$0xff] %v5342_v40  ;;  %6812 = vrcp.f32 %v2788_v58  ;;  %v1872_v30 = vmul.f32 1.442695, %v1261_v56  ;;  %v751_v57 = vand.u32 2147483647, %v9830_v48  ;;  %vm4323_vm9 = vcmp.ge.f32.partialorder %v9694_v14, 0.0 }
 0x10d   : > { %v9824_v55 = vpop.eup %6796  ;;  %v4831_v31 = vmul.f32 %v6795_v4, %v9744_v44  ;;  %6814 = vrcp.f32 %v2789_v8  ;;  %v1262_v44 = vsub.f32 0.0, %v750_v34  ;;  %v752_v10 = vand.u32 2147483647, %v9840_v0 }
 0x10e   : > { %v2790_v37 = vadd.f32 1.0, %v9824_v55  ;;  %6816 = vpow2.f32 %v1866_v2  ;;  %v1263_v45 = vsub.f32 0.0, %v751_v57  ;;  %vm4324_vm10 = vcmp.ge.f32.partialorder %v9700_v36, 0.0 }
 0x10f   : > { %v6799_v5 = vpop.eup %6798  ;;  %v5343_v18 = vsel %vm4319_vm5, %v6795_v4, %v4831_v31  ;;  %6818 = vpow2.f32 %v1868_v20  ;;  %v1874_v17 = vmul.f32 1.442695, %v1262_v44  ;;  %v1264_v39 = vsub.f32 0.0, %v752_v10  ;;  %v9883_v20 = vld [vmem:[%s8712_s30 + $0x348] sm:$0xff] }
 0x110   : > { %v6801_v24 = vpop.eup %6800  ;;  %5855 = vst [vmem:[%s8863_s17 + $0x2a8] sm:$0xff] %v5343_v18  ;;  %v4832_v61 = vmul.f32 %v6799_v5, %v9765_v23  ;;  %6820 = vrcp.f32 %v2790_v37  ;;  %v1876_v38 = vmul.f32 1.442695, %v1263_v45  ;;  %v753_v15 = vand.u32 2147483647, %v9850_v21 }
 0x111   : > { %v6803_v41 = vpop.eup %6802  ;;  %v4833_v59 = vmul.f32 %v6801_v24, %v9773_v49  ;;  %6822 = vpow2.f32 %v1870_v12  ;;  %vm4325_vm11 = vcmp.ge.f32.partialorder %v9709_v43, 0.0  ;;  %v754_v27 = vand.u32 2147483647, %v9860_v3 }
 0x112   : > { %v9844_v54 = vpop.eup %6804  ;;  %v5344_v23 = vsel %vm4320_vm6, %v6799_v5, %v4832_v61  ;;  %v4834_v50 = vmul.f32 %v6803_v41, %v9778_v28  ;;  %6824 = vpow2.f32 %v1872_v30  ;;  %v1878_v6 = vmul.f32 1.442695, %v1264_v39  ;;  %v9906_v5 = vld [vmem:[%s8712_s30 + $0x358] sm:$0xff]  ;;  %v9913_v61 = vld [vmem:[%s8712_s30 + $0x360] sm:$0xff] }
 0x113   : > { %v9852_v63 = vpop.eup %6806  ;;  %5856 = vst [vmem:[%s8863_s17 + $0x2b0] sm:$0xff] %v5344_v23  ;;  %v5345_v49 = vsel %vm4321_vm7, %v6801_v24, %v4833_v59  ;;  %v2791_v60 = vadd.f32 1.0, %v9844_v54  ;;  %6826 = vpow2.f32 %v1874_v17  ;;  %v1265_v8 = vsub.f32 0.0, %v753_v15 }
 0x114   : > { %v6809_v26 = vpop.eup %6808  ;;  %5857 = vst [vmem:[%s8863_s17 + $0x2b8] sm:$0xff] %v5345_v49  ;;  %v5346_v28 = vsel %vm4322_vm8, %v6803_v41, %v4834_v50  ;;  %v2792_v51 = vadd.f32 1.0, %v9852_v63  ;;  %v1266_v4 = vsub.f32 0.0, %v754_v27  ;;  %vm4326_vm12 = vcmp.ge.f32.partialorder %v9720_v1, 0.0 }
 0x115   : > { %v9867_v62 = vpop.eup %6810  ;;  %5858 = vst [vmem:[%s8863_s17 + $0x2c0] sm:$0xff] %v5346_v28  ;;  %v4835_v11 = vmul.f32 %v6809_v26, %v9793_v9  ;;  %6828 = vrcp.f32 %v2791_v60  ;;  %vm4327_vm13 = vcmp.ge.f32.partialorder %v9736_v35, 0.0  ;;  %v1880_v36 = vmul.f32 1.442695, %v1265_v8 }
 0x116   : > { %v6813_v52 = vpop.eup %6812  ;;  %6830 = vrcp.f32 %v2792_v51  ;;  %v2793_v25 = vadd.f32 1.0, %v9867_v62  ;;  %vm4328_vm14 = vcmp.ge.f32.partialorder %v9751_v46, 0.0  ;;  %v755_v56 = vand.u32 2147483647, %v9883_v20 }
 0x117   : > { %v6815_v2 = vpop.eup %6814  ;;  %v5347_v58 = vsel %vm4323_vm9, %v6809_v26, %v4835_v11  ;;  %v4836_v9 = vmul.f32 %v6813_v52, %v9802_v7  ;;  %6832 = vpow2.f32 %v1876_v38  ;;  %v1882_v44 = vmul.f32 1.442695, %v1266_v4  ;;  %v9931_v11 = vld [vmem:[%s8712_s30 + $0x368] sm:$0xff] }
 0x118   : > { %v9878_v33 = vpop.eup %6816  ;;  %5859 = vst [vmem:[%s8863_s17 + $0x2c8] sm:$0xff] %v5347_v58  ;;  %v4837_v40 = vmul.f32 %v6815_v2, %v9810_v53  ;;  %6834 = vrcp.f32 %v2793_v25  ;;  %v756_v24 = vand.u32 2147483647, %v9892_v19  ;;  %v1267_v41 = vsub.f32 0.0, %v755_v56  ;;  %v9937_v25 = vld [vmem:[%s8712_s30 + $0x370] sm:$0xff] }
 0x119   : > { %v9885_v32 = vpop.eup %6818  ;;  %v5348_v14 = vsel %vm4324_vm10, %v6813_v52, %v4836_v9  ;;  %v2794_v7 = vadd.f32 1.0, %v9878_v33  ;;  %6836 = vpow2.f32 %v1878_v6  ;;  %v757_v23 = vand.u32 2147483647, %v9906_v5  ;;  %v9946_v9 = vld [vmem:[%s8712_s30 + $0x378] sm:$0xff] }
 0x11a   : > { %v6821_v53 = vpop.eup %6820  ;;  %5860 = vst [vmem:[%s8863_s17 + $0x2d0] sm:$0xff] %v5348_v14  ;;  %v5349_v31 = vsel %vm4325_vm11, %v6815_v2, %v4837_v40  ;;  %v2795_v34 = vadd.f32 1.0, %v9885_v32  ;;  %v1268_v17 = vsub.f32 0.0, %v756_v24  ;;  %vm4329_vm15 = vcmp.ge.f32.partialorder %v9763_v16, 0.0 }
 0x11b   : > { %v9899_v37 = vpop.eup %6822  ;;  %5861 = vst [vmem:[%s8863_s17 + $0x2d8] sm:$0xff] %v5349_v31  ;;  %v4838_v12 = vmul.f32 %v6821_v53, %v9824_v55  ;;  %6838 = vrcp.f32 %v2794_v7  ;;  %v1884_v45 = vmul.f32 1.442695, %v1267_v41  ;;  %v758_v1 = vand.u32 2147483647, %v9913_v61  ;;  %v9975_v41 = vld [vmem:[%s8712_s30 + $0x388] sm:$0xff] }
 0x11c   : > { %v9908_v43 = vpop.eup %6824  ;;  %6840 = vrcp.f32 %v2795_v34  ;;  %v2796_v18 = vadd.f32 1.0, %v9899_v37  ;;  %v1886_v10 = vmul.f32 1.442695, %v1268_v17  ;;  %v1269_v26 = vsub.f32 0.0, %v757_v23 }
 0x11d   : > { %v9915_v30 = vpop.eup %6826  ;;  %v5350_v55 = vsel %vm4326_vm12, %v6821_v53, %v4838_v12  ;;  %v2797_v57 = vadd.f32 1.0, %v9908_v43  ;;  %6842 = vpow2.f32 %v1880_v36  ;;  %vm4330_vm0 = vcmp.ge.f32.partialorder %v9771_v47, 0.0  ;;  %v9960_v53 = vld [vmem:[%s8712_s30 + $0x380] sm:$0xff] }
 0x11e   : > { %5862 = vst [vmem:[%s8863_s17 + $0x2e0] sm:$0xff] %v5350_v55  ;;  %6844 = vrcp.f32 %v2796_v18  ;;  %v2798_v59 = vadd.f32 1.0, %v9915_v30  ;;  %v1270_v38 = vsub.f32 0.0, %v758_v1  ;;  %v1888_v52 = vmul.f32 1.442695, %v1269_v26 }
 0x11f   : > { %v6829_v50 = vpop.eup %6828  ;;  %6846 = vrcp.f32 %v2797_v57  ;;  %vm4331_vm1 = vcmp.ge.f32.partialorder %v9786_v22, 0.0  ;;  %v759_v6 = vand.u32 2147483647, %v9931_v11  ;;  %vm4332_vm2 = vcmp.ge.f32.partialorder %v9798_v13, 0.0 }
 0x120   : > { %v6831_v49 = vpop.eup %6830  ;;  %v4839_v60 = vmul.f32 %v6829_v50, %v9844_v54  ;;  %6848 = vrcp.f32 %v2798_v59  ;;  %v1890_v58 = vmul.f32 1.442695, %v1270_v38  ;;  %v761_v7 = vand.u32 2147483647, %v9946_v9 }
 0x121   : > { %v9926_v28 = vpop.eup %6832  ;;  %v4840_v51 = vmul.f32 %v6831_v49, %v9852_v63  ;;  %6850 = vpow2.f32 %v1882_v44  ;;  %v1271_v14 = vsub.f32 0.0, %v759_v6  ;;  %vm4333_vm3 = vcmp.ge.f32.partialorder %v9808_v29, 0.0 }
 0x122   : > { %v6835_v39 = vpop.eup %6834  ;;  %v5351_v54 = vsel %vm4327_vm13, %v6829_v50, %v4839_v60  ;;  %v2799_v15 = vadd.f32 1.0, %v9926_v28  ;;  %6852 = vpow2.f32 %v1884_v45  ;;  %v1273_v18 = vsub.f32 0.0, %v761_v7  ;;  %v9993_v60 = vld [vmem:[%s8712_s30 + $0x390] sm:$0xff] }
 0x123   : > { %v9939_v27 = vpop.eup %6836  ;;  %5863 = vst [vmem:[%s8863_s17 + $0x2e8] sm:$0xff] %v5351_v54  ;;  %v5352_v63 = vsel %vm4328_vm14, %v6831_v49, %v4840_v51  ;;  %v4841_v2 = vmul.f32 %v6835_v39, %v9867_v62  ;;  %6854 = vpow2.f32 %v1886_v10  ;;  %v760_v62 = vand.u32 2147483647, %v9937_v25  ;;  %v10002_v51 = vld [vmem:[%s8712_s30 + $0x398] sm:$0xff] }
 0x124   : > { %5864 = vst [vmem:[%s8863_s17 + $0x2f0] sm:$0xff] %v5352_v63  ;;  %6856 = vrcp.f32 %v2799_v15  ;;  %v2800_v35 = vadd.f32 1.0, %v9939_v27  ;;  %v1892_v56 = vmul.f32 1.442695, %v1271_v14  ;;  %v762_v57 = vand.u32 2147483647, %v9960_v53 }
 0x125   : > { %v6839_v40 = vpop.eup %6838  ;;  %v5353_v46 = vsel %vm4329_vm15, %v6835_v39, %v4841_v2  ;;  %6858 = vpow2.f32 %v1888_v52  ;;  %v1272_v34 = vsub.f32 0.0, %v760_v62  ;;  %vm4334_vm4 = vcmp.ge.f32.partialorder %v9816_v42, 0.0  ;;  %v10023_v62 = vld [vmem:[%s8712_s30 + $0x3a8] sm:$0xff] }
 0x126   : > { %v6841_v8 = vpop.eup %6840  ;;  %5865 = vst [vmem:[%s8863_s17 + $0x2f8] sm:$0xff] %v5353_v46  ;;  %v4842_v4 = vmul.f32 %v6839_v40, %v9878_v33  ;;  %6860 = vrcp.f32 %v2800_v35  ;;  %v1896_v17 = vmul.f32 1.442695, %v1273_v18  ;;  %v1274_v50 = vsub.f32 0.0, %v762_v57  ;;  %v10015_v35 = vld [vmem:[%s8712_s30 + $0x3a0] sm:$0xff] }
 0x127   : > { %v9962_v31 = vpop.eup %6842  ;;  %v4843_v16 = vmul.f32 %v6841_v8, %v9885_v32  ;;  %6862 = vpow2.f32 %v1890_v58  ;;  %v1894_v55 = vmul.f32 1.442695, %v1272_v34  ;;  %v763_v49 = vand.u32 2147483647, %v9975_v41 }
 0x128   : > { %v6845_v36 = vpop.eup %6844  ;;  %v5354_v33 = vsel %vm4330_vm0, %v6839_v40, %v4842_v4  ;;  %v2801_v12 = vadd.f32 1.0, %v9962_v31  ;;  %v1898_v26 = vmul.f32 1.442695, %v1274_v50  ;;  %vm4335_vm5 = vcmp.ge.f32.partialorder %v9830_v48, 0.0 }
 0x129   : > { %v6847_v44 = vpop.eup %6846  ;;  %5866 = vst [vmem:[%s8863_s17 + $0x300] sm:$0xff] %v5354_v33  ;;  %v5355_v24 = vsel %vm4331_vm1, %v6841_v8, %v4843_v16  ;;  %v4844_v32 = vmul.f32 %v6845_v36, %v9899_v37  ;;  %v1275_v39 = vsub.f32 0.0, %v763_v49  ;;  %vm4336_vm6 = vcmp.ge.f32.partialorder %v9840_v0, 0.0  ;;  %v10032_v16 = vld [vmem:[%s8712_s30 + $0x3b0] sm:$0xff] }
 0x12a   : > { %v6849_v59 = vpop.eup %6848  ;;  %5867 = vst [vmem:[%s8863_s17 + $0x308] sm:$0xff] %v5355_v24  ;;  %v4845_v47 = vmul.f32 %v6847_v44, %v9908_v43  ;;  %6864 = vrcp.f32 %v2801_v12  ;;  %v764_v15 = vand.u32 2147483647, %v9993_v60  ;;  %v765_v58 = vand.u32 2147483647, %v10002_v51 }
 0x12b   : > { %v9980_v22 = vpop.eup %6850  ;;  %v5356_v37 = vsel %vm4332_vm2, %v6845_v36, %v4844_v32  ;;  %v4846_v23 = vmul.f32 %v6849_v59, %v9915_v30  ;;  %6866 = vpow2.f32 %v1892_v56  ;;  %v1900_v2 = vmul.f32 1.442695, %v1275_v39  ;;  %v10046_v32 = vld [vmem:[%s8712_s30 + $0x3b8] sm:$0xff] }
 0x12c   : > { %v9985_v45 = vpop.eup %6852  ;;  %5868 = vst [vmem:[%s8863_s17 + $0x310] sm:$0xff] %v5356_v37  ;;  %v5357_v43 = vsel %vm4333_vm3, %v6847_v44, %v4845_v47  ;;  %v2802_v1 = vadd.f32 1.0, %v9980_v22  ;;  %6868 = vpow2.f32 %v1894_v55  ;;  %v1276_v46 = vsub.f32 0.0, %v764_v15  ;;  %v10055_v47 = vld [vmem:[%s8712_s30 + $0x3c0] sm:$0xff] }
 0x12d   : > { %v9995_v13 = vpop.eup %6854  ;;  %5869 = vst [vmem:[%s8863_s17 + $0x318] sm:$0xff] %v5357_v43  ;;  %v5358_v30 = vsel %vm4334_vm4, %v6849_v59, %v4846_v23  ;;  %v2803_v10 = vadd.f32 1.0, %v9985_v45  ;;  %6870 = vpow2.f32 %v1896_v17  ;;  %vm4337_vm7 = vcmp.ge.f32.partialorder %v9850_v21, 0.0 }
 0x12e   : > { %v6857_v29 = vpop.eup %6856  ;;  %5870 = vst [vmem:[%s8863_s17 + $0x320] sm:$0xff] %v5358_v30  ;;  %6872 = vrcp.f32 %v2802_v1  ;;  %v2804_v38 = vadd.f32 1.0, %v9995_v13  ;;  %v1277_v4 = vsub.f32 0.0, %v765_v58  ;;  %v1902_v48 = vmul.f32 1.442695, %v1276_v46 }
 0x12f   : > { %v10007_v54 = vpop.eup %6858  ;;  %v4847_v42 = vmul.f32 %v6857_v29, %v9926_v28  ;;  %6874 = vrcp.f32 %v2803_v10  ;;  %v766_v7 = vand.u32 2147483647, %v10015_v35  ;;  %vm4338_vm8 = vcmp.ge.f32.partialorder %v9860_v3, 0.0 }
 0x130   : > { %v6861_v52 = vpop.eup %6860  ;;  %6876 = vrcp.f32 %v2804_v38  ;;  %v2805_v63 = vadd.f32 1.0, %v10007_v54  ;;  %v1904_v34 = vmul.f32 1.442695, %v1277_v4  ;;  %v767_v36 = vand.u32 2147483647, %v10023_v62 }
 0x131   : > { %v10017_v6 = vpop.eup %6862  ;;  %v5359_v28 = vsel %vm4335_vm5, %v6857_v29, %v4847_v42  ;;  %v4848_v40 = vmul.f32 %v6861_v52, %v9939_v27  ;;  %6878 = vpow2.f32 %v1898_v26  ;;  %vm4339_vm9 = vcmp.ge.f32.partialorder %v9883_v20, 0.0  ;;  %v10083_v20 = vld [vmem:[%s8712_s30 + $0x3d0] sm:$0xff] }
 0x132   : > { %5871 = vst [vmem:[%s8863_s17 + $0x328] sm:$0xff] %v5359_v28  ;;  %6880 = vrcp.f32 %v2805_v63  ;;  %v2806_v8 = vadd.f32 1.0, %v10017_v6  ;;  %v1278_v12 = vsub.f32 0.0, %v766_v7  ;;  %v1279_v44 = vsub.f32 0.0, %v767_v36  ;;  %v10074_v63 = vld [vmem:[%s8712_s30 + $0x3c8] sm:$0xff]  ;;  %v10107_v36 = vld [vmem:[%s8712_s30 + $0x3e0] sm:$0xff] }
 0x133   : > { %v5360_v14 = vsel %vm4336_vm6, %v6861_v52, %v4848_v40  ;;  %6882 = vpow2.f32 %v1900_v2  ;;  %v768_v24 = vand.u32 2147483647, %v10032_v16  ;;  %vm4340_vm10 = vcmp.ge.f32.partialorder %v9892_v19, 0.0 }
 0x134   : > { %v6865_v27 = vpop.eup %6864  ;;  %5872 = vst [vmem:[%s8863_s17 + $0x330] sm:$0xff] %v5360_v14  ;;  %6884 = vrcp.f32 %v2806_v8  ;;  %v1906_v59 = vmul.f32 1.442695, %v1278_v12  ;;  %v1908_v23 = vmul.f32 1.442695, %v1279_v44  ;;  %vm4341_vm11 = vcmp.ge.f32.partialorder %v9906_v5, 0.0 }
 0x135   : > { %v10037_v33 = vpop.eup %6866  ;;  %v4849_v0 = vmul.f32 %v6865_v27, %v9962_v31  ;;  %6886 = vpow2.f32 %v1902_v48  ;;  %v1280_v50 = vsub.f32 0.0, %v768_v24  ;;  %v769_v21 = vand.u32 2147483647, %v10046_v32  ;;  %v10095_v14 = vld [vmem:[%s8712_s30 + $0x3d8] sm:$0xff] }
 0x136   : > { %v10041_v56 = vpop.eup %6868  ;;  %v2807_v18 = vadd.f32 1.0, %v10037_v33  ;;  %6888 = vpow2.f32 %v1904_v34  ;;  %v770_v26 = vand.u32 2147483647, %v10055_v47  ;;  %vm4342_vm12 = vcmp.ge.f32.partialorder %v9913_v61, 0.0 }
 0x137   : > { %v10048_v55 = vpop.eup %6870  ;;  %v5361_v31 = vsel %vm4337_vm7, %v6865_v27, %v4849_v0  ;;  %v2808_v57 = vadd.f32 1.0, %v10041_v56  ;;  %v1910_v10 = vmul.f32 1.442695, %v1280_v50  ;;  %v1281_v39 = vsub.f32 0.0, %v769_v21 }
 0x138   : > { %v6873_v17 = vpop.eup %6872  ;;  %5873 = vst [vmem:[%s8863_s17 + $0x338] sm:$0xff] %v5361_v31  ;;  %6890 = vrcp.f32 %v2807_v18  ;;  %v2809_v37 = vadd.f32 1.0, %v10048_v55  ;;  %v1282_v52 = vsub.f32 0.0, %v770_v26  ;;  %v771_v4 = vand.u32 2147483647, %v10074_v63 }
 0x139   : > { %v6875_v43 = vpop.eup %6874  ;;  %v4850_v1 = vmul.f32 %v6873_v17, %v9980_v22  ;;  %6892 = vrcp.f32 %v2808_v57  ;;  %v1912_v58 = vmul.f32 1.442695, %v1281_v39  ;;  %vm4343_vm13 = vcmp.ge.f32.partialorder %v9931_v11, 0.0 }
 0x13a   : > { %v6877_v49 = vpop.eup %6876  ;;  %v4851_v30 = vmul.f32 %v6875_v43, %v9985_v45  ;;  %6894 = vrcp.f32 %v2809_v37  ;;  %v1914_v46 = vmul.f32 1.442695, %v1282_v52  ;;  %v772_v5 = vand.u32 2147483647, %v10083_v20  ;;  %v10149_v52 = vld [vmem:[%s8712_s30 + $0x3f8] sm:$0xff] }
 0x13b   : > { %v10064_v29 = vpop.eup %6878  ;;  %v5362_v38 = vsel %vm4338_vm8, %v6873_v17, %v4850_v1  ;;  %v4852_v22 = vmul.f32 %v6877_v49, %v9995_v13  ;;  %6896 = vpow2.f32 %v1906_v59  ;;  %v1283_v34 = vsub.f32 0.0, %v771_v4  ;;  %v10126_v1 = vld [vmem:[%s8712_s30 + $0x3f0] sm:$0xff] }
 0x13c   : > { %v6881_v42 = vpop.eup %6880  ;;  %5874 = vst [vmem:[%s8863_s17 + $0x340] sm:$0xff] %v5362_v38  ;;  %v5363_v45 = vsel %vm4339_vm9, %v6875_v43, %v4851_v30  ;;  %v2810_v15 = vadd.f32 1.0, %v10064_v29  ;;  %6898 = vpow2.f32 %v1908_v23  ;;  %vm4344_vm14 = vcmp.ge.f32.partialorder %v9937_v25, 0.0  ;;  %v10117_v23 = vld [vmem:[%s8712_s30 + $0x3e8] sm:$0xff] }
 0x13d   : > { %v10076_v2 = vpop.eup %6882  ;;  %5875 = vst [vmem:[%s8863_s17 + $0x348] sm:$0xff] %v5363_v45  ;;  %v5364_v3 = vsel %vm4340_vm10, %v6877_v49, %v4852_v22  ;;  %v4853_v13 = vmul.f32 %v6881_v42, %v10007_v54  ;;  %6900 = vpow2.f32 %v1910_v10  ;;  %v1284_v12 = vsub.f32 0.0, %v772_v5 }
 0x13e   : > { %v6885_v28 = vpop.eup %6884  ;;  %5876 = vst [vmem:[%s8863_s17 + $0x350] sm:$0xff] %v5364_v3  ;;  %6902 = vrcp.f32 %v2810_v15  ;;  %v2811_v40 = vadd.f32 1.0, %v10076_v2  ;;  %v773_v18 = vand.u32 2147483647, %v10095_v14  ;;  %vm4345_vm15 = vcmp.ge.f32.partialorder %v9946_v9, 0.0 }
 0x13f   : > { %v10088_v8 = vpop.eup %6886  ;;  %v5365_v19 = vsel %vm4341_vm11, %v6881_v42, %v4853_v13  ;;  %v4854_v54 = vmul.f32 %v6885_v28, %v10017_v6  ;;  %6904 = vpow2.f32 %v1912_v58  ;;  %v1916_v24 = vmul.f32 1.442695, %v1283_v34 }
 0x140   : > { %v10097_v48 = vpop.eup %6888  ;;  %5877 = vst [vmem:[%s8863_s17 + $0x358] sm:$0xff] %v5365_v19  ;;  %6906 = vrcp.f32 %v2811_v40  ;;  %v2812_v7 = vadd.f32 1.0, %v10088_v8  ;;  %v1918_v59 = vmul.f32 1.442695, %v1284_v12  ;;  %v1285_v17 = vsub.f32 0.0, %v773_v18  ;;  %v10159_v19 = vld [vmem:[%s8712_s30 + $0x400] sm:$0xff] }
 0x141   : > { %v5366_v27 = vsel %vm4342_vm12, %v6885_v28, %v4854_v54  ;;  %v2813_v6 = vadd.f32 1.0, %v10097_v48  ;;  %6908 = vpow2.f32 %v1914_v46  ;;  %v774_v37 = vand.u32 2147483647, %v10107_v36 }
 0x142   : > { %v6891_v0 = vpop.eup %6890  ;;  %5878 = vst [vmem:[%s8863_s17 + $0x360] sm:$0xff] %v5366_v27  ;;  %6910 = vrcp.f32 %v2812_v7  ;;  %vm4346_vm0 = vcmp.ge.f32.partialorder %v9960_v53, 0.0  ;;  %v1920_v30 = vmul.f32 1.442695, %v1285_v17  ;;  %v775_v38 = vand.u32 2147483647, %v10117_v23 }
 0x143   : > { %v6893_v44 = vpop.eup %6892  ;;  %v4855_v61 = vmul.f32 %v6891_v0, %v10037_v33  ;;  %6912 = vrcp.f32 %v2813_v6  ;;  %v1286_v26 = vsub.f32 0.0, %v774_v37  ;;  %vm4347_vm1 = vcmp.ge.f32.partialorder %v9975_v41, 0.0  ;;  %v10165_v27 = vld [vmem:[%s8712_s30 + $0x408] sm:$0xff] }
 0x144   : > { %v6895_v31 = vpop.eup %6894  ;;  %v4856_v57 = vmul.f32 %v6893_v44, %v10041_v56  ;;  %6914 = vpow2.f32 %v1916_v24  ;;  %v776_v39 = vand.u32 2147483647, %v10126_v1  ;;  %v1287_v15 = vsub.f32 0.0, %v775_v38 }
 0x145   : > { %v10119_v50 = vpop.eup %6896  ;;  %v5367_v33 = vsel %vm4343_vm13, %v6891_v0, %v4855_v61  ;;  %v4857_v43 = vmul.f32 %v6895_v31, %v10048_v55  ;;  %6916 = vpow2.f32 %v1918_v59  ;;  %v1922_v45 = vmul.f32 1.442695, %v1286_v26  ;;  %v10184_v61 = vld [vmem:[%s8712_s30 + $0x418] sm:$0xff] }
 0x146   : > { %v10128_v56 = vpop.eup %6898  ;;  %5879 = vst [vmem:[%s8863_s17 + $0x368] sm:$0xff] %v5367_v33  ;;  %v5368_v21 = vsel %vm4344_vm14, %v6893_v44, %v4856_v57  ;;  %v2814_v49 = vadd.f32 1.0, %v10119_v50  ;;  %vm4348_vm2 = vcmp.ge.f32.partialorder %v9993_v60, 0.0  ;;  %v1288_v58 = vsub.f32 0.0, %v776_v39  ;;  %v10181_v44 = vld [vmem:[%s8712_s30 + $0x410] sm:$0xff] }
 0x147   : > { %v10134_v11 = vpop.eup %6900  ;;  %5880 = vst [vmem:[%s8863_s17 + $0x370] sm:$0xff] %v5368_v21  ;;  %v5369_v55 = vsel %vm4345_vm15, %v6895_v31, %v4857_v43  ;;  %v2815_v10 = vadd.f32 1.0, %v10128_v56  ;;  %v1924_v46 = vmul.f32 1.442695, %v1287_v15  ;;  %v777_v5 = vand.u32 2147483647, %v10149_v52 }
 0x148   : > { %v6903_v22 = vpop.eup %6902  ;;  %5881 = vst [vmem:[%s8863_s17 + $0x378] sm:$0xff] %v5369_v55  ;;  %6918 = vrcp.f32 %v2814_v49  ;;  %v2816_v25 = vadd.f32 1.0, %v10134_v11  ;;  %v1926_v7 = vmul.f32 1.442695, %v1288_v58  ;;  %vm4349_vm3 = vcmp.ge.f32.partialorder %v10002_v51, 0.0 }
 0x149   : > { %v10145_v42 = vpop.eup %6904  ;;  %v4858_v9 = vmul.f32 %v6903_v22, %v10064_v29  ;;  %6920 = vrcp.f32 %v2815_v10  ;;  %v1289_v0 = vsub.f32 0.0, %v777_v5  ;;  %v778_v12 = vand.u32 2147483647, %v10159_v19 }
 0x14a   : > { %v6907_v3 = vpop.eup %6906  ;;  %6922 = vrcp.f32 %v2816_v25  ;;  %v2817_v13 = vadd.f32 1.0, %v10145_v42  ;;  %vm4350_vm4 = vcmp.ge.f32.partialorder %v10015_v35, 0.0  ;;  %vm4351_vm5 = vcmp.ge.f32.partialorder %v10023_v62, 0.0 }
 0x14b   : > { %v10153_v28 = vpop.eup %6908  ;;  %v5370_v40 = vsel %vm4346_vm0, %v6903_v22, %v4858_v9  ;;  %v4859_v29 = vmul.f32 %v6907_v3, %v10076_v2  ;;  %6924 = vpow2.f32 %v1920_v30  ;;  %v1928_v60 = vmul.f32 1.442695, %v1289_v0  ;;  %v10201_v22 = vld [vmem:[%s8712_s30 + $0x420] sm:$0xff]  ;;  %v10210_v9 = vld [vmem:[%s8712_s30 + $0x428] sm:$0xff] }
 0x14c   : > { %v6911_v54 = vpop.eup %6910  ;;  %5882 = vst [vmem:[%s8863_s17 + $0x380] sm:$0xff] %v5370_v40  ;;  %6926 = vrcp.f32 %v2817_v13  ;;  %v2818_v4 = vadd.f32 1.0, %v10153_v28  ;;  %v1290_v59 = vsub.f32 0.0, %v778_v12  ;;  %vm4352_vm6 = vcmp.ge.f32.partialorder %v10032_v16, 0.0  ;;  %v10247_v0 = vld [vmem:[%s8712_s30 + $0x440] sm:$0xff] }
 0x14d   : > { %v6913_v53 = vpop.eup %6912  ;;  %v5371_v2 = vsel %vm4347_vm1, %v6907_v3, %v4859_v29  ;;  %v4860_v6 = vmul.f32 %v6911_v54, %v10088_v8  ;;  %6928 = vpow2.f32 %v1922_v45  ;;  %v779_v8 = vand.u32 2147483647, %v10165_v27 }
 0x14e   : > { %5883 = vst [vmem:[%s8863_s17 + $0x388] sm:$0xff] %v5371_v2  ;;  %v4861_v34 = vmul.f32 %v6913_v53, %v10097_v48  ;;  %6930 = vrcp.f32 %v2818_v4  ;;  %v10174_v18 = vpop.eup %6914  ;;  %v780_v33 = vand.u32 2147483647, %v10181_v44  ;;  %v781_v51 = vand.u32 2147483647, %v10184_v61 }
 0x14f   : > { %v5372_v41 = vsel %vm4348_vm2, %v6911_v54, %v4860_v6  ;;  %6932 = vpow2.f32 %v1924_v46  ;;  %v10186_v48 = vpop.eup %6916  ;;  %v2819_v31 = vadd.f32 1.0, %v10174_v18  ;;  %v1291_v17 = vsub.f32 0.0, %v779_v8  ;;  %v10241_v6 = vld [vmem:[%s8712_s30 + $0x438] sm:$0xff] }
 0x150   : > { %5884 = vst [vmem:[%s8863_s17 + $0x390] sm:$0xff] %v5372_v41  ;;  %v5373_v24 = vsel %vm4349_vm3, %v6913_v53, %v4861_v34  ;;  %6934 = vpow2.f32 %v1926_v7  ;;  %v2820_v57 = vadd.f32 1.0, %v10186_v48  ;;  %v1930_v49 = vmul.f32 1.442695, %v1290_v59  ;;  %v10233_v7 = vld [vmem:[%s8712_s30 + $0x430] sm:$0xff] }
 0x151   : > { %5885 = vst [vmem:[%s8863_s17 + $0x398] sm:$0xff] %v5373_v24  ;;  %6936 = vrcp.f32 %v2819_v31  ;;  %v1932_v30 = vmul.f32 1.442695, %v1291_v17  ;;  %v1292_v26 = vsub.f32 0.0, %v780_v33  ;;  %v1293_v38 = vsub.f32 0.0, %v781_v51 }
 0x152   : > { %v6919_v37 = vpop.eup %6918  ;;  %6938 = vrcp.f32 %v2820_v57  ;;  %vm4353_vm7 = vcmp.ge.f32.partialorder %v10046_v32, 0.0  ;;  %v782_v40 = vand.u32 2147483647, %v10201_v22  ;;  %vm4354_vm8 = vcmp.ge.f32.partialorder %v10055_v47, 0.0 }
 0x153   : > { %v6921_v43 = vpop.eup %6920  ;;  %v4862_v21 = vmul.f32 %v6919_v37, %v10119_v50  ;;  %6940 = vpow2.f32 %v1928_v60  ;;  %v1934_v3 = vmul.f32 1.442695, %v1292_v26  ;;  %v1936_v58 = vmul.f32 1.442695, %v1293_v38  ;;  %v10280_v38 = vld [vmem:[%s8712_s30 + $0x458] sm:$0xff] }
 0x154   : > { %v6923_v55 = vpop.eup %6922  ;;  %v4863_v10 = vmul.f32 %v6921_v43, %v10128_v56  ;;  %6942 = vpow2.f32 %v1930_v49  ;;  %v783_v46 = vand.u32 2147483647, %v10210_v9  ;;  %v1294_v4 = vsub.f32 0.0, %v782_v40 }
 0x155   : > { %v10203_v25 = vpop.eup %6924  ;;  %v5374_v39 = vsel %vm4350_vm4, %v6919_v37, %v4862_v21  ;;  %v4864_v50 = vmul.f32 %v6923_v55, %v10134_v11  ;;  %6944 = vpow2.f32 %v1932_v30  ;;  %vm4355_vm9 = vcmp.ge.f32.partialorder %v10074_v63, 0.0 }
 0x156   : > { %v6927_v56 = vpop.eup %6926  ;;  %5886 = vst [vmem:[%s8863_s17 + $0x3a0] sm:$0xff] %v5374_v39  ;;  %v5375_v45 = vsel %vm4351_vm5, %v6921_v43, %v4863_v10  ;;  %v2821_v15 = vadd.f32 1.0, %v10203_v25  ;;  %v1295_v2 = vsub.f32 0.0, %v783_v46  ;;  %v1938_v34 = vmul.f32 1.442695, %v1294_v4  ;;  %v10265_v43 = vld [vmem:[%s8712_s30 + $0x448] sm:$0xff] }
 0x157   : > { %v10216_v13 = vpop.eup %6928  ;;  %5887 = vst [vmem:[%s8863_s17 + $0x3a8] sm:$0xff] %v5375_v45  ;;  %v5376_v35 = vsel %vm4352_vm6, %v6923_v55, %v4864_v50  ;;  %v4865_v11 = vmul.f32 %v6927_v56, %v10145_v42  ;;  %vm4356_vm10 = vcmp.ge.f32.partialorder %v10083_v20, 0.0  ;;  %v784_v8 = vand.u32 2147483647, %v10233_v7  ;;  %v10274_v10 = vld [vmem:[%s8712_s30 + $0x450] sm:$0xff] }
 0x158   : > { %v6931_v29 = vpop.eup %6930  ;;  %5888 = vst [vmem:[%s8863_s17 + $0x3b0] sm:$0xff] %v5376_v35  ;;  %6946 = vrcp.f32 %v2821_v15  ;;  %v2822_v62 = vadd.f32 1.0, %v10216_v13  ;;  %v1940_v41 = vmul.f32 1.442695, %v1295_v2  ;;  %vm4357_vm11 = vcmp.ge.f32.partialorder %v10095_v14, 0.0 }
 0x159   : > { %v10227_v54 = vpop.eup %6932  ;;  %v5377_v16 = vsel %vm4353_vm7, %v6927_v56, %v4865_v11  ;;  %v4866_v42 = vmul.f32 %v6931_v29, %v10153_v28  ;;  %6948 = vpow2.f32 %v1934_v3  ;;  %v785_v47 = vand.u32 2147483647, %v10241_v6 }
 0x15a   : > { %v10235_v5 = vpop.eup %6934  ;;  %5889 = vst [vmem:[%s8863_s17 + $0x3b8] sm:$0xff] %v5377_v16  ;;  %6950 = vrcp.f32 %v2822_v62  ;;  %v2823_v53 = vadd.f32 1.0, %v10227_v54  ;;  %v1296_v59 = vsub.f32 0.0, %v784_v8  ;;  %v786_v17 = vand.u32 2147483647, %v10247_v0 }
 0x15b   : > { %v5378_v32 = vsel %vm4354_vm8, %v6931_v29, %v4866_v42  ;;  %v2824_v28 = vadd.f32 1.0, %v10235_v5  ;;  %6952 = vpow2.f32 %v1936_v58  ;;  %v6937_v12 = vpop.eup %6936  ;;  %v1297_v51 = vsub.f32 0.0, %v785_v47 }
 0x15c   : > { %5890 = vst [vmem:[%s8863_s17 + $0x3c0] sm:$0xff] %v5378_v32  ;;  %6954 = vrcp.f32 %v2823_v53  ;;  %v6939_v24 = vpop.eup %6938  ;;  %v4867_v31 = vmul.f32 %v6937_v12, %v10174_v18  ;;  %v1942_v30 = vmul.f32 1.442695, %v1296_v59  ;;  %v1298_v55 = vsub.f32 0.0, %v786_v17  ;;  %v10299_v53 = vld [vmem:[%s8712_s30 + $0x460] sm:$0xff]  ;;  %v10330_v17 = vld [vmem:[%s8712_s30 + $0x478] sm:$0xff] }
 0x15d   : > { %6956 = vrcp.f32 %v2824_v28  ;;  %v10255_v60 = vpop.eup %6940  ;;  %v4868_v57 = vmul.f32 %v6939_v24, %v10186_v48  ;;  %vm4358_vm12 = vcmp.ge.f32.partialorder %v10107_v36, 0.0  ;;  %v1944_v26 = vmul.f32 1.442695, %v1297_v51 }
 0x15e   : > { %6958 = vpow2.f32 %v1938_v34  ;;  %v10259_v37 = vpop.eup %6942  ;;  %v5379_v18 = vsel %vm4355_vm9, %v6937_v12, %v4867_v31  ;;  %v2825_v33 = vadd.f32 1.0, %v10255_v60  ;;  %vm4359_vm13 = vcmp.ge.f32.partialorder %v10117_v23, 0.0  ;;  %v10319_v31 = vld [vmem:[%s8712_s30 + $0x470] sm:$0xff] }
 0x15f   : > { %6960 = vpow2.f32 %v1940_v41  ;;  %v10267_v21 = vpop.eup %6944  ;;  %5891 = vst [vmem:[%s8863_s17 + $0x3c8] sm:$0xff] %v5379_v18  ;;  %v5380_v48 = vsel %vm4356_vm10, %v6939_v24, %v4868_v57  ;;  %v2826_v49 = vadd.f32 1.0, %v10259_v37  ;;  %vm4360_vm14 = vcmp.ge.f32.partialorder %v10126_v1, 0.0  ;;  %v10310_v41 = vld [vmem:[%s8712_s30 + $0x468] sm:$0xff] }
 0x160   : > { %5892 = vst [vmem:[%s8863_s17 + $0x3d0] sm:$0xff] %v5380_v48  ;;  %6962 = vrcp.f32 %v2825_v33  ;;  %v2827_v63 = vadd.f32 1.0, %v10267_v21  ;;  %v787_v20 = vand.u32 2147483647, %v10265_v43  ;;  %v1946_v45 = vmul.f32 1.442695, %v1298_v55 }
 0x161   : > { %6964 = vrcp.f32 %v2826_v49  ;;  %v788_v15 = vand.u32 2147483647, %v10274_v10  ;;  %v789_v58 = vand.u32 2147483647, %v10280_v38  ;;  %vm4361_vm15 = vcmp.ge.f32.partialorder %v10149_v52, 0.0 }
 0x162   : > { %v6947_v39 = vpop.eup %6946  ;;  %6966 = vrcp.f32 %v2827_v63  ;;  %v1299_v11 = vsub.f32 0.0, %v787_v20  ;;  %v790_v24 = vand.u32 2147483647, %v10299_v53  ;;  %vm4362_vm0 = vcmp.ge.f32.partialorder %v10159_v19, 0.0  ;;  %v10343_v20 = vld [vmem:[%s8712_s30 + $0x480] sm:$0xff] }
 0x163   : > { %v10285_v50 = vpop.eup %6948  ;;  %v4869_v56 = vmul.f32 %v6947_v39, %v10203_v25  ;;  %6968 = vpow2.f32 %v1942_v30  ;;  %v1300_v25 = vsub.f32 0.0, %v788_v15  ;;  %v1301_v4 = vsub.f32 0.0, %v789_v58 }
 0x164   : > { %v6951_v3 = vpop.eup %6950  ;;  %v2828_v35 = vadd.f32 1.0, %v10285_v50  ;;  %6970 = vpow2.f32 %v1944_v26  ;;  %v1948_v42 = vmul.f32 1.442695, %v1299_v11  ;;  %vm4363_vm1 = vcmp.ge.f32.partialorder %v10165_v27, 0.0 }
 0x165   : > { %v10291_v40 = vpop.eup %6952  ;;  %v5381_v29 = vsel %vm4357_vm11, %v6947_v39, %v4869_v56  ;;  %v4870_v62 = vmul.f32 %v6951_v3, %v10216_v13  ;;  %v1950_v32 = vmul.f32 1.442695, %v1300_v25  ;;  %v1952_v12 = vmul.f32 1.442695, %v1301_v4  ;;  %v10374_v4 = vld [vmem:[%s8712_s30 + $0x490] sm:$0xff] }
 0x166   : > { %v6955_v46 = vpop.eup %6954  ;;  %5893 = vst [vmem:[%s8863_s17 + $0x3d8] sm:$0xff] %v5381_v29  ;;  %6972 = vrcp.f32 %v2828_v35  ;;  %v2829_v16 = vadd.f32 1.0, %v10291_v40  ;;  %v1302_v23 = vsub.f32 0.0, %v790_v24  ;;  %v791_v59 = vand.u32 2147483647, %v10310_v41 }
 0x167   : > { %v6957_v2 = vpop.eup %6956  ;;  %v5382_v14 = vsel %vm4358_vm12, %v6951_v3, %v4870_v62  ;;  %v4871_v13 = vmul.f32 %v6955_v46, %v10227_v54  ;;  %6974 = vpow2.f32 %v1946_v45  ;;  %vm4364_vm2 = vcmp.ge.f32.partialorder %v10181_v44, 0.0  ;;  %v10362_v62 = vld [vmem:[%s8712_s30 + $0x488] sm:$0xff]  ;;  %v10382_v44 = vld [vmem:[%s8712_s30 + $0x498] sm:$0xff] }
 0x168   : > { %v10304_v28 = vpop.eup %6958  ;;  %5894 = vst [vmem:[%s8863_s17 + $0x3e0] sm:$0xff] %v5382_v14  ;;  %v4872_v34 = vmul.f32 %v6957_v2, %v10235_v5  ;;  %6976 = vrcp.f32 %v2829_v16  ;;  %v792_v33 = vand.u32 2147483647, %v10319_v31  ;;  %v1954_v49 = vmul.f32 1.442695, %v1302_v23 }
 0x169   : > { %v10312_v36 = vpop.eup %6960  ;;  %v5383_v54 = vsel %vm4359_vm13, %v6955_v46, %v4871_v13  ;;  %v2830_v8 = vadd.f32 1.0, %v10304_v28  ;;  %6978 = vpow2.f32 %v1948_v42  ;;  %v1303_v30 = vsub.f32 0.0, %v791_v59  ;;  %v10396_v59 = vld [vmem:[%s8712_s30 + $0x4a0] sm:$0xff] }
 0x16a   : > { %5895 = vst [vmem:[%s8863_s17 + $0x3e8] sm:$0xff] %v5383_v54  ;;  %v5384_v5 = vsel %vm4360_vm14, %v6957_v2, %v4872_v34  ;;  %v2831_v47 = vadd.f32 1.0, %v10312_v36  ;;  %6980 = vpow2.f32 %v1950_v32  ;;  %v6963_v57 = vpop.eup %6962  ;;  %v1304_v26 = vsub.f32 0.0, %v792_v33 }
 0x16b   : > { %5896 = vst [vmem:[%s8863_s17 + $0x3f0] sm:$0xff] %v5384_v5  ;;  %6982 = vrcp.f32 %v2830_v8  ;;  %v6965_v18 = vpop.eup %6964  ;;  %v4873_v1 = vmul.f32 %v6963_v57, %v10255_v60  ;;  %v793_v39 = vand.u32 2147483647, %v10330_v17  ;;  %v1956_v52 = vmul.f32 1.442695, %v1303_v30 }
 0x16c   : > { %6984 = vrcp.f32 %v2831_v47  ;;  %v6967_v51 = vpop.eup %6966  ;;  %v4874_v48 = vmul.f32 %v6965_v18, %v10259_v37  ;;  %vm4365_vm3 = vcmp.ge.f32.partialorder %v10184_v61, 0.0  ;;  %v1958_v58 = vmul.f32 1.442695, %v1304_v26 }
 0x16d   : > { %6986 = vpow2.f32 %v1952_v12  ;;  %v10336_v55 = vpop.eup %6968  ;;  %v5385_v63 = vsel %vm4361_vm15, %v6963_v57, %v4873_v1  ;;  %v4875_v60 = vmul.f32 %v6967_v51, %v10267_v21  ;;  %v1305_v35 = vsub.f32 0.0, %v793_v39 }
 0x16e   : > { %v10345_v56 = vpop.eup %6970  ;;  %5897 = vst [vmem:[%s8863_s17 + $0x3f8] sm:$0xff] %v5385_v63  ;;  %v5386_v37 = vsel %vm4362_vm0, %v6965_v18, %v4874_v48  ;;  %v2832_v45 = vadd.f32 1.0, %v10336_v55  ;;  %6988 = vpow2.f32 %v1954_v49  ;;  %v794_v29 = vand.u32 2147483647, %v10343_v20  ;;  %v10407_v49 = vld [vmem:[%s8712_s30 + $0x4a8] sm:$0xff]  ;;  %v10414_v63 = vld [vmem:[%s8712_s30 + $0x4b0] sm:$0xff] }
 0x16f   : > { %5898 = vst [vmem:[%s8863_s17 + $0x400] sm:$0xff] %v5386_v37  ;;  %v5387_v21 = vsel %vm4363_vm1, %v6967_v51, %v4875_v60  ;;  %v2833_v3 = vadd.f32 1.0, %v10345_v56  ;;  %vm4366_vm4 = vcmp.ge.f32.partialorder %v10201_v22, 0.0  ;;  %vm4367_vm5 = vcmp.ge.f32.partialorder %v10210_v9, 0.0 }
 0x170   : > { %v6973_v15 = vpop.eup %6972  ;;  %5899 = vst [vmem:[%s8863_s17 + $0x408] sm:$0xff] %v5387_v21  ;;  %6990 = vrcp.f32 %v2832_v45  ;;  %vm4368_vm6 = vcmp.ge.f32.partialorder %v10233_v7, 0.0  ;;  %v1306_v42 = vsub.f32 0.0, %v794_v29  ;;  %v1960_v13 = vmul.f32 1.442695, %v1305_v35  ;;  %v10425_v35 = vld [vmem:[%s8712_s30 + $0x4b8] sm:$0xff] }
 0x171   : > { %v10356_v11 = vpop.eup %6974  ;;  %v4876_v19 = vmul.f32 %v6973_v15, %v10285_v50  ;;  %6992 = vrcp.f32 %v2833_v3  ;;  %v795_v32 = vand.u32 2147483647, %v10362_v62  ;;  %v796_v47 = vand.u32 2147483647, %v10374_v4 }
 0x172   : > { %v6977_v27 = vpop.eup %6976  ;;  %v2834_v25 = vadd.f32 1.0, %v10356_v11  ;;  %6994 = vpow2.f32 %v1956_v52  ;;  %v1962_v54 = vmul.f32 1.442695, %v1306_v42  ;;  %vm4369_vm7 = vcmp.ge.f32.partialorder %v10241_v6, 0.0 }
 0x173   : > { %v10367_v46 = vpop.eup %6978  ;;  %v5388_v50 = vsel %vm4364_vm2, %v6973_v15, %v4876_v19  ;;  %v4877_v16 = vmul.f32 %v6977_v27, %v10291_v40  ;;  %v1307_v5 = vsub.f32 0.0, %v795_v32  ;;  %v797_v23 = vand.u32 2147483647, %v10382_v44 }
 0x174   : > { %v10376_v2 = vpop.eup %6980  ;;  %5900 = vst [vmem:[%s8863_s17 + $0x410] sm:$0xff] %v5388_v50  ;;  %6996 = vrcp.f32 %v2834_v25  ;;  %v2835_v14 = vadd.f32 1.0, %v10367_v46  ;;  %v1308_v51 = vsub.f32 0.0, %v796_v47  ;;  %vm4370_vm8 = vcmp.ge.f32.partialorder %v10247_v0, 0.0 }
 0x175   : > { %v6983_v34 = vpop.eup %6982  ;;  %v5389_v40 = vsel %vm4365_vm3, %v6977_v27, %v4877_v16  ;;  %v2836_v12 = vadd.f32 1.0, %v10376_v2  ;;  %6998 = vpow2.f32 %v1958_v58  ;;  %v1964_v1 = vmul.f32 1.442695, %v1307_v5  ;;  %v10457_v5 = vld [vmem:[%s8712_s30 + $0x4c8] sm:$0xff] }
 0x176   : > { %v6985_v8 = vpop.eup %6984  ;;  %5901 = vst [vmem:[%s8863_s17 + $0x418] sm:$0xff] %v5389_v40  ;;  %v4878_v24 = vmul.f32 %v6983_v34, %v10304_v28  ;;  %7000 = vrcp.f32 %v2835_v14  ;;  %v1309_v48 = vsub.f32 0.0, %v797_v23  ;;  %v798_v30 = vand.u32 2147483647, %v10396_v59 }
 0x177   : > { %v10390_v57 = vpop.eup %6986  ;;  %v4879_v61 = vmul.f32 %v6985_v8, %v10312_v36  ;;  %7002 = vrcp.f32 %v2836_v12  ;;  %vm4371_vm9 = vcmp.ge.f32.partialorder %v10265_v43, 0.0  ;;  %v1966_v9 = vmul.f32 1.442695, %v1308_v51 }
 0x178   : > { %v5390_v28 = vsel %vm4366_vm4, %v6983_v34, %v4878_v24  ;;  %v2837_v18 = vadd.f32 1.0, %v10390_v57  ;;  %7004 = vpow2.f32 %v1960_v13  ;;  %v10401_v33 = vpop.eup %6988  ;;  %v1968_v26 = vmul.f32 1.442695, %v1309_v48 }
 0x179   : > { %5902 = vst [vmem:[%s8863_s17 + $0x420] sm:$0xff] %v5390_v28  ;;  %v5391_v36 = vsel %vm4367_vm5, %v6985_v8, %v4879_v61  ;;  %7006 = vpow2.f32 %v1962_v54  ;;  %v2838_v22 = vadd.f32 1.0, %v10401_v33  ;;  %v1310_v45 = vsub.f32 0.0, %v798_v30  ;;  %v10448_v8 = vld [vmem:[%s8712_s30 + $0x4c0] sm:$0xff] }
 0x17a   : > { %5903 = vst [vmem:[%s8863_s17 + $0x428] sm:$0xff] %v5391_v36  ;;  %7008 = vrcp.f32 %v2837_v18  ;;  %v6991_v60 = vpop.eup %6990  ;;  %v799_v52 = vand.u32 2147483647, %v10407_v49  ;;  %vm4372_vm10 = vcmp.ge.f32.partialorder %v10274_v10, 0.0  ;;  %v800_v3 = vand.u32 2147483647, %v10414_v63 }
 0x17b   : > { %7010 = vpow2.f32 %v1964_v1  ;;  %v6993_v39 = vpop.eup %6992  ;;  %v4880_v37 = vmul.f32 %v6991_v60, %v10336_v55  ;;  %v1970_v29 = vmul.f32 1.442695, %v1310_v45  ;;  %vm4373_vm11 = vcmp.ge.f32.partialorder %v10280_v38, 0.0  ;;  %v10470_v1 = vld [vmem:[%s8712_s30 + $0x4d0] sm:$0xff]  ;;  %v10489_v45 = vld [vmem:[%s8712_s30 + $0x4e0] sm:$0xff] }
 0x17c   : > { %7012 = vrcp.f32 %v2838_v22  ;;  %v10419_v15 = vpop.eup %6994  ;;  %v4881_v21 = vmul.f32 %v6993_v39, %v10345_v56  ;;  %v1311_v50 = vsub.f32 0.0, %v799_v52  ;;  %v1312_v16 = vsub.f32 0.0, %v800_v3 }
 0x17d   : > { %7014 = vpow2.f32 %v1966_v9  ;;  %v5392_v55 = vsel %vm4368_vm6, %v6991_v60, %v4880_v37  ;;  %v2839_v58 = vadd.f32 1.0, %v10419_v15  ;;  %v801_v14 = vand.u32 2147483647, %v10425_v35  ;;  %v10481_v60 = vld [vmem:[%s8712_s30 + $0x4d8] sm:$0xff] }
 0x17e   : > { %v6997_v19 = vpop.eup %6996  ;;  %7016 = vpow2.f32 %v1968_v26  ;;  %5904 = vst [vmem:[%s8863_s17 + $0x430] sm:$0xff] %v5392_v55  ;;  %v5393_v56 = vsel %vm4369_vm7, %v6993_v39, %v4881_v21  ;;  %v1974_v12 = vmul.f32 1.442695, %v1312_v16  ;;  %vm4374_vm12 = vcmp.ge.f32.partialorder %v10299_v53, 0.0 }
 0x17f   : > { %v10430_v27 = vpop.eup %6998  ;;  %v4882_v25 = vmul.f32 %v6997_v19, %v10356_v11  ;;  %5905 = vst [vmem:[%s8863_s17 + $0x438] sm:$0xff] %v5393_v56  ;;  %7018 = vrcp.f32 %v2839_v58  ;;  %v1972_v11 = vmul.f32 1.442695, %v1311_v50  ;;  %v1313_v54 = vsub.f32 0.0, %v801_v14 }
 0x180   : > { %v7001_v42 = vpop.eup %7000  ;;  %v2840_v7 = vadd.f32 1.0, %v10430_v27  ;;  %7020 = vpow2.f32 %v1970_v29  ;;  %vm4375_vm13 = vcmp.ge.f32.partialorder %v10310_v41, 0.0  ;;  %v802_v18 = vand.u32 2147483647, %v10448_v8 }
 0x181   : > { %v7003_v13 = vpop.eup %7002  ;;  %v5394_v6 = vsel %vm4370_vm8, %v6997_v19, %v4882_v25  ;;  %v4883_v32 = vmul.f32 %v7001_v42, %v10367_v46  ;;  %v1976_v23 = vmul.f32 1.442695, %v1313_v54  ;;  %vm4376_vm14 = vcmp.ge.f32.partialorder %v10319_v31, 0.0 }
 0x182   : > { %v10443_v34 = vpop.eup %7004  ;;  %5906 = vst [vmem:[%s8863_s17 + $0x440] sm:$0xff] %v5394_v6  ;;  %v4884_v40 = vmul.f32 %v7003_v13, %v10376_v2  ;;  %7022 = vrcp.f32 %v2840_v7  ;;  %v803_v51 = vand.u32 2147483647, %v10457_v5  ;;  %v1314_v30 = vsub.f32 0.0, %v802_v18 }
 0x183   : > { %v10450_v24 = vpop.eup %7006  ;;  %v5395_v0 = vsel %vm4371_vm9, %v7001_v42, %v4883_v32  ;;  %v2841_v46 = vadd.f32 1.0, %v10443_v34  ;;  %7024 = vpow2.f32 %v1972_v11  ;;  %v804_v37 = vand.u32 2147483647, %v10470_v1 }
 0x184   : > { %v7009_v2 = vpop.eup %7008  ;;  %5907 = vst [vmem:[%s8863_s17 + $0x448] sm:$0xff] %v5395_v0  ;;  %v5396_v47 = vsel %vm4372_vm10, %v7003_v13, %v4884_v40  ;;  %v2842_v61 = vadd.f32 1.0, %v10450_v24  ;;  %7026 = vpow2.f32 %v1974_v12  ;;  %v1315_v39 = vsub.f32 0.0, %v803_v51  ;;  %v10509_v13 = vld [vmem:[%s8712_s30 + $0x4e8] sm:$0xff]  ;;  %v10517_v40 = vld [vmem:[%s8712_s30 + $0x4f0] sm:$0xff] }
 0x185   : > { %v10463_v28 = vpop.eup %7010  ;;  %5908 = vst [vmem:[%s8863_s17 + $0x450] sm:$0xff] %v5396_v47  ;;  %v4885_v43 = vmul.f32 %v7009_v2, %v10390_v57  ;;  %7028 = vrcp.f32 %v2841_v46  ;;  %vm4377_vm15 = vcmp.ge.f32.partialorder %v10330_v17, 0.0  ;;  %v1978_v52 = vmul.f32 1.442695, %v1314_v30 }
 0x186   : > { %v7013_v10 = vpop.eup %7012  ;;  %7030 = vrcp.f32 %v2842_v61  ;;  %v2843_v36 = vadd.f32 1.0, %v10463_v28  ;;  %v1980_v3 = vmul.f32 1.442695, %v1315_v39  ;;  %v1316_v19 = vsub.f32 0.0, %v804_v37 }
 0x187   : > { %v10475_v48 = vpop.eup %7014  ;;  %v5397_v57 = vsel %vm4373_vm11, %v7009_v2, %v4885_v43  ;;  %v4886_v22 = vmul.f32 %v7013_v10, %v10401_v33  ;;  %7032 = vpow2.f32 %v1976_v23  ;;  %v805_v55 = vand.u32 2147483647, %v10481_v60  ;;  %v10532_v23 = vld [vmem:[%s8712_s30 + $0x4f8] sm:$0xff] }
 0x188   : > { %v10483_v9 = vpop.eup %7016  ;;  %5909 = vst [vmem:[%s8863_s17 + $0x458] sm:$0xff] %v5397_v57  ;;  %7034 = vrcp.f32 %v2843_v36  ;;  %v2844_v26 = vadd.f32 1.0, %v10475_v48  ;;  %vm4378_vm0 = vcmp.ge.f32.partialorder %v10343_v20, 0.0  ;;  %v806_v53 = vand.u32 2147483647, %v10489_v45  ;;  %v10538_v36 = vld [vmem:[%s8712_s30 + $0x500] sm:$0xff] }
 0x189   : > { %v5398_v38 = vsel %vm4374_vm12, %v7013_v10, %v4886_v22  ;;  %v2845_v33 = vadd.f32 1.0, %v10483_v9  ;;  %v7019_v21 = vpop.eup %7018  ;;  %v1982_v50 = vmul.f32 1.442695, %v1316_v19  ;;  %v1317_v16 = vsub.f32 0.0, %v805_v55  ;;  %v10565_v55 = vld [vmem:[%s8712_s30 + $0x510] sm:$0xff] }
 0x18a   : > { %5910 = vst [vmem:[%s8863_s17 + $0x460] sm:$0xff] %v5398_v38  ;;  %7036 = vrcp.f32 %v2844_v26  ;;  %v10497_v58 = vpop.eup %7020  ;;  %v4887_v29 = vmul.f32 %v7019_v21, %v10419_v15  ;;  %v1318_v14 = vsub.f32 0.0, %v806_v53  ;;  %vm4379_vm1 = vcmp.ge.f32.partialorder %v10362_v62, 0.0  ;;  %v10552_v38 = vld [vmem:[%s8712_s30 + $0x508] sm:$0xff] }
 0x18b   : > { %7038 = vrcp.f32 %v2845_v33  ;;  %v2846_v25 = vadd.f32 1.0, %v10497_v58  ;;  %v1984_v11 = vmul.f32 1.442695, %v1317_v16  ;;  %vm4380_vm2 = vcmp.ge.f32.partialorder %v10374_v4, 0.0 }
 0x18c   : > { %v7023_v56 = vpop.eup %7022  ;;  %7040 = vpow2.f32 %v1978_v52  ;;  %v5399_v7 = vsel %vm4375_vm13, %v7019_v21, %v4887_v29  ;;  %v1986_v54 = vmul.f32 1.442695, %v1318_v14  ;;  %v807_v2 = vand.u32 2147483647, %v10509_v13 }
 0x18d   : > { %v10503_v42 = vpop.eup %7024  ;;  %v4888_v15 = vmul.f32 %v7023_v56, %v10430_v27  ;;  %7042 = vpow2.f32 %v1980_v3  ;;  %5911 = vst [vmem:[%s8863_s17 + $0x468] sm:$0xff] %v5399_v7  ;;  %vm4381_vm3 = vcmp.ge.f32.partialorder %v10382_v44, 0.0  ;;  %v808_v61 = vand.u32 2147483647, %v10517_v40 }
 0x18e   : > { %v10511_v6 = vpop.eup %7026  ;;  %7044 = vrcp.f32 %v2846_v25  ;;  %v2847_v32 = vadd.f32 1.0, %v10503_v42  ;;  %v1319_v10 = vsub.f32 0.0, %v807_v2  ;;  %vm4382_vm4 = vcmp.ge.f32.partialorder %v10396_v59, 0.0 }
 0x18f   : > { %v7029_v41 = vpop.eup %7028  ;;  %v5400_v27 = vsel %vm4376_vm14, %v7023_v56, %v4888_v15  ;;  %v2848_v12 = vadd.f32 1.0, %v10511_v6  ;;  %7046 = vpow2.f32 %v1982_v50  ;;  %v1320_v57 = vsub.f32 0.0, %v808_v61  ;;  %v10600_v61 = vld [vmem:[%s8712_s30 + $0x528] sm:$0xff] }
 0x190   : > { %v7031_v0 = vpop.eup %7030  ;;  %5912 = vst [vmem:[%s8863_s17 + $0x470] sm:$0xff] %v5400_v27  ;;  %v4889_v46 = vmul.f32 %v7029_v41, %v10443_v34  ;;  %7048 = vrcp.f32 %v2847_v32  ;;  %v1988_v17 = vmul.f32 1.442695, %v1319_v10  ;;  %v809_v30 = vand.u32 2147483647, %v10532_v23  ;;  %v10580_v32 = vld [vmem:[%s8712_s30 + $0x518] sm:$0xff] }
 0x191   : > { %v10526_v47 = vpop.eup %7032  ;;  %v4890_v31 = vmul.f32 %v7031_v0, %v10450_v24  ;;  %7050 = vrcp.f32 %v2848_v12  ;;  %v1990_v37 = vmul.f32 1.442695, %v1320_v57  ;;  %vm4383_vm5 = vcmp.ge.f32.partialorder %v10407_v49, 0.0 }
 0x192   : > { %v7035_v43 = vpop.eup %7034  ;;  %v5401_v34 = vsel %vm4377_vm15, %v7029_v41, %v4889_v46  ;;  %v2849_v18 = vadd.f32 1.0, %v10526_v47  ;;  %7052 = vpow2.f32 %v1984_v11  ;;  %v1321_v62 = vsub.f32 0.0, %v809_v30 }
 0x193   : > { %5913 = vst [vmem:[%s8863_s17 + $0x478] sm:$0xff] %v5401_v34  ;;  %v5402_v24 = vsel %vm4378_vm0, %v7031_v0, %v4890_v31  ;;  %v4891_v51 = vmul.f32 %v7035_v43, %v10463_v28  ;;  %7054 = vpow2.f32 %v1986_v54  ;;  %v810_v28 = vand.u32 2147483647, %v10538_v36  ;;  %v10597_v31 = vld [vmem:[%s8712_s30 + $0x520] sm:$0xff] }
 0x194   : > { %v7037_v22 = vpop.eup %7036  ;;  %5914 = vst [vmem:[%s8863_s17 + $0x480] sm:$0xff] %v5402_v24  ;;  %7056 = vrcp.f32 %v2849_v18  ;;  %v1992_v56 = vmul.f32 1.442695, %v1321_v62  ;;  %v811_v25 = vand.u32 2147483647, %v10552_v38  ;;  %vm4384_vm6 = vcmp.ge.f32.partialorder %v10414_v63, 0.0 }
 0x195   : > { %v7039_v26 = vpop.eup %7038  ;;  %v5403_v39 = vsel %vm4379_vm1, %v7035_v43, %v4891_v51  ;;  %v4892_v20 = vmul.f32 %v7037_v22, %v10475_v48  ;;  %7058 = vpow2.f32 %v1988_v17  ;;  %v1322_v19 = vsub.f32 0.0, %v810_v28  ;;  %v10610_v24 = vld [vmem:[%s8712_s30 + $0x530] sm:$0xff] }
 0x196   : > { %v10554_v33 = vpop.eup %7040  ;;  %5915 = vst [vmem:[%s8863_s17 + $0x488] sm:$0xff] %v5403_v39  ;;  %v4893_v52 = vmul.f32 %v7039_v26, %v10483_v9  ;;  %7060 = vpow2.f32 %v1990_v37  ;;  %v1323_v15 = vsub.f32 0.0, %v811_v25  ;;  %v812_v14 = vand.u32 2147483647, %v10565_v55  ;;  %v10636_v25 = vld [vmem:[%s8712_s30 + $0x540] sm:$0xff] }
 0x197   : > { %v10559_v21 = vpop.eup %7042  ;;  %v5404_v48 = vsel %vm4380_vm2, %v7037_v22, %v4892_v20  ;;  %v2850_v3 = vadd.f32 1.0, %v10554_v33  ;;  %v1994_v16 = vmul.f32 1.442695, %v1322_v19  ;;  %vm4385_vm7 = vcmp.ge.f32.partialorder %v10425_v35, 0.0  ;;  %v10618_v22 = vld [vmem:[%s8712_s30 + $0x538] sm:$0xff] }
 0x198   : > { %v7045_v29 = vpop.eup %7044  ;;  %5916 = vst [vmem:[%s8863_s17 + $0x490] sm:$0xff] %v5404_v48  ;;  %v5405_v9 = vsel %vm4381_vm3, %v7039_v26, %v4893_v52  ;;  %v2851_v53 = vadd.f32 1.0, %v10559_v21  ;;  %v1996_v54 = vmul.f32 1.442695, %v1323_v15  ;;  %v1324_v0 = vsub.f32 0.0, %v812_v14  ;;  %v10649_v14 = vld [vmem:[%s8712_s30 + $0x548] sm:$0xff] }
 0x199   : > { %v10572_v50 = vpop.eup %7046  ;;  %5917 = vst [vmem:[%s8863_s17 + $0x498] sm:$0xff] %v5405_v9  ;;  %v4894_v4 = vmul.f32 %v7045_v29, %v10497_v58  ;;  %7062 = vrcp.f32 %v2850_v3  ;;  %v813_v2 = vand.u32 2147483647, %v10580_v32  ;;  %vm4386_vm8 = vcmp.ge.f32.partialorder %v10448_v8, 0.0 }
 0x19a   : > { %v7049_v7 = vpop.eup %7048  ;;  %7064 = vrcp.f32 %v2851_v53  ;;  %v2852_v44 = vadd.f32 1.0, %v10572_v50  ;;  %v1998_v49 = vmul.f32 1.442695, %v1324_v0  ;;  %vm4387_vm9 = vcmp.ge.f32.partialorder %v10457_v5, 0.0 }
 0x19b   : > { %v7051_v11 = vpop.eup %7050  ;;  %v5406_v41 = vsel %vm4382_vm4, %v7045_v29, %v4894_v4  ;;  %v4895_v58 = vmul.f32 %v7049_v7, %v10503_v42  ;;  %7066 = vpow2.f32 %v1992_v56  ;;  %v1325_v10 = vsub.f32 0.0, %v813_v2 }
 0x19c   : > { %v10586_v27 = vpop.eup %7052  ;;  %5918 = vst [vmem:[%s8863_s17 + $0x4a0] sm:$0xff] %v5406_v41  ;;  %v4896_v12 = vmul.f32 %v7051_v11, %v10511_v6  ;;  %7068 = vrcp.f32 %v2852_v44  ;;  %v814_v63 = vand.u32 2147483647, %v10597_v31  ;;  %v815_v57 = vand.u32 2147483647, %v10600_v61 }
 0x19d   : > { %v10590_v46 = vpop.eup %7054  ;;  %v5407_v59 = vsel %vm4383_vm5, %v7049_v7, %v4895_v58  ;;  %v2853_v42 = vadd.f32 1.0, %v10586_v27  ;;  %7070 = vpow2.f32 %v1994_v16  ;;  %v2000_v26 = vmul.f32 1.442695, %v1325_v10 }
 0x19e   : > { %v7057_v6 = vpop.eup %7056  ;;  %5919 = vst [vmem:[%s8863_s17 + $0x4a8] sm:$0xff] %v5407_v59  ;;  %v5408_v43 = vsel %vm4384_vm6, %v7051_v11, %v4896_v12  ;;  %v2854_v34 = vadd.f32 1.0, %v10590_v46  ;;  %7072 = vpow2.f32 %v1996_v54  ;;  %vm4388_vm10 = vcmp.ge.f32.partialorder %v10470_v1, 0.0  ;;  %v10657_v12 = vld [vmem:[%s8712_s30 + $0x550] sm:$0xff] }
 0x19f   : > { %5920 = vst [vmem:[%s8863_s17 + $0x4b0] sm:$0xff] %v5408_v43  ;;  %v4897_v18 = vmul.f32 %v7057_v6, %v10526_v47  ;;  %7074 = vrcp.f32 %v2853_v42  ;;  %v10612_v51 = vpop.eup %7058  ;;  %v1326_v20 = vsub.f32 0.0, %v814_v63  ;;  %v1327_v37 = vsub.f32 0.0, %v815_v57 }
 0x1a0   : > { %7076 = vrcp.f32 %v2854_v34  ;;  %v10620_v17 = vpop.eup %7060  ;;  %v2855_v30 = vadd.f32 1.0, %v10612_v51  ;;  %vm4389_vm11 = vcmp.ge.f32.partialorder %v10481_v60, 0.0  ;;  %v816_v52 = vand.u32 2147483647, %v10610_v24  ;;  %v10672_v34 = vld [vmem:[%s8712_s30 + $0x558] sm:$0xff] }
 0x1a1   : > { %v5409_v47 = vsel %vm4385_vm7, %v7057_v6, %v4897_v18  ;;  %7078 = vpow2.f32 %v1998_v49  ;;  %v2856_v39 = vadd.f32 1.0, %v10620_v17  ;;  %v817_v35 = vand.u32 2147483647, %v10618_v22 }
 0x1a2   : > { %5921 = vst [vmem:[%s8863_s17 + $0x4b8] sm:$0xff] %v5409_v47  ;;  %7080 = vrcp.f32 %v2855_v30  ;;  %v2002_v3 = vmul.f32 1.442695, %v1326_v20  ;;  %v2004_v19 = vmul.f32 1.442695, %v1327_v37  ;;  %v1328_v53 = vsub.f32 0.0, %v816_v52 }
 0x1a3   : > { %v7063_v28 = vpop.eup %7062  ;;  %7082 = vrcp.f32 %v2856_v39  ;;  %v1329_v56 = vsub.f32 0.0, %v817_v35  ;;  %vm4390_vm12 = vcmp.ge.f32.partialorder %v10489_v45, 0.0  ;;  %v818_v58 = vand.u32 2147483647, %v10636_v25  ;;  %v10682_v47 = vld [vmem:[%s8712_s30 + $0x560] sm:$0xff] }
 0x1a4   : > { %v7065_v62 = vpop.eup %7064  ;;  %v4898_v48 = vmul.f32 %v7063_v28, %v10554_v33  ;;  %7084 = vpow2.f32 %v2000_v26  ;;  %v2006_v15 = vmul.f32 1.442695, %v1328_v53  ;;  %vm4391_vm13 = vcmp.ge.f32.partialorder %v10509_v13, 0.0 }
 0x1a5   : > { %v10632_v29 = vpop.eup %7066  ;;  %v4899_v9 = vmul.f32 %v7065_v62, %v10559_v21  ;;  %7086 = vpow2.f32 %v2002_v3  ;;  %v2008_v41 = vmul.f32 1.442695, %v1329_v56  ;;  %v1330_v42 = vsub.f32 0.0, %v818_v58 }
 0x1a6   : > { %v7069_v4 = vpop.eup %7068  ;;  %v5410_v16 = vsel %vm4386_vm8, %v7063_v28, %v4898_v48  ;;  %v2857_v33 = vadd.f32 1.0, %v10632_v29  ;;  %7088 = vpow2.f32 %v2004_v19  ;;  %v819_v2 = vand.u32 2147483647, %v10649_v14 }
 0x1a7   : > { %v10642_v7 = vpop.eup %7070  ;;  %5922 = vst [vmem:[%s8863_s17 + $0x4c0] sm:$0xff] %v5410_v16  ;;  %v5411_v21 = vsel %vm4387_vm9, %v7065_v62, %v4899_v9  ;;  %v4900_v44 = vmul.f32 %v7069_v4, %v10572_v50  ;;  %vm4392_vm14 = vcmp.ge.f32.partialorder %v10517_v40, 0.0  ;;  %v820_v43 = vand.u32 2147483647, %v10657_v12  ;;  %v10699_v62 = vld [vmem:[%s8712_s30 + $0x568] sm:$0xff]  ;;  %v10708_v9 = vld [vmem:[%s8712_s30 + $0x570] sm:$0xff] }
 0x1a8   : > { %v10651_v8 = vpop.eup %7072  ;;  %5923 = vst [vmem:[%s8863_s17 + $0x4c8] sm:$0xff] %v5411_v21  ;;  %7090 = vrcp.f32 %v2857_v33  ;;  %v2858_v11 = vadd.f32 1.0, %v10642_v7  ;;  %v2010_v18 = vmul.f32 1.442695, %v1330_v42  ;;  %vm4393_vm15 = vcmp.ge.f32.partialorder %v10532_v23, 0.0  ;;  %v10731_v23 = vld [vmem:[%s8712_s30 + $0x580] sm:$0xff] }
 0x1a9   : > { %v7075_v5 = vpop.eup %7074  ;;  %v5412_v50 = vsel %vm4388_vm10, %v7069_v4, %v4900_v44  ;;  %v2859_v54 = vadd.f32 1.0, %v10651_v8  ;;  %7092 = vpow2.f32 %v2006_v15  ;;  %v1331_v63 = vsub.f32 0.0, %v819_v2 }
 0x1aa   : > { %v7077_v0 = vpop.eup %7076  ;;  %5924 = vst [vmem:[%s8863_s17 + $0x4d0] sm:$0xff] %v5412_v50  ;;  %v4901_v59 = vmul.f32 %v7075_v5, %v10586_v27  ;;  %7094 = vrcp.f32 %v2858_v11  ;;  %v1332_v57 = vsub.f32 0.0, %v820_v43  ;;  %vm4394_vm0 = vcmp.ge.f32.partialorder %v10538_v36, 0.0  ;;  %v10723_v50 = vld [vmem:[%s8712_s30 + $0x578] sm:$0xff] }
 0x1ab   : > { %v10666_v6 = vpop.eup %7078  ;;  %v4902_v1 = vmul.f32 %v7077_v0, %v10590_v46  ;;  %7096 = vrcp.f32 %v2859_v54  ;;  %v821_v26 = vand.u32 2147483647, %v10672_v34  ;;  %vm4395_vm1 = vcmp.ge.f32.partialorder %v10552_v38, 0.0 }
 0x1ac   : > { %v5413_v27 = vsel %vm4389_vm11, %v7075_v5, %v4901_v59  ;;  %v2860_v49 = vadd.f32 1.0, %v10666_v6  ;;  %7098 = vpow2.f32 %v2008_v41  ;;  %v7081_v10 = vpop.eup %7080  ;;  %v2012_v20 = vmul.f32 1.442695, %v1331_v63  ;;  %v10752_v63 = vld [vmem:[%s8712_s30 + $0x590] sm:$0xff] }
 0x1ad   : > { %5925 = vst [vmem:[%s8863_s17 + $0x4d8] sm:$0xff] %v5413_v27  ;;  %v5414_v46 = vsel %vm4390_vm12, %v7077_v0, %v4902_v1  ;;  %v7083_v30 = vpop.eup %7082  ;;  %v4903_v60 = vmul.f32 %v7081_v10, %v10612_v51  ;;  %v1333_v52 = vsub.f32 0.0, %v821_v26  ;;  %v822_v35 = vand.u32 2147483647, %v10682_v47  ;;  %v10760_v26 = vld [vmem:[%s8712_s30 + $0x598] sm:$0xff] }
 0x1ae   : > { %5926 = vst [vmem:[%s8863_s17 + $0x4e0] sm:$0xff] %v5414_v46  ;;  %7100 = vrcp.f32 %v2860_v49  ;;  %v10688_v39 = vpop.eup %7084  ;;  %v4904_v45 = vmul.f32 %v7083_v30, %v10620_v17  ;;  %v2014_v19 = vmul.f32 1.442695, %v1332_v57  ;;  %vm4396_vm2 = vcmp.ge.f32.partialorder %v10565_v55, 0.0  ;;  %v10741_v49 = vld [vmem:[%s8712_s30 + $0x588] sm:$0xff] }
 0x1af   : > { %7102 = vpow2.f32 %v2010_v18  ;;  %v10692_v37 = vpop.eup %7086  ;;  %v5415_v51 = vsel %vm4391_vm13, %v7081_v10, %v4903_v60  ;;  %v2861_v28 = vadd.f32 1.0, %v10688_v39  ;;  %v1334_v56 = vsub.f32 0.0, %v822_v35 }
 0x1b0   : > { %v10701_v48 = vpop.eup %7088  ;;  %5927 = vst [vmem:[%s8863_s17 + $0x4e8] sm:$0xff] %v5415_v51  ;;  %v5416_v17 = vsel %vm4392_vm14, %v7083_v30, %v4904_v45  ;;  %v2862_v3 = vadd.f32 1.0, %v10692_v37  ;;  %7104 = vpow2.f32 %v2012_v20  ;;  %v2016_v16 = vmul.f32 1.442695, %v1333_v52 }
 0x1b1   : > { %5928 = vst [vmem:[%s8863_s17 + $0x4f0] sm:$0xff] %v5416_v17  ;;  %7106 = vrcp.f32 %v2861_v28  ;;  %v2863_v53 = vadd.f32 1.0, %v10701_v48  ;;  %v823_v33 = vand.u32 2147483647, %v10699_v62  ;;  %v2018_v15 = vmul.f32 1.442695, %v1334_v56 }
 0x1b2   : > { %v7091_v13 = vpop.eup %7090  ;;  %7108 = vrcp.f32 %v2862_v3  ;;  %v824_v11 = vand.u32 2147483647, %v10708_v9  ;;  %vm4397_vm3 = vcmp.ge.f32.partialorder %v10580_v32, 0.0  ;;  %v825_v27 = vand.u32 2147483647, %v10723_v50 }
 0x1b3   : > { %v10713_v4 = vpop.eup %7092  ;;  %v4905_v40 = vmul.f32 %v7091_v13, %v10632_v29  ;;  %7110 = vrcp.f32 %v2863_v53  ;;  %v1335_v29 = vsub.f32 0.0, %v823_v33  ;;  %vm4398_vm4 = vcmp.ge.f32.partialorder %v10597_v31, 0.0 }
 0x1b4   : > { %v7095_v21 = vpop.eup %7094  ;;  %v2864_v44 = vadd.f32 1.0, %v10713_v4  ;;  %7112 = vpow2.f32 %v2014_v19  ;;  %v1336_v59 = vsub.f32 0.0, %v824_v11  ;;  %v826_v38 = vand.u32 2147483647, %v10731_v23 }
 0x1b5   : > { %v7097_v41 = vpop.eup %7096  ;;  %v5417_v58 = vsel %vm4393_vm15, %v7091_v13, %v4905_v40  ;;  %v4906_v5 = vmul.f32 %v7095_v21, %v10642_v7  ;;  %v2020_v2 = vmul.f32 1.442695, %v1335_v29  ;;  %vm4399_vm5 = vcmp.ge.f32.partialorder %v10600_v61, 0.0 }
 0x1b6   : > { %v10725_v54 = vpop.eup %7098  ;;  %5929 = vst [vmem:[%s8863_s17 + $0x4f8] sm:$0xff] %v5417_v58  ;;  %v4907_v0 = vmul.f32 %v7097_v41, %v10651_v8  ;;  %7114 = vrcp.f32 %v2864_v44  ;;  %v2022_v43 = vmul.f32 1.442695, %v1336_v59  ;;  %v1337_v46 = vsub.f32 0.0, %v825_v27  ;;  %v10780_v44 = vld [vmem:[%s8712_s30 + $0x5a0] sm:$0xff]  ;;  %v10814_v27 = vld [vmem:[%s8712_s30 + $0x5b8] sm:$0xff] }
 0x1b7   : > { %v5418_v7 = vsel %vm4394_vm0, %v7095_v21, %v4906_v5  ;;  %v2865_v42 = vadd.f32 1.0, %v10725_v54  ;;  %7116 = vpow2.f32 %v2016_v16  ;;  %v827_v60 = vand.u32 2147483647, %v10741_v49 }
 0x1b8   : > { %v7101_v1 = vpop.eup %7100  ;;  %5930 = vst [vmem:[%s8863_s17 + $0x500] sm:$0xff] %v5418_v7  ;;  %v5419_v8 = vsel %vm4395_vm1, %v7097_v41, %v4907_v0  ;;  %7118 = vpow2.f32 %v2018_v15  ;;  %vm4400_vm6 = vcmp.ge.f32.partialorder %v10610_v24, 0.0  ;;  %v2024_v51 = vmul.f32 1.442695, %v1337_v46  ;;  %v10789_v41 = vld [vmem:[%s8712_s30 + $0x5a8] sm:$0xff]  ;;  %v10808_v24 = vld [vmem:[%s8712_s30 + $0x5b0] sm:$0xff] }
 0x1b9   : > { %v10743_v18 = vpop.eup %7102  ;;  %5931 = vst [vmem:[%s8863_s17 + $0x508] sm:$0xff] %v5419_v8  ;;  %v4908_v36 = vmul.f32 %v7101_v1, %v10666_v6  ;;  %7120 = vrcp.f32 %v2865_v42  ;;  %v1338_v6 = vsub.f32 0.0, %v826_v38  ;;  %v1339_v35 = vsub.f32 0.0, %v827_v60 }
 0x1ba   : > { %v2866_v10 = vadd.f32 1.0, %v10743_v18  ;;  %7122 = vpow2.f32 %v2020_v2  ;;  %v10754_v57 = vpop.eup %7104  ;;  %v828_v17 = vand.u32 2147483647, %v10752_v63  ;;  %vm4401_vm7 = vcmp.ge.f32.partialorder %v10618_v22, 0.0 }
 0x1bb   : > { %v5420_v30 = vsel %vm4396_vm2, %v7101_v1, %v4908_v36  ;;  %7124 = vpow2.f32 %v2022_v43  ;;  %v7107_v45 = vpop.eup %7106  ;;  %v2867_v20 = vadd.f32 1.0, %v10754_v57  ;;  %v2026_v55 = vmul.f32 1.442695, %v1338_v6 }
 0x1bc   : > { %5932 = vst [vmem:[%s8863_s17 + $0x510] sm:$0xff] %v5420_v30  ;;  %7126 = vrcp.f32 %v2866_v10  ;;  %v7109_v28 = vpop.eup %7108  ;;  %v4909_v52 = vmul.f32 %v7107_v45, %v10688_v39  ;;  %v829_v13 = vand.u32 2147483647, %v10760_v26  ;;  %v2028_v40 = vmul.f32 1.442695, %v1339_v35 }
 0x1bd   : > { %v7111_v3 = vpop.eup %7110  ;;  %v4910_v19 = vmul.f32 %v7109_v28, %v10692_v37  ;;  %7128 = vrcp.f32 %v2867_v20  ;;  %v1340_v21 = vsub.f32 0.0, %v828_v17  ;;  %vm4402_vm8 = vcmp.ge.f32.partialorder %v10636_v25, 0.0 }
 0x1be   : > { %v10770_v53 = vpop.eup %7112  ;;  %v5421_v56 = vsel %vm4397_vm3, %v7107_v45, %v4909_v52  ;;  %v4911_v39 = vmul.f32 %v7111_v3, %v10701_v48  ;;  %7130 = vpow2.f32 %v2024_v51  ;;  %v1341_v11 = vsub.f32 0.0, %v829_v13  ;;  %v10830_v52 = vld [vmem:[%s8712_s30 + $0x5c0] sm:$0xff] }
 0x1bf   : > { %5933 = vst [vmem:[%s8863_s17 + $0x518] sm:$0xff] %v5421_v56  ;;  %v5422_v37 = vsel %vm4398_vm4, %v7109_v28, %v4910_v19  ;;  %v2868_v33 = vadd.f32 1.0, %v10770_v53  ;;  %7132 = vpow2.f32 %v2026_v55  ;;  %v2030_v5 = vmul.f32 1.442695, %v1340_v21  ;;  %v10846_v56 = vld [vmem:[%s8712_s30 + $0x5d0] sm:$0xff] }
 0x1c0   : > { %v7115_v16 = vpop.eup %7114  ;;  %5934 = vst [vmem:[%s8863_s17 + $0x520] sm:$0xff] %v5422_v37  ;;  %v5423_v32 = vsel %vm4399_vm5, %v7111_v3, %v4911_v39  ;;  %7134 = vpow2.f32 %v2028_v40  ;;  %vm4403_vm9 = vcmp.ge.f32.partialorder %v10649_v14, 0.0  ;;  %v830_v0 = vand.u32 2147483647, %v10780_v44  ;;  %v10838_v3 = vld [vmem:[%s8712_s30 + $0x5c8] sm:$0xff] }
 0x1c1   : > { %v10782_v15 = vpop.eup %7116  ;;  %v4912_v48 = vmul.f32 %v7115_v16, %v10713_v4  ;;  %5935 = vst [vmem:[%s8863_s17 + $0x528] sm:$0xff] %v5423_v32  ;;  %7136 = vrcp.f32 %v2868_v33  ;;  %vm4404_vm10 = vcmp.ge.f32.partialorder %v10657_v12, 0.0  ;;  %v831_v42 = vand.u32 2147483647, %v10789_v41 }
 0x1c2   : > { %v10791_v31 = vpop.eup %7118  ;;  %v2869_v58 = vadd.f32 1.0, %v10782_v15  ;;  %v2032_v8 = vmul.f32 1.442695, %v1341_v11  ;;  %v1342_v43 = vsub.f32 0.0, %v830_v0  ;;  %v832_v6 = vand.u32 2147483647, %v10808_v24 }
 0x1c3   : > { %v7121_v29 = vpop.eup %7120  ;;  %v5424_v61 = vsel %vm4400_vm6, %v7115_v16, %v4912_v48  ;;  %v2870_v4 = vadd.f32 1.0, %v10791_v31  ;;  %v1343_v10 = vsub.f32 0.0, %v831_v42  ;;  %vm4405_vm11 = vcmp.ge.f32.partialorder %v10672_v34, 0.0 }
 0x1c4   : > { %v10801_v59 = vpop.eup %7122  ;;  %5936 = vst [vmem:[%s8863_s17 + $0x530] sm:$0xff] %v5424_v61  ;;  %v4913_v7 = vmul.f32 %v7121_v29, %v10725_v54  ;;  %7138 = vrcp.f32 %v2869_v58  ;;  %v2034_v30 = vmul.f32 1.442695, %v1342_v43  ;;  %v833_v45 = vand.u32 2147483647, %v10814_v27 }
 0x1c5   : > { %v10810_v2 = vpop.eup %7124  ;;  %7140 = vrcp.f32 %v2870_v4  ;;  %v2871_v1 = vadd.f32 1.0, %v10801_v59  ;;  %v2036_v22 = vmul.f32 1.442695, %v1343_v10  ;;  %v1344_v28 = vsub.f32 0.0, %v832_v6  ;;  %v10890_v6 = vld [vmem:[%s8712_s30 + $0x5e8] sm:$0xff] }
 0x1c6   : > { %v7127_v36 = vpop.eup %7126  ;;  %v5425_v54 = vsel %vm4401_vm7, %v7121_v29, %v4913_v7  ;;  %v2872_v38 = vadd.f32 1.0, %v10810_v2  ;;  %7142 = vpow2.f32 %v2030_v5  ;;  %vm4406_vm12 = vcmp.ge.f32.partialorder %v10682_v47, 0.0  ;;  %v10864_v7 = vld [vmem:[%s8712_s30 + $0x5d8] sm:$0xff] }
 0x1c7   : > { %5937 = vst [vmem:[%s8863_s17 + $0x538] sm:$0xff] %v5425_v54  ;;  %v4914_v46 = vmul.f32 %v7127_v36, %v10743_v18  ;;  %7144 = vrcp.f32 %v2871_v1  ;;  %v7129_v60 = vpop.eup %7128  ;;  %v1345_v17 = vsub.f32 0.0, %v833_v45  ;;  %v2038_v13 = vmul.f32 1.442695, %v1344_v28 }
 0x1c8   : > { %7146 = vrcp.f32 %v2872_v38  ;;  %v10824_v20 = vpop.eup %7130  ;;  %v4915_v18 = vmul.f32 %v7129_v60, %v10754_v57  ;;  %v834_v37 = vand.u32 2147483647, %v10830_v52  ;;  %vm4407_vm13 = vcmp.ge.f32.partialorder %v10699_v62, 0.0 }
 0x1c9   : > { %v5426_v51 = vsel %vm4402_vm8, %v7127_v36, %v4914_v46  ;;  %7148 = vpow2.f32 %v2032_v8  ;;  %v10832_v55 = vpop.eup %7132  ;;  %v2873_v35 = vadd.f32 1.0, %v10824_v20  ;;  %v2040_v16 = vmul.f32 1.442695, %v1345_v17  ;;  %v10871_v8 = vld [vmem:[%s8712_s30 + $0x5e0] sm:$0xff] }
 0x1ca   : > { %5938 = vst [vmem:[%s8863_s17 + $0x540] sm:$0xff] %v5426_v51  ;;  %7150 = vpow2.f32 %v2034_v30  ;;  %v10840_v25 = vpop.eup %7134  ;;  %v5427_v57 = vsel %vm4403_vm9, %v7129_v60, %v4915_v18  ;;  %v2874_v19 = vadd.f32 1.0, %v10832_v55  ;;  %v835_v14 = vand.u32 2147483647, %v10838_v3 }
 0x1cb   : > { %7152 = vpow2.f32 %v2036_v22  ;;  %v7137_v39 = vpop.eup %7136  ;;  %5939 = vst [vmem:[%s8863_s17 + $0x548] sm:$0xff] %v5427_v57  ;;  %v2875_v40 = vadd.f32 1.0, %v10840_v25  ;;  %vm4408_vm14 = vcmp.ge.f32.partialorder %v10708_v9, 0.0  ;;  %v1346_v32 = vsub.f32 0.0, %v834_v37  ;;  %v10904_v57 = vld [vmem:[%s8712_s30 + $0x5f0] sm:$0xff] }
 0x1cc   : > { %7154 = vrcp.f32 %v2873_v35  ;;  %v4916_v33 = vmul.f32 %v7137_v39, %v10770_v53  ;;  %v836_v48 = vand.u32 2147483647, %v10846_v56  ;;  %v1347_v5 = vsub.f32 0.0, %v835_v14 }
 0x1cd   : > { %7156 = vrcp.f32 %v2874_v19  ;;  %v2042_v4 = vmul.f32 1.442695, %v1346_v32  ;;  %vm4409_vm15 = vcmp.ge.f32.partialorder %v10723_v50, 0.0  ;;  %vm4410_vm0 = vcmp.ge.f32.partialorder %v10731_v23, 0.0  ;;  %v10924_v32 = vld [vmem:[%s8712_s30 + $0x600] sm:$0xff] }
 0x1ce   : > { %v7139_v21 = vpop.eup %7138  ;;  %7158 = vrcp.f32 %v2875_v40  ;;  %v5428_v58 = vsel %vm4404_vm10, %v7137_v39, %v4916_v33  ;;  %v1348_v0 = vsub.f32 0.0, %v836_v48  ;;  %v2044_v1 = vmul.f32 1.442695, %v1347_v5  ;;  %v10914_v33 = vld [vmem:[%s8712_s30 + $0x5f8] sm:$0xff]  ;;  %v10937_v5 = vld [vmem:[%s8712_s30 + $0x608] sm:$0xff] }
 0x1cf   : > { %v7141_v11 = vpop.eup %7140  ;;  %v4917_v53 = vmul.f32 %v7139_v21, %v10782_v15  ;;  %7160 = vpow2.f32 %v2038_v13  ;;  %5940 = vst [vmem:[%s8863_s17 + $0x550] sm:$0xff] %v5428_v58  ;;  %v837_v10 = vand.u32 2147483647, %v10864_v7  ;;  %v838_v30 = vand.u32 2147483647, %v10871_v8 }
 0x1d0   : > { %v10859_v29 = vpop.eup %7142  ;;  %v4918_v61 = vmul.f32 %v7141_v11, %v10791_v31  ;;  %7162 = vpow2.f32 %v2040_v16  ;;  %v2046_v54 = vmul.f32 1.442695, %v1348_v0  ;;  %vm4411_vm1 = vcmp.ge.f32.partialorder %v10741_v49, 0.0 }
 0x1d1   : > { %v7145_v42 = vpop.eup %7144  ;;  %v5429_v12 = vsel %vm4405_vm11, %v7139_v21, %v4917_v53  ;;  %v2876_v15 = vadd.f32 1.0, %v10859_v29  ;;  %7164 = vpow2.f32 %v2042_v4  ;;  %v1349_v45 = vsub.f32 0.0, %v837_v10 }
 0x1d2   : > { %v7147_v43 = vpop.eup %7146  ;;  %5941 = vst [vmem:[%s8863_s17 + $0x558] sm:$0xff] %v5429_v12  ;;  %v5430_v31 = vsel %vm4406_vm12, %v7141_v11, %v4918_v61  ;;  %v4919_v36 = vmul.f32 %v7145_v42, %v10801_v59  ;;  %v1350_v18 = vsub.f32 0.0, %v838_v30  ;;  %v839_v17 = vand.u32 2147483647, %v10890_v6 }
 0x1d3   : > { %v10877_v34 = vpop.eup %7148  ;;  %5942 = vst [vmem:[%s8863_s17 + $0x560] sm:$0xff] %v5430_v31  ;;  %v4920_v38 = vmul.f32 %v7147_v43, %v10810_v2  ;;  %7166 = vrcp.f32 %v2876_v15  ;;  %v2048_v9 = vmul.f32 1.442695, %v1349_v45  ;;  %vm4412_vm2 = vcmp.ge.f32.partialorder %v10752_v63, 0.0 }
 0x1d4   : > { %v10883_v46 = vpop.eup %7150  ;;  %v5431_v47 = vsel %vm4407_vm13, %v7145_v42, %v4919_v36  ;;  %v2877_v59 = vadd.f32 1.0, %v10877_v34  ;;  %7168 = vpow2.f32 %v2044_v1  ;;  %v2050_v39 = vmul.f32 1.442695, %v1350_v18 }
 0x1d5   : > { %v10892_v60 = vpop.eup %7152  ;;  %5943 = vst [vmem:[%s8863_s17 + $0x568] sm:$0xff] %v5431_v47  ;;  %v5432_v2 = vsel %vm4408_vm14, %v7147_v43, %v4920_v38  ;;  %v2878_v22 = vadd.f32 1.0, %v10883_v46  ;;  %7170 = vpow2.f32 %v2046_v54  ;;  %v1351_v37 = vsub.f32 0.0, %v839_v17  ;;  %v10950_v54 = vld [vmem:[%s8712_s30 + $0x610] sm:$0xff] }
 0x1d6   : > { %v7155_v62 = vpop.eup %7154  ;;  %5944 = vst [vmem:[%s8863_s17 + $0x570] sm:$0xff] %v5432_v2  ;;  %7172 = vrcp.f32 %v2877_v59  ;;  %v2879_v51 = vadd.f32 1.0, %v10892_v60  ;;  %v840_v50 = vand.u32 2147483647, %v10904_v57  ;;  %vm4413_vm3 = vcmp.ge.f32.partialorder %v10760_v26, 0.0  ;;  %v10975_v26 = vld [vmem:[%s8712_s30 + $0x620] sm:$0xff] }
 0x1d7   : > { %v7157_v28 = vpop.eup %7156  ;;  %v4921_v35 = vmul.f32 %v7155_v62, %v10824_v20  ;;  %7174 = vrcp.f32 %v2878_v22  ;;  %v2052_v11 = vmul.f32 1.442695, %v1351_v37  ;;  %vm4414_vm4 = vcmp.ge.f32.partialorder %v10780_v44, 0.0 }
 0x1d8   : > { %v7159_v19 = vpop.eup %7158  ;;  %v4922_v13 = vmul.f32 %v7157_v28, %v10832_v55  ;;  %7176 = vrcp.f32 %v2879_v51  ;;  %v1352_v23 = vsub.f32 0.0, %v840_v50  ;;  %v841_v53 = vand.u32 2147483647, %v10914_v33 }
 0x1d9   : > { %v10908_v40 = vpop.eup %7160  ;;  %v5433_v20 = vsel %vm4409_vm15, %v7155_v62, %v4921_v35  ;;  %v4923_v16 = vmul.f32 %v7159_v19, %v10840_v25  ;;  %7178 = vpow2.f32 %v2048_v9  ;;  %vm4415_vm5 = vcmp.ge.f32.partialorder %v10789_v41, 0.0  ;;  %v10966_v35 = vld [vmem:[%s8712_s30 + $0x618] sm:$0xff] }
 0x1da   : > { %v10916_v14 = vpop.eup %7162  ;;  %5945 = vst [vmem:[%s8863_s17 + $0x578] sm:$0xff] %v5433_v20  ;;  %v5434_v55 = vsel %vm4410_vm0, %v7157_v28, %v4922_v13  ;;  %v2880_v21 = vadd.f32 1.0, %v10908_v40  ;;  %7180 = vpow2.f32 %v2050_v39  ;;  %v842_v4 = vand.u32 2147483647, %v10924_v32  ;;  %v10983_v39 = vld [vmem:[%s8712_s30 + $0x628] sm:$0xff] }
 0x1db   : > { %5946 = vst [vmem:[%s8863_s17 + $0x580] sm:$0xff] %v5434_v55  ;;  %v5435_v25 = vsel %vm4411_vm1, %v7159_v19, %v4923_v16  ;;  %v2881_v48 = vadd.f32 1.0, %v10916_v14  ;;  %v10931_v58 = vpop.eup %7164  ;;  %v2054_v12 = vmul.f32 1.442695, %v1352_v23  ;;  %v1353_v15 = vsub.f32 0.0, %v841_v53 }
 0x1dc   : > { %5947 = vst [vmem:[%s8863_s17 + $0x588] sm:$0xff] %v5435_v25  ;;  %7182 = vrcp.f32 %v2880_v21  ;;  %v2882_v49 = vadd.f32 1.0, %v10931_v58  ;;  %v1354_v31 = vsub.f32 0.0, %v842_v4  ;;  %v843_v36 = vand.u32 2147483647, %v10937_v5 }
 0x1dd   : > { %v7167_v61 = vpop.eup %7166  ;;  %7184 = vrcp.f32 %v2881_v48  ;;  %v2056_v47 = vmul.f32 1.442695, %v1353_v15  ;;  %vm4416_vm6 = vcmp.ge.f32.partialorder %v10808_v24, 0.0  ;;  %v844_v63 = vand.u32 2147483647, %v10950_v54 }
 0x1de   : > { %v10942_v0 = vpop.eup %7168  ;;  %v4924_v42 = vmul.f32 %v7167_v61, %v10859_v29  ;;  %7186 = vpow2.f32 %v2052_v11  ;;  %v2058_v2 = vmul.f32 1.442695, %v1354_v31  ;;  %v1355_v22 = vsub.f32 0.0, %v843_v36  ;;  %v10996_v11 = vld [vmem:[%s8712_s30 + $0x630] sm:$0xff]  ;;  %v11012_v36 = vld [vmem:[%s8712_s30 + $0x638] sm:$0xff] }
 0x1df   : > { %v10945_v1 = vpop.eup %7170  ;;  %7188 = vrcp.f32 %v2882_v49  ;;  %v2883_v43 = vadd.f32 1.0, %v10942_v0  ;;  %v1356_v19 = vsub.f32 0.0, %v844_v63  ;;  %vm4417_vm7 = vcmp.ge.f32.partialorder %v10814_v27, 0.0 }
 0x1e0   : > { %v7173_v38 = vpop.eup %7172  ;;  %v5436_v10 = vsel %vm4412_vm2, %v7167_v61, %v4924_v42  ;;  %v2884_v29 = vadd.f32 1.0, %v10945_v1  ;;  %7190 = vpow2.f32 %v2054_v12  ;;  %v2060_v28 = vmul.f32 1.442695, %v1355_v22  ;;  %v11029_v22 = vld [vmem:[%s8712_s30 + $0x640] sm:$0xff] }
 0x1e1   : > { %v7175_v59 = vpop.eup %7174  ;;  %5948 = vst [vmem:[%s8863_s17 + $0x590] sm:$0xff] %v5436_v10  ;;  %v4925_v30 = vmul.f32 %v7173_v38, %v10877_v34  ;;  %7192 = vrcp.f32 %v2883_v43  ;;  %vm4418_vm8 = vcmp.ge.f32.partialorder %v10830_v52, 0.0  ;;  %v2062_v44 = vmul.f32 1.442695, %v1356_v19 }
 0x1e2   : > { %v7177_v45 = vpop.eup %7176  ;;  %v4926_v62 = vmul.f32 %v7175_v59, %v10883_v46  ;;  %7194 = vrcp.f32 %v2884_v29  ;;  %v845_v16 = vand.u32 2147483647, %v10966_v35  ;;  %vm4419_vm9 = vcmp.ge.f32.partialorder %v10838_v3, 0.0 }
 0x1e3   : > { %v10960_v51 = vpop.eup %7178  ;;  %v5437_v18 = vsel %vm4413_vm3, %v7173_v38, %v4925_v30  ;;  %v4927_v34 = vmul.f32 %v7177_v45, %v10892_v60  ;;  %7196 = vpow2.f32 %v2056_v47  ;;  %v846_v55 = vand.u32 2147483647, %v10975_v26 }
 0x1e4   : > { %v10968_v46 = vpop.eup %7180  ;;  %5949 = vst [vmem:[%s8863_s17 + $0x598] sm:$0xff] %v5437_v18  ;;  %v5438_v9 = vsel %vm4414_vm4, %v7175_v59, %v4926_v62  ;;  %v2885_v17 = vadd.f32 1.0, %v10960_v51  ;;  %7198 = vpow2.f32 %v2058_v2  ;;  %v1357_v25 = vsub.f32 0.0, %v845_v16  ;;  %v11038_v18 = vld [vmem:[%s8712_s30 + $0x648] sm:$0xff] }
 0x1e5   : > { %5950 = vst [vmem:[%s8863_s17 + $0x5a0] sm:$0xff] %v5438_v9  ;;  %v5439_v60 = vsel %vm4415_vm5, %v7177_v45, %v4927_v34  ;;  %v2886_v13 = vadd.f32 1.0, %v10968_v46  ;;  %7200 = vpow2.f32 %v2060_v28  ;;  %v847_v48 = vand.u32 2147483647, %v10983_v39 }
 0x1e6   : > { %v7183_v20 = vpop.eup %7182  ;;  %5951 = vst [vmem:[%s8863_s17 + $0x5a8] sm:$0xff] %v5439_v60  ;;  %7202 = vrcp.f32 %v2885_v17  ;;  %vm4420_vm10 = vcmp.ge.f32.partialorder %v10846_v56, 0.0  ;;  %v1358_v61 = vsub.f32 0.0, %v846_v55  ;;  %v2064_v42 = vmul.f32 1.442695, %v1357_v25 }
 0x1e7   : > { %v7185_v37 = vpop.eup %7184  ;;  %v4928_v41 = vmul.f32 %v7183_v20, %v10908_v40  ;;  %7204 = vrcp.f32 %v2886_v13  ;;  %v1359_v12 = vsub.f32 0.0, %v847_v48  ;;  %v848_v31 = vand.u32 2147483647, %v10996_v11 }
 0x1e8   : > { %v10991_v21 = vpop.eup %7186  ;;  %v4929_v50 = vmul.f32 %v7185_v37, %v10916_v14  ;;  %7206 = vpow2.f32 %v2062_v44  ;;  %v2066_v43 = vmul.f32 1.442695, %v1358_v61  ;;  %vm4421_vm11 = vcmp.ge.f32.partialorder %v10864_v7, 0.0  ;;  %v11051_v44 = vld [vmem:[%s8712_s30 + $0x650] sm:$0xff] }
 0x1e9   : > { %v7189_v23 = vpop.eup %7188  ;;  %v5440_v40 = vsel %vm4416_vm6, %v7183_v20, %v4928_v41  ;;  %v2887_v53 = vadd.f32 1.0, %v10991_v21  ;;  %v2068_v10 = vmul.f32 1.442695, %v1359_v12  ;;  %v1360_v59 = vsub.f32 0.0, %v848_v31  ;;  %v11057_v41 = vld [vmem:[%s8712_s30 + $0x658] sm:$0xff] }
 0x1ea   : > { %v11002_v49 = vpop.eup %7190  ;;  %5952 = vst [vmem:[%s8863_s17 + $0x5b0] sm:$0xff] %v5440_v40  ;;  %v5441_v14 = vsel %vm4417_vm7, %v7185_v37, %v4929_v50  ;;  %v4930_v4 = vmul.f32 %v7189_v23, %v10931_v58  ;;  %v849_v2 = vand.u32 2147483647, %v11012_v36  ;;  %vm4422_vm12 = vcmp.ge.f32.partialorder %v10871_v8, 0.0  ;;  %v11064_v50 = vld [vmem:[%s8712_s30 + $0x660] sm:$0xff] }
 0x1eb   : > { %v7193_v15 = vpop.eup %7192  ;;  %5953 = vst [vmem:[%s8863_s17 + $0x5b8] sm:$0xff] %v5441_v14  ;;  %7208 = vrcp.f32 %v2887_v53  ;;  %v2888_v24 = vadd.f32 1.0, %v11002_v49  ;;  %v2070_v63 = vmul.f32 1.442695, %v1360_v59  ;;  %vm4423_vm13 = vcmp.ge.f32.partialorder %v10890_v6, 0.0 }
 0x1ec   : > { %v7195_v38 = vpop.eup %7194  ;;  %v5442_v27 = vsel %vm4418_vm8, %v7189_v23, %v4930_v4  ;;  %v4931_v58 = vmul.f32 %v7193_v15, %v10942_v0  ;;  %7210 = vpow2.f32 %v2064_v42  ;;  %v1361_v28 = vsub.f32 0.0, %v849_v2 }
 0x1ed   : > { %v11017_v29 = vpop.eup %7196  ;;  %5954 = vst [vmem:[%s8863_s17 + $0x5c0] sm:$0xff] %v5442_v27  ;;  %v4932_v47 = vmul.f32 %v7195_v38, %v10945_v1  ;;  %7212 = vrcp.f32 %v2888_v24  ;;  %v850_v17 = vand.u32 2147483647, %v11029_v22  ;;  %v851_v20 = vand.u32 2147483647, %v11038_v18 }
 0x1ee   : > { %v11022_v30 = vpop.eup %7198  ;;  %v5443_v52 = vsel %vm4419_vm9, %v7193_v15, %v4931_v58  ;;  %v2889_v0 = vadd.f32 1.0, %v11017_v29  ;;  %7214 = vpow2.f32 %v2066_v43  ;;  %v2072_v13 = vmul.f32 1.442695, %v1361_v28  ;;  %v11082_v43 = vld [vmem:[%s8712_s30 + $0x668] sm:$0xff] }
 0x1ef   : > { %v11031_v45 = vpop.eup %7200  ;;  %5955 = vst [vmem:[%s8863_s17 + $0x5c8] sm:$0xff] %v5443_v52  ;;  %v5444_v1 = vsel %vm4420_vm10, %v7195_v38, %v4932_v47  ;;  %v2890_v62 = vadd.f32 1.0, %v11022_v30  ;;  %7216 = vpow2.f32 %v2068_v10  ;;  %v1362_v37 = vsub.f32 0.0, %v850_v17  ;;  %v11089_v10 = vld [vmem:[%s8712_s30 + $0x670] sm:$0xff] }
 0x1f0   : > { %v7203_v3 = vpop.eup %7202  ;;  %5956 = vst [vmem:[%s8863_s17 + $0x5d0] sm:$0xff] %v5444_v1  ;;  %7218 = vrcp.f32 %v2889_v0  ;;  %v2891_v34 = vadd.f32 1.0, %v11031_v45  ;;  %vm4424_vm14 = vcmp.ge.f32.partialorder %v10904_v57, 0.0  ;;  %v1363_v55 = vsub.f32 0.0, %v851_v20 }
 0x1f1   : > { %v7205_v9 = vpop.eup %7204  ;;  %v4933_v56 = vmul.f32 %v7203_v3, %v10960_v51  ;;  %7220 = vrcp.f32 %v2890_v62  ;;  %vm4425_vm15 = vcmp.ge.f32.partialorder %v10914_v33, 0.0  ;;  %v2074_v7 = vmul.f32 1.442695, %v1362_v37 }
 0x1f2   : > { %v11046_v19 = vpop.eup %7206  ;;  %v4934_v60 = vmul.f32 %v7205_v9, %v10968_v46  ;;  %7222 = vrcp.f32 %v2891_v34  ;;  %v852_v48 = vand.u32 2147483647, %v11051_v44  ;;  %vm4426_vm0 = vcmp.ge.f32.partialorder %v10924_v32, 0.0 }
 0x1f3   : > { %v5445_v51 = vsel %vm4421_vm11, %v7203_v3, %v4933_v56  ;;  %v2892_v16 = vadd.f32 1.0, %v11046_v19  ;;  %7224 = vpow2.f32 %v2070_v63  ;;  %v2076_v40 = vmul.f32 1.442695, %v1363_v55  ;;  %v11130_v55 = vld [vmem:[%s8712_s30 + $0x688] sm:$0xff] }
 0x1f4   : > { %5957 = vst [vmem:[%s8863_s17 + $0x5d8] sm:$0xff] %v5445_v51  ;;  %v5446_v46 = vsel %vm4422_vm12, %v7205_v9, %v4934_v60  ;;  %7226 = vpow2.f32 %v2072_v13  ;;  %v853_v53 = vand.u32 2147483647, %v11057_v41  ;;  %v1364_v4 = vsub.f32 0.0, %v852_v48  ;;  %v11113_v60 = vld [vmem:[%s8712_s30 + $0x678] sm:$0xff]  ;;  %v11116_v13 = vld [vmem:[%s8712_s30 + $0x680] sm:$0xff] }
 0x1f5   : > { %v7209_v25 = vpop.eup %7208  ;;  %5958 = vst [vmem:[%s8863_s17 + $0x5e0] sm:$0xff] %v5446_v46  ;;  %7228 = vrcp.f32 %v2892_v16  ;;  %v854_v42 = vand.u32 2147483647, %v11064_v50  ;;  %vm4427_vm1 = vcmp.ge.f32.partialorder %v10937_v5, 0.0  ;;  %v855_v1 = vand.u32 2147483647, %v11082_v43 }
 0x1f6   : > { %v11069_v23 = vpop.eup %7210  ;;  %v4935_v8 = vmul.f32 %v7209_v25, %v10991_v21  ;;  %7230 = vpow2.f32 %v2074_v7  ;;  %v1365_v24 = vsub.f32 0.0, %v853_v53  ;;  %v2078_v27 = vmul.f32 1.442695, %v1364_v4  ;;  %v11139_v48 = vld [vmem:[%s8712_s30 + $0x690] sm:$0xff]  ;;  %v11147_v4 = vld [vmem:[%s8712_s30 + $0x698] sm:$0xff] }
 0x1f7   : > { %v7213_v61 = vpop.eup %7212  ;;  %v2893_v14 = vadd.f32 1.0, %v11069_v23  ;;  %7232 = vpow2.f32 %v2076_v40  ;;  %v1366_v58 = vsub.f32 0.0, %v854_v42  ;;  %vm4428_vm2 = vcmp.ge.f32.partialorder %v10950_v54, 0.0 }
 0x1f8   : > { %v11076_v12 = vpop.eup %7214  ;;  %v5447_v15 = vsel %vm4423_vm13, %v7209_v25, %v4935_v8  ;;  %v4936_v21 = vmul.f32 %v7213_v61, %v11002_v49  ;;  %v2080_v59 = vmul.f32 1.442695, %v1365_v24  ;;  %v856_v57 = vand.u32 2147483647, %v11089_v10 }
 0x1f9   : > { %v11084_v31 = vpop.eup %7216  ;;  %5959 = vst [vmem:[%s8863_s17 + $0x5e8] sm:$0xff] %v5447_v15  ;;  %7234 = vrcp.f32 %v2893_v14  ;;  %v2894_v38 = vadd.f32 1.0, %v11076_v12  ;;  %v2082_v2 = vmul.f32 1.442695, %v1366_v58  ;;  %v1367_v28 = vsub.f32 0.0, %v855_v1 }
 0x1fa   : > { %v7219_v47 = vpop.eup %7218  ;;  %v5448_v6 = vsel %vm4424_vm14, %v7213_v61, %v4936_v21  ;;  %v2895_v49 = vadd.f32 1.0, %v11084_v31  ;;  %v1368_v17 = vsub.f32 0.0, %v856_v57  ;;  %vm4429_vm3 = vcmp.ge.f32.partialorder %v10966_v35, 0.0  ;;  %v11175_v57 = vld [vmem:[%s8712_s30 + $0x6a8] sm:$0xff] }
 0x1fb   : > { %v7221_v52 = vpop.eup %7220  ;;  %5960 = vst [vmem:[%s8863_s17 + $0x5f0] sm:$0xff] %v5448_v6  ;;  %v4937_v0 = vmul.f32 %v7219_v47, %v11017_v29  ;;  %7236 = vrcp.f32 %v2894_v38  ;;  %v2084_v51 = vmul.f32 1.442695, %v1367_v28  ;;  %v857_v46 = vand.u32 2147483647, %v11113_v60 }
 0x1fc   : > { %v7223_v62 = vpop.eup %7222  ;;  %v4938_v63 = vmul.f32 %v7221_v52, %v11022_v30  ;;  %7238 = vrcp.f32 %v2895_v49  ;;  %v2086_v16 = vmul.f32 1.442695, %v1368_v17  ;;  %v858_v5 = vand.u32 2147483647, %v11116_v13 }
 0x1fd   : > { %v11101_v3 = vpop.eup %7224  ;;  %v5449_v29 = vsel %vm4425_vm15, %v7219_v47, %v4937_v0  ;;  %v4939_v34 = vmul.f32 %v7223_v62, %v11031_v45  ;;  %7240 = vpow2.f32 %v2078_v27  ;;  %vm4430_vm4 = vcmp.ge.f32.partialorder %v10975_v26, 0.0 }
 0x1fe   : > { %v11106_v9 = vpop.eup %7226  ;;  %5961 = vst [vmem:[%s8863_s17 + $0x5f8] sm:$0xff] %v5449_v29  ;;  %v5450_v30 = vsel %vm4426_vm0, %v7221_v52, %v4938_v63  ;;  %v2896_v56 = vadd.f32 1.0, %v11101_v3  ;;  %7242 = vpow2.f32 %v2080_v59  ;;  %v1369_v53 = vsub.f32 0.0, %v857_v46  ;;  %v11160_v52 = vld [vmem:[%s8712_s30 + $0x6a0] sm:$0xff]  ;;  %v11197_v46 = vld [vmem:[%s8712_s30 + $0x6b8] sm:$0xff] }
 0x1ff   : > { %v7229_v33 = vpop.eup %7228  ;;  %5962 = vst [vmem:[%s8863_s17 + $0x600] sm:$0xff] %v5450_v30  ;;  %v5451_v45 = vsel %vm4427_vm1, %v7223_v62, %v4939_v34  ;;  %v2897_v20 = vadd.f32 1.0, %v11106_v9  ;;  %7244 = vpow2.f32 %v2082_v2  ;;  %v1370_v61 = vsub.f32 0.0, %v858_v5 }
 0x200   : > { %5963 = vst [vmem:[%s8863_s17 + $0x608] sm:$0xff] %v5451_v45  ;;  %v4940_v32 = vmul.f32 %v7229_v33, %v11046_v19  ;;  %7246 = vrcp.f32 %v2896_v56  ;;  %v11124_v37 = vpop.eup %7230  ;;  %vm4431_vm5 = vcmp.ge.f32.partialorder %v10983_v39, 0.0  ;;  %v859_v54 = vand.u32 2147483647, %v11130_v55 }
 0x201   : > { %7248 = vrcp.f32 %v2897_v20  ;;  %v11132_v25 = vpop.eup %7232  ;;  %v2898_v7 = vadd.f32 1.0, %v11124_v37  ;;  %v2088_v15 = vmul.f32 1.442695, %v1369_v53  ;;  %v2090_v21 = vmul.f32 1.442695, %v1370_v61  ;;  %v11189_v20 = vld [vmem:[%s8712_s30 + $0x6b0] sm:$0xff] }
 0x202   : > { %v5452_v19 = vsel %vm4428_vm2, %v7229_v33, %v4940_v32  ;;  %7250 = vpow2.f32 %v2084_v51  ;;  %v2899_v40 = vadd.f32 1.0, %v11132_v25  ;;  %v860_v24 = vand.u32 2147483647, %v11139_v48 }
 0x203   : > { %v7235_v8 = vpop.eup %7234  ;;  %5964 = vst [vmem:[%s8863_s17 + $0x610] sm:$0xff] %v5452_v19  ;;  %7252 = vpow2.f32 %v2086_v16  ;;  %vm4432_vm6 = vcmp.ge.f32.partialorder %v10996_v11, 0.0  ;;  %v1371_v58 = vsub.f32 0.0, %v859_v54  ;;  %v861_v59 = vand.u32 2147483647, %v11147_v4 }
 0x204   : > { %v4941_v14 = vmul.f32 %v7235_v8, %v11069_v23  ;;  %7254 = vrcp.f32 %v2898_v7  ;;  %v1372_v49 = vsub.f32 0.0, %v860_v24  ;;  %vm4433_vm7 = vcmp.ge.f32.partialorder %v11012_v36, 0.0 }
 0x205   : > { %v7237_v42 = vpop.eup %7236  ;;  %7256 = vrcp.f32 %v2899_v40  ;;  %v2092_v62 = vmul.f32 1.442695, %v1371_v58  ;;  %v1373_v63 = vsub.f32 0.0, %v861_v59  ;;  %v862_v28 = vand.u32 2147483647, %v11160_v52  ;;  %v11229_v58 = vld [vmem:[%s8712_s30 + $0x6d0] sm:$0xff] }
 0x206   : > { %v7239_v38 = vpop.eup %7238  ;;  %v5453_v27 = vsel %vm4429_vm3, %v7235_v8, %v4941_v14  ;;  %v4942_v23 = vmul.f32 %v7237_v42, %v11076_v12  ;;  %7258 = vpow2.f32 %v2088_v15  ;;  %v2094_v34 = vmul.f32 1.442695, %v1372_v49  ;;  %v11214_v15 = vld [vmem:[%s8712_s30 + $0x6c0] sm:$0xff] }
 0x207   : > { %v11154_v47 = vpop.eup %7240  ;;  %5965 = vst [vmem:[%s8863_s17 + $0x618] sm:$0xff] %v5453_v27  ;;  %v4943_v6 = vmul.f32 %v7239_v38, %v11084_v31  ;;  %7260 = vpow2.f32 %v2090_v21  ;;  %vm4434_vm8 = vcmp.ge.f32.partialorder %v11029_v22, 0.0  ;;  %vm4435_vm9 = vcmp.ge.f32.partialorder %v11038_v18, 0.0  ;;  %v11223_v27 = vld [vmem:[%s8712_s30 + $0x6c8] sm:$0xff] }
 0x208   : > { %v11162_v35 = vpop.eup %7242  ;;  %v5454_v12 = vsel %vm4430_vm4, %v7237_v42, %v4942_v23  ;;  %v2900_v0 = vadd.f32 1.0, %v11154_v47  ;;  %vm4436_vm10 = vcmp.ge.f32.partialorder %v11051_v44, 0.0  ;;  %v1374_v33 = vsub.f32 0.0, %v862_v28  ;;  %v11244_v28 = vld [vmem:[%s8712_s30 + $0x6d8] sm:$0xff] }
 0x209   : > { %v11168_v2 = vpop.eup %7244  ;;  %5966 = vst [vmem:[%s8863_s17 + $0x620] sm:$0xff] %v5454_v12  ;;  %v5455_v31 = vsel %vm4431_vm5, %v7239_v38, %v4943_v6  ;;  %v2901_v1 = vadd.f32 1.0, %v11162_v35  ;;  %v863_v45 = vand.u32 2147483647, %v11175_v57  ;;  %v2096_v16 = vmul.f32 1.442695, %v1373_v63 }
 0x20a   : > { %v7247_v29 = vpop.eup %7246  ;;  %5967 = vst [vmem:[%s8863_s17 + $0x628] sm:$0xff] %v5455_v31  ;;  %7262 = vrcp.f32 %v2900_v0  ;;  %v2902_v26 = vadd.f32 1.0, %v11168_v2  ;;  %v2098_v7 = vmul.f32 1.442695, %v1374_v33  ;;  %v864_v53 = vand.u32 2147483647, %v11189_v20 }
 0x20b   : > { %v7249_v30 = vpop.eup %7248  ;;  %v4944_v56 = vmul.f32 %v7247_v29, %v11101_v3  ;;  %7264 = vrcp.f32 %v2901_v1  ;;  %v1375_v40 = vsub.f32 0.0, %v863_v45  ;;  %vm4437_vm11 = vcmp.ge.f32.partialorder %v11057_v41, 0.0  ;;  %v11253_v45 = vld [vmem:[%s8712_s30 + $0x6e0] sm:$0xff] }
 0x20c   : > { %v11183_v39 = vpop.eup %7250  ;;  %v4945_v17 = vmul.f32 %v7249_v30, %v11106_v9  ;;  %7266 = vrcp.f32 %v2902_v26  ;;  %v865_v36 = vand.u32 2147483647, %v11197_v46  ;;  %v1376_v42 = vsub.f32 0.0, %v864_v53  ;;  %v11274_v53 = vld [vmem:[%s8712_s30 + $0x6e8] sm:$0xff] }
 0x20d   : > { %v11191_v3 = vpop.eup %7252  ;;  %v5456_v51 = vsel %vm4432_vm6, %v7247_v29, %v4944_v56  ;;  %v2903_v32 = vadd.f32 1.0, %v11183_v39  ;;  %7268 = vpow2.f32 %v2092_v62  ;;  %vm4438_vm12 = vcmp.ge.f32.partialorder %v11064_v50, 0.0 }
 0x20e   : > { %v7255_v9 = vpop.eup %7254  ;;  %5968 = vst [vmem:[%s8863_s17 + $0x630] sm:$0xff] %v5456_v51  ;;  %v5457_v5 = vsel %vm4433_vm7, %v7249_v30, %v4945_v17  ;;  %v2904_v19 = vadd.f32 1.0, %v11191_v3  ;;  %7270 = vpow2.f32 %v2094_v34  ;;  %v1377_v38 = vsub.f32 0.0, %v865_v36 }
 0x20f   : > { %v7257_v8 = vpop.eup %7256  ;;  %5969 = vst [vmem:[%s8863_s17 + $0x638] sm:$0xff] %v5457_v5  ;;  %v4946_v11 = vmul.f32 %v7255_v9, %v11124_v37  ;;  %7272 = vrcp.f32 %v2903_v32  ;;  %v2100_v37 = vmul.f32 1.442695, %v1375_v40  ;;  %v2102_v23 = vmul.f32 1.442695, %v1376_v42 }
 0x210   : > { %v4947_v61 = vmul.f32 %v7257_v8, %v11132_v25  ;;  %7274 = vrcp.f32 %v2904_v19  ;;  %v11209_v14 = vpop.eup %7258  ;;  %vm4439_vm13 = vcmp.ge.f32.partialorder %v11082_v43, 0.0  ;;  %v2104_v18 = vmul.f32 1.442695, %v1377_v38 }
 0x211   : > { %v5458_v54 = vsel %vm4434_vm8, %v7255_v9, %v4946_v11  ;;  %7276 = vpow2.f32 %v2096_v16  ;;  %v11216_v21 = vpop.eup %7260  ;;  %v2905_v24 = vadd.f32 1.0, %v11209_v14  ;;  %v866_v49 = vand.u32 2147483647, %v11214_v15 }
 0x212   : > { %5970 = vst [vmem:[%s8863_s17 + $0x640] sm:$0xff] %v5458_v54  ;;  %v5459_v25 = vsel %vm4435_vm9, %v7257_v8, %v4947_v61  ;;  %7278 = vpow2.f32 %v2098_v7  ;;  %v2906_v22 = vadd.f32 1.0, %v11216_v21  ;;  %vm4440_vm14 = vcmp.ge.f32.partialorder %v11089_v10, 0.0 }
 0x213   : > { %5971 = vst [vmem:[%s8863_s17 + $0x648] sm:$0xff] %v5459_v25  ;;  %7280 = vpow2.f32 %v2100_v37  ;;  %v867_v0 = vand.u32 2147483647, %v11223_v27  ;;  %v1378_v62 = vsub.f32 0.0, %v866_v49  ;;  %v868_v63 = vand.u32 2147483647, %v11229_v58 }
 0x214   : > { %v7263_v6 = vpop.eup %7262  ;;  %7282 = vrcp.f32 %v2905_v24  ;;  %vm4441_vm15 = vcmp.ge.f32.partialorder %v11113_v60, 0.0  ;;  %vm4442_vm0 = vcmp.ge.f32.partialorder %v11116_v13, 0.0  ;;  %v869_v9 = vand.u32 2147483647, %v11244_v28  ;;  %v11283_v37 = vld [vmem:[%s8712_s30 + $0x6f0] sm:$0xff]  ;;  %v11296_v49 = vld [vmem:[%s8712_s30 + $0x6f8] sm:$0xff] }
 0x215   : > { %v7265_v59 = vpop.eup %7264  ;;  %v4948_v12 = vmul.f32 %v7263_v6, %v11154_v47  ;;  %7284 = vrcp.f32 %v2906_v22  ;;  %v1379_v34 = vsub.f32 0.0, %v867_v0  ;;  %v2106_v17 = vmul.f32 1.442695, %v1378_v62 }
 0x216   : > { %v7267_v31 = vpop.eup %7266  ;;  %v4949_v1 = vmul.f32 %v7265_v59, %v11162_v35  ;;  %7286 = vpow2.f32 %v2102_v23  ;;  %v1380_v33 = vsub.f32 0.0, %v868_v63  ;;  %v870_v7 = vand.u32 2147483647, %v11253_v45 }
 0x217   : > { %v11238_v29 = vpop.eup %7268  ;;  %v5460_v47 = vsel %vm4436_vm10, %v7263_v6, %v4948_v12  ;;  %v4950_v26 = vmul.f32 %v7267_v31, %v11168_v2  ;;  %7288 = vpow2.f32 %v2104_v18  ;;  %v2108_v32 = vmul.f32 1.442695, %v1379_v34 }
 0x218   : > { %v11246_v30 = vpop.eup %7270  ;;  %5972 = vst [vmem:[%s8863_s17 + $0x650] sm:$0xff] %v5460_v47  ;;  %v5461_v35 = vsel %vm4437_vm11, %v7265_v59, %v4949_v1  ;;  %v2907_v56 = vadd.f32 1.0, %v11238_v29  ;;  %v2110_v19 = vmul.f32 1.442695, %v1380_v33  ;;  %v1381_v40 = vsub.f32 0.0, %v869_v9  ;;  %v11314_v47 = vld [vmem:[%s8712_s30 + $0x708] sm:$0xff] }
 0x219   : > { %v7273_v44 = vpop.eup %7272  ;;  %5973 = vst [vmem:[%s8863_s17 + $0x658] sm:$0xff] %v5461_v35  ;;  %v5462_v2 = vsel %vm4438_vm12, %v7267_v31, %v4950_v26  ;;  %v2908_v51 = vadd.f32 1.0, %v11246_v30  ;;  %v1382_v54 = vsub.f32 0.0, %v870_v7  ;;  %vm4443_vm1 = vcmp.ge.f32.partialorder %v11130_v55, 0.0  ;;  %v11304_v31 = vld [vmem:[%s8712_s30 + $0x700] sm:$0xff] }
 0x21a   : > { %v7275_v16 = vpop.eup %7274  ;;  %5974 = vst [vmem:[%s8863_s17 + $0x660] sm:$0xff] %v5462_v2  ;;  %v4951_v41 = vmul.f32 %v7273_v44, %v11183_v39  ;;  %7290 = vrcp.f32 %v2907_v56  ;;  %v2112_v25 = vmul.f32 1.442695, %v1381_v40  ;;  %vm4444_vm2 = vcmp.ge.f32.partialorder %v11139_v48, 0.0 }
 0x21b   : > { %v11264_v5 = vpop.eup %7276  ;;  %v4952_v50 = vmul.f32 %v7275_v16, %v11191_v3  ;;  %7292 = vrcp.f32 %v2908_v51  ;;  %v871_v38 = vand.u32 2147483647, %v11274_v53  ;;  %v2114_v6 = vmul.f32 1.442695, %v1382_v54 }
 0x21c   : > { %v11268_v8 = vpop.eup %7278  ;;  %v5463_v39 = vsel %vm4439_vm13, %v7273_v44, %v4951_v41  ;;  %v2909_v11 = vadd.f32 1.0, %v11264_v5  ;;  %7294 = vpow2.f32 %v2106_v17  ;;  %v872_v18 = vand.u32 2147483647, %v11283_v37 }
 0x21d   : > { %v11276_v61 = vpop.eup %7280  ;;  %5975 = vst [vmem:[%s8863_s17 + $0x668] sm:$0xff] %v5463_v39  ;;  %v5464_v3 = vsel %vm4440_vm14, %v7275_v16, %v4952_v50  ;;  %v2910_v36 = vadd.f32 1.0, %v11268_v8  ;;  %7296 = vpow2.f32 %v2108_v32  ;;  %v1383_v0 = vsub.f32 0.0, %v871_v38  ;;  %v11325_v32 = vld [vmem:[%s8712_s30 + $0x710] sm:$0xff] }
 0x21e   : > { %v7283_v43 = vpop.eup %7282  ;;  %5976 = vst [vmem:[%s8863_s17 + $0x670] sm:$0xff] %v5464_v3  ;;  %7298 = vrcp.f32 %v2909_v11  ;;  %v2911_v42 = vadd.f32 1.0, %v11276_v61  ;;  %v1384_v62 = vsub.f32 0.0, %v872_v18  ;;  %vm4445_vm3 = vcmp.ge.f32.partialorder %v11147_v4, 0.0  ;;  %v11341_v3 = vld [vmem:[%s8712_s30 + $0x718] sm:$0xff] }
 0x21f   : > { %v7285_v24 = vpop.eup %7284  ;;  %v4953_v10 = vmul.f32 %v7283_v43, %v11209_v14  ;;  %7300 = vrcp.f32 %v2910_v36  ;;  %v2116_v60 = vmul.f32 1.442695, %v1383_v0  ;;  %v873_v63 = vand.u32 2147483647, %v11296_v49  ;;  %v11368_v0 = vld [vmem:[%s8712_s30 + $0x728] sm:$0xff] }
 0x220   : > { %v11291_v22 = vpop.eup %7286  ;;  %v4954_v23 = vmul.f32 %v7285_v24, %v11216_v21  ;;  %7302 = vrcp.f32 %v2911_v42  ;;  %vm4446_vm4 = vcmp.ge.f32.partialorder %v11160_v52, 0.0  ;;  %v2118_v13 = vmul.f32 1.442695, %v1384_v62  ;;  %v11376_v62 = vld [vmem:[%s8712_s30 + $0x730] sm:$0xff] }
 0x221   : > { %v11298_v59 = vpop.eup %7288  ;;  %v5465_v14 = vsel %vm4441_vm15, %v7283_v43, %v4953_v10  ;;  %v2912_v12 = vadd.f32 1.0, %v11291_v22  ;;  %7304 = vpow2.f32 %v2110_v19  ;;  %v874_v34 = vand.u32 2147483647, %v11304_v31 }
 0x222   : > { %5977 = vst [vmem:[%s8863_s17 + $0x678] sm:$0xff] %v5465_v14  ;;  %v5466_v21 = vsel %vm4442_vm0, %v7285_v24, %v4954_v23  ;;  %v2913_v1 = vadd.f32 1.0, %v11298_v59  ;;  %7306 = vpow2.f32 %v2112_v25  ;;  %vm4447_vm5 = vcmp.ge.f32.partialorder %v11175_v57, 0.0  ;;  %v11358_v23 = vld [vmem:[%s8712_s30 + $0x720] sm:$0xff] }
 0x223   : > { %5978 = vst [vmem:[%s8863_s17 + $0x680] sm:$0xff] %v5466_v21  ;;  %7308 = vrcp.f32 %v2912_v12  ;;  %v1385_v17 = vsub.f32 0.0, %v873_v63  ;;  %v1386_v2 = vsub.f32 0.0, %v874_v34  ;;  %v875_v51 = vand.u32 2147483647, %v11314_v47 }
 0x224   : > { %v7291_v26 = vpop.eup %7290  ;;  %7310 = vrcp.f32 %v2913_v1  ;;  %vm4448_vm6 = vcmp.ge.f32.partialorder %v11189_v20, 0.0  ;;  %v876_v55 = vand.u32 2147483647, %v11325_v32  ;;  %vm4449_vm7 = vcmp.ge.f32.partialorder %v11197_v46, 0.0 }
 0x225   : > { %v7293_v35 = vpop.eup %7292  ;;  %v4955_v56 = vmul.f32 %v7291_v26, %v11238_v29  ;;  %7312 = vpow2.f32 %v2114_v6  ;;  %v2120_v9 = vmul.f32 1.442695, %v1385_v17  ;;  %v2122_v7 = vmul.f32 1.442695, %v1386_v2  ;;  %v11391_v17 = vld [vmem:[%s8712_s30 + $0x738] sm:$0xff] }
 0x226   : > { %v11320_v33 = vpop.eup %7294  ;;  %v4956_v44 = vmul.f32 %v7293_v35, %v11246_v30  ;;  %7314 = vpow2.f32 %v2116_v60  ;;  %v1387_v39 = vsub.f32 0.0, %v875_v51  ;;  %v1388_v25 = vsub.f32 0.0, %v876_v55 }
 0x227   : > { %v11327_v16 = vpop.eup %7296  ;;  %v5467_v29 = vsel %vm4443_vm1, %v7291_v26, %v4955_v56  ;;  %v2914_v41 = vadd.f32 1.0, %v11320_v33  ;;  %7316 = vpow2.f32 %v2118_v13  ;;  %v877_v38 = vand.u32 2147483647, %v11341_v3 }
 0x228   : > { %v7299_v50 = vpop.eup %7298  ;;  %5979 = vst [vmem:[%s8863_s17 + $0x688] sm:$0xff] %v5467_v29  ;;  %v5468_v30 = vsel %vm4444_vm2, %v7293_v35, %v4956_v44  ;;  %v2915_v19 = vadd.f32 1.0, %v11327_v16  ;;  %v2124_v54 = vmul.f32 1.442695, %v1387_v39  ;;  %v2126_v18 = vmul.f32 1.442695, %v1388_v25 }
 0x229   : > { %v7301_v11 = vpop.eup %7300  ;;  %5980 = vst [vmem:[%s8863_s17 + $0x690] sm:$0xff] %v5468_v30  ;;  %v4957_v40 = vmul.f32 %v7299_v50, %v11264_v5  ;;  %7318 = vrcp.f32 %v2914_v41  ;;  %vm4450_vm8 = vcmp.ge.f32.partialorder %v11214_v15, 0.0  ;;  %v1389_v12 = vsub.f32 0.0, %v877_v38  ;;  %v11405_v39 = vld [vmem:[%s8712_s30 + $0x740] sm:$0xff] }
 0x22a   : > { %v7303_v36 = vpop.eup %7302  ;;  %v4958_v48 = vmul.f32 %v7301_v11, %v11268_v8  ;;  %7320 = vrcp.f32 %v2915_v19  ;;  %vm4451_vm9 = vcmp.ge.f32.partialorder %v11223_v27, 0.0  ;;  %v878_v1 = vand.u32 2147483647, %v11358_v23 }
 0x22b   : > { %v11345_v43 = vpop.eup %7304  ;;  %v5469_v5 = vsel %vm4445_vm3, %v7299_v50, %v4957_v40  ;;  %v4959_v42 = vmul.f32 %v7303_v36, %v11276_v61  ;;  %7322 = vpow2.f32 %v2120_v9  ;;  %v2128_v26 = vmul.f32 1.442695, %v1389_v12  ;;  %v11438_v12 = vld [vmem:[%s8712_s30 + $0x758] sm:$0xff] }
 0x22c   : > { %v11350_v24 = vpop.eup %7306  ;;  %5981 = vst [vmem:[%s8863_s17 + $0x698] sm:$0xff] %v5469_v5  ;;  %v5470_v8 = vsel %vm4446_vm4, %v7301_v11, %v4958_v48  ;;  %v2916_v10 = vadd.f32 1.0, %v11345_v43  ;;  %7324 = vpow2.f32 %v2122_v7  ;;  %v1390_v35 = vsub.f32 0.0, %v878_v1 }
 0x22d   : > { %v7309_v4 = vpop.eup %7308  ;;  %5982 = vst [vmem:[%s8863_s17 + $0x6a0] sm:$0xff] %v5470_v8  ;;  %v5471_v61 = vsel %vm4447_vm5, %v7303_v36, %v4959_v42  ;;  %v2917_v6 = vadd.f32 1.0, %v11350_v24  ;;  %7326 = vpow2.f32 %v2124_v54  ;;  %v879_v56 = vand.u32 2147483647, %v11368_v0  ;;  %v11413_v36 = vld [vmem:[%s8712_s30 + $0x748] sm:$0xff] }
 0x22e   : > { %v7311_v52 = vpop.eup %7310  ;;  %5983 = vst [vmem:[%s8863_s17 + $0x6a8] sm:$0xff] %v5471_v61  ;;  %v4960_v14 = vmul.f32 %v7309_v4, %v11291_v22  ;;  %7328 = vrcp.f32 %v2916_v10  ;;  %vm4452_vm10 = vcmp.ge.f32.partialorder %v11229_v58, 0.0  ;;  %v880_v44 = vand.u32 2147483647, %v11376_v62 }
 0x22f   : > { %v11370_v21 = vpop.eup %7312  ;;  %v4961_v57 = vmul.f32 %v7311_v52, %v11298_v59  ;;  %7330 = vrcp.f32 %v2917_v6  ;;  %vm4453_vm11 = vcmp.ge.f32.partialorder %v11244_v28, 0.0  ;;  %v2130_v46 = vmul.f32 1.442695, %v1390_v35 }
 0x230   : > { %v11378_v22 = vpop.eup %7314  ;;  %v5472_v60 = vsel %vm4448_vm6, %v7309_v4, %v4960_v14  ;;  %v2918_v63 = vadd.f32 1.0, %v11370_v21  ;;  %7332 = vpow2.f32 %v2126_v18  ;;  %v1391_v51 = vsub.f32 0.0, %v879_v56  ;;  %v11428_v4 = vld [vmem:[%s8712_s30 + $0x750] sm:$0xff]  ;;  %v11450_v56 = vld [vmem:[%s8712_s30 + $0x760] sm:$0xff] }
 0x231   : > { %v11383_v13 = vpop.eup %7316  ;;  %5984 = vst [vmem:[%s8863_s17 + $0x6b0] sm:$0xff] %v5472_v60  ;;  %v5473_v59 = vsel %vm4449_vm7, %v7311_v52, %v4961_v57  ;;  %v2919_v34 = vadd.f32 1.0, %v11378_v22  ;;  %v1392_v9 = vsub.f32 0.0, %v880_v44  ;;  %v881_v50 = vand.u32 2147483647, %v11391_v17 }
 0x232   : > { %5985 = vst [vmem:[%s8863_s17 + $0x6b8] sm:$0xff] %v5473_v59  ;;  %7334 = vrcp.f32 %v2918_v63  ;;  %v2920_v20 = vadd.f32 1.0, %v11383_v13  ;;  %vm4454_vm12 = vcmp.ge.f32.partialorder %v11253_v45, 0.0  ;;  %v2132_v7 = vmul.f32 1.442695, %v1391_v51 }
 0x233   : > { %v7319_v2 = vpop.eup %7318  ;;  %7336 = vrcp.f32 %v2919_v34  ;;  %v2134_v55 = vmul.f32 1.442695, %v1392_v9  ;;  %v1393_v5 = vsub.f32 0.0, %v881_v50  ;;  %vm4455_vm13 = vcmp.ge.f32.partialorder %v11274_v53, 0.0 }
 0x234   : > { %v7321_v29 = vpop.eup %7320  ;;  %v4962_v41 = vmul.f32 %v7319_v2, %v11320_v33  ;;  %7338 = vrcp.f32 %v2920_v20  ;;  %v882_v25 = vand.u32 2147483647, %v11405_v39  ;;  %v883_v38 = vand.u32 2147483647, %v11413_v36 }
 0x235   : > { %v11400_v30 = vpop.eup %7322  ;;  %v4963_v19 = vmul.f32 %v7321_v29, %v11327_v16  ;;  %7340 = vpow2.f32 %v2128_v26  ;;  %v2136_v27 = vmul.f32 1.442695, %v1393_v5  ;;  %vm4456_vm14 = vcmp.ge.f32.partialorder %v11283_v37, 0.0 }
 0x236   : > { %v11407_v11 = vpop.eup %7324  ;;  %v5474_v33 = vsel %vm4450_vm8, %v7319_v2, %v4962_v41  ;;  %v2921_v40 = vadd.f32 1.0, %v11400_v30  ;;  %7342 = vpow2.f32 %v2130_v46  ;;  %v1394_v18 = vsub.f32 0.0, %v882_v25 }
 0x237   : > { %v11415_v48 = vpop.eup %7326  ;;  %5986 = vst [vmem:[%s8863_s17 + $0x6c0] sm:$0xff] %v5474_v33  ;;  %v5475_v16 = vsel %vm4451_vm9, %v7321_v29, %v4963_v19  ;;  %v2922_v54 = vadd.f32 1.0, %v11407_v11  ;;  %7344 = vpow2.f32 %v2132_v7  ;;  %v1395_v14 = vsub.f32 0.0, %v883_v38  ;;  %v11476_v19 = vld [vmem:[%s8712_s30 + $0x770] sm:$0xff] }
 0x238   : > { %v7329_v42 = vpop.eup %7328  ;;  %5987 = vst [vmem:[%s8863_s17 + $0x6c8] sm:$0xff] %v5475_v16  ;;  %7346 = vrcp.f32 %v2921_v40  ;;  %v2923_v15 = vadd.f32 1.0, %v11415_v48  ;;  %v2138_v1 = vmul.f32 1.442695, %v1394_v18  ;;  %v884_v60 = vand.u32 2147483647, %v11428_v4 }
 0x239   : > { %v7331_v8 = vpop.eup %7330  ;;  %v4964_v10 = vmul.f32 %v7329_v42, %v11345_v43  ;;  %7348 = vrcp.f32 %v2922_v54  ;;  %vm4457_vm15 = vcmp.ge.f32.partialorder %v11296_v49, 0.0  ;;  %v2140_v26 = vmul.f32 1.442695, %v1395_v14 }
 0x23a   : > { %v11430_v61 = vpop.eup %7332  ;;  %v4965_v6 = vmul.f32 %v7331_v8, %v11350_v24  ;;  %7350 = vrcp.f32 %v2923_v15  ;;  %v1396_v28 = vsub.f32 0.0, %v884_v60  ;;  %v885_v35 = vand.u32 2147483647, %v11438_v12 }
 0x23b   : > { %v5476_v52 = vsel %vm4452_vm10, %v7329_v42, %v4964_v10  ;;  %v2924_v43 = vadd.f32 1.0, %v11430_v61  ;;  %7352 = vpow2.f32 %v2134_v55  ;;  %vm4458_vm0 = vcmp.ge.f32.partialorder %v11304_v31, 0.0 }
 0x23c   : > { %v7335_v57 = vpop.eup %7334  ;;  %5988 = vst [vmem:[%s8863_s17 + $0x6d0] sm:$0xff] %v5476_v52  ;;  %v5477_v24 = vsel %vm4453_vm11, %v7331_v8, %v4965_v6  ;;  %7354 = vpow2.f32 %v2136_v27  ;;  %vm4459_vm1 = vcmp.ge.f32.partialorder %v11314_v47, 0.0  ;;  %v1397_v51 = vsub.f32 0.0, %v885_v35  ;;  %v11491_v27 = vld [vmem:[%s8712_s30 + $0x778] sm:$0xff]  ;;  %v11513_v47 = vld [vmem:[%s8712_s30 + $0x788] sm:$0xff] }
 0x23d   : > { %v7337_v63 = vpop.eup %7336  ;;  %5989 = vst [vmem:[%s8863_s17 + $0x6d8] sm:$0xff] %v5477_v24  ;;  %v4966_v58 = vmul.f32 %v7335_v57, %v11370_v21  ;;  %7356 = vrcp.f32 %v2924_v43  ;;  %v2142_v9 = vmul.f32 1.442695, %v1396_v28  ;;  %v886_v50 = vand.u32 2147483647, %v11450_v56  ;;  %v11510_v24 = vld [vmem:[%s8712_s30 + $0x780] sm:$0xff] }
 0x23e   : > { %v7339_v59 = vpop.eup %7338  ;;  %v4967_v34 = vmul.f32 %v7337_v63, %v11378_v22  ;;  %7358 = vpow2.f32 %v2138_v1  ;;  %v11459_v22 = vld [vmem:[%s8712_s30 + $0x768] sm:$0xff]  ;;  %v2144_v33 = vmul.f32 1.442695, %v1397_v51  ;;  %vm4460_vm2 = vcmp.ge.f32.partialorder %v11325_v32, 0.0 }
 0x23f   : > { %v11452_v20 = vpop.eup %7340  ;;  %v5478_v21 = vsel %vm4454_vm12, %v7335_v57, %v4966_v58  ;;  %v4968_v44 = vmul.f32 %v7339_v59, %v11383_v13  ;;  %7360 = vpow2.f32 %v2140_v26  ;;  %v887_v40 = vand.u32 2147483647, %v11459_v22  ;;  %v11520_v58 = vld [vmem:[%s8712_s30 + $0x790] sm:$0xff] }
 0x240   : > { %v11461_v2 = vpop.eup %7342  ;;  %5990 = vst [vmem:[%s8863_s17 + $0x6e0] sm:$0xff] %v5478_v21  ;;  %v5479_v46 = vsel %vm4455_vm13, %v7337_v63, %v4967_v34  ;;  %v2925_v45 = vadd.f32 1.0, %v11452_v20  ;;  %v1398_v16 = vsub.f32 0.0, %v886_v50  ;;  %v888_v15 = vand.u32 2147483647, %v11476_v19 }
 0x241   : > { %v11468_v29 = vpop.eup %7344  ;;  %5991 = vst [vmem:[%s8863_s17 + $0x6e8] sm:$0xff] %v5479_v46  ;;  %v5480_v13 = vsel %vm4456_vm14, %v7339_v59, %v4968_v44  ;;  %v2926_v41 = vadd.f32 1.0, %v11461_v2  ;;  %v1399_v42 = vsub.f32 0.0, %v887_v40  ;;  %vm4461_vm3 = vcmp.ge.f32.partialorder %v11341_v3, 0.0  ;;  %v11544_v40 = vld [vmem:[%s8712_s30 + $0x7a0] sm:$0xff] }
 0x242   : > { %v7347_v53 = vpop.eup %7346  ;;  %5992 = vst [vmem:[%s8863_s17 + $0x6f0] sm:$0xff] %v5480_v13  ;;  %7362 = vrcp.f32 %v2925_v45  ;;  %v2927_v7 = vadd.f32 1.0, %v11468_v29  ;;  %v2146_v10 = vmul.f32 1.442695, %v1398_v16  ;;  %v1400_v43 = vsub.f32 0.0, %v888_v15  ;;  %v11533_v13 = vld [vmem:[%s8712_s30 + $0x798] sm:$0xff] }
 0x243   : > { %v7349_v55 = vpop.eup %7348  ;;  %v4969_v37 = vmul.f32 %v7347_v53, %v11400_v30  ;;  %7364 = vrcp.f32 %v2926_v41  ;;  %v2148_v49 = vmul.f32 1.442695, %v1399_v42  ;;  %v889_v57 = vand.u32 2147483647, %v11491_v27 }
 0x244   : > { %v7351_v54 = vpop.eup %7350  ;;  %v4970_v5 = vmul.f32 %v7349_v55, %v11407_v11  ;;  %7366 = vrcp.f32 %v2927_v7  ;;  %vm4462_vm4 = vcmp.ge.f32.partialorder %v11358_v23, 0.0  ;;  %v2150_v63 = vmul.f32 1.442695, %v1400_v43 }
 0x245   : > { %v11485_v25 = vpop.eup %7352  ;;  %v5481_v8 = vsel %vm4457_vm15, %v7347_v53, %v4969_v37  ;;  %v4971_v30 = vmul.f32 %v7351_v54, %v11415_v48  ;;  %7368 = vpow2.f32 %v2142_v9  ;;  %v1401_v59 = vsub.f32 0.0, %v889_v57 }
 0x246   : > { %v11493_v38 = vpop.eup %7354  ;;  %5993 = vst [vmem:[%s8863_s17 + $0x6f8] sm:$0xff] %v5481_v8  ;;  %v5482_v11 = vsel %vm4458_vm0, %v7349_v55, %v4970_v5  ;;  %v2928_v6 = vadd.f32 1.0, %v11485_v25  ;;  %7370 = vpow2.f32 %v2144_v33  ;;  %vm4463_vm5 = vcmp.ge.f32.partialorder %v11368_v0, 0.0 }
 0x247   : > { %v7357_v18 = vpop.eup %7356  ;;  %5994 = vst [vmem:[%s8863_s17 + $0x700] sm:$0xff] %v5482_v11  ;;  %v5483_v48 = vsel %vm4459_vm1, %v7351_v54, %v4971_v30  ;;  %v2929_v52 = vadd.f32 1.0, %v11493_v38  ;;  %7372 = vpow2.f32 %v2146_v10  ;;  %v890_v34 = vand.u32 2147483647, %v11510_v24  ;;  %v11554_v54 = vld [vmem:[%s8712_s30 + $0x7a8] sm:$0xff] }
 0x248   : > { %v11503_v14 = vpop.eup %7358  ;;  %5995 = vst [vmem:[%s8863_s17 + $0x708] sm:$0xff] %v5483_v48  ;;  %v4972_v31 = vmul.f32 %v7357_v18, %v11430_v61  ;;  %7374 = vrcp.f32 %v2928_v6  ;;  %v891_v28 = vand.u32 2147483647, %v11513_v47  ;;  %vm4464_vm6 = vcmp.ge.f32.partialorder %v11376_v62, 0.0 }
 0x249   : > { %v11515_v1 = vpop.eup %7360  ;;  %7376 = vrcp.f32 %v2929_v52  ;;  %v2930_v60 = vadd.f32 1.0, %v11503_v14  ;;  %v2152_v21 = vmul.f32 1.442695, %v1401_v59  ;;  %v892_v32 = vand.u32 2147483647, %v11520_v58 }
 0x24a   : > { %v5484_v61 = vsel %vm4460_vm2, %v7357_v18, %v4972_v31  ;;  %v2931_v26 = vadd.f32 1.0, %v11515_v1  ;;  %7378 = vpow2.f32 %v2148_v49  ;;  %v1402_v45 = vsub.f32 0.0, %v890_v34 }
 0x24b   : > { %5996 = vst [vmem:[%s8863_s17 + $0x710] sm:$0xff] %v5484_v61  ;;  %7380 = vrcp.f32 %v2930_v60  ;;  %v1403_v51 = vsub.f32 0.0, %v891_v28  ;;  %vm4465_vm7 = vcmp.ge.f32.partialorder %v11391_v17, 0.0  ;;  %v1404_v50 = vsub.f32 0.0, %v892_v32  ;;  %v11575_v60 = vld [vmem:[%s8712_s30 + $0x7b0] sm:$0xff]  ;;  %v11587_v28 = vld [vmem:[%s8712_s30 + $0x7b8] sm:$0xff] }
 0x24c   : > { %v7363_v35 = vpop.eup %7362  ;;  %7382 = vrcp.f32 %v2931_v26  ;;  %vm4466_vm8 = vcmp.ge.f32.partialorder %v11405_v39, 0.0  ;;  %v2154_v33 = vmul.f32 1.442695, %v1402_v45  ;;  %v893_v3 = vand.u32 2147483647, %v11533_v13  ;;  %v11596_v32 = vld [vmem:[%s8712_s30 + $0x7c0] sm:$0xff] }
 0x24d   : > { %v7365_v44 = vpop.eup %7364  ;;  %v4973_v46 = vmul.f32 %v7363_v35, %v11452_v20  ;;  %7384 = vpow2.f32 %v2150_v63  ;;  %v2156_v16 = vmul.f32 1.442695, %v1403_v51  ;;  %v2158_v15 = vmul.f32 1.442695, %v1404_v50 }
 0x24e   : > { %v7367_v41 = vpop.eup %7366  ;;  %v4974_v9 = vmul.f32 %v7365_v44, %v11461_v2  ;;  %7386 = vpow2.f32 %v2152_v21  ;;  %v1405_v30 = vsub.f32 0.0, %v893_v3  ;;  %v894_v10 = vand.u32 2147483647, %v11544_v40 }
 0x24f   : > { %v11537_v53 = vpop.eup %7368  ;;  %v5485_v20 = vsel %vm4461_vm3, %v7363_v35, %v4973_v46  ;;  %v4975_v7 = vmul.f32 %v7367_v41, %v11468_v29  ;;  %7388 = vpow2.f32 %v2154_v33  ;;  %vm4467_vm9 = vcmp.ge.f32.partialorder %v11413_v36, 0.0 }
 0x250   : > { %v11546_v2 = vpop.eup %7370  ;;  %5997 = vst [vmem:[%s8863_s17 + $0x718] sm:$0xff] %v5485_v20  ;;  %v5486_v55 = vsel %vm4462_vm4, %v7365_v44, %v4974_v9  ;;  %v2932_v37 = vadd.f32 1.0, %v11537_v53  ;;  %v895_v0 = vand.u32 2147483647, %v11554_v54  ;;  %v2160_v48 = vmul.f32 1.442695, %v1405_v30 }
 0x251   : > { %v11556_v29 = vpop.eup %7372  ;;  %5998 = vst [vmem:[%s8863_s17 + $0x720] sm:$0xff] %v5486_v55  ;;  %v5487_v5 = vsel %vm4463_vm5, %v7367_v41, %v4975_v7  ;;  %v2933_v42 = vadd.f32 1.0, %v11546_v2  ;;  %v1406_v52 = vsub.f32 0.0, %v894_v10  ;;  %vm4468_vm10 = vcmp.ge.f32.partialorder %v11428_v4, 0.0  ;;  %v11615_v9 = vld [vmem:[%s8712_s30 + $0x7d0] sm:$0xff] }
 0x252   : > { %v7375_v8 = vpop.eup %7374  ;;  %5999 = vst [vmem:[%s8863_s17 + $0x728] sm:$0xff] %v5487_v5  ;;  %7390 = vrcp.f32 %v2932_v37  ;;  %v2934_v23 = vadd.f32 1.0, %v11556_v29  ;;  %v1407_v57 = vsub.f32 0.0, %v895_v0  ;;  %v896_v21 = vand.u32 2147483647, %v11575_v60 }
 0x253   : > { %v7377_v11 = vpop.eup %7376  ;;  %v4976_v6 = vmul.f32 %v7375_v8, %v11485_v25  ;;  %7392 = vrcp.f32 %v2933_v42  ;;  %v2162_v62 = vmul.f32 1.442695, %v1406_v52  ;;  %vm4469_vm11 = vcmp.ge.f32.partialorder %v11438_v12, 0.0 }
 0x254   : > { %v11568_v49 = vpop.eup %7378  ;;  %v4977_v18 = vmul.f32 %v7377_v11, %v11493_v38  ;;  %7394 = vrcp.f32 %v2934_v23  ;;  %v2164_v34 = vmul.f32 1.442695, %v1407_v57  ;;  %vm4470_vm12 = vcmp.ge.f32.partialorder %v11450_v56, 0.0 }
 0x255   : > { %v7381_v43 = vpop.eup %7380  ;;  %v5488_v31 = vsel %vm4464_vm6, %v7375_v8, %v4976_v6  ;;  %v2935_v25 = vadd.f32 1.0, %v11568_v49  ;;  %7396 = vpow2.f32 %v2156_v16  ;;  %v1408_v39 = vsub.f32 0.0, %v896_v21 }
 0x256   : > { %v7383_v63 = vpop.eup %7382  ;;  %6000 = vst [vmem:[%s8863_s17 + $0x730] sm:$0xff] %v5488_v31  ;;  %v5489_v38 = vsel %vm4465_vm7, %v7377_v11, %v4977_v18  ;;  %v4978_v61 = vmul.f32 %v7381_v43, %v11503_v14  ;;  %7398 = vpow2.f32 %v2158_v15  ;;  %v897_v45 = vand.u32 2147483647, %v11587_v28  ;;  %v11628_v11 = vld [vmem:[%s8712_s30 + $0x7d8] sm:$0xff] }
 0x257   : > { %v11581_v26 = vpop.eup %7384  ;;  %6001 = vst [vmem:[%s8863_s17 + $0x738] sm:$0xff] %v5489_v38  ;;  %v4979_v59 = vmul.f32 %v7383_v63, %v11515_v1  ;;  %7400 = vrcp.f32 %v2935_v25  ;;  %v11599_v1 = vld [vmem:[%s8712_s30 + $0x7c8] sm:$0xff]  ;;  %vm4471_vm13 = vcmp.ge.f32.partialorder %v11459_v22, 0.0  ;;  %v898_v36 = vand.u32 2147483647, %v11596_v32  ;;  %v11647_v25 = vld [vmem:[%s8712_s30 + $0x7e0] sm:$0xff] }
 0x258   : > { %v11589_v17 = vpop.eup %7386  ;;  %v5490_v14 = vsel %vm4466_vm8, %v7381_v43, %v4978_v61  ;;  %v2936_v35 = vadd.f32 1.0, %v11581_v26  ;;  %7402 = vpow2.f32 %v2160_v48  ;;  %v899_v41 = vand.u32 2147483647, %v11599_v1  ;;  %v11654_v38 = vld [vmem:[%s8712_s30 + $0x7e8] sm:$0xff] }
 0x259   : > { %6002 = vst [vmem:[%s8863_s17 + $0x740] sm:$0xff] %v5490_v14  ;;  %v5491_v44 = vsel %vm4467_vm9, %v7383_v63, %v4979_v59  ;;  %v2937_v46 = vadd.f32 1.0, %v11589_v17  ;;  %7404 = vpow2.f32 %v2162_v62  ;;  %v11609_v51 = vpop.eup %7388  ;;  %v2166_v7 = vmul.f32 1.442695, %v1408_v39  ;;  %v11668_v39 = vld [vmem:[%s8712_s30 + $0x7f0] sm:$0xff] }
 0x25a   : > { %6003 = vst [vmem:[%s8863_s17 + $0x748] sm:$0xff] %v5491_v44  ;;  %7406 = vrcp.f32 %v2936_v35  ;;  %v2938_v20 = vadd.f32 1.0, %v11609_v51  ;;  %v1409_v33 = vsub.f32 0.0, %v897_v45  ;;  %vm4472_vm14 = vcmp.ge.f32.partialorder %v11476_v19, 0.0 }
 0x25b   : > { %7408 = vrcp.f32 %v2937_v46  ;;  %v1410_v16 = vsub.f32 0.0, %v898_v36  ;;  %v1411_v3 = vsub.f32 0.0, %v899_v41  ;;  %v900_v8 = vand.u32 2147483647, %v11615_v9  ;;  %v11674_v41 = vld [vmem:[%s8712_s30 + $0x7f8] sm:$0xff] }
 0x25c   : > { %v7391_v50 = vpop.eup %7390  ;;  %7410 = vpow2.f32 %v2164_v34  ;;  %v2168_v15 = vmul.f32 1.442695, %v1409_v33  ;;  %vm4473_vm15 = vcmp.ge.f32.partialorder %v11491_v27, 0.0  ;;  %v901_v31 = vand.u32 2147483647, %v11628_v11 }
 0x25d   : > { %v7393_v55 = vpop.eup %7392  ;;  %v4980_v37 = vmul.f32 %v7391_v50, %v11537_v53  ;;  %7412 = vrcp.f32 %v2938_v20  ;;  %v2170_v10 = vmul.f32 1.442695, %v1410_v16  ;;  %v2172_v18 = vmul.f32 1.442695, %v1411_v3 }
 0x25e   : > { %v7395_v5 = vpop.eup %7394  ;;  %v4981_v42 = vmul.f32 %v7393_v55, %v11546_v2  ;;  %7414 = vpow2.f32 %v2166_v7  ;;  %v1412_v52 = vsub.f32 0.0, %v900_v8  ;;  %vm4474_vm0 = vcmp.ge.f32.partialorder %v11510_v24, 0.0 }
 0x25f   : > { %v11622_v23 = vpop.eup %7396  ;;  %v5492_v30 = vsel %vm4468_vm10, %v7391_v50, %v4980_v37  ;;  %v4982_v53 = vmul.f32 %v7395_v5, %v11556_v29  ;;  %7416 = vpow2.f32 %v2168_v15  ;;  %v1413_v59 = vsub.f32 0.0, %v901_v31  ;;  %v11686_v37 = vld [vmem:[%s8712_s30 + $0x800] sm:$0xff] }
 0x260   : > { %v11630_v6 = vpop.eup %7398  ;;  %6004 = vst [vmem:[%s8863_s17 + $0x750] sm:$0xff] %v5492_v30  ;;  %v5493_v2 = vsel %vm4469_vm11, %v7393_v55, %v4981_v42  ;;  %v2939_v0 = vadd.f32 1.0, %v11622_v23  ;;  %7418 = vpow2.f32 %v2170_v10  ;;  %v2174_v63 = vmul.f32 1.442695, %v1412_v52 }
 0x261   : > { %v7401_v4 = vpop.eup %7400  ;;  %6005 = vst [vmem:[%s8863_s17 + $0x758] sm:$0xff] %v5493_v2  ;;  %v5494_v29 = vsel %vm4470_vm12, %v7395_v5, %v4982_v53  ;;  %v2940_v48 = vadd.f32 1.0, %v11630_v6  ;;  %vm4475_vm1 = vcmp.ge.f32.partialorder %v11513_v47, 0.0  ;;  %v902_v35 = vand.u32 2147483647, %v11647_v25 }
 0x262   : > { %v11640_v43 = vpop.eup %7402  ;;  %6006 = vst [vmem:[%s8863_s17 + $0x760] sm:$0xff] %v5494_v29  ;;  %v4983_v12 = vmul.f32 %v7401_v4, %v11568_v49  ;;  %7420 = vrcp.f32 %v2939_v0  ;;  %v2176_v44 = vmul.f32 1.442695, %v1413_v59  ;;  %v903_v46 = vand.u32 2147483647, %v11654_v38 }
 0x263   : > { %v11649_v56 = vpop.eup %7404  ;;  %7422 = vrcp.f32 %v2940_v48  ;;  %v2941_v57 = vadd.f32 1.0, %v11640_v43  ;;  %v1414_v36 = vsub.f32 0.0, %v902_v35  ;;  %vm4476_vm2 = vcmp.ge.f32.partialorder %v11520_v58, 0.0 }
 0x264   : > { %v7407_v61 = vpop.eup %7406  ;;  %v5495_v49 = vsel %vm4471_vm13, %v7401_v4, %v4983_v12  ;;  %v2942_v62 = vadd.f32 1.0, %v11649_v56  ;;  %7424 = vpow2.f32 %v2172_v18  ;;  %v1415_v20 = vsub.f32 0.0, %v903_v46  ;;  %v11704_v4 = vld [vmem:[%s8712_s30 + $0x808] sm:$0xff] }
 0x265   : > { %v7409_v34 = vpop.eup %7408  ;;  %6007 = vst [vmem:[%s8863_s17 + $0x768] sm:$0xff] %v5495_v49  ;;  %v4984_v14 = vmul.f32 %v7407_v61, %v11581_v26  ;;  %7426 = vrcp.f32 %v2941_v57  ;;  %v2178_v33 = vmul.f32 1.442695, %v1414_v36  ;;  %v904_v55 = vand.u32 2147483647, %v11668_v39 }
 0x266   : > { %v11663_v21 = vpop.eup %7410  ;;  %v4985_v22 = vmul.f32 %v7409_v34, %v11589_v17  ;;  %7428 = vrcp.f32 %v2942_v62  ;;  %vm4477_vm3 = vcmp.ge.f32.partialorder %v11533_v13, 0.0  ;;  %v2180_v3 = vmul.f32 1.442695, %v1415_v20  ;;  %v11719_v62 = vld [vmem:[%s8712_s30 + $0x810] sm:$0xff]  ;;  %v11750_v20 = vld [vmem:[%s8712_s30 + $0x828] sm:$0xff] }
 0x267   : > { %v5496_v26 = vsel %vm4472_vm14, %v7407_v61, %v4984_v14  ;;  %v2943_v45 = vadd.f32 1.0, %v11663_v21  ;;  %7430 = vpow2.f32 %v2174_v63  ;;  %v7413_v50 = vpop.eup %7412  ;;  %v905_v5 = vand.u32 2147483647, %v11674_v41 }
 0x268   : > { %6008 = vst [vmem:[%s8863_s17 + $0x770] sm:$0xff] %v5496_v26  ;;  %v5497_v17 = vsel %vm4473_vm15, %v7409_v34, %v4985_v22  ;;  %7432 = vpow2.f32 %v2176_v44  ;;  %v11680_v7 = vpop.eup %7414  ;;  %v4986_v19 = vmul.f32 %v7413_v50, %v11609_v51  ;;  %v1416_v8 = vsub.f32 0.0, %v904_v55  ;;  %v11732_v22 = vld [vmem:[%s8712_s30 + $0x818] sm:$0xff] }
 0x269   : > { %6009 = vst [vmem:[%s8863_s17 + $0x778] sm:$0xff] %v5497_v17  ;;  %7434 = vrcp.f32 %v2943_v45  ;;  %v11688_v16 = vpop.eup %7416  ;;  %v2944_v27 = vadd.f32 1.0, %v11680_v7  ;;  %vm4478_vm4 = vcmp.ge.f32.partialorder %v11544_v40, 0.0  ;;  %v1417_v10 = vsub.f32 0.0, %v905_v5  ;;  %v11740_v45 = vld [vmem:[%s8712_s30 + $0x820] sm:$0xff] }
 0x26a   : > { %v11693_v42 = vpop.eup %7418  ;;  %v5498_v51 = vsel %vm4474_vm0, %v7413_v50, %v4986_v19  ;;  %v2945_v15 = vadd.f32 1.0, %v11688_v16  ;;  %7436 = vpow2.f32 %v2178_v33  ;;  %v2182_v24 = vmul.f32 1.442695, %v1416_v8 }
 0x26b   : > { %6010 = vst [vmem:[%s8863_s17 + $0x780] sm:$0xff] %v5498_v51  ;;  %7438 = vrcp.f32 %v2944_v27  ;;  %v2946_v53 = vadd.f32 1.0, %v11693_v42  ;;  %v906_v18 = vand.u32 2147483647, %v11686_v37  ;;  %vm4479_vm5 = vcmp.ge.f32.partialorder %v11554_v54, 0.0 }
 0x26c   : > { %v7421_v30 = vpop.eup %7420  ;;  %7440 = vrcp.f32 %v2945_v15  ;;  %v2184_v52 = vmul.f32 1.442695, %v1417_v10  ;;  %v907_v49 = vand.u32 2147483647, %v11704_v4  ;;  %vm4480_vm6 = vcmp.ge.f32.partialorder %v11575_v60, 0.0 }
 0x26d   : > { %v7423_v2 = vpop.eup %7422  ;;  %v4987_v0 = vmul.f32 %v7421_v30, %v11622_v23  ;;  %7442 = vrcp.f32 %v2946_v53  ;;  %v1418_v57 = vsub.f32 0.0, %v906_v18  ;;  %v908_v26 = vand.u32 2147483647, %v11719_v62 }
 0x26e   : > { %v11706_v29 = vpop.eup %7424  ;;  %v4988_v48 = vmul.f32 %v7423_v2, %v11630_v6  ;;  %7444 = vpow2.f32 %v2180_v3  ;;  %v1419_v35 = vsub.f32 0.0, %v907_v49  ;;  %vm4481_vm7 = vcmp.ge.f32.partialorder %v11587_v28, 0.0  ;;  %v11794_v49 = vld [vmem:[%s8712_s30 + $0x840] sm:$0xff] }
 0x26f   : > { %v7427_v12 = vpop.eup %7426  ;;  %v5499_v23 = vsel %vm4475_vm1, %v7421_v30, %v4987_v0  ;;  %v2947_v31 = vadd.f32 1.0, %v11706_v29  ;;  %7446 = vpow2.f32 %v2182_v24  ;;  %v2186_v58 = vmul.f32 1.442695, %v1418_v57  ;;  %v11767_v0 = vld [vmem:[%s8712_s30 + $0x830] sm:$0xff] }
 0x270   : > { %v7429_v63 = vpop.eup %7428  ;;  %6011 = vst [vmem:[%s8863_s17 + $0x788] sm:$0xff] %v5499_v23  ;;  %v5500_v61 = vsel %vm4476_vm2, %v7423_v2, %v4988_v48  ;;  %v4989_v6 = vmul.f32 %v7427_v12, %v11640_v43  ;;  %v2188_v36 = vmul.f32 1.442695, %v1419_v35  ;;  %vm4482_vm8 = vcmp.ge.f32.partialorder %v11596_v32, 0.0 }
 0x271   : > { %v11721_v47 = vpop.eup %7430  ;;  %6012 = vst [vmem:[%s8863_s17 + $0x790] sm:$0xff] %v5500_v61  ;;  %v4990_v59 = vmul.f32 %v7429_v63, %v11649_v56  ;;  %7448 = vrcp.f32 %v2947_v31  ;;  %v1420_v40 = vsub.f32 0.0, %v908_v26  ;;  %v909_v17 = vand.u32 2147483647, %v11732_v22 }
 0x272   : > { %v11726_v34 = vpop.eup %7432  ;;  %v5501_v43 = vsel %vm4477_vm3, %v7427_v12, %v4989_v6  ;;  %v2948_v14 = vadd.f32 1.0, %v11721_v47  ;;  %7450 = vpow2.f32 %v2184_v52  ;;  %v910_v55 = vand.u32 2147483647, %v11740_v45  ;;  %v11776_v12 = vld [vmem:[%s8712_s30 + $0x838] sm:$0xff] }
 0x273   : > { %v7435_v44 = vpop.eup %7434  ;;  %6013 = vst [vmem:[%s8863_s17 + $0x798] sm:$0xff] %v5501_v43  ;;  %v5502_v56 = vsel %vm4478_vm4, %v7429_v63, %v4990_v59  ;;  %v2949_v46 = vadd.f32 1.0, %v11726_v34  ;;  %7452 = vpow2.f32 %v2186_v58  ;;  %vm4483_vm9 = vcmp.ge.f32.partialorder %v11599_v1, 0.0 }
 0x274   : > { %6014 = vst [vmem:[%s8863_s17 + $0x7a0] sm:$0xff] %v5502_v56  ;;  %v4991_v13 = vmul.f32 %v7435_v44, %v11663_v21  ;;  %7454 = vrcp.f32 %v2948_v14  ;;  %v11745_v50 = vpop.eup %7436  ;;  %v2190_v5 = vmul.f32 1.442695, %v1420_v40  ;;  %v1421_v51 = vsub.f32 0.0, %v909_v17  ;;  %v11813_v17 = vld [vmem:[%s8712_s30 + $0x850] sm:$0xff] }
 0x275   : > { %7456 = vrcp.f32 %v2949_v46  ;;  %v7439_v19 = vpop.eup %7438  ;;  %v2950_v21 = vadd.f32 1.0, %v11745_v50  ;;  %v1422_v54 = vsub.f32 0.0, %v910_v55  ;;  %v911_v30 = vand.u32 2147483647, %v11750_v20 }
 0x276   : > { %v5503_v33 = vsel %vm4479_vm5, %v7435_v44, %v4991_v13  ;;  %7458 = vpow2.f32 %v2188_v36  ;;  %v7441_v27 = vpop.eup %7440  ;;  %v4992_v3 = vmul.f32 %v7439_v19, %v11680_v7  ;;  %v2192_v2 = vmul.f32 1.442695, %v1421_v51  ;;  %v11807_v13 = vld [vmem:[%s8712_s30 + $0x848] sm:$0xff] }
 0x277   : > { %6015 = vst [vmem:[%s8863_s17 + $0x7a8] sm:$0xff] %v5503_v33  ;;  %v7443_v15 = vpop.eup %7442  ;;  %v4993_v8 = vmul.f32 %v7441_v27, %v11688_v16  ;;  %7460 = vrcp.f32 %v2950_v21  ;;  %v2194_v48 = vmul.f32 1.442695, %v1422_v54  ;;  %v1423_v52 = vsub.f32 0.0, %v911_v30  ;;  %v11820_v21 = vld [vmem:[%s8712_s30 + $0x858] sm:$0xff]  ;;  %v11837_v54 = vld [vmem:[%s8712_s30 + $0x860] sm:$0xff] }
 0x278   : > { %v11761_v53 = vpop.eup %7444  ;;  %v5504_v10 = vsel %vm4480_vm6, %v7439_v19, %v4992_v3  ;;  %v4994_v7 = vmul.f32 %v7443_v15, %v11693_v42  ;;  %7462 = vpow2.f32 %v2190_v5  ;;  %vm4484_vm10 = vcmp.ge.f32.partialorder %v11615_v9, 0.0 }
 0x279   : > { %v11769_v24 = vpop.eup %7446  ;;  %6016 = vst [vmem:[%s8863_s17 + $0x7b0] sm:$0xff] %v5504_v10  ;;  %v5505_v16 = vsel %vm4481_vm7, %v7441_v27, %v4993_v8  ;;  %v2951_v18 = vadd.f32 1.0, %v11761_v53  ;;  %7464 = vpow2.f32 %v2192_v2  ;;  %vm4485_vm11 = vcmp.ge.f32.partialorder %v11628_v11, 0.0 }
 0x27a   : > { %6017 = vst [vmem:[%s8863_s17 + $0x7b8] sm:$0xff] %v5505_v16  ;;  %v5506_v42 = vsel %vm4482_vm8, %v7443_v15, %v4994_v7  ;;  %v2952_v23 = vadd.f32 1.0, %v11769_v24  ;;  %v912_v57 = vand.u32 2147483647, %v11767_v0  ;;  %v2196_v61 = vmul.f32 1.442695, %v1423_v52 }
 0x27b   : > { %v7449_v60 = vpop.eup %7448  ;;  %6018 = vst [vmem:[%s8863_s17 + $0x7c0] sm:$0xff] %v5506_v42  ;;  %7466 = vrcp.f32 %v2951_v18  ;;  %v913_v6 = vand.u32 2147483647, %v11776_v12  ;;  %vm4486_vm12 = vcmp.ge.f32.partialorder %v11647_v25, 0.0  ;;  %v914_v26 = vand.u32 2147483647, %v11794_v49 }
 0x27c   : > { %v11783_v31 = vpop.eup %7450  ;;  %v4995_v28 = vmul.f32 %v7449_v60, %v11706_v29  ;;  %7468 = vrcp.f32 %v2952_v23  ;;  %v1424_v43 = vsub.f32 0.0, %v912_v57  ;;  %vm4487_vm13 = vcmp.ge.f32.partialorder %v11654_v38, 0.0  ;;  %v11848_v23 = vld [vmem:[%s8712_s30 + $0x868] sm:$0xff] }
 0x27d   : > { %v11789_v63 = vpop.eup %7452  ;;  %v2953_v32 = vadd.f32 1.0, %v11783_v31  ;;  %7470 = vpow2.f32 %v2194_v48  ;;  %v1425_v44 = vsub.f32 0.0, %v913_v6  ;;  %v1426_v33 = vsub.f32 0.0, %v914_v26 }
 0x27e   : > { %v7455_v59 = vpop.eup %7454  ;;  %v5507_v29 = vsel %vm4483_vm9, %v7449_v60, %v4995_v28  ;;  %v2954_v58 = vadd.f32 1.0, %v11789_v63  ;;  %v2198_v46 = vmul.f32 1.442695, %v1424_v43  ;;  %vm4488_vm14 = vcmp.ge.f32.partialorder %v11668_v39, 0.0  ;;  %v11863_v43 = vld [vmem:[%s8712_s30 + $0x870] sm:$0xff] }
 0x27f   : > { %v7457_v14 = vpop.eup %7456  ;;  %6019 = vst [vmem:[%s8863_s17 + $0x7c8] sm:$0xff] %v5507_v29  ;;  %v4996_v35 = vmul.f32 %v7455_v59, %v11721_v47  ;;  %7472 = vrcp.f32 %v2953_v32  ;;  %v2200_v40 = vmul.f32 1.442695, %v1425_v44  ;;  %v915_v27 = vand.u32 2147483647, %v11807_v13  ;;  %v11871_v44 = vld [vmem:[%s8712_s30 + $0x878] sm:$0xff] }
 0x280   : > { %v11802_v56 = vpop.eup %7458  ;;  %v4997_v1 = vmul.f32 %v7457_v14, %v11726_v34  ;;  %7474 = vrcp.f32 %v2954_v58  ;;  %v2202_v3 = vmul.f32 1.442695, %v1426_v33  ;;  %v916_v5 = vand.u32 2147483647, %v11813_v17 }
 0x281   : > { %v5508_v47 = vsel %vm4484_vm10, %v7455_v59, %v4996_v35  ;;  %v2955_v36 = vadd.f32 1.0, %v11802_v56  ;;  %7476 = vpow2.f32 %v2196_v61  ;;  %v7461_v19 = vpop.eup %7460  ;;  %vm4489_vm15 = vcmp.ge.f32.partialorder %v11674_v41, 0.0 }
 0x282   : > { %6020 = vst [vmem:[%s8863_s17 + $0x7d0] sm:$0xff] %v5508_v47  ;;  %v5509_v34 = vsel %vm4485_vm11, %v7457_v14, %v4997_v1  ;;  %7478 = vpow2.f32 %v2198_v46  ;;  %v11822_v9 = vpop.eup %7462  ;;  %v4998_v55 = vmul.f32 %v7461_v19, %v11745_v50  ;;  %v1427_v8 = vsub.f32 0.0, %v915_v27 }
 0x283   : > { %6021 = vst [vmem:[%s8863_s17 + $0x7d8] sm:$0xff] %v5509_v34  ;;  %7480 = vrcp.f32 %v2955_v36  ;;  %v2956_v11 = vadd.f32 1.0, %v11822_v9  ;;  %v11830_v51 = vpop.eup %7464  ;;  %v917_v50 = vand.u32 2147483647, %v11820_v21  ;;  %vm4490_vm0 = vcmp.ge.f32.partialorder %v11686_v37, 0.0 }
 0x284   : > { %7482 = vpow2.f32 %v2200_v40  ;;  %v5510_v15 = vsel %vm4486_vm12, %v7461_v19, %v4998_v55  ;;  %v2957_v10 = vadd.f32 1.0, %v11830_v51  ;;  %v1428_v7 = vsub.f32 0.0, %v916_v5  ;;  %v11885_v40 = vld [vmem:[%s8712_s30 + $0x880] sm:$0xff]  ;;  %v11896_v5 = vld [vmem:[%s8712_s30 + $0x888] sm:$0xff] }
 0x285   : > { %v7467_v30 = vpop.eup %7466  ;;  %6022 = vst [vmem:[%s8863_s17 + $0x7e0] sm:$0xff] %v5510_v15  ;;  %7484 = vrcp.f32 %v2956_v11  ;;  %v2204_v16 = vmul.f32 1.442695, %v1427_v8  ;;  %v1429_v18 = vsub.f32 0.0, %v917_v50  ;;  %v918_v42 = vand.u32 2147483647, %v11837_v54 }
 0x286   : > { %v7469_v2 = vpop.eup %7468  ;;  %v4999_v25 = vmul.f32 %v7467_v30, %v11761_v53  ;;  %7486 = vpow2.f32 %v2202_v3  ;;  %v2206_v60 = vmul.f32 1.442695, %v1428_v7  ;;  %v919_v58 = vand.u32 2147483647, %v11848_v23 }
 0x287   : > { %v11843_v48 = vpop.eup %7470  ;;  %v5000_v52 = vmul.f32 %v7469_v2, %v11769_v24  ;;  %7488 = vrcp.f32 %v2957_v10  ;;  %v2208_v32 = vmul.f32 1.442695, %v1429_v18  ;;  %v1430_v59 = vsub.f32 0.0, %v918_v42 }
 0x288   : > { %v5511_v53 = vsel %vm4487_vm13, %v7467_v30, %v4999_v25  ;;  %v2958_v57 = vadd.f32 1.0, %v11843_v48  ;;  %7490 = vpow2.f32 %v2204_v16  ;;  %vm4491_vm1 = vcmp.ge.f32.partialorder %v11704_v4, 0.0 }
 0x289   : > { %v7473_v28 = vpop.eup %7472  ;;  %6023 = vst [vmem:[%s8863_s17 + $0x7e8] sm:$0xff] %v5511_v53  ;;  %v5512_v24 = vsel %vm4488_vm14, %v7469_v2, %v5000_v52  ;;  %7492 = vpow2.f32 %v2206_v60  ;;  %v2210_v35 = vmul.f32 1.442695, %v1430_v59  ;;  %v1431_v26 = vsub.f32 0.0, %v919_v58  ;;  %v11907_v2 = vld [vmem:[%s8712_s30 + $0x890] sm:$0xff]  ;;  %v11915_v60 = vld [vmem:[%s8712_s30 + $0x898] sm:$0xff] }
 0x28a   : > { %v7475_v61 = vpop.eup %7474  ;;  %v5001_v6 = vmul.f32 %v7473_v28, %v11783_v31  ;;  %6024 = vst [vmem:[%s8863_s17 + $0x7f0] sm:$0xff] %v5512_v24  ;;  %7494 = vrcp.f32 %v2958_v57  ;;  %vm4492_vm2 = vcmp.ge.f32.partialorder %v11719_v62, 0.0  ;;  %v920_v36 = vand.u32 2147483647, %v11863_v43 }
 0x28b   : > { %v11857_v29 = vpop.eup %7476  ;;  %v5002_v38 = vmul.f32 %v7475_v61, %v11789_v63  ;;  %7496 = vpow2.f32 %v2208_v32  ;;  %v2212_v4 = vmul.f32 1.442695, %v1431_v26  ;;  %v921_v19 = vand.u32 2147483647, %v11871_v44  ;;  %v11941_v26 = vld [vmem:[%s8712_s30 + $0x8a8] sm:$0xff] }
 0x28c   : > { %v11865_v14 = vpop.eup %7478  ;;  %v5513_v39 = vsel %vm4489_vm15, %v7473_v28, %v5001_v6  ;;  %v2959_v31 = vadd.f32 1.0, %v11857_v29  ;;  %vm4493_vm3 = vcmp.ge.f32.partialorder %v11732_v22, 0.0  ;;  %v922_v3 = vand.u32 2147483647, %v11885_v40  ;;  %v11929_v6 = vld [vmem:[%s8712_s30 + $0x8a0] sm:$0xff] }
 0x28d   : > { %v7481_v1 = vpop.eup %7480  ;;  %6025 = vst [vmem:[%s8863_s17 + $0x7f8] sm:$0xff] %v5513_v39  ;;  %v5514_v63 = vsel %vm4490_vm0, %v7475_v61, %v5002_v38  ;;  %v2960_v46 = vadd.f32 1.0, %v11865_v14  ;;  %v1433_v11 = vsub.f32 0.0, %v921_v19  ;;  %vm4494_vm4 = vcmp.ge.f32.partialorder %v11740_v45, 0.0 }
 0x28e   : > { %v11878_v47 = vpop.eup %7482  ;;  %6026 = vst [vmem:[%s8863_s17 + $0x800] sm:$0xff] %v5514_v63  ;;  %v5003_v41 = vmul.f32 %v7481_v1, %v11802_v56  ;;  %7498 = vrcp.f32 %v2959_v31  ;;  %v1432_v56 = vsub.f32 0.0, %v920_v36  ;;  %vm4495_vm5 = vcmp.ge.f32.partialorder %v11750_v20, 0.0 }
 0x28f   : > { %7500 = vrcp.f32 %v2960_v46  ;;  %v2961_v37 = vadd.f32 1.0, %v11878_v47  ;;  %v7485_v34 = vpop.eup %7484  ;;  %v1434_v7 = vsub.f32 0.0, %v922_v3  ;;  %v2216_v18 = vmul.f32 1.442695, %v1433_v11 }
 0x290   : > { %v5515_v33 = vsel %vm4491_vm1, %v7481_v1, %v5003_v41  ;;  %7502 = vpow2.f32 %v2210_v35  ;;  %v11890_v55 = vpop.eup %7486  ;;  %v5004_v27 = vmul.f32 %v7485_v34, %v11822_v9  ;;  %v2214_v50 = vmul.f32 1.442695, %v1432_v56 }
 0x291   : > { %6027 = vst [vmem:[%s8863_s17 + $0x808] sm:$0xff] %v5515_v33  ;;  %7504 = vrcp.f32 %v2961_v37  ;;  %v7489_v15 = vpop.eup %7488  ;;  %v2962_v8 = vadd.f32 1.0, %v11890_v55  ;;  %v923_v52 = vand.u32 2147483647, %v11896_v5  ;;  %v2218_v28 = vmul.f32 1.442695, %v1434_v7 }
 0x292   : > { %7506 = vpow2.f32 %v2212_v4  ;;  %v11900_v30 = vpop.eup %7490  ;;  %v5516_v9 = vsel %vm4492_vm2, %v7485_v34, %v5004_v27  ;;  %v5005_v10 = vmul.f32 %v7489_v15, %v11830_v51  ;;  %v924_v61 = vand.u32 2147483647, %v11907_v2  ;;  %v11953_v33 = vld [vmem:[%s8712_s30 + $0x8b0] sm:$0xff]  ;;  %v11960_v27 = vld [vmem:[%s8712_s30 + $0x8b8] sm:$0xff] }
 0x293   : > { %v11909_v25 = vpop.eup %7492  ;;  %6028 = vst [vmem:[%s8863_s17 + $0x810] sm:$0xff] %v5516_v9  ;;  %7508 = vrcp.f32 %v2962_v8  ;;  %v2963_v16 = vadd.f32 1.0, %v11900_v30  ;;  %v1435_v32 = vsub.f32 0.0, %v923_v52  ;;  %vm4496_vm6 = vcmp.ge.f32.partialorder %v11767_v0, 0.0 }
 0x294   : > { %v7495_v62 = vpop.eup %7494  ;;  %v5517_v51 = vsel %vm4493_vm3, %v7489_v15, %v5005_v10  ;;  %v2964_v42 = vadd.f32 1.0, %v11909_v25  ;;  %7510 = vpow2.f32 %v2214_v50  ;;  %v925_v24 = vand.u32 2147483647, %v11915_v60 }
 0x295   : > { %v11920_v53 = vpop.eup %7496  ;;  %6029 = vst [vmem:[%s8863_s17 + $0x818] sm:$0xff] %v5517_v51  ;;  %v5006_v57 = vmul.f32 %v7495_v62, %v11843_v48  ;;  %7512 = vrcp.f32 %v2963_v16  ;;  %v2220_v48 = vmul.f32 1.442695, %v1435_v32  ;;  %v1436_v58 = vsub.f32 0.0, %v924_v61 }
 0x296   : > { %7514 = vrcp.f32 %v2964_v42  ;;  %v2965_v22 = vadd.f32 1.0, %v11920_v53  ;;  %vm4497_vm7 = vcmp.ge.f32.partialorder %v11776_v12, 0.0  ;;  %v1437_v35 = vsub.f32 0.0, %v925_v24 }
 0x297   : > { %v5518_v38 = vsel %vm4494_vm4, %v7495_v62, %v5006_v57  ;;  %7516 = vpow2.f32 %v2216_v18  ;;  %v2222_v45 = vmul.f32 1.442695, %v1436_v58  ;;  %v926_v46 = vand.u32 2147483647, %v11929_v6  ;;  %v11977_v62 = vld [vmem:[%s8712_s30 + $0x8c0] sm:$0xff]  ;;  %v11985_v57 = vld [vmem:[%s8712_s30 + $0x8c8] sm:$0xff] }
 0x298   : > { %v7499_v59 = vpop.eup %7498  ;;  %6030 = vst [vmem:[%s8863_s17 + $0x820] sm:$0xff] %v5518_v38  ;;  %7518 = vrcp.f32 %v2965_v22  ;;  %v2224_v37 = vmul.f32 1.442695, %v1437_v35  ;;  %vm4498_vm8 = vcmp.ge.f32.partialorder %v11794_v49, 0.0  ;;  %v927_v56 = vand.u32 2147483647, %v11941_v26 }
 0x299   : > { %v7501_v39 = vpop.eup %7500  ;;  %v5007_v31 = vmul.f32 %v7499_v59, %v11857_v29  ;;  %7520 = vpow2.f32 %v2218_v28  ;;  %v1438_v34 = vsub.f32 0.0, %v926_v46  ;;  %vm4499_vm9 = vcmp.ge.f32.partialorder %v11807_v13, 0.0 }
 0x29a   : > { %v11936_v1 = vpop.eup %7502  ;;  %v5008_v63 = vmul.f32 %v7501_v39, %v11865_v14  ;;  %7522 = vpow2.f32 %v2220_v48  ;;  %v1439_v8 = vsub.f32 0.0, %v927_v56  ;;  %v928_v50 = vand.u32 2147483647, %v11953_v33 }
 0x29b   : > { %v7505_v41 = vpop.eup %7504  ;;  %v5519_v29 = vsel %vm4495_vm5, %v7499_v59, %v5007_v31  ;;  %v2966_v36 = vadd.f32 1.0, %v11936_v1  ;;  %7524 = vpow2.f32 %v2222_v45  ;;  %vm4500_vm10 = vcmp.ge.f32.partialorder %v11813_v17, 0.0 }
 0x29c   : > { %v11946_v4 = vpop.eup %7506  ;;  %6031 = vst [vmem:[%s8863_s17 + $0x828] sm:$0xff] %v5519_v29  ;;  %v5520_v14 = vsel %vm4496_vm6, %v7501_v39, %v5008_v63  ;;  %v5009_v19 = vmul.f32 %v7505_v41, %v11878_v47  ;;  %v2226_v47 = vmul.f32 1.442695, %v1438_v34  ;;  %v929_v10 = vand.u32 2147483647, %v11960_v27  ;;  %v12004_v39 = vld [vmem:[%s8712_s30 + $0x8d0] sm:$0xff] }
 0x29d   : > { %6032 = vst [vmem:[%s8863_s17 + $0x830] sm:$0xff] %v5520_v14  ;;  %7526 = vrcp.f32 %v2966_v36  ;;  %v2967_v20 = vadd.f32 1.0, %v11946_v4  ;;  %v7509_v11 = vpop.eup %7508  ;;  %v2228_v18 = vmul.f32 1.442695, %v1439_v8  ;;  %v1440_v52 = vsub.f32 0.0, %v928_v50  ;;  %v12036_v8 = vld [vmem:[%s8712_s30 + $0x8e8] sm:$0xff] }
 0x29e   : > { %v5521_v0 = vsel %vm4497_vm7, %v7505_v41, %v5009_v19  ;;  %7528 = vpow2.f32 %v2224_v37  ;;  %v11965_v3 = vpop.eup %7510  ;;  %v5010_v15 = vmul.f32 %v7509_v11, %v11890_v55  ;;  %vm4501_vm11 = vcmp.ge.f32.partialorder %v11820_v21, 0.0  ;;  %v12019_v37 = vld [vmem:[%s8712_s30 + $0x8d8] sm:$0xff] }
 0x29f   : > { %6033 = vst [vmem:[%s8863_s17 + $0x838] sm:$0xff] %v5521_v0  ;;  %7530 = vrcp.f32 %v2967_v20  ;;  %v7513_v9 = vpop.eup %7512  ;;  %v2968_v12 = vadd.f32 1.0, %v11965_v3  ;;  %v1441_v28 = vsub.f32 0.0, %v929_v10  ;;  %v2230_v61 = vmul.f32 1.442695, %v1440_v52  ;;  %v12024_v20 = vld [vmem:[%s8712_s30 + $0x8e0] sm:$0xff] }
 0x2a0   : > { %7532 = vpow2.f32 %v2226_v47  ;;  %v7515_v7 = vpop.eup %7514  ;;  %v5522_v16 = vsel %vm4498_vm8, %v7509_v11, %v5010_v15  ;;  %v5011_v55 = vmul.f32 %v7513_v9, %v11900_v30  ;;  %vm4502_vm12 = vcmp.ge.f32.partialorder %v11837_v54, 0.0 }
 0x2a1   : > { %v11979_v51 = vpop.eup %7516  ;;  %6034 = vst [vmem:[%s8863_s17 + $0x840] sm:$0xff] %v5522_v16  ;;  %v5012_v42 = vmul.f32 %v7515_v7, %v11909_v25  ;;  %7534 = vrcp.f32 %v2968_v12  ;;  %v930_v59 = vand.u32 2147483647, %v11977_v62  ;;  %v2232_v48 = vmul.f32 1.442695, %v1441_v28 }
 0x2a2   : > { %v7519_v49 = vpop.eup %7518  ;;  %v5523_v30 = vsel %vm4499_vm9, %v7513_v9, %v5011_v55  ;;  %v2969_v32 = vadd.f32 1.0, %v11979_v51  ;;  %7536 = vpow2.f32 %v2228_v18  ;;  %v931_v58 = vand.u32 2147483647, %v11985_v57  ;;  %v12049_v18 = vld [vmem:[%s8712_s30 + $0x8f0] sm:$0xff] }
 0x2a3   : > { %v11990_v22 = vpop.eup %7520  ;;  %6035 = vst [vmem:[%s8863_s17 + $0x848] sm:$0xff] %v5523_v30  ;;  %v5524_v25 = vsel %vm4500_vm10, %v7515_v7, %v5012_v42  ;;  %v5013_v24 = vmul.f32 %v7519_v49, %v11920_v53  ;;  %v1442_v35 = vsub.f32 0.0, %v930_v59  ;;  %vm4503_vm13 = vcmp.ge.f32.partialorder %v11848_v23, 0.0 }
 0x2a4   : > { %v11998_v13 = vpop.eup %7522  ;;  %6036 = vst [vmem:[%s8863_s17 + $0x850] sm:$0xff] %v5524_v25  ;;  %7538 = vrcp.f32 %v2969_v32  ;;  %v2970_v38 = vadd.f32 1.0, %v11990_v22  ;;  %v1443_v46 = vsub.f32 0.0, %v931_v58  ;;  %v932_v36 = vand.u32 2147483647, %v12004_v39 }
 0x2a5   : > { %v12006_v17 = vpop.eup %7524  ;;  %v5525_v53 = vsel %vm4501_vm11, %v7519_v49, %v5013_v24  ;;  %v2971_v31 = vadd.f32 1.0, %v11998_v13  ;;  %7540 = vpow2.f32 %v2230_v61  ;;  %v2234_v21 = vmul.f32 1.442695, %v1442_v35  ;;  %v12059_v61 = vld [vmem:[%s8712_s30 + $0x8f8] sm:$0xff] }
 0x2a6   : > { %6037 = vst [vmem:[%s8863_s17 + $0x858] sm:$0xff] %v5525_v53  ;;  %7542 = vrcp.f32 %v2970_v38  ;;  %v2972_v45 = vadd.f32 1.0, %v12006_v17  ;;  %vm4504_vm14 = vcmp.ge.f32.partialorder %v11863_v43, 0.0  ;;  %v2236_v34 = vmul.f32 1.442695, %v1443_v46  ;;  %v12080_v46 = vld [vmem:[%s8712_s30 + $0x908] sm:$0xff] }
 0x2a7   : > { %v7527_v63 = vpop.eup %7526  ;;  %7544 = vrcp.f32 %v2971_v31  ;;  %v1444_v0 = vsub.f32 0.0, %v932_v36  ;;  %vm4505_vm15 = vcmp.ge.f32.partialorder %v11871_v44, 0.0  ;;  %v933_v15 = vand.u32 2147483647, %v12019_v37 }
 0x2a8   : > { %v12014_v41 = vpop.eup %7528  ;;  %v5014_v29 = vmul.f32 %v7527_v63, %v11936_v1  ;;  %7546 = vrcp.f32 %v2972_v45  ;;  %vm4506_vm0 = vcmp.ge.f32.partialorder %v11885_v40, 0.0  ;;  %v935_v55 = vand.u32 2147483647, %v12036_v8 }
 0x2a9   : > { %v7531_v14 = vpop.eup %7530  ;;  %v2973_v19 = vadd.f32 1.0, %v12014_v41  ;;  %7548 = vpow2.f32 %v2232_v48  ;;  %v2238_v9 = vmul.f32 1.442695, %v1444_v0  ;;  %v1445_v7 = vsub.f32 0.0, %v933_v15 }
 0x2aa   : > { %v12026_v56 = vpop.eup %7532  ;;  %v5526_v1 = vsel %vm4502_vm12, %v7527_v63, %v5014_v29  ;;  %v5015_v11 = vmul.f32 %v7531_v14, %v11946_v4  ;;  %v934_v4 = vand.u32 2147483647, %v12024_v20  ;;  %vm4507_vm1 = vcmp.ge.f32.partialorder %v11896_v5, 0.0  ;;  %v12071_v63 = vld [vmem:[%s8712_s30 + $0x900] sm:$0xff] }
 0x2ab   : > { %6038 = vst [vmem:[%s8863_s17 + $0x860] sm:$0xff] %v5526_v1  ;;  %7550 = vrcp.f32 %v2973_v19  ;;  %v2974_v47 = vadd.f32 1.0, %v12026_v56  ;;  %v7535_v50 = vpop.eup %7534  ;;  %v1447_v32 = vsub.f32 0.0, %v935_v55  ;;  %vm4508_vm2 = vcmp.ge.f32.partialorder %v11907_v2, 0.0 }
 0x2ac   : > { %v5527_v54 = vsel %vm4503_vm13, %v7531_v14, %v5015_v11  ;;  %7552 = vpow2.f32 %v2234_v21  ;;  %v12041_v12 = vpop.eup %7536  ;;  %v5016_v10 = vmul.f32 %v7535_v50, %v11965_v3  ;;  %v1446_v23 = vsub.f32 0.0, %v934_v4 }
 0x2ad   : > { %6039 = vst [vmem:[%s8863_s17 + $0x868] sm:$0xff] %v5527_v54  ;;  %7554 = vrcp.f32 %v2974_v47  ;;  %v2975_v16 = vadd.f32 1.0, %v12041_v12  ;;  %v2240_v3 = vmul.f32 1.442695, %v1445_v7  ;;  %v936_v24 = vand.u32 2147483647, %v12049_v18 }
 0x2ae   : > { %7556 = vpow2.f32 %v2236_v34  ;;  %v7539_v52 = vpop.eup %7538  ;;  %v5528_v42 = vsel %vm4504_vm14, %v7535_v50, %v5016_v10  ;;  %v2242_v30 = vmul.f32 1.442695, %v1446_v23  ;;  %v2244_v48 = vmul.f32 1.442695, %v1447_v32  ;;  %v12103_v50 = vld [vmem:[%s8712_s30 + $0x910] sm:$0xff]  ;;  %v12111_v10 = vld [vmem:[%s8712_s30 + $0x918] sm:$0xff] }
 0x2af   : > { %7558 = vpow2.f32 %v2238_v9  ;;  %v12054_v28 = vpop.eup %7540  ;;  %6040 = vst [vmem:[%s8863_s17 + $0x870] sm:$0xff] %v5528_v42  ;;  %v5017_v49 = vmul.f32 %v7539_v52, %v11979_v51  ;;  %v1448_v31 = vsub.f32 0.0, %v936_v24  ;;  %v937_v35 = vand.u32 2147483647, %v12059_v61 }
 0x2b0   : > { %7560 = vrcp.f32 %v2975_v16  ;;  %v7543_v25 = vpop.eup %7542  ;;  %v2976_v43 = vadd.f32 1.0, %v12054_v28  ;;  %vm4509_vm3 = vcmp.ge.f32.partialorder %v11915_v60, 0.0  ;;  %vm4510_vm4 = vcmp.ge.f32.partialorder %v11929_v6, 0.0 }
 0x2b1   : > { %7562 = vpow2.f32 %v2240_v3  ;;  %v7545_v59 = vpop.eup %7544  ;;  %v5529_v38 = vsel %vm4505_vm15, %v7539_v52, %v5017_v49  ;;  %v5018_v51 = vmul.f32 %v7543_v25, %v11990_v22  ;;  %v2246_v36 = vmul.f32 1.442695, %v1448_v31 }
 0x2b2   : > { %7564 = vpow2.f32 %v2242_v30  ;;  %v7547_v58 = vpop.eup %7546  ;;  %6041 = vst [vmem:[%s8863_s17 + $0x878] sm:$0xff] %v5529_v38  ;;  %v5019_v53 = vmul.f32 %v7545_v59, %v11998_v13  ;;  %v1449_v14 = vsub.f32 0.0, %v937_v35  ;;  %v938_v34 = vand.u32 2147483647, %v12071_v63  ;;  %v12127_v30 = vld [vmem:[%s8712_s30 + $0x920] sm:$0xff] }
 0x2b3   : > { %7566 = vrcp.f32 %v2976_v43  ;;  %v12073_v45 = vpop.eup %7548  ;;  %v5530_v44 = vsel %vm4506_vm0, %v7543_v25, %v5018_v51  ;;  %v5020_v22 = vmul.f32 %v7547_v58, %v12006_v17  ;;  %v939_v0 = vand.u32 2147483647, %v12080_v46  ;;  %v12138_v51 = vld [vmem:[%s8712_s30 + $0x928] sm:$0xff] }
 0x2b4   : > { %7568 = vpow2.f32 %v2244_v48  ;;  %6042 = vst [vmem:[%s8863_s17 + $0x880] sm:$0xff] %v5530_v44  ;;  %v5531_v29 = vsel %vm4507_vm1, %v7545_v59, %v5019_v53  ;;  %v2977_v21 = vadd.f32 1.0, %v12073_v45  ;;  %v2248_v11 = vmul.f32 1.442695, %v1449_v14  ;;  %v12143_v53 = vld [vmem:[%s8712_s30 + $0x930] sm:$0xff] }
 0x2b5   : > { %v7551_v13 = vpop.eup %7550  ;;  %6043 = vst [vmem:[%s8863_s17 + $0x888] sm:$0xff] %v5531_v29  ;;  %v5532_v40 = vsel %vm4508_vm2, %v7547_v58, %v5020_v22  ;;  %v1450_v15 = vsub.f32 0.0, %v938_v34  ;;  %vm4511_vm5 = vcmp.ge.f32.partialorder %v11941_v26, 0.0  ;;  %v1451_v4 = vsub.f32 0.0, %v939_v0  ;;  %v12167_v0 = vld [vmem:[%s8712_s30 + $0x940] sm:$0xff] }
 0x2b6   : > { %v12086_v19 = vpop.eup %7552  ;;  %v5021_v17 = vmul.f32 %v7551_v13, %v12014_v41  ;;  %6044 = vst [vmem:[%s8863_s17 + $0x890] sm:$0xff] %v5532_v40  ;;  %7570 = vrcp.f32 %v2977_v21  ;;  %vm4512_vm6 = vcmp.ge.f32.partialorder %v11953_v33, 0.0  ;;  %v940_v52 = vand.u32 2147483647, %v12103_v50 }
 0x2b7   : > { %v7555_v5 = vpop.eup %7554  ;;  %v2978_v1 = vadd.f32 1.0, %v12086_v19  ;;  %7572 = vpow2.f32 %v2246_v36  ;;  %v2250_v16 = vmul.f32 1.442695, %v1450_v15  ;;  %v2252_v3 = vmul.f32 1.442695, %v1451_v4 }
 0x2b8   : > { %v12097_v47 = vpop.eup %7556  ;;  %v5533_v2 = vsel %vm4509_vm3, %v7551_v13, %v5021_v17  ;;  %v5022_v41 = vmul.f32 %v7555_v5, %v12026_v56  ;;  %v941_v49 = vand.u32 2147483647, %v12111_v10  ;;  %v1452_v43 = vsub.f32 0.0, %v940_v52  ;;  %v12152_v13 = vld [vmem:[%s8712_s30 + $0x938] sm:$0xff] }
 0x2b9   : > { %v12105_v54 = vpop.eup %7558  ;;  %6045 = vst [vmem:[%s8863_s17 + $0x898] sm:$0xff] %v5533_v2  ;;  %7574 = vrcp.f32 %v2978_v1  ;;  %v2979_v9 = vadd.f32 1.0, %v12097_v47  ;;  %vm4513_vm7 = vcmp.ge.f32.partialorder %v11960_v27, 0.0  ;;  %v942_v58 = vand.u32 2147483647, %v12127_v30 }
 0x2ba   : > { %v7561_v60 = vpop.eup %7560  ;;  %v5534_v56 = vsel %vm4510_vm4, %v7555_v5, %v5022_v41  ;;  %v2980_v7 = vadd.f32 1.0, %v12105_v54  ;;  %7576 = vpow2.f32 %v2248_v11  ;;  %v1453_v38 = vsub.f32 0.0, %v941_v49 }
 0x2bb   : > { %v12116_v23 = vpop.eup %7562  ;;  %6046 = vst [vmem:[%s8863_s17 + $0x8a0] sm:$0xff] %v5534_v56  ;;  %v5023_v55 = vmul.f32 %v7561_v60, %v12041_v12  ;;  %7578 = vrcp.f32 %v2979_v9  ;;  %v2254_v48 = vmul.f32 1.442695, %v1452_v43  ;;  %vm4514_vm8 = vcmp.ge.f32.partialorder %v11977_v62, 0.0  ;;  %v12197_v43 = vld [vmem:[%s8712_s30 + $0x950] sm:$0xff] }
 0x2bc   : > { %v12122_v42 = vpop.eup %7564  ;;  %7580 = vrcp.f32 %v2980_v7  ;;  %v2981_v6 = vadd.f32 1.0, %v12116_v23  ;;  %vm4515_vm9 = vcmp.ge.f32.partialorder %v11985_v57, 0.0  ;;  %v1454_v44 = vsub.f32 0.0, %v942_v58 }
 0x2bd   : > { %v7567_v32 = vpop.eup %7566  ;;  %v5535_v12 = vsel %vm4511_vm5, %v7561_v60, %v5023_v55  ;;  %v2982_v25 = vadd.f32 1.0, %v12122_v42  ;;  %7582 = vpow2.f32 %v2250_v16  ;;  %v943_v22 = vand.u32 2147483647, %v12138_v51  ;;  %v12181_v55 = vld [vmem:[%s8712_s30 + $0x948] sm:$0xff] }
 0x2be   : > { %v12132_v24 = vpop.eup %7568  ;;  %6047 = vst [vmem:[%s8863_s17 + $0x8a8] sm:$0xff] %v5535_v12  ;;  %v5024_v59 = vmul.f32 %v7567_v32, %v12054_v28  ;;  %7584 = vrcp.f32 %v2981_v6  ;;  %v2256_v28 = vmul.f32 1.442695, %v1453_v38  ;;  %vm4516_vm10 = vcmp.ge.f32.partialorder %v12004_v39, 0.0 }
 0x2bf   : > { %7586 = vrcp.f32 %v2982_v25  ;;  %v2983_v26 = vadd.f32 1.0, %v12132_v24  ;;  %v944_v21 = vand.u32 2147483647, %v12143_v53  ;;  %v2258_v40 = vmul.f32 1.442695, %v1454_v44 }
 0x2c0   : > { %v5536_v31 = vsel %vm4512_vm6, %v7567_v32, %v5024_v59  ;;  %7588 = vpow2.f32 %v2252_v3  ;;  %v7571_v35 = vpop.eup %7570  ;;  %v1455_v17 = vsub.f32 0.0, %v943_v22  ;;  %v945_v11 = vand.u32 2147483647, %v12152_v13 }
 0x2c1   : > { %6048 = vst [vmem:[%s8863_s17 + $0x8b0] sm:$0xff] %v5536_v31  ;;  %7590 = vrcp.f32 %v2983_v26  ;;  %v12154_v29 = vpop.eup %7572  ;;  %v5025_v33 = vmul.f32 %v7571_v35, %v12073_v45  ;;  %v1456_v45 = vsub.f32 0.0, %v944_v21  ;;  %vm4517_vm11 = vcmp.ge.f32.partialorder %v12019_v37, 0.0  ;;  %v12210_v31 = vld [vmem:[%s8712_s30 + $0x958] sm:$0xff] }
 0x2c2   : > { %7592 = vpow2.f32 %v2254_v48  ;;  %v2984_v14 = vadd.f32 1.0, %v12154_v29  ;;  %v2260_v15 = vmul.f32 1.442695, %v1455_v17  ;;  %v1457_v7 = vsub.f32 0.0, %v945_v11 }
 0x2c3   : > { %v7575_v36 = vpop.eup %7574  ;;  %7594 = vpow2.f32 %v2256_v28  ;;  %v5537_v5 = vsel %vm4513_vm7, %v7571_v35, %v5025_v33  ;;  %v2262_v4 = vmul.f32 1.442695, %v1456_v45  ;;  %v946_v16 = vand.u32 2147483647, %v12167_v0 }
 0x2c4   : > { %v12160_v34 = vpop.eup %7576  ;;  %v5026_v1 = vmul.f32 %v7575_v36, %v12086_v19  ;;  %6049 = vst [vmem:[%s8863_s17 + $0x8b8] sm:$0xff] %v5537_v5  ;;  %7596 = vrcp.f32 %v2984_v14  ;;  %vm4518_vm12 = vcmp.ge.f32.partialorder %v12024_v20, 0.0  ;;  %v2264_v49 = vmul.f32 1.442695, %v1457_v7  ;;  %v12219_v20 = vld [vmem:[%s8712_s30 + $0x960] sm:$0xff]  ;;  %v12228_v14 = vld [vmem:[%s8712_s30 + $0x968] sm:$0xff] }
 0x2c5   : > { %v7579_v2 = vpop.eup %7578  ;;  %v2985_v41 = vadd.f32 1.0, %v12160_v34  ;;  %7598 = vpow2.f32 %v2258_v40  ;;  %v1458_v12 = vsub.f32 0.0, %v946_v16  ;;  %v947_v25 = vand.u32 2147483647, %v12181_v55  ;;  %v12251_v7 = vld [vmem:[%s8712_s30 + $0x978] sm:$0xff] }
 0x2c6   : > { %v7581_v9 = vpop.eup %7580  ;;  %v5538_v27 = vsel %vm4514_vm8, %v7575_v36, %v5026_v1  ;;  %v5027_v19 = vmul.f32 %v7579_v2, %v12097_v47  ;;  %vm4519_vm13 = vcmp.ge.f32.partialorder %v12036_v8, 0.0  ;;  %vm4520_vm14 = vcmp.ge.f32.partialorder %v12049_v18, 0.0 }
 0x2c7   : > { %v12175_v60 = vpop.eup %7582  ;;  %6050 = vst [vmem:[%s8863_s17 + $0x8c0] sm:$0xff] %v5538_v27  ;;  %v5028_v56 = vmul.f32 %v7581_v9, %v12105_v54  ;;  %7600 = vrcp.f32 %v2985_v41  ;;  %v2266_v48 = vmul.f32 1.442695, %v1458_v12  ;;  %v1459_v58 = vsub.f32 0.0, %v947_v25  ;;  %v12243_v27 = vld [vmem:[%s8712_s30 + $0x970] sm:$0xff] }
 0x2c8   : > { %v7585_v52 = vpop.eup %7584  ;;  %v5539_v62 = vsel %vm4515_vm9, %v7579_v2, %v5027_v19  ;;  %v2986_v47 = vadd.f32 1.0, %v12175_v60  ;;  %7602 = vpow2.f32 %v2260_v15  ;;  %v948_v35 = vand.u32 2147483647, %v12197_v43 }
 0x2c9   : > { %v7587_v6 = vpop.eup %7586  ;;  %6051 = vst [vmem:[%s8863_s17 + $0x8c8] sm:$0xff] %v5539_v62  ;;  %v5540_v54 = vsel %vm4516_vm10, %v7581_v9, %v5028_v56  ;;  %v5029_v3 = vmul.f32 %v7585_v52, %v12116_v23  ;;  %7604 = vpow2.f32 %v2262_v4  ;;  %v2268_v22 = vmul.f32 1.442695, %v1459_v58  ;;  %v12277_v58 = vld [vmem:[%s8712_s30 + $0x988] sm:$0xff] }
 0x2ca   : > { %v12191_v32 = vpop.eup %7588  ;;  %6052 = vst [vmem:[%s8863_s17 + $0x8d0] sm:$0xff] %v5540_v54  ;;  %v5030_v57 = vmul.f32 %v7587_v6, %v12122_v42  ;;  %7606 = vrcp.f32 %v2986_v47  ;;  %vm4521_vm15 = vcmp.ge.f32.partialorder %v12059_v61, 0.0  ;;  %v1460_v21 = vsub.f32 0.0, %v948_v35 }
 0x2cb   : > { %v7591_v39 = vpop.eup %7590  ;;  %v5541_v23 = vsel %vm4517_vm11, %v7585_v52, %v5029_v3  ;;  %v2987_v59 = vadd.f32 1.0, %v12191_v32  ;;  %7608 = vpow2.f32 %v2264_v49  ;;  %v949_v36 = vand.u32 2147483647, %v12210_v31  ;;  %v12265_v49 = vld [vmem:[%s8712_s30 + $0x980] sm:$0xff] }
 0x2cc   : > { %v12203_v38 = vpop.eup %7592  ;;  %6053 = vst [vmem:[%s8863_s17 + $0x8d8] sm:$0xff] %v5541_v23  ;;  %v5542_v42 = vsel %vm4518_vm12, %v7587_v6, %v5030_v57  ;;  %v5031_v26 = vmul.f32 %v7591_v39, %v12132_v24  ;;  %vm4522_vm0 = vcmp.ge.f32.partialorder %v12071_v63, 0.0  ;;  %v950_v17 = vand.u32 2147483647, %v12219_v20 }
 0x2cd   : > { %v12212_v37 = vpop.eup %7594  ;;  %6054 = vst [vmem:[%s8863_s17 + $0x8e0] sm:$0xff] %v5542_v42  ;;  %7610 = vrcp.f32 %v2987_v59  ;;  %v2988_v28 = vadd.f32 1.0, %v12203_v38  ;;  %v2270_v45 = vmul.f32 1.442695, %v1460_v21  ;;  %v1461_v11 = vsub.f32 0.0, %v949_v36  ;;  %v12288_v21 = vld [vmem:[%s8712_s30 + $0x990] sm:$0xff] }
 0x2ce   : > { %v5543_v24 = vsel %vm4519_vm13, %v7591_v39, %v5031_v26  ;;  %v2989_v44 = vadd.f32 1.0, %v12212_v37  ;;  %7612 = vpow2.f32 %v2266_v48  ;;  %v7597_v33 = vpop.eup %7596  ;;  %v1462_v15 = vsub.f32 0.0, %v950_v17 }
 0x2cf   : > { %6055 = vst [vmem:[%s8863_s17 + $0x8e8] sm:$0xff] %v5543_v24  ;;  %7614 = vrcp.f32 %v2988_v28  ;;  %v12230_v40 = vpop.eup %7598  ;;  %v5032_v8 = vmul.f32 %v7597_v33, %v12154_v29  ;;  %v951_v9 = vand.u32 2147483647, %v12228_v14  ;;  %vm4523_vm1 = vcmp.ge.f32.partialorder %v12080_v46, 0.0 }
 0x2d0   : > { %7616 = vrcp.f32 %v2989_v44  ;;  %v2990_v1 = vadd.f32 1.0, %v12230_v40  ;;  %v2272_v56 = vmul.f32 1.442695, %v1461_v11  ;;  %v2274_v52 = vmul.f32 1.442695, %v1462_v15 }
 0x2d1   : > { %v7601_v5 = vpop.eup %7600  ;;  %7618 = vpow2.f32 %v2268_v22  ;;  %v5544_v41 = vsel %vm4520_vm14, %v7597_v33, %v5032_v8  ;;  %v1463_v6 = vsub.f32 0.0, %v951_v9  ;;  %v952_v54 = vand.u32 2147483647, %v12243_v27  ;;  %v12295_v8 = vld [vmem:[%s8712_s30 + $0x998] sm:$0xff] }
 0x2d2   : > { %v12236_v2 = vpop.eup %7602  ;;  %v5033_v29 = vmul.f32 %v7601_v5, %v12160_v34  ;;  %6056 = vst [vmem:[%s8863_s17 + $0x8f0] sm:$0xff] %v5544_v41  ;;  %7620 = vrcp.f32 %v2990_v1  ;;  %vm4524_vm2 = vcmp.ge.f32.partialorder %v12103_v50, 0.0  ;;  %v953_v3 = vand.u32 2147483647, %v12251_v7 }
 0x2d3   : > { %v12245_v19 = vpop.eup %7604  ;;  %v2991_v4 = vadd.f32 1.0, %v12236_v2  ;;  %7622 = vpow2.f32 %v2270_v45  ;;  %v1464_v25 = vsub.f32 0.0, %v952_v54  ;;  %vm4525_vm3 = vcmp.ge.f32.partialorder %v12111_v10, 0.0 }
 0x2d4   : > { %v7607_v18 = vpop.eup %7606  ;;  %v5545_v34 = vsel %vm4521_vm15, %v7601_v5, %v5033_v29  ;;  %v2992_v16 = vadd.f32 1.0, %v12245_v19  ;;  %v1465_v59 = vsub.f32 0.0, %v953_v3  ;;  %v954_v48 = vand.u32 2147483647, %v12265_v49 }
 0x2d5   : > { %v12256_v62 = vpop.eup %7608  ;;  %6057 = vst [vmem:[%s8863_s17 + $0x8f8] sm:$0xff] %v5545_v34  ;;  %v5034_v47 = vmul.f32 %v7607_v18, %v12175_v60  ;;  %7624 = vrcp.f32 %v2991_v4  ;;  %v2276_v60 = vmul.f32 1.442695, %v1463_v6  ;;  %v2278_v63 = vmul.f32 1.442695, %v1464_v25 }
 0x2d6   : > { %7626 = vrcp.f32 %v2992_v16  ;;  %v2993_v61 = vadd.f32 1.0, %v12256_v62  ;;  %v2280_v24 = vmul.f32 1.442695, %v1465_v59  ;;  %vm4526_vm4 = vcmp.ge.f32.partialorder %v12127_v30, 0.0 }
 0x2d7   : > { %v7611_v57 = vpop.eup %7610  ;;  %v5546_v12 = vsel %vm4522_vm0, %v7607_v18, %v5034_v47  ;;  %7628 = vpow2.f32 %v2272_v56  ;;  %v1466_v33 = vsub.f32 0.0, %v954_v48  ;;  %v955_v36 = vand.u32 2147483647, %v12277_v58  ;;  %v12313_v18 = vld [vmem:[%s8712_s30 + $0x9a0] sm:$0xff]  ;;  %v12321_v47 = vld [vmem:[%s8712_s30 + $0x9a8] sm:$0xff] }
 0x2d8   : > { %v12269_v39 = vpop.eup %7612  ;;  %6058 = vst [vmem:[%s8863_s17 + $0x900] sm:$0xff] %v5546_v12  ;;  %v5035_v23 = vmul.f32 %v7611_v57, %v12191_v32  ;;  %7630 = vrcp.f32 %v2993_v61  ;;  %vm4527_vm5 = vcmp.ge.f32.partialorder %v12138_v51, 0.0  ;;  %v956_v11 = vand.u32 2147483647, %v12288_v21 }
 0x2d9   : > { %v7615_v42 = vpop.eup %7614  ;;  %v2994_v26 = vadd.f32 1.0, %v12269_v39  ;;  %7632 = vpow2.f32 %v2274_v52  ;;  %v2282_v5 = vmul.f32 1.442695, %v1466_v33  ;;  %v1467_v45 = vsub.f32 0.0, %v955_v36 }
 0x2da   : > { %v7617_v28 = vpop.eup %7616  ;;  %v5547_v32 = vsel %vm4523_vm1, %v7611_v57, %v5035_v23  ;;  %v5036_v35 = vmul.f32 %v7615_v42, %v12203_v38  ;;  %7634 = vpow2.f32 %v2276_v60  ;;  %vm4528_vm6 = vcmp.ge.f32.partialorder %v12143_v53, 0.0  ;;  %v12340_v23 = vld [vmem:[%s8712_s30 + $0x9b0] sm:$0xff] }
 0x2db   : > { %v12282_v44 = vpop.eup %7618  ;;  %6059 = vst [vmem:[%s8863_s17 + $0x908] sm:$0xff] %v5547_v32  ;;  %v5037_v22 = vmul.f32 %v7617_v28, %v12212_v37  ;;  %7636 = vrcp.f32 %v2994_v26  ;;  %v957_v29 = vand.u32 2147483647, %v12295_v8  ;;  %v2284_v4 = vmul.f32 1.442695, %v1467_v45 }
 0x2dc   : > { %v5548_v46 = vsel %vm4524_vm2, %v7615_v42, %v5036_v35  ;;  %v2995_v38 = vadd.f32 1.0, %v12282_v44  ;;  %7638 = vpow2.f32 %v2278_v63  ;;  %v7621_v17 = vpop.eup %7620  ;;  %v1468_v56 = vsub.f32 0.0, %v956_v11 }
 0x2dd   : > { %6060 = vst [vmem:[%s8863_s17 + $0x910] sm:$0xff] %v5548_v46  ;;  %v5549_v37 = vsel %vm4525_vm3, %v7617_v28, %v5037_v22  ;;  %7640 = vpow2.f32 %v2280_v24  ;;  %v12301_v1 = vpop.eup %7622  ;;  %v5038_v50 = vmul.f32 %v7621_v17, %v12230_v40  ;;  %vm4529_vm7 = vcmp.ge.f32.partialorder %v12152_v13, 0.0  ;;  %v12355_v24 = vld [vmem:[%s8712_s30 + $0x9b8] sm:$0xff]  ;;  %v12362_v46 = vld [vmem:[%s8712_s30 + $0x9c0] sm:$0xff] }
 0x2de   : > { %6061 = vst [vmem:[%s8863_s17 + $0x918] sm:$0xff] %v5549_v37  ;;  %7642 = vrcp.f32 %v2995_v38  ;;  %v2996_v10 = vadd.f32 1.0, %v12301_v1  ;;  %v1469_v52 = vsub.f32 0.0, %v957_v29  ;;  %v2286_v54 = vmul.f32 1.442695, %v1468_v56 }
 0x2df   : > { %v7625_v41 = vpop.eup %7624  ;;  %7644 = vpow2.f32 %v2282_v5  ;;  %v5550_v9 = vsel %vm4526_vm4, %v7621_v17, %v5038_v50  ;;  %vm4530_vm8 = vcmp.ge.f32.partialorder %v12167_v0, 0.0  ;;  %v958_v57 = vand.u32 2147483647, %v12313_v18  ;;  %v12372_v50 = vld [vmem:[%s8712_s30 + $0x9c8] sm:$0xff] }
 0x2e0   : > { %v7627_v15 = vpop.eup %7626  ;;  %v5039_v40 = vmul.f32 %v7625_v41, %v12236_v2  ;;  %6062 = vst [vmem:[%s8863_s17 + $0x920] sm:$0xff] %v5550_v9  ;;  %7646 = vrcp.f32 %v2996_v10  ;;  %v2288_v60 = vmul.f32 1.442695, %v1469_v52  ;;  %v959_v25 = vand.u32 2147483647, %v12321_v47 }
 0x2e1   : > { %v12315_v34 = vpop.eup %7628  ;;  %v5040_v16 = vmul.f32 %v7627_v15, %v12245_v19  ;;  %7648 = vpow2.f32 %v2284_v4  ;;  %v1470_v42 = vsub.f32 0.0, %v958_v57  ;;  %vm4531_vm9 = vcmp.ge.f32.partialorder %v12181_v55, 0.0  ;;  %v12385_v4 = vld [vmem:[%s8712_s30 + $0x9d0] sm:$0xff] }
 0x2e2   : > { %v7631_v30 = vpop.eup %7630  ;;  %v5551_v2 = vsel %vm4527_vm5, %v7625_v41, %v5039_v40  ;;  %v2997_v6 = vadd.f32 1.0, %v12315_v34  ;;  %v1471_v48 = vsub.f32 0.0, %v959_v25  ;;  %v960_v35 = vand.u32 2147483647, %v12340_v23 }
 0x2e3   : > { %v12326_v61 = vpop.eup %7632  ;;  %6063 = vst [vmem:[%s8863_s17 + $0x928] sm:$0xff] %v5551_v2  ;;  %v5552_v19 = vsel %vm4528_vm6, %v7627_v15, %v5040_v16  ;;  %v5041_v3 = vmul.f32 %v7631_v30, %v12256_v62  ;;  %v2290_v32 = vmul.f32 1.442695, %v1470_v42  ;;  %vm4532_vm10 = vcmp.ge.f32.partialorder %v12197_v43, 0.0  ;;  %v12409_v42 = vld [vmem:[%s8712_s30 + $0x9e0] sm:$0xff] }
 0x2e4   : > { %v12334_v51 = vpop.eup %7634  ;;  %6064 = vst [vmem:[%s8863_s17 + $0x930] sm:$0xff] %v5552_v19  ;;  %7650 = vrcp.f32 %v2997_v6  ;;  %v2998_v12 = vadd.f32 1.0, %v12326_v61  ;;  %v2292_v17 = vmul.f32 1.442695, %v1471_v48  ;;  %v1472_v37 = vsub.f32 0.0, %v960_v35 }
 0x2e5   : > { %v7637_v53 = vpop.eup %7636  ;;  %v5553_v62 = vsel %vm4529_vm7, %v7631_v30, %v5041_v3  ;;  %v2999_v59 = vadd.f32 1.0, %v12334_v51  ;;  %7652 = vpow2.f32 %v2286_v54  ;;  %vm4533_vm11 = vcmp.ge.f32.partialorder %v12210_v31, 0.0  ;;  %v12395_v54 = vld [vmem:[%s8712_s30 + $0x9d8] sm:$0xff] }
 0x2e6   : > { %v12345_v26 = vpop.eup %7638  ;;  %6065 = vst [vmem:[%s8863_s17 + $0x938] sm:$0xff] %v5553_v62  ;;  %v5042_v63 = vmul.f32 %v7637_v53, %v12269_v39  ;;  %7654 = vrcp.f32 %v2998_v12  ;;  %v961_v5 = vand.u32 2147483647, %v12355_v24  ;;  %v2294_v41 = vmul.f32 1.442695, %v1472_v37 }
 0x2e7   : > { %v12350_v28 = vpop.eup %7640  ;;  %7656 = vrcp.f32 %v2999_v59  ;;  %v3000_v13 = vadd.f32 1.0, %v12345_v26  ;;  %vm4534_vm12 = vcmp.ge.f32.partialorder %v12219_v20, 0.0  ;;  %v963_v40 = vand.u32 2147483647, %v12372_v50 }
 0x2e8   : > { %v7643_v22 = vpop.eup %7642  ;;  %v5554_v39 = vsel %vm4530_vm8, %v7637_v53, %v5042_v63  ;;  %v3001_v33 = vadd.f32 1.0, %v12350_v28  ;;  %7658 = vpow2.f32 %v2288_v60  ;;  %v1473_v15 = vsub.f32 0.0, %v961_v5 }
 0x2e9   : > { %v12364_v38 = vpop.eup %7644  ;;  %6066 = vst [vmem:[%s8863_s17 + $0x940] sm:$0xff] %v5554_v39  ;;  %v5043_v36 = vmul.f32 %v7643_v22, %v12282_v44  ;;  %7660 = vrcp.f32 %v3000_v13  ;;  %v962_v44 = vand.u32 2147483647, %v12362_v46  ;;  %vm4535_vm13 = vcmp.ge.f32.partialorder %v12228_v14, 0.0  ;;  %v12429_v14 = vld [vmem:[%s8712_s30 + $0x9f0] sm:$0xff] }
 0x2ea   : > { %7662 = vrcp.f32 %v3001_v33  ;;  %v3002_v0 = vadd.f32 1.0, %v12364_v38  ;;  %v7647_v45 = vpop.eup %7646  ;;  %v1475_v6 = vsub.f32 0.0, %v963_v40  ;;  %vm4536_vm14 = vcmp.ge.f32.partialorder %v12243_v27, 0.0 }
 0x2eb   : > { %v5555_v11 = vsel %vm4531_vm9, %v7643_v22, %v5043_v36  ;;  %7664 = vpow2.f32 %v2290_v32  ;;  %v12377_v10 = vpop.eup %7648  ;;  %v5044_v29 = vmul.f32 %v7647_v45, %v12301_v1  ;;  %v1474_v55 = vsub.f32 0.0, %v962_v44  ;;  %v12420_v22 = vld [vmem:[%s8712_s30 + $0x9e8] sm:$0xff] }
 0x2ec   : > { %6067 = vst [vmem:[%s8863_s17 + $0x948] sm:$0xff] %v5555_v11  ;;  %7666 = vrcp.f32 %v3002_v0  ;;  %v3003_v9 = vadd.f32 1.0, %v12377_v10  ;;  %v2296_v1 = vmul.f32 1.442695, %v1473_v15  ;;  %v964_v3 = vand.u32 2147483647, %v12385_v4 }
 0x2ed   : > { %7668 = vpow2.f32 %v2292_v17  ;;  %v5556_v16 = vsel %vm4532_vm10, %v7647_v45, %v5044_v29  ;;  %v2298_v2 = vmul.f32 1.442695, %v1474_v55  ;;  %v2300_v60 = vmul.f32 1.442695, %v1475_v6  ;;  %v12448_v29 = vld [vmem:[%s8712_s30 + $0x9f8] sm:$0xff] }
 0x2ee   : > { %v7651_v56 = vpop.eup %7650  ;;  %7670 = vpow2.f32 %v2294_v41  ;;  %6068 = vst [vmem:[%s8863_s17 + $0x950] sm:$0xff] %v5556_v16  ;;  %v1476_v62 = vsub.f32 0.0, %v964_v3  ;;  %v965_v59 = vand.u32 2147483647, %v12395_v54  ;;  %vm4537_vm15 = vcmp.ge.f32.partialorder %v12251_v7, 0.0 }
 0x2ef   : > { %v12390_v52 = vpop.eup %7652  ;;  %v5045_v30 = vmul.f32 %v7651_v56, %v12315_v34  ;;  %7672 = vrcp.f32 %v3003_v9  ;;  %vm4538_vm0 = vcmp.ge.f32.partialorder %v12265_v49, 0.0  ;;  %v966_v33 = vand.u32 2147483647, %v12409_v42 }
 0x2f0   : > { %v7655_v19 = vpop.eup %7654  ;;  %v3004_v43 = vadd.f32 1.0, %v12390_v52  ;;  %7674 = vpow2.f32 %v2296_v1  ;;  %v2302_v32 = vmul.f32 1.442695, %v1476_v62  ;;  %v1477_v35 = vsub.f32 0.0, %v965_v59  ;;  %v12479_v62 = vld [vmem:[%s8712_s30 + $0xa10] sm:$0xff] }
 0x2f1   : > { %v7657_v57 = vpop.eup %7656  ;;  %v5557_v12 = vsel %vm4533_vm11, %v7651_v56, %v5045_v30  ;;  %v5046_v34 = vmul.f32 %v7655_v19, %v12326_v61  ;;  %7676 = vpow2.f32 %v2298_v2  ;;  %v1478_v45 = vsub.f32 0.0, %v966_v33  ;;  %v12463_v2 = vld [vmem:[%s8712_s30 + $0xa00] sm:$0xff] }
 0x2f2   : > { %v12403_v25 = vpop.eup %7658  ;;  %6069 = vst [vmem:[%s8863_s17 + $0x958] sm:$0xff] %v5557_v12  ;;  %v5047_v53 = vmul.f32 %v7657_v57, %v12334_v51  ;;  %7678 = vrcp.f32 %v3004_v43  ;;  %v2304_v37 = vmul.f32 1.442695, %v1477_v35  ;;  %v967_v11 = vand.u32 2147483647, %v12420_v22 }
 0x2f3   : > { %v7661_v31 = vpop.eup %7660  ;;  %v5558_v61 = vsel %vm4534_vm12, %v7655_v19, %v5046_v34  ;;  %v3005_v63 = vadd.f32 1.0, %v12403_v25  ;;  %7680 = vpow2.f32 %v2300_v60  ;;  %vm4539_vm1 = vcmp.ge.f32.partialorder %v12277_v58, 0.0  ;;  %v12473_v60 = vld [vmem:[%s8712_s30 + $0xa08] sm:$0xff] }
 0x2f4   : > { %v7663_v48 = vpop.eup %7662  ;;  %6070 = vst [vmem:[%s8863_s17 + $0x960] sm:$0xff] %v5558_v61  ;;  %v5559_v51 = vsel %vm4535_vm13, %v7657_v57, %v5047_v53  ;;  %v5048_v13 = vmul.f32 %v7661_v31, %v12345_v26  ;;  %v968_v44 = vand.u32 2147483647, %v12429_v14  ;;  %v2306_v9 = vmul.f32 1.442695, %v1478_v45 }
 0x2f5   : > { %v12422_v20 = vpop.eup %7664  ;;  %6071 = vst [vmem:[%s8863_s17 + $0x968] sm:$0xff] %v5559_v51  ;;  %v5049_v39 = vmul.f32 %v7663_v48, %v12350_v28  ;;  %7682 = vrcp.f32 %v3005_v63  ;;  %v1479_v56 = vsub.f32 0.0, %v967_v11  ;;  %vm4540_vm2 = vcmp.ge.f32.partialorder %v12288_v21, 0.0 }
 0x2f6   : > { %v7667_v36 = vpop.eup %7666  ;;  %v5560_v26 = vsel %vm4536_vm14, %v7661_v31, %v5048_v13  ;;  %v3006_v17 = vadd.f32 1.0, %v12422_v20  ;;  %7684 = vpow2.f32 %v2302_v32  ;;  %v1480_v16 = vsub.f32 0.0, %v968_v44  ;;  %v12493_v32 = vld [vmem:[%s8712_s30 + $0xa18] sm:$0xff] }
 0x2f7   : > { %v12434_v0 = vpop.eup %7668  ;;  %6072 = vst [vmem:[%s8863_s17 + $0x970] sm:$0xff] %v5560_v26  ;;  %v5561_v28 = vsel %vm4537_vm15, %v7663_v48, %v5049_v39  ;;  %v5050_v5 = vmul.f32 %v7667_v36, %v12364_v38  ;;  %v969_v30 = vand.u32 2147483647, %v12448_v29  ;;  %v2308_v43 = vmul.f32 1.442695, %v1479_v56 }
 0x2f8   : > { %v12441_v41 = vpop.eup %7670  ;;  %6073 = vst [vmem:[%s8863_s17 + $0x978] sm:$0xff] %v5561_v28  ;;  %7686 = vrcp.f32 %v3006_v17  ;;  %v3007_v27 = vadd.f32 1.0, %v12434_v0  ;;  %v2310_v12 = vmul.f32 1.442695, %v1480_v16  ;;  %vm4541_vm3 = vcmp.ge.f32.partialorder %v12295_v8, 0.0 }
 0x2f9   : > { %v7673_v7 = vpop.eup %7672  ;;  %v5562_v38 = vsel %vm4538_vm0, %v7667_v36, %v5050_v5  ;;  %v3008_v15 = vadd.f32 1.0, %v12441_v41  ;;  %7688 = vpow2.f32 %v2304_v37  ;;  %v1481_v34 = vsub.f32 0.0, %v969_v30  ;;  %v12503_v37 = vld [vmem:[%s8712_s30 + $0xa20] sm:$0xff] }
 0x2fa   : > { %v12453_v55 = vpop.eup %7674  ;;  %6074 = vst [vmem:[%s8863_s17 + $0x980] sm:$0xff] %v5562_v38  ;;  %v5051_v40 = vmul.f32 %v7673_v7, %v12377_v10  ;;  %7690 = vrcp.f32 %v3007_v27  ;;  %v970_v53 = vand.u32 2147483647, %v12463_v2  ;;  %vm4542_vm4 = vcmp.ge.f32.partialorder %v12313_v18, 0.0 }
 0x2fb   : > { %v12457_v1 = vpop.eup %7676  ;;  %7692 = vrcp.f32 %v3008_v15  ;;  %v3009_v49 = vadd.f32 1.0, %v12453_v55  ;;  %v2312_v31 = vmul.f32 1.442695, %v1481_v34  ;;  %v971_v51 = vand.u32 2147483647, %v12473_v60 }
 0x2fc   : > { %v7679_v6 = vpop.eup %7678  ;;  %v5563_v10 = vsel %vm4539_vm1, %v7673_v7, %v5051_v40  ;;  %v3010_v19 = vadd.f32 1.0, %v12457_v1  ;;  %7694 = vpow2.f32 %v2306_v9  ;;  %v1482_v48 = vsub.f32 0.0, %v970_v53  ;;  %v12517_v40 = vld [vmem:[%s8712_s30 + $0xa28] sm:$0xff] }
 0x2fd   : > { %v12468_v3 = vpop.eup %7680  ;;  %6075 = vst [vmem:[%s8863_s17 + $0x988] sm:$0xff] %v5563_v10  ;;  %v5052_v57 = vmul.f32 %v7679_v6, %v12390_v52  ;;  %7696 = vrcp.f32 %v3009_v49  ;;  %vm4543_vm5 = vcmp.ge.f32.partialorder %v12321_v47, 0.0  ;;  %v972_v13 = vand.u32 2147483647, %v12479_v62 }
 0x2fe   : > { %7698 = vrcp.f32 %v3010_v19  ;;  %v3011_v58 = vadd.f32 1.0, %v12468_v3  ;;  %v1483_v33 = vsub.f32 0.0, %v971_v51  ;;  %vm4544_vm6 = vcmp.ge.f32.partialorder %v12340_v23, 0.0 }
 0x2ff   : > { %v7683_v59 = vpop.eup %7682  ;;  %v5564_v52 = vsel %vm4540_vm2, %v7679_v6, %v5052_v57  ;;  %7700 = vpow2.f32 %v2308_v43  ;;  %v1484_v17 = vsub.f32 0.0, %v972_v13  ;;  %v973_v45 = vand.u32 2147483647, %v12493_v32  ;;  %v12533_v43 = vld [vmem:[%s8712_s30 + $0xa30] sm:$0xff] }
 0x300   : > { %v12484_v61 = vpop.eup %7684  ;;  %6076 = vst [vmem:[%s8863_s17 + $0x990] sm:$0xff] %v5564_v52  ;;  %v5053_v63 = vmul.f32 %v7683_v59, %v12403_v25  ;;  %7702 = vrcp.f32 %v3011_v58  ;;  %v2314_v25 = vmul.f32 1.442695, %v1482_v48  ;;  %v2316_v5 = vmul.f32 1.442695, %v1483_v33  ;;  %v12569_v33 = vld [vmem:[%s8712_s30 + $0xa48] sm:$0xff] }
 0x301   : > { %v3012_v21 = vadd.f32 1.0, %v12484_v61  ;;  %7704 = vpow2.f32 %v2310_v12  ;;  %vm4545_vm7 = vcmp.ge.f32.partialorder %v12355_v24, 0.0  ;;  %v2318_v44 = vmul.f32 1.442695, %v1484_v17 }
 0x302   : > { %v7687_v35 = vpop.eup %7686  ;;  %v5565_v39 = vsel %vm4541_vm3, %v7683_v59, %v5053_v63  ;;  %7706 = vpow2.f32 %v2312_v31  ;;  %v1485_v15 = vsub.f32 0.0, %v973_v45  ;;  %v974_v9 = vand.u32 2147483647, %v12503_v37  ;;  %v12546_v59 = vld [vmem:[%s8712_s30 + $0xa38] sm:$0xff]  ;;  %v12555_v63 = vld [vmem:[%s8712_s30 + $0xa40] sm:$0xff] }
 0x303   : > { %v12497_v36 = vpop.eup %7688  ;;  %6077 = vst [vmem:[%s8863_s17 + $0x998] sm:$0xff] %v5565_v39  ;;  %v5054_v26 = vmul.f32 %v7687_v35, %v12422_v20  ;;  %7708 = vrcp.f32 %v3012_v21  ;;  %vm4546_vm8 = vcmp.ge.f32.partialorder %v12362_v46, 0.0  ;;  %v975_v19 = vand.u32 2147483647, %v12517_v40 }
 0x304   : > { %v7691_v28 = vpop.eup %7690  ;;  %v3013_v8 = vadd.f32 1.0, %v12497_v36  ;;  %7710 = vpow2.f32 %v2314_v25  ;;  %v2320_v30 = vmul.f32 1.442695, %v1485_v15  ;;  %v1486_v10 = vsub.f32 0.0, %v974_v9 }
 0x305   : > { %v7693_v11 = vpop.eup %7692  ;;  %v5566_v27 = vsel %vm4542_vm4, %v7687_v35, %v5054_v26  ;;  %v5055_v20 = vmul.f32 %v7691_v28, %v12434_v0  ;;  %vm4547_vm9 = vcmp.ge.f32.partialorder %v12372_v50, 0.0  ;;  %v1487_v53 = vsub.f32 0.0, %v975_v19 }
 0x306   : > { %v12511_v7 = vpop.eup %7694  ;;  %6078 = vst [vmem:[%s8863_s17 + $0x9a0] sm:$0xff] %v5566_v27  ;;  %v5056_v38 = vmul.f32 %v7693_v11, %v12441_v41  ;;  %7712 = vrcp.f32 %v3013_v8  ;;  %v2322_v58 = vmul.f32 1.442695, %v1486_v10  ;;  %vm4548_vm10 = vcmp.ge.f32.partialorder %v12385_v4, 0.0 }
 0x307   : > { %v7697_v18 = vpop.eup %7696  ;;  %v5567_v0 = vsel %vm4543_vm5, %v7691_v28, %v5055_v20  ;;  %v3014_v56 = vadd.f32 1.0, %v12511_v7  ;;  %7714 = vpow2.f32 %v2316_v5  ;;  %v976_v31 = vand.u32 2147483647, %v12533_v43 }
 0x308   : > { %v7699_v16 = vpop.eup %7698  ;;  %6079 = vst [vmem:[%s8863_s17 + $0x9a8] sm:$0xff] %v5567_v0  ;;  %v5568_v41 = vsel %vm4544_vm6, %v7693_v11, %v5056_v38  ;;  %v5057_v49 = vmul.f32 %v7697_v18, %v12453_v55  ;;  %7716 = vpow2.f32 %v2318_v44  ;;  %v2324_v51 = vmul.f32 1.442695, %v1487_v53  ;;  %v12579_v11 = vld [vmem:[%s8712_s30 + $0xa50] sm:$0xff]  ;;  %v12586_v38 = vld [vmem:[%s8712_s30 + $0xa58] sm:$0xff]  ;;  %v12613_v53 = vld [vmem:[%s8712_s30 + $0xa68] sm:$0xff] }
 0x309   : > { %v12527_v6 = vpop.eup %7700  ;;  %6080 = vst [vmem:[%s8863_s17 + $0x9b0] sm:$0xff] %v5568_v41  ;;  %v5058_v47 = vmul.f32 %v7699_v16, %v12457_v1  ;;  %7718 = vrcp.f32 %v3014_v56  ;;  %v1488_v35 = vsub.f32 0.0, %v976_v31  ;;  %v977_v39 = vand.u32 2147483647, %v12546_v59 }
 0x30a   : > { %v7703_v23 = vpop.eup %7702  ;;  %v5569_v55 = vsel %vm4545_vm7, %v7697_v18, %v5057_v49  ;;  %v3015_v57 = vadd.f32 1.0, %v12527_v6  ;;  %7720 = vpow2.f32 %v2320_v30  ;;  %vm4549_vm11 = vcmp.ge.f32.partialorder %v12395_v54, 0.0  ;;  %v12601_v30 = vld [vmem:[%s8712_s30 + $0xa60] sm:$0xff] }
 0x30b   : > { %v12539_v12 = vpop.eup %7704  ;;  %6081 = vst [vmem:[%s8863_s17 + $0x9b8] sm:$0xff] %v5569_v55  ;;  %v5570_v1 = vsel %vm4546_vm8, %v7699_v16, %v5058_v47  ;;  %v5059_v34 = vmul.f32 %v7703_v23, %v12468_v3  ;;  %v978_v25 = vand.u32 2147483647, %v12555_v63  ;;  %v1489_v28 = vsub.f32 0.0, %v977_v39  ;;  %v12628_v39 = vld [vmem:[%s8712_s30 + $0xa70] sm:$0xff] }
 0x30c   : > { %v12548_v24 = vpop.eup %7706  ;;  %6082 = vst [vmem:[%s8863_s17 + $0x9c0] sm:$0xff] %v5570_v1  ;;  %7722 = vrcp.f32 %v3015_v57  ;;  %v3016_v52 = vadd.f32 1.0, %v12539_v12  ;;  %vm4550_vm12 = vcmp.ge.f32.partialorder %v12409_v42, 0.0  ;;  %v979_v44 = vand.u32 2147483647, %v12569_v33 }
 0x30d   : > { %v7709_v46 = vpop.eup %7708  ;;  %v5571_v3 = vsel %vm4547_vm9, %v7703_v23, %v5059_v34  ;;  %v3017_v48 = vadd.f32 1.0, %v12548_v24  ;;  %7724 = vpow2.f32 %v2322_v58  ;;  %v1490_v45 = vsub.f32 0.0, %v978_v25 }
 0x30e   : > { %v12560_v21 = vpop.eup %7710  ;;  %6083 = vst [vmem:[%s8863_s17 + $0x9c8] sm:$0xff] %v5571_v3  ;;  %v5060_v13 = vmul.f32 %v7709_v46, %v12484_v61  ;;  %7726 = vrcp.f32 %v3016_v52  ;;  %v2326_v61 = vmul.f32 1.442695, %v1488_v35  ;;  %v2328_v20 = vmul.f32 1.442695, %v1489_v28  ;;  %v12643_v28 = vld [vmem:[%s8712_s30 + $0xa80] sm:$0xff] }
 0x30f   : > { %7728 = vrcp.f32 %v3017_v48  ;;  %v3018_v50 = vadd.f32 1.0, %v12560_v21  ;;  %vm4551_vm13 = vcmp.ge.f32.partialorder %v12420_v22, 0.0  ;;  %v2330_v18 = vmul.f32 1.442695, %v1490_v45 }
 0x310   : > { %v7713_v26 = vpop.eup %7712  ;;  %v5572_v17 = vsel %vm4548_vm10, %v7709_v46, %v5060_v13  ;;  %7730 = vpow2.f32 %v2324_v51  ;;  %v1491_v16 = vsub.f32 0.0, %v979_v44  ;;  %v980_v41 = vand.u32 2147483647, %v12579_v11 }
 0x311   : > { %v12573_v8 = vpop.eup %7714  ;;  %6084 = vst [vmem:[%s8863_s17 + $0x9d0] sm:$0xff] %v5572_v17  ;;  %v5061_v5 = vmul.f32 %v7713_v26, %v12497_v36  ;;  %7732 = vrcp.f32 %v3018_v50  ;;  %vm4552_vm14 = vcmp.ge.f32.partialorder %v12429_v14, 0.0  ;;  %v981_v49 = vand.u32 2147483647, %v12586_v38 }
 0x312   : > { %v12581_v27 = vpop.eup %7716  ;;  %v3019_v4 = vadd.f32 1.0, %v12573_v8  ;;  %7734 = vpow2.f32 %v2326_v61  ;;  %v1492_v19 = vsub.f32 0.0, %v980_v41  ;;  %vm4553_vm15 = vcmp.ge.f32.partialorder %v12448_v29, 0.0 }
 0x313   : > { %v7719_v15 = vpop.eup %7718  ;;  %v5573_v36 = vsel %vm4549_vm11, %v7713_v26, %v5061_v5  ;;  %v3020_v9 = vadd.f32 1.0, %v12581_v27  ;;  %v1493_v57 = vsub.f32 0.0, %v981_v49  ;;  %v982_v58 = vand.u32 2147483647, %v12601_v30  ;;  %v12637_v26 = vld [vmem:[%s8712_s30 + $0xa78] sm:$0xff] }
 0x314   : > { %v12592_v0 = vpop.eup %7720  ;;  %6085 = vst [vmem:[%s8863_s17 + $0x9d8] sm:$0xff] %v5573_v36  ;;  %v5062_v56 = vmul.f32 %v7719_v15, %v12511_v7  ;;  %7736 = vrcp.f32 %v3019_v4  ;;  %v2332_v7 = vmul.f32 1.442695, %v1491_v16  ;;  %v2334_v42 = vmul.f32 1.442695, %v1492_v19 }
 0x315   : > { %7738 = vrcp.f32 %v3020_v9  ;;  %v3021_v54 = vadd.f32 1.0, %v12592_v0  ;;  %v2336_v46 = vmul.f32 1.442695, %v1493_v57  ;;  %vm4554_vm0 = vcmp.ge.f32.partialorder %v12463_v2, 0.0 }
 0x316   : > { %v7723_v47 = vpop.eup %7722  ;;  %v5574_v10 = vsel %vm4550_vm12, %v7719_v15, %v5062_v56  ;;  %7740 = vpow2.f32 %v2328_v20  ;;  %v1494_v51 = vsub.f32 0.0, %v982_v58  ;;  %v983_v35 = vand.u32 2147483647, %v12613_v53  ;;  %v12688_v58 = vld [vmem:[%s8712_s30 + $0xa98] sm:$0xff] }
 0x317   : > { %v12605_v23 = vpop.eup %7724  ;;  %6086 = vst [vmem:[%s8863_s17 + $0x9e0] sm:$0xff] %v5574_v10  ;;  %v5063_v55 = vmul.f32 %v7723_v47, %v12527_v6  ;;  %7742 = vrcp.f32 %v3021_v54  ;;  %vm4555_vm1 = vcmp.ge.f32.partialorder %v12473_v60, 0.0  ;;  %vm4556_vm2 = vcmp.ge.f32.partialorder %v12479_v62, 0.0  ;;  %v12667_v10 = vld [vmem:[%s8712_s30 + $0xa88] sm:$0xff] }
 0x318   : > { %v7727_v1 = vpop.eup %7726  ;;  %v3022_v34 = vadd.f32 1.0, %v12605_v23  ;;  %7744 = vpow2.f32 %v2330_v18  ;;  %v2338_v14 = vmul.f32 1.442695, %v1494_v51  ;;  %v1495_v61 = vsub.f32 0.0, %v983_v35 }
 0x319   : > { %v7729_v52 = vpop.eup %7728  ;;  %v5575_v31 = vsel %vm4551_vm13, %v7723_v47, %v5063_v55  ;;  %v5064_v6 = vmul.f32 %v7727_v1, %v12539_v12  ;;  %7746 = vpow2.f32 %v2332_v7  ;;  %v985_v44 = vand.u32 2147483647, %v12637_v26  ;;  %v12675_v55 = vld [vmem:[%s8712_s30 + $0xa90] sm:$0xff] }
 0x31a   : > { %v12618_v3 = vpop.eup %7730  ;;  %6087 = vst [vmem:[%s8863_s17 + $0x9e8] sm:$0xff] %v5575_v31  ;;  %v5065_v48 = vmul.f32 %v7729_v52, %v12548_v24  ;;  %7748 = vrcp.f32 %v3022_v34  ;;  %v2340_v20 = vmul.f32 1.442695, %v1495_v61  ;;  %vm4557_vm3 = vcmp.ge.f32.partialorder %v12493_v32, 0.0 }
 0x31b   : > { %v7733_v13 = vpop.eup %7732  ;;  %v5576_v22 = vsel %vm4552_vm14, %v7727_v1, %v5064_v6  ;;  %v3023_v12 = vadd.f32 1.0, %v12618_v3  ;;  %7750 = vpow2.f32 %v2334_v42  ;;  %v986_v9 = vand.u32 2147483647, %v12643_v28 }
 0x31c   : > { %v12630_v50 = vpop.eup %7734  ;;  %6088 = vst [vmem:[%s8863_s17 + $0x9f0] sm:$0xff] %v5576_v22  ;;  %v5577_v24 = vsel %vm4553_vm15, %v7729_v52, %v5065_v48  ;;  %v5066_v25 = vmul.f32 %v7733_v13, %v12560_v21  ;;  %7752 = vpow2.f32 %v2336_v46  ;;  %v984_v21 = vand.u32 2147483647, %v12628_v39 }
 0x31d   : > { %6089 = vst [vmem:[%s8863_s17 + $0x9f8] sm:$0xff] %v5577_v24  ;;  %7754 = vrcp.f32 %v3023_v12  ;;  %v3024_v17 = vadd.f32 1.0, %v12630_v50  ;;  %v1497_v16 = vsub.f32 0.0, %v985_v44  ;;  %v1498_v47 = vsub.f32 0.0, %v986_v9  ;;  %v12703_v24 = vld [vmem:[%s8712_s30 + $0xaa0] sm:$0xff] }
 0x31e   : > { %v7737_v5 = vpop.eup %7736  ;;  %v5578_v29 = vsel %vm4554_vm0, %v7733_v13, %v5066_v25  ;;  %7756 = vpow2.f32 %v2338_v14  ;;  %v1496_v36 = vsub.f32 0.0, %v984_v21  ;;  %vm4558_vm4 = vcmp.ge.f32.partialorder %v12503_v37, 0.0 }
 0x31f   : > { %v7739_v45 = vpop.eup %7738  ;;  %6090 = vst [vmem:[%s8863_s17 + $0xa00] sm:$0xff] %v5578_v29  ;;  %v5067_v4 = vmul.f32 %v7737_v5, %v12573_v8  ;;  %7758 = vrcp.f32 %v3024_v17  ;;  %v2344_v19 = vmul.f32 1.442695, %v1497_v16  ;;  %vm4559_vm5 = vcmp.ge.f32.partialorder %v12517_v40, 0.0  ;;  %v12708_v17 = vld [vmem:[%s8712_s30 + $0xaa8] sm:$0xff] }
 0x320   : > { %v12652_v15 = vpop.eup %7740  ;;  %v5068_v2 = vmul.f32 %v7739_v45, %v12581_v27  ;;  %7760 = vpow2.f32 %v2340_v20  ;;  %v2342_v49 = vmul.f32 1.442695, %v1496_v36  ;;  %vm4560_vm6 = vcmp.ge.f32.partialorder %v12533_v43, 0.0 }
 0x321   : > { %v7743_v18 = vpop.eup %7742  ;;  %v5579_v56 = vsel %vm4555_vm1, %v7737_v5, %v5067_v4  ;;  %v3025_v8 = vadd.f32 1.0, %v12652_v15  ;;  %v987_v42 = vand.u32 2147483647, %v12667_v10  ;;  %v2346_v31 = vmul.f32 1.442695, %v1498_v47  ;;  %v12719_v4 = vld [vmem:[%s8712_s30 + $0xab0] sm:$0xff] }
 0x322   : > { %v12660_v41 = vpop.eup %7744  ;;  %6091 = vst [vmem:[%s8863_s17 + $0xa08] sm:$0xff] %v5579_v56  ;;  %v5580_v27 = vsel %vm4556_vm2, %v7739_v45, %v5068_v2  ;;  %v5069_v54 = vmul.f32 %v7743_v18, %v12592_v0  ;;  %v988_v6 = vand.u32 2147483647, %v12675_v55  ;;  %v989_v35 = vand.u32 2147483647, %v12688_v58 }
 0x323   : > { %v12669_v60 = vpop.eup %7746  ;;  %6092 = vst [vmem:[%s8863_s17 + $0xa10] sm:$0xff] %v5580_v27  ;;  %7762 = vrcp.f32 %v3025_v8  ;;  %v3026_v7 = vadd.f32 1.0, %v12660_v41  ;;  %v1499_v51 = vsub.f32 0.0, %v987_v42  ;;  %vm4561_vm7 = vcmp.ge.f32.partialorder %v12546_v59, 0.0  ;;  %v12732_v8 = vld [vmem:[%s8712_s30 + $0xab8] sm:$0xff] }
 0x324   : > { %v7749_v62 = vpop.eup %7748  ;;  %v5581_v0 = vsel %vm4557_vm3, %v7743_v18, %v5069_v54  ;;  %v3027_v57 = vadd.f32 1.0, %v12669_v60  ;;  %7764 = vpow2.f32 %v2342_v49  ;;  %v1500_v12 = vsub.f32 0.0, %v988_v6 }
 0x325   : > { %v12681_v1 = vpop.eup %7750  ;;  %6093 = vst [vmem:[%s8863_s17 + $0xa18] sm:$0xff] %v5581_v0  ;;  %v5070_v34 = vmul.f32 %v7749_v62, %v12605_v23  ;;  %7766 = vrcp.f32 %v3026_v7  ;;  %v2348_v14 = vmul.f32 1.442695, %v1499_v51  ;;  %vm4562_vm8 = vcmp.ge.f32.partialorder %v12555_v63, 0.0 }
 0x326   : > { %v12690_v32 = vpop.eup %7752  ;;  %7768 = vrcp.f32 %v3027_v57  ;;  %v3028_v52 = vadd.f32 1.0, %v12681_v1  ;;  %v2350_v5 = vmul.f32 1.442695, %v1500_v12  ;;  %v1501_v21 = vsub.f32 0.0, %v989_v35 }
 0x327   : > { %v7755_v46 = vpop.eup %7754  ;;  %v5582_v23 = vsel %vm4558_vm4, %v7749_v62, %v5070_v34  ;;  %v3029_v48 = vadd.f32 1.0, %v12690_v32  ;;  %7770 = vpow2.f32 %v2344_v19  ;;  %v990_v45 = vand.u32 2147483647, %v12703_v24  ;;  %v12746_v34 = vld [vmem:[%s8712_s30 + $0xac0] sm:$0xff] }
 0x328   : > { %v12697_v13 = vpop.eup %7756  ;;  %6094 = vst [vmem:[%s8863_s17 + $0xa20] sm:$0xff] %v5582_v23  ;;  %v5071_v22 = vmul.f32 %v7755_v46, %v12618_v3  ;;  %7772 = vrcp.f32 %v3028_v52  ;;  %vm4563_vm9 = vcmp.ge.f32.partialorder %v12569_v33, 0.0  ;;  %v2352_v2 = vmul.f32 1.442695, %v1501_v21  ;;  %v12756_v23 = vld [vmem:[%s8712_s30 + $0xac8] sm:$0xff]  ;;  %v12765_v33 = vld [vmem:[%s8712_s30 + $0xad0] sm:$0xff] }
 0x329   : > { %v7759_v25 = vpop.eup %7758  ;;  %7774 = vrcp.f32 %v3029_v48  ;;  %v3030_v37 = vadd.f32 1.0, %v12697_v13  ;;  %v1502_v36 = vsub.f32 0.0, %v990_v45  ;;  %v992_v56 = vand.u32 2147483647, %v12719_v4  ;;  %v12784_v21 = vld [vmem:[%s8712_s30 + $0xad8] sm:$0xff] }
 0x32a   : > { %v5583_v3 = vsel %vm4559_vm5, %v7755_v46, %v5071_v22  ;;  %v5072_v61 = vmul.f32 %v7759_v25, %v12630_v50  ;;  %7776 = vpow2.f32 %v2346_v31  ;;  %v12713_v29 = vpop.eup %7760  ;;  %v991_v50 = vand.u32 2147483647, %v12708_v17 }
 0x32b   : > { %6095 = vst [vmem:[%s8863_s17 + $0xa28] sm:$0xff] %v5583_v3  ;;  %7778 = vrcp.f32 %v3030_v37  ;;  %v3031_v20 = vadd.f32 1.0, %v12713_v29  ;;  %vm4564_vm10 = vcmp.ge.f32.partialorder %v12579_v11, 0.0  ;;  %v2354_v54 = vmul.f32 1.442695, %v1502_v36 }
 0x32c   : > { %v5584_v40 = vsel %vm4560_vm6, %v7759_v25, %v5072_v61  ;;  %7780 = vpow2.f32 %v2348_v14  ;;  %v1503_v43 = vsub.f32 0.0, %v991_v50  ;;  %v1504_v19 = vsub.f32 0.0, %v992_v56 }
 0x32d   : > { %v7763_v44 = vpop.eup %7762  ;;  %6096 = vst [vmem:[%s8863_s17 + $0xa30] sm:$0xff] %v5584_v40  ;;  %7782 = vpow2.f32 %v2350_v5  ;;  %vm4565_vm11 = vcmp.ge.f32.partialorder %v12586_v38, 0.0  ;;  %v993_v57 = vand.u32 2147483647, %v12732_v8  ;;  %vm4566_vm12 = vcmp.ge.f32.partialorder %v12601_v30, 0.0 }
 0x32e   : > { %v12727_v9 = vpop.eup %7764  ;;  %v5073_v18 = vmul.f32 %v7763_v44, %v12652_v15  ;;  %7784 = vrcp.f32 %v3031_v20  ;;  %v2356_v7 = vmul.f32 1.442695, %v1503_v43  ;;  %v2358_v52 = vmul.f32 1.442695, %v1504_v19  ;;  %v12815_v19 = vld [vmem:[%s8712_s30 + $0xaf0] sm:$0xff] }
 0x32f   : > { %v7767_v16 = vpop.eup %7766  ;;  %v3032_v27 = vadd.f32 1.0, %v12727_v9  ;;  %7786 = vpow2.f32 %v2352_v2  ;;  %v1505_v46 = vsub.f32 0.0, %v993_v57  ;;  %v994_v51 = vand.u32 2147483647, %v12746_v34 }
 0x330   : > { %v7769_v49 = vpop.eup %7768  ;;  %v5585_v47 = vsel %vm4561_vm7, %v7763_v44, %v5073_v18  ;;  %v5074_v15 = vmul.f32 %v7767_v16, %v12660_v41  ;;  %v995_v3 = vand.u32 2147483647, %v12756_v23  ;;  %vm4567_vm13 = vcmp.ge.f32.partialorder %v12613_v53, 0.0  ;;  %v12797_v18 = vld [vmem:[%s8712_s30 + $0xae0] sm:$0xff] }
 0x331   : > { %v12739_v62 = vpop.eup %7770  ;;  %6097 = vst [vmem:[%s8863_s17 + $0xa38] sm:$0xff] %v5585_v47  ;;  %v5075_v0 = vmul.f32 %v7769_v49, %v12669_v60  ;;  %7788 = vrcp.f32 %v3032_v27  ;;  %v2360_v35 = vmul.f32 1.442695, %v1505_v46  ;;  %v1506_v14 = vsub.f32 0.0, %v994_v51  ;;  %v12807_v47 = vld [vmem:[%s8712_s30 + $0xae8] sm:$0xff] }
 0x332   : > { %v7773_v59 = vpop.eup %7772  ;;  %v5586_v41 = vsel %vm4562_vm8, %v7767_v16, %v5074_v15  ;;  %v3033_v42 = vadd.f32 1.0, %v12739_v62  ;;  %7790 = vpow2.f32 %v2354_v54  ;;  %v996_v5 = vand.u32 2147483647, %v12765_v33 }
 0x333   : > { %v7775_v31 = vpop.eup %7774  ;;  %6098 = vst [vmem:[%s8863_s17 + $0xa40] sm:$0xff] %v5586_v41  ;;  %v5587_v60 = vsel %vm4563_vm9, %v7769_v49, %v5075_v0  ;;  %v5076_v6 = vmul.f32 %v7773_v59, %v12681_v1  ;;  %7792 = vpow2.f32 %v2356_v7  ;;  %v2362_v40 = vmul.f32 1.442695, %v1506_v14 }
 0x334   : > { %v12758_v48 = vpop.eup %7776  ;;  %6099 = vst [vmem:[%s8863_s17 + $0xa48] sm:$0xff] %v5587_v60  ;;  %v5077_v63 = vmul.f32 %v7775_v31, %v12690_v32  ;;  %7794 = vrcp.f32 %v3033_v42  ;;  %v1507_v44 = vsub.f32 0.0, %v995_v3  ;;  %v1508_v2 = vsub.f32 0.0, %v996_v5 }
 0x335   : > { %v7779_v22 = vpop.eup %7778  ;;  %v5588_v1 = vsel %vm4564_vm10, %v7773_v59, %v5076_v6  ;;  %v3034_v12 = vadd.f32 1.0, %v12758_v48  ;;  %7796 = vpow2.f32 %v2358_v52  ;;  %vm4568_vm14 = vcmp.ge.f32.partialorder %v12628_v39, 0.0  ;;  %v12829_v6 = vld [vmem:[%s8712_s30 + $0xaf8] sm:$0xff] }
 0x336   : > { %v12770_v25 = vpop.eup %7780  ;;  %6100 = vst [vmem:[%s8863_s17 + $0xa50] sm:$0xff] %v5588_v1  ;;  %v5589_v32 = vsel %vm4565_vm11, %v7775_v31, %v5077_v63  ;;  %v5078_v37 = vmul.f32 %v7779_v22, %v12697_v13  ;;  %v997_v36 = vand.u32 2147483647, %v12784_v21  ;;  %v2366_v16 = vmul.f32 1.442695, %v1508_v2 }
 0x337   : > { %v12777_v61 = vpop.eup %7782  ;;  %6101 = vst [vmem:[%s8863_s17 + $0xa58] sm:$0xff] %v5589_v32  ;;  %7798 = vrcp.f32 %v3034_v12  ;;  %v3035_v11 = vadd.f32 1.0, %v12770_v25  ;;  %vm4569_vm15 = vcmp.ge.f32.partialorder %v12637_v26, 0.0  ;;  %vm4570_vm0 = vcmp.ge.f32.partialorder %v12643_v28, 0.0 }
 0x338   : > { %v7785_v38 = vpop.eup %7784  ;;  %v5590_v13 = vsel %vm4566_vm12, %v7779_v22, %v5078_v37  ;;  %v3036_v45 = vadd.f32 1.0, %v12777_v61  ;;  %7800 = vpow2.f32 %v2360_v35  ;;  %v1509_v49 = vsub.f32 0.0, %v997_v36  ;;  %v12839_v35 = vld [vmem:[%s8712_s30 + $0xb00] sm:$0xff] }
 0x339   : > { %v12789_v20 = vpop.eup %7786  ;;  %6102 = vst [vmem:[%s8863_s17 + $0xa60] sm:$0xff] %v5590_v13  ;;  %v5079_v50 = vmul.f32 %v7785_v38, %v12713_v29  ;;  %7802 = vrcp.f32 %v3035_v11  ;;  %v2364_v29 = vmul.f32 1.442695, %v1507_v44  ;;  %v998_v7 = vand.u32 2147483647, %v12797_v18 }
 0x33a   : > { %7804 = vrcp.f32 %v3036_v45  ;;  %v3037_v30 = vadd.f32 1.0, %v12789_v20  ;;  %v2368_v59 = vmul.f32 1.442695, %v1509_v49  ;;  %v999_v31 = vand.u32 2147483647, %v12807_v47 }
 0x33b   : > { %v7789_v43 = vpop.eup %7788  ;;  %v5591_v56 = vsel %vm4567_vm13, %v7785_v38, %v5079_v50  ;;  %7806 = vpow2.f32 %v2362_v40  ;;  %v1510_v52 = vsub.f32 0.0, %v998_v7  ;;  %vm4571_vm1 = vcmp.ge.f32.partialorder %v12667_v10, 0.0  ;;  %v12853_v50 = vld [vmem:[%s8712_s30 + $0xb08] sm:$0xff] }
 0x33c   : > { %v12801_v27 = vpop.eup %7790  ;;  %6103 = vst [vmem:[%s8863_s17 + $0xa68] sm:$0xff] %v5591_v56  ;;  %v5080_v54 = vmul.f32 %v7789_v43, %v12727_v9  ;;  %7808 = vrcp.f32 %v3037_v30  ;;  %v1000_v60 = vand.u32 2147483647, %v12815_v19  ;;  %v1511_v51 = vsub.f32 0.0, %v999_v31 }
 0x33d   : > { %v12809_v15 = vpop.eup %7792  ;;  %v3038_v53 = vadd.f32 1.0, %v12801_v27  ;;  %7810 = vpow2.f32 %v2364_v29  ;;  %vm4572_vm2 = vcmp.ge.f32.partialorder %v12675_v55, 0.0  ;;  %v1001_v14 = vand.u32 2147483647, %v12829_v6 }
 0x33e   : > { %v7795_v9 = vpop.eup %7794  ;;  %v5592_v0 = vsel %vm4568_vm14, %v7789_v43, %v5080_v54  ;;  %v3039_v57 = vadd.f32 1.0, %v12809_v15  ;;  %7812 = vpow2.f32 %v2366_v16  ;;  %v1512_v12 = vsub.f32 0.0, %v1000_v60  ;;  %v12871_v16 = vld [vmem:[%s8712_s30 + $0xb10] sm:$0xff] }
 0x33f   : > { %v12820_v41 = vpop.eup %7796  ;;  %6104 = vst [vmem:[%s8863_s17 + $0xa70] sm:$0xff] %v5592_v0  ;;  %v5081_v42 = vmul.f32 %v7795_v9, %v12739_v62  ;;  %7814 = vrcp.f32 %v3038_v53  ;;  %v2370_v62 = vmul.f32 1.442695, %v1510_v52  ;;  %v2372_v37 = vmul.f32 1.442695, %v1511_v51  ;;  %v12880_v0 = vld [vmem:[%s8712_s30 + $0xb18] sm:$0xff] }
 0x340   : > { %7816 = vrcp.f32 %v3039_v57  ;;  %v3040_v39 = vadd.f32 1.0, %v12820_v41  ;;  %vm4573_vm3 = vcmp.ge.f32.partialorder %v12688_v58, 0.0  ;;  %v2374_v5 = vmul.f32 1.442695, %v1512_v12 }
 0x341   : > { %v7799_v46 = vpop.eup %7798  ;;  %v5593_v63 = vsel %vm4569_vm15, %v7795_v9, %v5081_v42  ;;  %7818 = vpow2.f32 %v2368_v59  ;;  %v1513_v45 = vsub.f32 0.0, %v1001_v14  ;;  %v1002_v40 = vand.u32 2147483647, %v12839_v35  ;;  %v12888_v42 = vld [vmem:[%s8712_s30 + $0xb20] sm:$0xff] }
 0x342   : > { %v12833_v22 = vpop.eup %7800  ;;  %6105 = vst [vmem:[%s8863_s17 + $0xa78] sm:$0xff] %v5593_v63  ;;  %v5082_v1 = vmul.f32 %v7799_v46, %v12758_v48  ;;  %7820 = vrcp.f32 %v3040_v39  ;;  %vm4574_vm4 = vcmp.ge.f32.partialorder %v12703_v24, 0.0  ;;  %v1003_v29 = vand.u32 2147483647, %v12853_v50 }
 0x343   : > { %v7803_v32 = vpop.eup %7802  ;;  %v3041_v26 = vadd.f32 1.0, %v12833_v22  ;;  %7822 = vpow2.f32 %v2370_v62  ;;  %v2376_v36 = vmul.f32 1.442695, %v1513_v45  ;;  %v1514_v56 = vsub.f32 0.0, %v1002_v40 }
 0x344   : > { %v7805_v3 = vpop.eup %7804  ;;  %v5594_v11 = vsel %vm4570_vm0, %v7799_v46, %v5082_v1  ;;  %v5083_v48 = vmul.f32 %v7803_v32, %v12770_v25  ;;  %vm4575_vm5 = vcmp.ge.f32.partialorder %v12708_v17, 0.0  ;;  %v1515_v9 = vsub.f32 0.0, %v1003_v29  ;;  %v12905_v1 = vld [vmem:[%s8712_s30 + $0xb28] sm:$0xff] }
 0x345   : > { %v12847_v38 = vpop.eup %7806  ;;  %6106 = vst [vmem:[%s8863_s17 + $0xa80] sm:$0xff] %v5594_v11  ;;  %v5084_v13 = vmul.f32 %v7805_v3, %v12777_v61  ;;  %7824 = vrcp.f32 %v3041_v26  ;;  %v2378_v7 = vmul.f32 1.442695, %v1514_v56  ;;  %vm4576_vm6 = vcmp.ge.f32.partialorder %v12719_v4, 0.0 }
 0x346   : > { %v7809_v28 = vpop.eup %7808  ;;  %v5595_v25 = vsel %vm4571_vm1, %v7803_v32, %v5083_v48  ;;  %v3042_v44 = vadd.f32 1.0, %v12847_v38  ;;  %7826 = vpow2.f32 %v2372_v37  ;;  %v1004_v59 = vand.u32 2147483647, %v12871_v16 }
 0x347   : > { %v12859_v2 = vpop.eup %7810  ;;  %6107 = vst [vmem:[%s8863_s17 + $0xa88] sm:$0xff] %v5595_v25  ;;  %v5596_v61 = vsel %vm4572_vm2, %v7805_v3, %v5084_v13  ;;  %v5085_v30 = vmul.f32 %v7809_v28, %v12789_v20  ;;  %7828 = vpow2.f32 %v2374_v5  ;;  %v2380_v39 = vmul.f32 1.442695, %v1515_v9  ;;  %v12915_v3 = vld [vmem:[%s8712_s30 + $0xb30] sm:$0xff]  ;;  %v12922_v13 = vld [vmem:[%s8712_s30 + $0xb38] sm:$0xff]  ;;  %v12951_v9 = vld [vmem:[%s8712_s30 + $0xb48] sm:$0xff] }
 0x348   : > { %v12865_v43 = vpop.eup %7812  ;;  %6108 = vst [vmem:[%s8863_s17 + $0xa90] sm:$0xff] %v5596_v61  ;;  %7830 = vrcp.f32 %v3042_v44  ;;  %v3043_v10 = vadd.f32 1.0, %v12859_v2  ;;  %v1516_v63 = vsub.f32 0.0, %v1004_v59  ;;  %v1005_v62 = vand.u32 2147483647, %v12880_v0 }
 0x349   : > { %v7815_v54 = vpop.eup %7814  ;;  %v5597_v55 = vsel %vm4573_vm3, %v7809_v28, %v5085_v30  ;;  %v3044_v20 = vadd.f32 1.0, %v12865_v43  ;;  %7832 = vpow2.f32 %v2376_v36  ;;  %vm4577_vm7 = vcmp.ge.f32.partialorder %v12732_v8, 0.0 }
 0x34a   : > { %v7817_v49 = vpop.eup %7816  ;;  %6109 = vst [vmem:[%s8863_s17 + $0xa98] sm:$0xff] %v5597_v55  ;;  %v5086_v53 = vmul.f32 %v7815_v54, %v12801_v27  ;;  %7834 = vrcp.f32 %v3043_v10  ;;  %v1006_v51 = vand.u32 2147483647, %v12888_v42  ;;  %v1517_v32 = vsub.f32 0.0, %v1005_v62 }
 0x34b   : > { %v12882_v57 = vpop.eup %7818  ;;  %v5087_v58 = vmul.f32 %v7817_v49, %v12809_v15  ;;  %7836 = vrcp.f32 %v3044_v20  ;;  %vm4578_vm8 = vcmp.ge.f32.partialorder %v12746_v34, 0.0  ;;  %v1007_v5 = vand.u32 2147483647, %v12905_v1 }
 0x34c   : > { %v7821_v52 = vpop.eup %7820  ;;  %v5598_v27 = vsel %vm4574_vm4, %v7815_v54, %v5086_v53  ;;  %v3045_v31 = vadd.f32 1.0, %v12882_v57  ;;  %7838 = vpow2.f32 %v2378_v7  ;;  %v1518_v14 = vsub.f32 0.0, %v1006_v51  ;;  %v12944_v7 = vld [vmem:[%s8712_s30 + $0xb40] sm:$0xff] }
 0x34d   : > { %v12893_v60 = vpop.eup %7822  ;;  %6110 = vst [vmem:[%s8863_s17 + $0xaa0] sm:$0xff] %v5598_v27  ;;  %v5599_v15 = vsel %vm4575_vm5, %v7817_v49, %v5087_v58  ;;  %v5088_v46 = vmul.f32 %v7821_v52, %v12820_v41  ;;  %v2382_v41 = vmul.f32 1.442695, %v1516_v63  ;;  %v2384_v48 = vmul.f32 1.442695, %v1517_v32  ;;  %v12969_v63 = vld [vmem:[%s8712_s30 + $0xb58] sm:$0xff] }
 0x34e   : > { %6111 = vst [vmem:[%s8863_s17 + $0xaa8] sm:$0xff] %v5599_v15  ;;  %7840 = vrcp.f32 %v3045_v31  ;;  %v3046_v24 = vadd.f32 1.0, %v12893_v60  ;;  %vm4579_vm9 = vcmp.ge.f32.partialorder %v12756_v23, 0.0  ;;  %v2386_v28 = vmul.f32 1.442695, %v1518_v14 }
 0x34f   : > { %v7825_v12 = vpop.eup %7824  ;;  %v5600_v17 = vsel %vm4576_vm6, %v7821_v52, %v5088_v46  ;;  %7842 = vpow2.f32 %v2380_v39  ;;  %v1519_v61 = vsub.f32 0.0, %v1007_v5  ;;  %v1008_v30 = vand.u32 2147483647, %v12915_v3  ;;  %v12963_v39 = vld [vmem:[%s8712_s30 + $0xb50] sm:$0xff] }
 0x350   : > { %v12909_v26 = vpop.eup %7826  ;;  %6112 = vst [vmem:[%s8863_s17 + $0xab0] sm:$0xff] %v5600_v17  ;;  %v5089_v37 = vmul.f32 %v7825_v12, %v12833_v22  ;;  %7844 = vrcp.f32 %v3046_v24  ;;  %vm4580_vm10 = vcmp.ge.f32.partialorder %v12765_v33, 0.0  ;;  %v1009_v10 = vand.u32 2147483647, %v12922_v13 }
 0x351   : > { %v12917_v11 = vpop.eup %7828  ;;  %v3047_v4 = vadd.f32 1.0, %v12909_v26  ;;  %7846 = vpow2.f32 %v2382_v41  ;;  %v2388_v54 = vmul.f32 1.442695, %v1519_v61  ;;  %v1520_v49 = vsub.f32 0.0, %v1008_v30 }
 0x352   : > { %v7831_v45 = vpop.eup %7830  ;;  %v5601_v22 = vsel %vm4577_vm7, %v7825_v12, %v5089_v37  ;;  %v3048_v40 = vadd.f32 1.0, %v12917_v11  ;;  %v1521_v53 = vsub.f32 0.0, %v1009_v10  ;;  %vm4581_vm11 = vcmp.ge.f32.partialorder %v12784_v21, 0.0 }
 0x353   : > { %v12928_v25 = vpop.eup %7832  ;;  %6113 = vst [vmem:[%s8863_s17 + $0xab8] sm:$0xff] %v5601_v22  ;;  %v5090_v44 = vmul.f32 %v7831_v45, %v12847_v38  ;;  %7848 = vrcp.f32 %v3047_v4  ;;  %v2390_v59 = vmul.f32 1.442695, %v1520_v49  ;;  %vm4582_vm12 = vcmp.ge.f32.partialorder %v12797_v18, 0.0 }
 0x354   : > { %v7835_v36 = vpop.eup %7834  ;;  %7850 = vrcp.f32 %v3048_v40  ;;  %v3049_v8 = vadd.f32 1.0, %v12928_v25  ;;  %v2392_v52 = vmul.f32 1.442695, %v1521_v53  ;;  %v1010_v31 = vand.u32 2147483647, %v12944_v7 }
 0x355   : > { %v7837_v56 = vpop.eup %7836  ;;  %v5602_v29 = vsel %vm4578_vm8, %v7831_v45, %v5090_v44  ;;  %v5091_v38 = vmul.f32 %v7835_v36, %v12859_v2  ;;  %7852 = vpow2.f32 %v2384_v48  ;;  %vm4583_vm13 = vcmp.ge.f32.partialorder %v12807_v47, 0.0  ;;  %v12986_v45 = vld [vmem:[%s8712_s30 + $0xb60] sm:$0xff] }
 0x356   : > { %v12939_v55 = vpop.eup %7838  ;;  %6114 = vst [vmem:[%s8863_s17 + $0xac0] sm:$0xff] %v5602_v29  ;;  %v5092_v20 = vmul.f32 %v7837_v56, %v12865_v43  ;;  %7854 = vrcp.f32 %v3049_v8  ;;  %v1011_v46 = vand.u32 2147483647, %v12951_v9  ;;  %v1522_v51 = vsub.f32 0.0, %v1010_v31 }
 0x357   : > { %v5603_v34 = vsel %vm4579_vm9, %v7835_v36, %v5091_v38  ;;  %v3050_v2 = vadd.f32 1.0, %v12939_v55  ;;  %7856 = vpow2.f32 %v2386_v28  ;;  %v1012_v41 = vand.u32 2147483647, %v12963_v39  ;;  %v12993_v28 = vld [vmem:[%s8712_s30 + $0xb68] sm:$0xff] }
 0x358   : > { %v7841_v58 = vpop.eup %7840  ;;  %6115 = vst [vmem:[%s8863_s17 + $0xac8] sm:$0xff] %v5603_v34  ;;  %v5604_v43 = vsel %vm4580_vm10, %v7837_v56, %v5092_v20  ;;  %7858 = vpow2.f32 %v2388_v54  ;;  %v1523_v17 = vsub.f32 0.0, %v1011_v46  ;;  %vm4584_vm14 = vcmp.ge.f32.partialorder %v12815_v19, 0.0  ;;  %v13012_v54 = vld [vmem:[%s8712_s30 + $0xb70] sm:$0xff] }
 0x359   : > { %v12956_v27 = vpop.eup %7842  ;;  %6116 = vst [vmem:[%s8863_s17 + $0xad0] sm:$0xff] %v5604_v43  ;;  %v5093_v23 = vmul.f32 %v7841_v58, %v12882_v57  ;;  %7860 = vrcp.f32 %v3050_v2  ;;  %v2394_v21 = vmul.f32 1.442695, %v1522_v51  ;;  %v1524_v5 = vsub.f32 0.0, %v1012_v41 }
 0x35a   : > { %v7845_v15 = vpop.eup %7844  ;;  %v3051_v33 = vadd.f32 1.0, %v12956_v27  ;;  %7862 = vpow2.f32 %v2390_v59  ;;  %v2396_v48 = vmul.f32 1.442695, %v1523_v17  ;;  %vm4585_vm15 = vcmp.ge.f32.partialorder %v12829_v6, 0.0 }
 0x35b   : > { %v12971_v62 = vpop.eup %7846  ;;  %v5605_v57 = vsel %vm4581_vm11, %v7841_v58, %v5093_v23  ;;  %v5094_v24 = vmul.f32 %v7845_v15, %v12893_v60  ;;  %7864 = vpow2.f32 %v2392_v52  ;;  %v1013_v60 = vand.u32 2147483647, %v12969_v63  ;;  %v13023_v58 = vld [vmem:[%s8712_s30 + $0xb78] sm:$0xff]  ;;  %v13030_v23 = vld [vmem:[%s8712_s30 + $0xb80] sm:$0xff] }
 0x35c   : > { %6117 = vst [vmem:[%s8863_s17 + $0xad8] sm:$0xff] %v5605_v57  ;;  %7866 = vrcp.f32 %v3051_v33  ;;  %v3052_v12 = vadd.f32 1.0, %v12971_v62  ;;  %v2398_v30 = vmul.f32 1.442695, %v1524_v5  ;;  %vm4586_vm0 = vcmp.ge.f32.partialorder %v12839_v35, 0.0 }
 0x35d   : > { %v7849_v32 = vpop.eup %7848  ;;  %v5606_v37 = vsel %vm4582_vm12, %v7845_v15, %v5094_v24  ;;  %v1525_v40 = vsub.f32 0.0, %v1013_v60  ;;  %v1014_v10 = vand.u32 2147483647, %v12986_v45  ;;  %v1015_v38 = vand.u32 2147483647, %v12993_v28 }
 0x35e   : > { %v7851_v14 = vpop.eup %7850  ;;  %6118 = vst [vmem:[%s8863_s17 + $0xae0] sm:$0xff] %v5606_v37  ;;  %v5095_v4 = vmul.f32 %v7849_v32, %v12909_v26  ;;  %7868 = vrcp.f32 %v3052_v12  ;;  %vm4587_vm1 = vcmp.ge.f32.partialorder %v12853_v50, 0.0  ;;  %v1016_v52 = vand.u32 2147483647, %v13012_v54 }
 0x35f   : > { %v12988_v22 = vpop.eup %7852  ;;  %v5096_v18 = vmul.f32 %v7851_v14, %v12917_v11  ;;  %7870 = vpow2.f32 %v2394_v21  ;;  %v2400_v29 = vmul.f32 1.442695, %v1525_v40  ;;  %v1526_v49 = vsub.f32 0.0, %v1014_v10 }
 0x360   : > { %v7855_v44 = vpop.eup %7854  ;;  %v5607_v26 = vsel %vm4583_vm13, %v7849_v32, %v5095_v4  ;;  %v3053_v61 = vadd.f32 1.0, %v12988_v22  ;;  %7872 = vpow2.f32 %v2396_v48  ;;  %v1527_v2 = vsub.f32 0.0, %v1015_v38  ;;  %v13047_v32 = vld [vmem:[%s8712_s30 + $0xb88] sm:$0xff]  ;;  %v13054_v4 = vld [vmem:[%s8712_s30 + $0xb90] sm:$0xff] }
 0x361   : > { %v12998_v36 = vpop.eup %7856  ;;  %6119 = vst [vmem:[%s8863_s17 + $0xae8] sm:$0xff] %v5607_v26  ;;  %v5608_v11 = vsel %vm4584_vm14, %v7851_v14, %v5096_v18  ;;  %v5097_v8 = vmul.f32 %v7855_v44, %v12928_v25  ;;  %v2402_v59 = vmul.f32 1.442695, %v1526_v49  ;;  %vm4588_vm2 = vcmp.ge.f32.partialorder %v12871_v16, 0.0  ;;  %v13081_v49 = vld [vmem:[%s8712_s30 + $0xba0] sm:$0xff] }
 0x362   : > { %v13006_v47 = vpop.eup %7858  ;;  %6120 = vst [vmem:[%s8863_s17 + $0xaf0] sm:$0xff] %v5608_v11  ;;  %7874 = vrcp.f32 %v3053_v61  ;;  %v3054_v56 = vadd.f32 1.0, %v12998_v36  ;;  %v2404_v33 = vmul.f32 1.442695, %v1527_v2  ;;  %v1528_v57 = vsub.f32 0.0, %v1016_v52  ;;  %v13068_v61 = vld [vmem:[%s8712_s30 + $0xb98] sm:$0xff] }
 0x363   : > { %v7861_v19 = vpop.eup %7860  ;;  %v5609_v25 = vsel %vm4585_vm15, %v7855_v44, %v5097_v8  ;;  %v3055_v20 = vadd.f32 1.0, %v13006_v47  ;;  %7876 = vpow2.f32 %v2398_v30  ;;  %vm4589_vm3 = vcmp.ge.f32.partialorder %v12880_v0, 0.0 }
 0x364   : > { %v13017_v53 = vpop.eup %7862  ;;  %6121 = vst [vmem:[%s8863_s17 + $0xaf8] sm:$0xff] %v5609_v25  ;;  %v5098_v34 = vmul.f32 %v7861_v19, %v12939_v55  ;;  %7878 = vrcp.f32 %v3054_v56  ;;  %v1017_v35 = vand.u32 2147483647, %v13023_v58  ;;  %v1018_v51 = vand.u32 2147483647, %v13030_v23 }
 0x365   : > { %v13025_v43 = vpop.eup %7864  ;;  %7880 = vrcp.f32 %v3055_v20  ;;  %v3056_v6 = vadd.f32 1.0, %v13017_v53  ;;  %v2406_v41 = vmul.f32 1.442695, %v1528_v57  ;;  %vm4590_vm4 = vcmp.ge.f32.partialorder %v12888_v42, 0.0 }
 0x366   : > { %v7867_v31 = vpop.eup %7866  ;;  %v5610_v55 = vsel %vm4586_vm0, %v7861_v19, %v5098_v34  ;;  %v3057_v15 = vadd.f32 1.0, %v13025_v43  ;;  %7882 = vpow2.f32 %v2400_v29  ;;  %v1529_v60 = vsub.f32 0.0, %v1017_v35 }
 0x367   : > { %6122 = vst [vmem:[%s8863_s17 + $0xb00] sm:$0xff] %v5610_v55  ;;  %v5099_v46 = vmul.f32 %v7867_v31, %v12956_v27  ;;  %7884 = vrcp.f32 %v3056_v6  ;;  %v1530_v14 = vsub.f32 0.0, %v1018_v51  ;;  %v1019_v40 = vand.u32 2147483647, %v13047_v32 }
 0x368   : > { %v7869_v24 = vpop.eup %7868  ;;  %7886 = vrcp.f32 %v3057_v15  ;;  %v2408_v5 = vmul.f32 1.442695, %v1529_v60  ;;  %vm4591_vm5 = vcmp.ge.f32.partialorder %v12905_v1, 0.0  ;;  %v1020_v16 = vand.u32 2147483647, %v13054_v4  ;;  %v13101_v1 = vld [vmem:[%s8712_s30 + $0xbb0] sm:$0xff] }
 0x369   : > { %v13041_v12 = vpop.eup %7870  ;;  %v5611_v17 = vsel %vm4587_vm1, %v7867_v31, %v5099_v46  ;;  %v5100_v27 = vmul.f32 %v7869_v24, %v12971_v62  ;;  %7888 = vpow2.f32 %v2402_v59  ;;  %v2410_v18 = vmul.f32 1.442695, %v1530_v14  ;;  %v13092_v31 = vld [vmem:[%s8712_s30 + $0xba8] sm:$0xff] }
 0x36a   : > { %v13049_v37 = vpop.eup %7872  ;;  %6123 = vst [vmem:[%s8863_s17 + $0xb08] sm:$0xff] %v5611_v17  ;;  %v3058_v21 = vadd.f32 1.0, %v13041_v12  ;;  %7890 = vpow2.f32 %v2404_v33  ;;  %vm4592_vm6 = vcmp.ge.f32.partialorder %v12915_v3, 0.0  ;;  %v1531_v8 = vsub.f32 0.0, %v1019_v40 }
 0x36b   : > { %v5612_v50 = vsel %vm4588_vm2, %v7869_v24, %v5100_v27  ;;  %v3059_v62 = vadd.f32 1.0, %v13049_v37  ;;  %7892 = vpow2.f32 %v2406_v41  ;;  %v1532_v29 = vsub.f32 0.0, %v1020_v16  ;;  %v13133_v16 = vld [vmem:[%s8712_s30 + $0xbc0] sm:$0xff] }
 0x36c   : > { %v7875_v48 = vpop.eup %7874  ;;  %6124 = vst [vmem:[%s8863_s17 + $0xb10] sm:$0xff] %v5612_v50  ;;  %7894 = vrcp.f32 %v3058_v21  ;;  %v2412_v25 = vmul.f32 1.442695, %v1531_v8  ;;  %v1021_v20 = vand.u32 2147483647, %v13068_v61  ;;  %vm4593_vm7 = vcmp.ge.f32.partialorder %v12922_v13, 0.0 }
 0x36d   : > { %v13062_v44 = vpop.eup %7876  ;;  %v5101_v26 = vmul.f32 %v7875_v48, %v12988_v22  ;;  %7896 = vrcp.f32 %v3059_v62  ;;  %v2414_v2 = vmul.f32 1.442695, %v1532_v29  ;;  %vm4594_vm8 = vcmp.ge.f32.partialorder %v12944_v7, 0.0 }
 0x36e   : > { %v7879_v30 = vpop.eup %7878  ;;  %v3060_v11 = vadd.f32 1.0, %v13062_v44  ;;  %7898 = vpow2.f32 %v2408_v5  ;;  %v1533_v52 = vsub.f32 0.0, %v1021_v20  ;;  %v1022_v15 = vand.u32 2147483647, %v13081_v49  ;;  %v13125_v5 = vld [vmem:[%s8712_s30 + $0xbb8] sm:$0xff] }
 0x36f   : > { %v7881_v10 = vpop.eup %7880  ;;  %v5613_v22 = vsel %vm4589_vm3, %v7875_v48, %v5101_v26  ;;  %v5102_v56 = vmul.f32 %v7879_v30, %v12998_v36  ;;  %7900 = vpow2.f32 %v2410_v18  ;;  %v1023_v17 = vand.u32 2147483647, %v13092_v31 }
 0x370   : > { %v13075_v38 = vpop.eup %7882  ;;  %6125 = vst [vmem:[%s8863_s17 + $0xb18] sm:$0xff] %v5613_v22  ;;  %v5103_v19 = vmul.f32 %v7881_v10, %v13006_v47  ;;  %7902 = vrcp.f32 %v3060_v11  ;;  %v2416_v57 = vmul.f32 1.442695, %v1533_v52  ;;  %v1534_v51 = vsub.f32 0.0, %v1022_v15 }
 0x371   : > { %v7885_v0 = vpop.eup %7884  ;;  %v5614_v36 = vsel %vm4590_vm4, %v7879_v30, %v5102_v56  ;;  %v3061_v34 = vadd.f32 1.0, %v13075_v38  ;;  %7904 = vpow2.f32 %v2412_v25  ;;  %vm4595_vm9 = vcmp.ge.f32.partialorder %v12951_v9, 0.0  ;;  %v13136_v30 = vld [vmem:[%s8712_s30 + $0xbc8] sm:$0xff] }
 0x372   : > { %v7887_v6 = vpop.eup %7886  ;;  %6126 = vst [vmem:[%s8863_s17 + $0xb20] sm:$0xff] %v5614_v36  ;;  %v5615_v47 = vsel %vm4591_vm5, %v7881_v10, %v5103_v19  ;;  %v5104_v59 = vmul.f32 %v7885_v0, %v13017_v53  ;;  %v1024_v41 = vand.u32 2147483647, %v13101_v1  ;;  %v2418_v60 = vmul.f32 1.442695, %v1534_v51 }
 0x373   : > { %v13094_v42 = vpop.eup %7888  ;;  %6127 = vst [vmem:[%s8863_s17 + $0xb28] sm:$0xff] %v5615_v47  ;;  %v5105_v55 = vmul.f32 %v7887_v6, %v13025_v43  ;;  %7906 = vrcp.f32 %v3061_v34  ;;  %v1535_v14 = vsub.f32 0.0, %v1023_v17  ;;  %vm4596_vm10 = vcmp.ge.f32.partialorder %v12963_v39, 0.0  ;;  %v13162_v47 = vld [vmem:[%s8712_s30 + $0xbd8] sm:$0xff]  ;;  %v13176_v17 = vld [vmem:[%s8712_s30 + $0xbe0] sm:$0xff] }
 0x374   : > { %v13103_v33 = vpop.eup %7890  ;;  %v5616_v53 = vsel %vm4592_vm6, %v7885_v0, %v5104_v59  ;;  %v3062_v46 = vadd.f32 1.0, %v13094_v42  ;;  %7908 = vpow2.f32 %v2414_v2  ;;  %v1536_v48 = vsub.f32 0.0, %v1024_v41  ;;  %v13155_v0 = vld [vmem:[%s8712_s30 + $0xbd0] sm:$0xff] }
 0x375   : > { %v13108_v24 = vpop.eup %7892  ;;  %6128 = vst [vmem:[%s8863_s17 + $0xb30] sm:$0xff] %v5616_v53  ;;  %v5617_v43 = vsel %vm4593_vm7, %v7887_v6, %v5105_v55  ;;  %v3063_v35 = vadd.f32 1.0, %v13103_v33  ;;  %v2420_v26 = vmul.f32 1.442695, %v1535_v14  ;;  %vm4597_vm11 = vcmp.ge.f32.partialorder %v12969_v63, 0.0 }
 0x376   : > { %v7895_v27 = vpop.eup %7894  ;;  %6129 = vst [vmem:[%s8863_s17 + $0xb38] sm:$0xff] %v5617_v43  ;;  %7910 = vrcp.f32 %v3062_v46  ;;  %v3064_v3 = vadd.f32 1.0, %v13108_v24  ;;  %v2422_v10 = vmul.f32 1.442695, %v1536_v48  ;;  %v1025_v22 = vand.u32 2147483647, %v13125_v5 }
 0x377   : > { %v7897_v21 = vpop.eup %7896  ;;  %v5106_v13 = vmul.f32 %v7895_v27, %v13041_v12  ;;  %7912 = vrcp.f32 %v3063_v35  ;;  %vm4598_vm12 = vcmp.ge.f32.partialorder %v12986_v45, 0.0  ;;  %v1026_v9 = vand.u32 2147483647, %v13133_v16 }
 0x378   : > { %v13120_v50 = vpop.eup %7898  ;;  %v5107_v62 = vmul.f32 %v7897_v21, %v13049_v37  ;;  %7914 = vrcp.f32 %v3064_v3  ;;  %v1027_v29 = vand.u32 2147483647, %v13136_v30  ;;  %v1537_v20 = vsub.f32 0.0, %v1025_v22 }
 0x379   : > { %v13127_v18 = vpop.eup %7900  ;;  %v5618_v12 = vsel %vm4594_vm8, %v7895_v27, %v5106_v13  ;;  %v3065_v40 = vadd.f32 1.0, %v13120_v50  ;;  %7916 = vpow2.f32 %v2416_v57  ;;  %v1538_v2 = vsub.f32 0.0, %v1026_v9  ;;  %v13214_v9 = vld [vmem:[%s8712_s30 + $0xbf8] sm:$0xff] }
 0x37a   : > { %v7903_v37 = vpop.eup %7902  ;;  %6130 = vst [vmem:[%s8863_s17 + $0xb40] sm:$0xff] %v5618_v12  ;;  %v5619_v11 = vsel %vm4595_vm9, %v7897_v21, %v5107_v62  ;;  %v3066_v8 = vadd.f32 1.0, %v13127_v18  ;;  %7918 = vpow2.f32 %v2418_v60  ;;  %v1539_v6 = vsub.f32 0.0, %v1027_v29  ;;  %v13184_v21 = vld [vmem:[%s8712_s30 + $0xbe8] sm:$0xff] }
 0x37b   : > { %6131 = vst [vmem:[%s8863_s17 + $0xb48] sm:$0xff] %v5619_v11  ;;  %v5108_v7 = vmul.f32 %v7903_v37, %v13062_v44  ;;  %7920 = vrcp.f32 %v3065_v40  ;;  %v13146_v56 = vpop.eup %7904  ;;  %vm4599_vm13 = vcmp.ge.f32.partialorder %v12993_v28, 0.0  ;;  %v2424_v59 = vmul.f32 1.442695, %v1537_v20 }
 0x37c   : > { %7922 = vrcp.f32 %v3066_v8  ;;  %v3067_v25 = vadd.f32 1.0, %v13146_v56  ;;  %v2426_v15 = vmul.f32 1.442695, %v1538_v2  ;;  %v2428_v53 = vmul.f32 1.442695, %v1539_v6  ;;  %v13206_v8 = vld [vmem:[%s8712_s30 + $0xbf0] sm:$0xff] }
 0x37d   : > { %v7907_v19 = vpop.eup %7906  ;;  %v5620_v44 = vsel %vm4596_vm10, %v7903_v37, %v5108_v7  ;;  %7924 = vpow2.f32 %v2420_v26  ;;  %vm4600_vm14 = vcmp.ge.f32.partialorder %v13012_v54, 0.0  ;;  %v1029_v43 = vand.u32 2147483647, %v13162_v47 }
 0x37e   : > { %v13157_v36 = vpop.eup %7908  ;;  %6132 = vst [vmem:[%s8863_s17 + $0xb50] sm:$0xff] %v5620_v44  ;;  %v5109_v34 = vmul.f32 %v7907_v19, %v13075_v38  ;;  %7926 = vpow2.f32 %v2422_v10  ;;  %v1028_v38 = vand.u32 2147483647, %v13155_v0  ;;  %vm4601_vm15 = vcmp.ge.f32.partialorder %v13023_v58, 0.0 }
 0x37f   : > { %7928 = vrcp.f32 %v3067_v25  ;;  %v3068_v39 = vadd.f32 1.0, %v13157_v36  ;;  %v1541_v41 = vsub.f32 0.0, %v1029_v43  ;;  %v1030_v12 = vand.u32 2147483647, %v13176_v17 }
 0x380   : > { %v7911_v52 = vpop.eup %7910  ;;  %v5621_v55 = vsel %vm4597_vm11, %v7907_v19, %v5109_v34  ;;  %v1540_v51 = vsub.f32 0.0, %v1028_v38  ;;  %vm4602_vm0 = vcmp.ge.f32.partialorder %v13030_v23, 0.0  ;;  %v1031_v26 = vand.u32 2147483647, %v13184_v21  ;;  %v13224_v34 = vld [vmem:[%s8712_s30 + $0xc00] sm:$0xff]  ;;  %v13240_v38 = vld [vmem:[%s8712_s30 + $0xc08] sm:$0xff] }
 0x381   : > { %v7913_v46 = vpop.eup %7912  ;;  %6133 = vst [vmem:[%s8863_s17 + $0xb58] sm:$0xff] %v5621_v55  ;;  %v5110_v57 = vmul.f32 %v7911_v52, %v13094_v42  ;;  %7930 = vrcp.f32 %v3068_v39  ;;  %v2432_v48 = vmul.f32 1.442695, %v1541_v41  ;;  %vm4603_vm1 = vcmp.ge.f32.partialorder %v13047_v32, 0.0  ;;  %v13257_v41 = vld [vmem:[%s8712_s30 + $0xc18] sm:$0xff] }
 0x382   : > { %v7915_v35 = vpop.eup %7914  ;;  %v5111_v63 = vmul.f32 %v7913_v46, %v13103_v33  ;;  %7932 = vpow2.f32 %v2424_v59  ;;  %v2430_v14 = vmul.f32 1.442695, %v1540_v51  ;;  %v1542_v11 = vsub.f32 0.0, %v1030_v12 }
 0x383   : > { %v13178_v27 = vpop.eup %7916  ;;  %v5622_v42 = vsel %vm4598_vm12, %v7911_v52, %v5110_v57  ;;  %v5112_v3 = vmul.f32 %v7915_v35, %v13108_v24  ;;  %7934 = vpow2.f32 %v2426_v15  ;;  %v1543_v22 = vsub.f32 0.0, %v1031_v26  ;;  %v13271_v26 = vld [vmem:[%s8712_s30 + $0xc20] sm:$0xff] }
 0x384   : > { %v13186_v33 = vpop.eup %7918  ;;  %6134 = vst [vmem:[%s8863_s17 + $0xb60] sm:$0xff] %v5622_v42  ;;  %v5623_v13 = vsel %vm4599_vm13, %v7913_v46, %v5111_v63  ;;  %v3069_v60 = vadd.f32 1.0, %v13178_v27  ;;  %7936 = vpow2.f32 %v2428_v53  ;;  %v2434_v44 = vmul.f32 1.442695, %v1542_v11  ;;  %v13243_v46 = vld [vmem:[%s8712_s30 + $0xc10] sm:$0xff] }
 0x385   : > { %v7921_v62 = vpop.eup %7920  ;;  %6135 = vst [vmem:[%s8863_s17 + $0xb68] sm:$0xff] %v5623_v13  ;;  %v5624_v45 = vsel %vm4600_vm14, %v7915_v35, %v5112_v3  ;;  %v3070_v24 = vadd.f32 1.0, %v13186_v33  ;;  %v2436_v25 = vmul.f32 1.442695, %v1543_v22  ;;  %v1032_v20 = vand.u32 2147483647, %v13206_v8 }
 0x386   : > { %v7923_v40 = vpop.eup %7922  ;;  %6136 = vst [vmem:[%s8863_s17 + $0xb70] sm:$0xff] %v5624_v45  ;;  %v5113_v28 = vmul.f32 %v7921_v62, %v13120_v50  ;;  %7938 = vrcp.f32 %v3069_v60  ;;  %vm4604_vm2 = vcmp.ge.f32.partialorder %v13054_v4, 0.0  ;;  %vm4605_vm3 = vcmp.ge.f32.partialorder %v13068_v61, 0.0 }
 0x387   : > { %v13201_v37 = vpop.eup %7924  ;;  %v5114_v54 = vmul.f32 %v7923_v40, %v13127_v18  ;;  %7940 = vrcp.f32 %v3070_v24  ;;  %v1033_v23 = vand.u32 2147483647, %v13214_v9  ;;  %v1544_v59 = vsub.f32 0.0, %v1032_v20 }
 0x388   : > { %v13208_v10 = vpop.eup %7926  ;;  %v5625_v50 = vsel %vm4601_vm15, %v7921_v62, %v5113_v28  ;;  %v3071_v7 = vadd.f32 1.0, %v13201_v37  ;;  %7942 = vpow2.f32 %v2430_v14  ;;  %v1034_v53 = vand.u32 2147483647, %v13224_v34 }
 0x389   : > { %v7929_v18 = vpop.eup %7928  ;;  %6137 = vst [vmem:[%s8863_s17 + $0xb78] sm:$0xff] %v5625_v50  ;;  %v5626_v29 = vsel %vm4602_vm0, %v7923_v40, %v5114_v54  ;;  %v3072_v19 = vadd.f32 1.0, %v13208_v10  ;;  %7944 = vpow2.f32 %v2432_v48  ;;  %v1545_v15 = vsub.f32 0.0, %v1033_v23 }
 0x38a   : > { %6138 = vst [vmem:[%s8863_s17 + $0xb80] sm:$0xff] %v5626_v29  ;;  %v5115_v58 = vmul.f32 %v7929_v18, %v13146_v56  ;;  %7946 = vrcp.f32 %v3071_v7  ;;  %vm4606_vm4 = vcmp.ge.f32.partialorder %v13081_v49, 0.0  ;;  %v2438_v43 = vmul.f32 1.442695, %v1544_v59 }
 0x38b   : > { %v7931_v2 = vpop.eup %7930  ;;  %7948 = vrcp.f32 %v3072_v19  ;;  %v2440_v63 = vmul.f32 1.442695, %v1545_v15  ;;  %v1546_v51 = vsub.f32 0.0, %v1034_v53  ;;  %vm4607_vm5 = vcmp.ge.f32.partialorder %v13092_v31, 0.0  ;;  %v13306_v53 = vld [vmem:[%s8712_s30 + $0xc38] sm:$0xff] }
 0x38c   : > { %v13229_v6 = vpop.eup %7932  ;;  %v5627_v56 = vsel %vm4603_vm1, %v7929_v18, %v5115_v58  ;;  %v5116_v39 = vmul.f32 %v7931_v2, %v13157_v36  ;;  %7950 = vpow2.f32 %v2434_v44  ;;  %v1035_v3 = vand.u32 2147483647, %v13240_v38  ;;  %v13285_v44 = vld [vmem:[%s8712_s30 + $0xc28] sm:$0xff] }
 0x38d   : > { %v13234_v52 = vpop.eup %7934  ;;  %6139 = vst [vmem:[%s8863_s17 + $0xb88] sm:$0xff] %v5627_v56  ;;  %v3073_v55 = vadd.f32 1.0, %v13229_v6  ;;  %7952 = vpow2.f32 %v2436_v25  ;;  %v1036_v4 = vand.u32 2147483647, %v13243_v46  ;;  %vm4608_vm6 = vcmp.ge.f32.partialorder %v13101_v1, 0.0 }
 0x38e   : > { %v13245_v32 = vpop.eup %7936  ;;  %v5628_v36 = vsel %vm4604_vm2, %v7931_v2, %v5116_v39  ;;  %v3074_v57 = vadd.f32 1.0, %v13234_v52  ;;  %v2442_v14 = vmul.f32 1.442695, %v1546_v51  ;;  %v1547_v24 = vsub.f32 0.0, %v1035_v3  ;;  %v13293_v2 = vld [vmem:[%s8712_s30 + $0xc30] sm:$0xff] }
 0x38f   : > { %6140 = vst [vmem:[%s8863_s17 + $0xb90] sm:$0xff] %v5628_v36  ;;  %7954 = vrcp.f32 %v3073_v55  ;;  %v3075_v35 = vadd.f32 1.0, %v13245_v32  ;;  %v1548_v48 = vsub.f32 0.0, %v1036_v4  ;;  %v1037_v28 = vand.u32 2147483647, %v13257_v41 }
 0x390   : > { %v7939_v42 = vpop.eup %7938  ;;  %7956 = vrcp.f32 %v3074_v57  ;;  %v2444_v50 = vmul.f32 1.442695, %v1547_v24  ;;  %vm4609_vm7 = vcmp.ge.f32.partialorder %v13125_v5, 0.0  ;;  %v1038_v49 = vand.u32 2147483647, %v13271_v26 }
 0x391   : > { %v7941_v13 = vpop.eup %7940  ;;  %v5117_v60 = vmul.f32 %v7939_v42, %v13178_v27  ;;  %7958 = vrcp.f32 %v3075_v35  ;;  %v2446_v22 = vmul.f32 1.442695, %v1548_v48  ;;  %v1549_v18 = vsub.f32 0.0, %v1037_v28 }
 0x392   : > { %v13261_v62 = vpop.eup %7942  ;;  %v5118_v45 = vmul.f32 %v7941_v13, %v13186_v33  ;;  %7960 = vpow2.f32 %v2438_v43  ;;  %v1550_v56 = vsub.f32 0.0, %v1038_v49  ;;  %vm4610_vm8 = vcmp.ge.f32.partialorder %v13133_v16, 0.0 }
 0x393   : > { %v13264_v12 = vpop.eup %7944  ;;  %v5629_v40 = vsel %vm4605_vm3, %v7939_v42, %v5117_v60  ;;  %v3076_v27 = vadd.f32 1.0, %v13261_v62  ;;  %7962 = vpow2.f32 %v2440_v63  ;;  %v2448_v20 = vmul.f32 1.442695, %v1549_v18  ;;  %v13316_v42 = vld [vmem:[%s8712_s30 + $0xc40] sm:$0xff] }
 0x394   : > { %v7947_v54 = vpop.eup %7946  ;;  %6141 = vst [vmem:[%s8863_s17 + $0xb98] sm:$0xff] %v5629_v40  ;;  %v5630_v33 = vsel %vm4606_vm4, %v7941_v13, %v5118_v45  ;;  %v3077_v11 = vadd.f32 1.0, %v13264_v12  ;;  %7964 = vpow2.f32 %v2442_v14  ;;  %vm4611_vm9 = vcmp.ge.f32.partialorder %v13136_v30, 0.0  ;;  %v13327_v13 = vld [vmem:[%s8712_s30 + $0xc48] sm:$0xff] }
 0x395   : > { %v7949_v7 = vpop.eup %7948  ;;  %6142 = vst [vmem:[%s8863_s17 + $0xba0] sm:$0xff] %v5630_v33  ;;  %v5119_v61 = vmul.f32 %v7947_v54, %v13201_v37  ;;  %7966 = vrcp.f32 %v3076_v27  ;;  %v1039_v31 = vand.u32 2147483647, %v13285_v44  ;;  %v2450_v1 = vmul.f32 1.442695, %v1550_v56 }
 0x396   : > { %v13279_v29 = vpop.eup %7950  ;;  %v5120_v19 = vmul.f32 %v7949_v7, %v13208_v10  ;;  %7968 = vrcp.f32 %v3077_v11  ;;  %v1040_v15 = vand.u32 2147483647, %v13293_v2  ;;  %vm4612_vm10 = vcmp.ge.f32.partialorder %v13155_v0, 0.0 }
 0x397   : > { %v13287_v58 = vpop.eup %7952  ;;  %v5631_v37 = vsel %vm4607_vm5, %v7947_v54, %v5119_v61  ;;  %v3078_v25 = vadd.f32 1.0, %v13279_v29  ;;  %7970 = vpow2.f32 %v2444_v50  ;;  %v1551_v43 = vsub.f32 0.0, %v1039_v31  ;;  %v13368_v31 = vld [vmem:[%s8712_s30 + $0xc60] sm:$0xff] }
 0x398   : > { %6143 = vst [vmem:[%s8863_s17 + $0xba8] sm:$0xff] %v5631_v37  ;;  %v5632_v10 = vsel %vm4608_vm6, %v7949_v7, %v5120_v19  ;;  %v3079_v23 = vadd.f32 1.0, %v13287_v58  ;;  %7972 = vpow2.f32 %v2446_v22  ;;  %v1552_v51 = vsub.f32 0.0, %v1040_v15  ;;  %v13350_v19 = vld [vmem:[%s8712_s30 + $0xc50] sm:$0xff]  ;;  %v13377_v15 = vld [vmem:[%s8712_s30 + $0xc68] sm:$0xff] }
 0x399   : > { %v7955_v39 = vpop.eup %7954  ;;  %6144 = vst [vmem:[%s8863_s17 + $0xbb0] sm:$0xff] %v5632_v10  ;;  %7974 = vrcp.f32 %v3078_v25  ;;  %vm4613_vm11 = vcmp.ge.f32.partialorder %v13162_v47, 0.0  ;;  %v1041_v5 = vand.u32 2147483647, %v13306_v53  ;;  %v2452_v45 = vmul.f32 1.442695, %v1551_v43 }
 0x39a   : > { %v7957_v59 = vpop.eup %7956  ;;  %v5121_v55 = vmul.f32 %v7955_v39, %v13229_v6  ;;  %7976 = vrcp.f32 %v3079_v23  ;;  %v2454_v24 = vmul.f32 1.442695, %v1552_v51  ;;  %v1042_v27 = vand.u32 2147483647, %v13316_v42 }
 0x39b   : > { %v7959_v36 = vpop.eup %7958  ;;  %v5122_v57 = vmul.f32 %v7957_v59, %v13234_v52  ;;  %7978 = vpow2.f32 %v2448_v20  ;;  %v1553_v40 = vsub.f32 0.0, %v1041_v5  ;;  %vm4614_vm12 = vcmp.ge.f32.partialorder %v13176_v17, 0.0  ;;  %v13357_v20 = vld [vmem:[%s8712_s30 + $0xc58] sm:$0xff] }
 0x39c   : > { %v13310_v35 = vpop.eup %7960  ;;  %v5633_v6 = vsel %vm4609_vm7, %v7955_v39, %v5121_v55  ;;  %v5123_v63 = vmul.f32 %v7959_v36, %v13245_v32  ;;  %7980 = vpow2.f32 %v2450_v1  ;;  %v1043_v30 = vand.u32 2147483647, %v13327_v13 }
 0x39d   : > { %v13318_v3 = vpop.eup %7962  ;;  %6145 = vst [vmem:[%s8863_s17 + $0xbb8] sm:$0xff] %v5633_v6  ;;  %v5634_v52 = vsel %vm4610_vm8, %v7957_v59, %v5122_v57  ;;  %v3080_v4 = vadd.f32 1.0, %v13310_v35  ;;  %v2456_v50 = vmul.f32 1.442695, %v1553_v40  ;;  %v1554_v7 = vsub.f32 0.0, %v1042_v27  ;;  %v13400_v27 = vld [vmem:[%s8712_s30 + $0xc78] sm:$0xff] }
 0x39e   : > { %v13329_v32 = vpop.eup %7964  ;;  %6146 = vst [vmem:[%s8863_s17 + $0xbc0] sm:$0xff] %v5634_v52  ;;  %v5635_v60 = vsel %vm4611_vm9, %v7959_v36, %v5123_v63  ;;  %v3081_v14 = vadd.f32 1.0, %v13318_v3  ;;  %v1555_v18 = vsub.f32 0.0, %v1043_v30  ;;  %vm4615_vm13 = vcmp.ge.f32.partialorder %v13184_v21, 0.0 }
 0x39f   : > { %v7967_v16 = vpop.eup %7966  ;;  %6147 = vst [vmem:[%s8863_s17 + $0xbc8] sm:$0xff] %v5635_v60  ;;  %7982 = vrcp.f32 %v3080_v4  ;;  %v3082_v48 = vadd.f32 1.0, %v13329_v32  ;;  %v2458_v25 = vmul.f32 1.442695, %v1554_v7  ;;  %vm4616_vm14 = vcmp.ge.f32.partialorder %v13206_v8, 0.0  ;;  %v13390_v60 = vld [vmem:[%s8712_s30 + $0xc70] sm:$0xff] }
 0x3a0   : > { %v7969_v28 = vpop.eup %7968  ;;  %v5124_v54 = vmul.f32 %v7967_v16, %v13261_v62  ;;  %7984 = vrcp.f32 %v3081_v14  ;;  %v2460_v56 = vmul.f32 1.442695, %v1555_v18  ;;  %v1044_v39 = vand.u32 2147483647, %v13350_v19  ;;  %v13410_v8 = vld [vmem:[%s8712_s30 + $0xc80] sm:$0xff] }
 0x3a1   : > { %v13341_v33 = vpop.eup %7970  ;;  %v5125_v11 = vmul.f32 %v7969_v28, %v13264_v12  ;;  %7986 = vrcp.f32 %v3082_v48  ;;  %v1045_v1 = vand.u32 2147483647, %v13357_v20  ;;  %vm4617_vm15 = vcmp.ge.f32.partialorder %v13214_v9, 0.0 }
 0x3a2   : > { %v13344_v61 = vpop.eup %7972  ;;  %v5636_v62 = vsel %vm4612_vm10, %v7967_v16, %v5124_v54  ;;  %v3083_v22 = vadd.f32 1.0, %v13341_v33  ;;  %7988 = vpow2.f32 %v2452_v45  ;;  %v1556_v57 = vsub.f32 0.0, %v1044_v39 }
 0x3a3   : > { %v7975_v49 = vpop.eup %7974  ;;  %6148 = vst [vmem:[%s8863_s17 + $0xbd0] sm:$0xff] %v5636_v62  ;;  %v5637_v12 = vsel %vm4613_vm11, %v7969_v28, %v5125_v11  ;;  %v3084_v37 = vadd.f32 1.0, %v13344_v61  ;;  %7990 = vpow2.f32 %v2454_v24  ;;  %v1557_v17 = vsub.f32 0.0, %v1045_v1 }
 0x3a4   : > { %v7977_v0 = vpop.eup %7976  ;;  %6149 = vst [vmem:[%s8863_s17 + $0xbd8] sm:$0xff] %v5637_v12  ;;  %v5126_v10 = vmul.f32 %v7975_v49, %v13279_v29  ;;  %7992 = vrcp.f32 %v3083_v22  ;;  %v1046_v43 = vand.u32 2147483647, %v13368_v31  ;;  %vm4618_vm0 = vcmp.ge.f32.partialorder %v13224_v34, 0.0 }
 0x3a5   : > { %v13363_v47 = vpop.eup %7978  ;;  %v5127_v23 = vmul.f32 %v7977_v0, %v13287_v58  ;;  %7994 = vrcp.f32 %v3084_v37  ;;  %v2462_v63 = vmul.f32 1.442695, %v1556_v57  ;;  %v1047_v21 = vand.u32 2147483647, %v13377_v15  ;;  %v13426_v37 = vld [vmem:[%s8712_s30 + $0xc88] sm:$0xff]  ;;  %v13446_v57 = vld [vmem:[%s8712_s30 + $0xc90] sm:$0xff] }
 0x3a6   : > { %v13370_v59 = vpop.eup %7980  ;;  %v5638_v29 = vsel %vm4614_vm12, %v7975_v49, %v5126_v10  ;;  %v3085_v55 = vadd.f32 1.0, %v13363_v47  ;;  %7996 = vpow2.f32 %v2456_v50  ;;  %v2464_v4 = vmul.f32 1.442695, %v1557_v17 }
 0x3a7   : > { %6150 = vst [vmem:[%s8863_s17 + $0xbe0] sm:$0xff] %v5638_v29  ;;  %v5639_v58 = vsel %vm4615_vm13, %v7977_v0, %v5127_v23  ;;  %v3086_v36 = vadd.f32 1.0, %v13370_v59  ;;  %7998 = vpow2.f32 %v2458_v25  ;;  %v1558_v5 = vsub.f32 0.0, %v1046_v43 }
 0x3a8   : > { %6151 = vst [vmem:[%s8863_s17 + $0xbe8] sm:$0xff] %v5639_v58  ;;  %8000 = vrcp.f32 %v3085_v55  ;;  %vm4619_vm1 = vcmp.ge.f32.partialorder %v13240_v38, 0.0  ;;  %v1559_v24 = vsub.f32 0.0, %v1047_v21  ;;  %v1048_v11 = vand.u32 2147483647, %v13390_v60 }
 0x3a9   : > { %v7983_v6 = vpop.eup %7982  ;;  %8002 = vrcp.f32 %v3086_v36  ;;  %v2466_v40 = vmul.f32 1.442695, %v1558_v5  ;;  %vm4620_vm2 = vcmp.ge.f32.partialorder %v13243_v46, 0.0  ;;  %v1049_v18 = vand.u32 2147483647, %v13400_v27 }
 0x3aa   : > { %v7985_v51 = vpop.eup %7984  ;;  %v5128_v52 = vmul.f32 %v7983_v6, %v13310_v35  ;;  %8004 = vpow2.f32 %v2460_v56  ;;  %v2468_v30 = vmul.f32 1.442695, %v1559_v24  ;;  %v1560_v22 = vsub.f32 0.0, %v1048_v11  ;;  %v13478_v11 = vld [vmem:[%s8712_s30 + $0xca8] sm:$0xff] }
 0x3ab   : > { %v7987_v14 = vpop.eup %7986  ;;  %v5129_v45 = vmul.f32 %v7985_v51, %v13318_v3  ;;  %8006 = vpow2.f32 %v2462_v63  ;;  %vm4621_vm3 = vcmp.ge.f32.partialorder %v13257_v41, 0.0  ;;  %v1050_v12 = vand.u32 2147483647, %v13410_v8  ;;  %v13454_v63 = vld [vmem:[%s8712_s30 + $0xc98] sm:$0xff] }
 0x3ac   : > { %v13394_v16 = vpop.eup %7988  ;;  %v5640_v35 = vsel %vm4616_vm14, %v7983_v6, %v5128_v52  ;;  %v5130_v48 = vmul.f32 %v7987_v14, %v13329_v32  ;;  %8008 = vpow2.f32 %v2464_v4  ;;  %v2470_v10 = vmul.f32 1.442695, %v1560_v22  ;;  %v13463_v4 = vld [vmem:[%s8712_s30 + $0xca0] sm:$0xff] }
 0x3ad   : > { %v13402_v28 = vpop.eup %7990  ;;  %6152 = vst [vmem:[%s8863_s17 + $0xbf0] sm:$0xff] %v5640_v35  ;;  %v5641_v3 = vsel %vm4617_vm15, %v7985_v51, %v5129_v45  ;;  %v3087_v54 = vadd.f32 1.0, %v13394_v16  ;;  %8010 = vpow2.f32 %v2466_v40  ;;  %v1561_v39 = vsub.f32 0.0, %v1049_v18 }
 0x3ae   : > { %v7993_v50 = vpop.eup %7992  ;;  %6153 = vst [vmem:[%s8863_s17 + $0xbf8] sm:$0xff] %v5641_v3  ;;  %v5642_v32 = vsel %vm4618_vm0, %v7987_v14, %v5130_v48  ;;  %v3088_v7 = vadd.f32 1.0, %v13402_v28  ;;  %v1562_v29 = vsub.f32 0.0, %v1050_v12  ;;  %vm4622_vm4 = vcmp.ge.f32.partialorder %v13271_v26, 0.0 }
 0x3af   : > { %v7995_v9 = vpop.eup %7994  ;;  %6154 = vst [vmem:[%s8863_s17 + $0xc00] sm:$0xff] %v5642_v32  ;;  %v5131_v62 = vmul.f32 %v7993_v50, %v13341_v33  ;;  %8012 = vrcp.f32 %v3087_v54  ;;  %v1051_v1 = vand.u32 2147483647, %v13426_v37  ;;  %vm4623_vm5 = vcmp.ge.f32.partialorder %v13285_v44, 0.0 }
 0x3b0   : > { %v13420_v49 = vpop.eup %7996  ;;  %v5132_v34 = vmul.f32 %v7995_v9, %v13344_v61  ;;  %8014 = vrcp.f32 %v3088_v7  ;;  %v2472_v36 = vmul.f32 1.442695, %v1561_v39  ;;  %v2474_v52 = vmul.f32 1.442695, %v1562_v29 }
 0x3b1   : > { %v13428_v25 = vpop.eup %7998  ;;  %v5643_v33 = vsel %vm4619_vm1, %v7993_v50, %v5131_v62  ;;  %v3089_v0 = vadd.f32 1.0, %v13420_v49  ;;  %8016 = vpow2.f32 %v2468_v30  ;;  %v1563_v6 = vsub.f32 0.0, %v1051_v1  ;;  %v13484_v62 = vld [vmem:[%s8712_s30 + $0xcb0] sm:$0xff] }
 0x3b2   : > { %v8001_v23 = vpop.eup %8000  ;;  %6155 = vst [vmem:[%s8863_s17 + $0xc08] sm:$0xff] %v5643_v33  ;;  %v5644_v61 = vsel %vm4620_vm2, %v7995_v9, %v5132_v34  ;;  %v3090_v56 = vadd.f32 1.0, %v13428_v25  ;;  %vm4624_vm6 = vcmp.ge.f32.partialorder %v13293_v2, 0.0  ;;  %v1052_v5 = vand.u32 2147483647, %v13446_v57 }
 0x3b3   : > { %v8003_v55 = vpop.eup %8002  ;;  %6156 = vst [vmem:[%s8863_s17 + $0xc10] sm:$0xff] %v5644_v61  ;;  %v5133_v38 = vmul.f32 %v8001_v23, %v13363_v47  ;;  %8018 = vrcp.f32 %v3089_v0  ;;  %vm4625_vm7 = vcmp.ge.f32.partialorder %v13306_v53, 0.0  ;;  %v2476_v26 = vmul.f32 1.442695, %v1563_v6 }
 0x3b4   : > { %v13441_v58 = vpop.eup %8004  ;;  %v5134_v46 = vmul.f32 %v8003_v55, %v13370_v59  ;;  %8020 = vrcp.f32 %v3090_v56  ;;  %v1053_v45 = vand.u32 2147483647, %v13454_v63  ;;  %v1564_v48 = vsub.f32 0.0, %v1052_v5 }
 0x3b5   : > { %v13448_v17 = vpop.eup %8006  ;;  %v5645_v47 = vsel %vm4621_vm3, %v8001_v23, %v5133_v38  ;;  %v3091_v43 = vadd.f32 1.0, %v13441_v58  ;;  %8022 = vpow2.f32 %v2470_v10  ;;  %v1054_v40 = vand.u32 2147483647, %v13463_v4  ;;  %v13498_v23 = vld [vmem:[%s8712_s30 + $0xcb8] sm:$0xff]  ;;  %v13510_v38 = vld [vmem:[%s8712_s30 + $0xcc0] sm:$0xff] }
 0x3b6   : > { %v13456_v59 = vpop.eup %8008  ;;  %6157 = vst [vmem:[%s8863_s17 + $0xc18] sm:$0xff] %v5645_v47  ;;  %v5646_v21 = vsel %vm4622_vm4, %v8003_v55, %v5134_v46  ;;  %v3092_v51 = vadd.f32 1.0, %v13448_v17  ;;  %8024 = vpow2.f32 %v2472_v36  ;;  %vm4626_vm8 = vcmp.ge.f32.partialorder %v13316_v42, 0.0 }
 0x3b7   : > { %6158 = vst [vmem:[%s8863_s17 + $0xc20] sm:$0xff] %v5646_v21  ;;  %8026 = vrcp.f32 %v3091_v43  ;;  %v3093_v41 = vadd.f32 1.0, %v13456_v59  ;;  %v13469_v14 = vpop.eup %8010  ;;  %v1565_v30 = vsub.f32 0.0, %v1053_v45  ;;  %v2478_v7 = vmul.f32 1.442695, %v1564_v48  ;;  %v13532_v45 = vld [vmem:[%s8712_s30 + $0xcd0] sm:$0xff] }
 0x3b8   : > { %8028 = vrcp.f32 %v3092_v51  ;;  %v3094_v35 = vadd.f32 1.0, %v13469_v14  ;;  %v1566_v9 = vsub.f32 0.0, %v1054_v40  ;;  %v1055_v33 = vand.u32 2147483647, %v13478_v11 }
 0x3b9   : > { %v8013_v24 = vpop.eup %8012  ;;  %8030 = vrcp.f32 %v3093_v41  ;;  %v2480_v18 = vmul.f32 1.442695, %v1565_v30  ;;  %vm4627_vm9 = vcmp.ge.f32.partialorder %v13327_v13, 0.0  ;;  %v1056_v10 = vand.u32 2147483647, %v13484_v62  ;;  %v13523_v41 = vld [vmem:[%s8712_s30 + $0xcc8] sm:$0xff] }
 0x3ba   : > { %v8015_v3 = vpop.eup %8014  ;;  %v5135_v54 = vmul.f32 %v8013_v24, %v13394_v16  ;;  %8032 = vpow2.f32 %v2474_v52  ;;  %vm4628_vm10 = vcmp.ge.f32.partialorder %v13350_v19, 0.0  ;;  %v1567_v56 = vsub.f32 0.0, %v1055_v33 }
 0x3bb   : > { %v13480_v50 = vpop.eup %8016  ;;  %v5136_v32 = vmul.f32 %v8015_v3, %v13402_v28  ;;  %8034 = vrcp.f32 %v3094_v35  ;;  %v2482_v28 = vmul.f32 1.442695, %v1566_v9  ;;  %v1568_v55 = vsub.f32 0.0, %v1056_v10 }
 0x3bc   : > { %v5647_v16 = vsel %vm4623_vm5, %v8013_v24, %v5135_v54  ;;  %v3095_v22 = vadd.f32 1.0, %v13480_v50  ;;  %8036 = vpow2.f32 %v2476_v26  ;;  %v2484_v36 = vmul.f32 1.442695, %v1567_v56 }
 0x3bd   : > { %v8019_v34 = vpop.eup %8018  ;;  %6159 = vst [vmem:[%s8863_s17 + $0xc28] sm:$0xff] %v5647_v16  ;;  %v5648_v12 = vsel %vm4624_vm6, %v8015_v3, %v5136_v32  ;;  %8038 = vpow2.f32 %v2478_v7  ;;  %v1057_v47 = vand.u32 2147483647, %v13498_v23  ;;  %vm4629_vm11 = vcmp.ge.f32.partialorder %v13357_v20, 0.0  ;;  %v13552_v7 = vld [vmem:[%s8712_s30 + $0xcd8] sm:$0xff] }
 0x3be   : > { %v8021_v0 = vpop.eup %8020  ;;  %6160 = vst [vmem:[%s8863_s17 + $0xc30] sm:$0xff] %v5648_v12  ;;  %v5137_v44 = vmul.f32 %v8019_v34, %v13420_v49  ;;  %8040 = vrcp.f32 %v3095_v22  ;;  %v2486_v6 = vmul.f32 1.442695, %v1568_v55  ;;  %v1058_v52 = vand.u32 2147483647, %v13510_v38 }
 0x3bf   : > { %v13500_v61 = vpop.eup %8022  ;;  %v5138_v2 = vmul.f32 %v8021_v0, %v13428_v25  ;;  %8042 = vpow2.f32 %v2480_v18  ;;  %v1569_v51 = vsub.f32 0.0, %v1057_v47  ;;  %vm4630_vm12 = vcmp.ge.f32.partialorder %v13368_v31, 0.0 }
 0x3c0   : > { %v13504_v39 = vpop.eup %8024  ;;  %v5649_v49 = vsel %vm4625_vm7, %v8019_v34, %v5137_v44  ;;  %v3096_v29 = vadd.f32 1.0, %v13500_v61  ;;  %8044 = vpow2.f32 %v2482_v28  ;;  %v1570_v3 = vsub.f32 0.0, %v1058_v52  ;;  %v13597_v52 = vld [vmem:[%s8712_s30 + $0xcf8] sm:$0xff] }
 0x3c1   : > { %v8027_v1 = vpop.eup %8026  ;;  %6161 = vst [vmem:[%s8863_s17 + $0xc38] sm:$0xff] %v5649_v49  ;;  %v5650_v25 = vsel %vm4626_vm8, %v8021_v0, %v5138_v2  ;;  %v3097_v46 = vadd.f32 1.0, %v13504_v39  ;;  %v2488_v48 = vmul.f32 1.442695, %v1569_v51  ;;  %v1059_v54 = vand.u32 2147483647, %v13523_v41 }
 0x3c2   : > { %v8029_v43 = vpop.eup %8028  ;;  %6162 = vst [vmem:[%s8863_s17 + $0xc40] sm:$0xff] %v5650_v25  ;;  %v5139_v53 = vmul.f32 %v8027_v1, %v13441_v58  ;;  %8046 = vrcp.f32 %v3096_v29  ;;  %vm4631_vm13 = vcmp.ge.f32.partialorder %v13377_v15, 0.0  ;;  %v1060_v32 = vand.u32 2147483647, %v13532_v45  ;;  %v13567_v0 = vld [vmem:[%s8712_s30 + $0xce0] sm:$0xff]  ;;  %v13573_v2 = vld [vmem:[%s8712_s30 + $0xce8] sm:$0xff] }
 0x3c3   : > { %v8031_v21 = vpop.eup %8030  ;;  %v5140_v42 = vmul.f32 %v8029_v43, %v13448_v17  ;;  %8048 = vrcp.f32 %v3097_v46  ;;  %v2490_v16 = vmul.f32 1.442695, %v1570_v3  ;;  %v1571_v34 = vsub.f32 0.0, %v1059_v54  ;;  %v13609_v3 = vld [vmem:[%s8712_s30 + $0xd00] sm:$0xff] }
 0x3c4   : > { %v13525_v5 = vpop.eup %8032  ;;  %v5651_v58 = vsel %vm4627_vm9, %v8027_v1, %v5139_v53  ;;  %v5141_v26 = vmul.f32 %v8031_v21, %v13456_v59  ;;  %8050 = vpow2.f32 %v2484_v36  ;;  %v1572_v12 = vsub.f32 0.0, %v1060_v32 }
 0x3c5   : > { %v8035_v17 = vpop.eup %8034  ;;  %6163 = vst [vmem:[%s8863_s17 + $0xc48] sm:$0xff] %v5651_v58  ;;  %v5652_v24 = vsel %vm4628_vm10, %v8029_v43, %v5140_v42  ;;  %v3098_v35 = vadd.f32 1.0, %v13525_v5  ;;  %8052 = vpow2.f32 %v2486_v6  ;;  %vm4632_vm14 = vcmp.ge.f32.partialorder %v13390_v60, 0.0  ;;  %v13585_v43 = vld [vmem:[%s8712_s30 + $0xcf0] sm:$0xff] }
 0x3c6   : > { %v13538_v13 = vpop.eup %8036  ;;  %6164 = vst [vmem:[%s8863_s17 + $0xc50] sm:$0xff] %v5652_v24  ;;  %v5653_v59 = vsel %vm4629_vm11, %v8031_v21, %v5141_v26  ;;  %v5142_v40 = vmul.f32 %v8035_v17, %v13469_v14  ;;  %v1061_v33 = vand.u32 2147483647, %v13552_v7  ;;  %v2492_v10 = vmul.f32 1.442695, %v1571_v34 }
 0x3c7   : > { %v13545_v30 = vpop.eup %8038  ;;  %6165 = vst [vmem:[%s8863_s17 + $0xc58] sm:$0xff] %v5653_v59  ;;  %8054 = vrcp.f32 %v3098_v35  ;;  %v3099_v19 = vadd.f32 1.0, %v13538_v13  ;;  %vm4633_vm15 = vcmp.ge.f32.partialorder %v13400_v27, 0.0  ;;  %v2494_v49 = vmul.f32 1.442695, %v1572_v12 }
 0x3c8   : > { %v8041_v20 = vpop.eup %8040  ;;  %v5654_v14 = vsel %vm4630_vm12, %v8035_v17, %v5142_v40  ;;  %v3100_v9 = vadd.f32 1.0, %v13545_v30  ;;  %8056 = vpow2.f32 %v2488_v48  ;;  %v1573_v29 = vsub.f32 0.0, %v1061_v33 }
 0x3c9   : > { %v13557_v22 = vpop.eup %8042  ;;  %6166 = vst [vmem:[%s8863_s17 + $0xc60] sm:$0xff] %v5654_v14  ;;  %v5143_v18 = vmul.f32 %v8041_v20, %v13480_v50  ;;  %8058 = vrcp.f32 %v3099_v19  ;;  %vm4634_vm0 = vcmp.ge.f32.partialorder %v13410_v8, 0.0  ;;  %v1062_v15 = vand.u32 2147483647, %v13567_v0 }
 0x3ca   : > { %v13561_v28 = vpop.eup %8044  ;;  %8060 = vrcp.f32 %v3100_v9  ;;  %v3101_v31 = vadd.f32 1.0, %v13557_v22  ;;  %v2496_v36 = vmul.f32 1.442695, %v1573_v29  ;;  %v1063_v47 = vand.u32 2147483647, %v13573_v2  ;;  %v13646_v29 = vld [vmem:[%s8712_s30 + $0xd18] sm:$0xff] }
 0x3cb   : > { %v5655_v44 = vsel %vm4631_vm13, %v8041_v20, %v5143_v18  ;;  %v3102_v50 = vadd.f32 1.0, %v13561_v28  ;;  %8062 = vpow2.f32 %v2490_v16  ;;  %v1574_v21 = vsub.f32 0.0, %v1062_v15  ;;  %v13620_v16 = vld [vmem:[%s8712_s30 + $0xd08] sm:$0xff] }
 0x3cc   : > { %v8047_v56 = vpop.eup %8046  ;;  %6167 = vst [vmem:[%s8863_s17 + $0xc68] sm:$0xff] %v5655_v44  ;;  %8064 = vrcp.f32 %v3101_v31  ;;  %v1575_v51 = vsub.f32 0.0, %v1063_v47  ;;  %vm4635_vm1 = vcmp.ge.f32.partialorder %v13426_v37, 0.0  ;;  %v1064_v26 = vand.u32 2147483647, %v13585_v43 }
 0x3cd   : > { %v8049_v55 = vpop.eup %8048  ;;  %v5144_v1 = vmul.f32 %v8047_v56, %v13500_v61  ;;  %8066 = vrcp.f32 %v3102_v50  ;;  %v2498_v60 = vmul.f32 1.442695, %v1574_v21  ;;  %vm4636_vm2 = vcmp.ge.f32.partialorder %v13446_v57, 0.0 }
 0x3ce   : > { %v13580_v25 = vpop.eup %8050  ;;  %v5145_v46 = vmul.f32 %v8049_v55, %v13504_v39  ;;  %8068 = vpow2.f32 %v2492_v10  ;;  %v2500_v24 = vmul.f32 1.442695, %v1575_v51  ;;  %v1576_v59 = vsub.f32 0.0, %v1064_v26 }
 0x3cf   : > { %v13587_v53 = vpop.eup %8052  ;;  %v5656_v61 = vsel %vm4632_vm14, %v8047_v56, %v5144_v1  ;;  %v3103_v6 = vadd.f32 1.0, %v13580_v25  ;;  %8070 = vpow2.f32 %v2494_v49  ;;  %v1065_v40 = vand.u32 2147483647, %v13597_v52  ;;  %v13637_v56 = vld [vmem:[%s8712_s30 + $0xd10] sm:$0xff] }
 0x3d0   : > { %6168 = vst [vmem:[%s8863_s17 + $0xc70] sm:$0xff] %v5656_v61  ;;  %v5657_v39 = vsel %vm4633_vm15, %v8049_v55, %v5145_v46  ;;  %v3104_v42 = vadd.f32 1.0, %v13587_v53  ;;  %8072 = vpow2.f32 %v2496_v36  ;;  %vm4637_vm3 = vcmp.ge.f32.partialorder %v13454_v63, 0.0 }
 0x3d1   : > { %v8055_v58 = vpop.eup %8054  ;;  %6169 = vst [vmem:[%s8863_s17 + $0xc78] sm:$0xff] %v5657_v39  ;;  %8074 = vrcp.f32 %v3103_v6  ;;  %v2502_v14 = vmul.f32 1.442695, %v1576_v59  ;;  %v1577_v9 = vsub.f32 0.0, %v1065_v40  ;;  %vm4638_vm4 = vcmp.ge.f32.partialorder %v13463_v4, 0.0 }
 0x3d2   : > { %v13602_v17 = vpop.eup %8056  ;;  %v5146_v27 = vmul.f32 %v8055_v58, %v13525_v5  ;;  %8076 = vrcp.f32 %v3104_v42  ;;  %v1066_v34 = vand.u32 2147483647, %v13609_v3  ;;  %v1067_v10 = vand.u32 2147483647, %v13620_v16 }
 0x3d3   : > { %v8059_v35 = vpop.eup %8058  ;;  %v3105_v48 = vadd.f32 1.0, %v13602_v17  ;;  %8078 = vpow2.f32 %v2498_v60  ;;  %v2504_v33 = vmul.f32 1.442695, %v1577_v9  ;;  %vm4639_vm5 = vcmp.ge.f32.partialorder %v13478_v11, 0.0 }
 0x3d4   : > { %v8061_v54 = vpop.eup %8060  ;;  %v5658_v19 = vsel %vm4634_vm0, %v8055_v58, %v5146_v27  ;;  %v5147_v5 = vmul.f32 %v8059_v35, %v13538_v13  ;;  %8080 = vpow2.f32 %v2500_v24  ;;  %v1578_v50 = vsub.f32 0.0, %v1066_v34  ;;  %v13665_v58 = vld [vmem:[%s8712_s30 + $0xd20] sm:$0xff]  ;;  %v13673_v24 = vld [vmem:[%s8712_s30 + $0xd28] sm:$0xff] }
 0x3d5   : > { %v13615_v32 = vpop.eup %8062  ;;  %6170 = vst [vmem:[%s8863_s17 + $0xc80] sm:$0xff] %v5658_v19  ;;  %v5148_v20 = vmul.f32 %v8061_v54, %v13545_v30  ;;  %8082 = vrcp.f32 %v3105_v48  ;;  %v1579_v46 = vsub.f32 0.0, %v1067_v10  ;;  %vm4640_vm6 = vcmp.ge.f32.partialorder %v13484_v62, 0.0  ;;  %v13683_v19 = vld [vmem:[%s8712_s30 + $0xd30] sm:$0xff] }
 0x3d6   : > { %v8065_v18 = vpop.eup %8064  ;;  %v5659_v8 = vsel %vm4635_vm1, %v8059_v35, %v5147_v5  ;;  %v3106_v13 = vadd.f32 1.0, %v13615_v32  ;;  %8084 = vpow2.f32 %v2502_v14  ;;  %v2506_v15 = vmul.f32 1.442695, %v1578_v50 }
 0x3d7   : > { %v8067_v12 = vpop.eup %8066  ;;  %6171 = vst [vmem:[%s8863_s17 + $0xc88] sm:$0xff] %v5659_v8  ;;  %v5660_v30 = vsel %vm4636_vm2, %v8061_v54, %v5148_v20  ;;  %v5149_v31 = vmul.f32 %v8065_v18, %v13557_v22  ;;  %v1068_v47 = vand.u32 2147483647, %v13637_v56  ;;  %v2508_v4 = vmul.f32 1.442695, %v1579_v46 }
 0x3d8   : > { %v13631_v37 = vpop.eup %8068  ;;  %6172 = vst [vmem:[%s8863_s17 + $0xc90] sm:$0xff] %v5660_v30  ;;  %v5150_v44 = vmul.f32 %v8067_v12, %v13561_v28  ;;  %8086 = vrcp.f32 %v3106_v13  ;;  %v1069_v21 = vand.u32 2147483647, %v13646_v29  ;;  %vm4641_vm7 = vcmp.ge.f32.partialorder %v13498_v23, 0.0  ;;  %v13702_v30 = vld [vmem:[%s8712_s30 + $0xd40] sm:$0xff] }
 0x3d9   : > { %v13639_v57 = vpop.eup %8070  ;;  %v5661_v22 = vsel %vm4637_vm3, %v8065_v18, %v5149_v31  ;;  %v3107_v49 = vadd.f32 1.0, %v13631_v37  ;;  %8088 = vpow2.f32 %v2504_v33  ;;  %v1580_v51 = vsub.f32 0.0, %v1068_v47  ;;  %v13694_v18 = vld [vmem:[%s8712_s30 + $0xd38] sm:$0xff] }
 0x3da   : > { %v13648_v28 = vpop.eup %8072  ;;  %6173 = vst [vmem:[%s8863_s17 + $0xc98] sm:$0xff] %v5661_v22  ;;  %v5662_v55 = vsel %vm4638_vm4, %v8067_v12, %v5150_v44  ;;  %v3108_v1 = vadd.f32 1.0, %v13639_v57  ;;  %v1581_v27 = vsub.f32 0.0, %v1069_v21  ;;  %v1070_v54 = vand.u32 2147483647, %v13665_v58 }
 0x3db   : > { %v8075_v36 = vpop.eup %8074  ;;  %6174 = vst [vmem:[%s8863_s17 + $0xca0] sm:$0xff] %v5662_v55  ;;  %8090 = vrcp.f32 %v3107_v49  ;;  %v3109_v63 = vadd.f32 1.0, %v13648_v28  ;;  %v2510_v59 = vmul.f32 1.442695, %v1580_v51  ;;  %vm4642_vm8 = vcmp.ge.f32.partialorder %v13510_v38, 0.0 }
 0x3dc   : > { %v8077_v61 = vpop.eup %8076  ;;  %v5151_v6 = vmul.f32 %v8075_v36, %v13580_v25  ;;  %8092 = vrcp.f32 %v3108_v1  ;;  %v2512_v40 = vmul.f32 1.442695, %v1581_v27  ;;  %vm4643_vm9 = vcmp.ge.f32.partialorder %v13523_v41, 0.0 }
 0x3dd   : > { %v13660_v39 = vpop.eup %8078  ;;  %v5152_v42 = vmul.f32 %v8077_v61, %v13587_v53  ;;  %8094 = vrcp.f32 %v3109_v63  ;;  %v1071_v62 = vand.u32 2147483647, %v13673_v24  ;;  %v1582_v9 = vsub.f32 0.0, %v1070_v54  ;;  %v13754_v54 = vld [vmem:[%s8712_s30 + $0xd60] sm:$0xff] }
 0x3de   : > { %v13667_v60 = vpop.eup %8080  ;;  %v5663_v25 = vsel %vm4639_vm5, %v8075_v36, %v5151_v6  ;;  %v3110_v26 = vadd.f32 1.0, %v13660_v39  ;;  %8096 = vpow2.f32 %v2506_v15  ;;  %v1072_v12 = vand.u32 2147483647, %v13683_v19 }
 0x3df   : > { %v8083_v53 = vpop.eup %8082  ;;  %6175 = vst [vmem:[%s8863_s17 + $0xca8] sm:$0xff] %v5663_v25  ;;  %v5664_v35 = vsel %vm4640_vm6, %v8077_v61, %v5152_v42  ;;  %v3111_v48 = vadd.f32 1.0, %v13667_v60  ;;  %8098 = vpow2.f32 %v2508_v4  ;;  %v1583_v34 = vsub.f32 0.0, %v1071_v62  ;;  %v13720_v61 = vld [vmem:[%s8712_s30 + $0xd48] sm:$0xff]  ;;  %v13729_v42 = vld [vmem:[%s8712_s30 + $0xd50] sm:$0xff] }
 0x3e0   : > { %6176 = vst [vmem:[%s8863_s17 + $0xcb0] sm:$0xff] %v5664_v35  ;;  %v5153_v11 = vmul.f32 %v8083_v53, %v13602_v17  ;;  %8100 = vrcp.f32 %v3110_v26  ;;  %v13685_v5 = vpop.eup %8084  ;;  %vm4644_vm10 = vcmp.ge.f32.partialorder %v13532_v45, 0.0  ;;  %v2514_v31 = vmul.f32 1.442695, %v1582_v9 }
 0x3e1   : > { %8102 = vrcp.f32 %v3111_v48  ;;  %v3112_v14 = vadd.f32 1.0, %v13685_v5  ;;  %v2516_v50 = vmul.f32 1.442695, %v1583_v34  ;;  %v1584_v10 = vsub.f32 0.0, %v1072_v12  ;;  %v13746_v48 = vld [vmem:[%s8712_s30 + $0xd58] sm:$0xff]  ;;  %v13766_v12 = vld [vmem:[%s8712_s30 + $0xd68] sm:$0xff] }
 0x3e2   : > { %v8087_v20 = vpop.eup %8086  ;;  %v5665_v17 = vsel %vm4641_vm7, %v8083_v53, %v5153_v11  ;;  %8104 = vpow2.f32 %v2510_v59  ;;  %vm4645_vm11 = vcmp.ge.f32.partialorder %v13552_v7, 0.0  ;;  %v1074_v55 = vand.u32 2147483647, %v13702_v30 }
 0x3e3   : > { %v13696_v8 = vpop.eup %8088  ;;  %6177 = vst [vmem:[%s8863_s17 + $0xcb8] sm:$0xff] %v5665_v17  ;;  %v5154_v13 = vmul.f32 %v8087_v20, %v13615_v32  ;;  %8106 = vpow2.f32 %v2512_v40  ;;  %v1073_v32 = vand.u32 2147483647, %v13694_v18  ;;  %v2518_v38 = vmul.f32 1.442695, %v1584_v10 }
 0x3e4   : > { %8108 = vrcp.f32 %v3112_v14  ;;  %v3113_v23 = vadd.f32 1.0, %v13696_v8  ;;  %v1586_v47 = vsub.f32 0.0, %v1074_v55  ;;  %vm4646_vm12 = vcmp.ge.f32.partialorder %v13567_v0, 0.0 }
 0x3e5   : > { %v8091_v33 = vpop.eup %8090  ;;  %v5666_v44 = vsel %vm4642_vm8, %v8087_v20, %v5154_v13  ;;  %v1585_v46 = vsub.f32 0.0, %v1073_v32  ;;  %vm4647_vm13 = vcmp.ge.f32.partialorder %v13573_v2, 0.0  ;;  %v1075_v27 = vand.u32 2147483647, %v13720_v61  ;;  %v13779_v32 = vld [vmem:[%s8712_s30 + $0xd70] sm:$0xff] }
 0x3e6   : > { %v8093_v22 = vpop.eup %8092  ;;  %6178 = vst [vmem:[%s8863_s17 + $0xcc0] sm:$0xff] %v5666_v44  ;;  %v5155_v49 = vmul.f32 %v8091_v33, %v13631_v37  ;;  %8110 = vrcp.f32 %v3113_v23  ;;  %v2522_v25 = vmul.f32 1.442695, %v1586_v47  ;;  %vm4648_vm14 = vcmp.ge.f32.partialorder %v13585_v43, 0.0 }
 0x3e7   : > { %v8095_v1 = vpop.eup %8094  ;;  %v5156_v15 = vmul.f32 %v8093_v22, %v13639_v57  ;;  %8112 = vpow2.f32 %v2514_v31  ;;  %v2520_v21 = vmul.f32 1.442695, %v1585_v46  ;;  %v1076_v35 = vand.u32 2147483647, %v13729_v42 }
 0x3e8   : > { %v13714_v36 = vpop.eup %8096  ;;  %v5667_v63 = vsel %vm4643_vm9, %v8091_v33, %v5155_v49  ;;  %v5157_v37 = vmul.f32 %v8095_v1, %v13648_v28  ;;  %8114 = vpow2.f32 %v2516_v50  ;;  %v1587_v40 = vsub.f32 0.0, %v1075_v27  ;;  %v13810_v27 = vld [vmem:[%s8712_s30 + $0xd88] sm:$0xff] }
 0x3e9   : > { %v13722_v6 = vpop.eup %8098  ;;  %6179 = vst [vmem:[%s8863_s17 + $0xcc8] sm:$0xff] %v5667_v63  ;;  %v5668_v57 = vsel %vm4644_vm10, %v8093_v22, %v5156_v15  ;;  %v3114_v4 = vadd.f32 1.0, %v13714_v36  ;;  %8116 = vpow2.f32 %v2518_v38  ;;  %v1588_v17 = vsub.f32 0.0, %v1076_v35 }
 0x3ea   : > { %v8101_v41 = vpop.eup %8100  ;;  %6180 = vst [vmem:[%s8863_s17 + $0xcd0] sm:$0xff] %v5668_v57  ;;  %v5669_v28 = vsel %vm4645_vm11, %v8095_v1, %v5157_v37  ;;  %v3115_v51 = vadd.f32 1.0, %v13722_v6  ;;  %v2524_v14 = vmul.f32 1.442695, %v1587_v40  ;;  %v1077_v9 = vand.u32 2147483647, %v13746_v48 }
 0x3eb   : > { %v8103_v26 = vpop.eup %8102  ;;  %6181 = vst [vmem:[%s8863_s17 + $0xcd8] sm:$0xff] %v5669_v28  ;;  %v5158_v45 = vmul.f32 %v8101_v41, %v13660_v39  ;;  %8118 = vrcp.f32 %v3114_v4  ;;  %vm4649_vm15 = vcmp.ge.f32.partialorder %v13597_v52, 0.0  ;;  %v2526_v34 = vmul.f32 1.442695, %v1588_v17  ;;  %v13788_v1 = vld [vmem:[%s8712_s30 + $0xd78] sm:$0xff]  ;;  %v13825_v17 = vld [vmem:[%s8712_s30 + $0xd90] sm:$0xff] }
 0x3ec   : > { %v13740_v53 = vpop.eup %8104  ;;  %v5159_v7 = vmul.f32 %v8103_v26, %v13667_v60  ;;  %8120 = vrcp.f32 %v3115_v51  ;;  %v1078_v2 = vand.u32 2147483647, %v13754_v54  ;;  %v1589_v33 = vsub.f32 0.0, %v1077_v9  ;;  %v13802_v51 = vld [vmem:[%s8712_s30 + $0xd80] sm:$0xff] }
 0x3ed   : > { %v13748_v59 = vpop.eup %8106  ;;  %v5670_v39 = vsel %vm4646_vm12, %v8101_v41, %v5158_v45  ;;  %v3116_v11 = vadd.f32 1.0, %v13740_v53  ;;  %8122 = vpow2.f32 %v2520_v21  ;;  %vm4650_vm0 = vcmp.ge.f32.partialorder %v13609_v3, 0.0 }
 0x3ee   : > { %v8109_v60 = vpop.eup %8108  ;;  %6182 = vst [vmem:[%s8863_s17 + $0xce0] sm:$0xff] %v5670_v39  ;;  %v5671_v62 = vsel %vm4647_vm13, %v8103_v26, %v5159_v7  ;;  %v3117_v20 = vadd.f32 1.0, %v13748_v59  ;;  %8124 = vpow2.f32 %v2522_v25  ;;  %v1590_v10 = vsub.f32 0.0, %v1078_v2  ;;  %v13837_v2 = vld [vmem:[%s8712_s30 + $0xd98] sm:$0xff] }
 0x3ef   : > { %6183 = vst [vmem:[%s8863_s17 + $0xce8] sm:$0xff] %v5671_v62  ;;  %v5160_v0 = vmul.f32 %v8109_v60, %v13685_v5  ;;  %8126 = vrcp.f32 %v3116_v11  ;;  %v2528_v49 = vmul.f32 1.442695, %v1589_v33  ;;  %v1079_v55 = vand.u32 2147483647, %v13766_v12 }
 0x3f0   : > { %v8111_v13 = vpop.eup %8110  ;;  %8128 = vrcp.f32 %v3117_v20  ;;  %vm4651_vm1 = vcmp.ge.f32.partialorder %v13620_v16, 0.0  ;;  %v2530_v38 = vmul.f32 1.442695, %v1590_v10  ;;  %vm4652_vm2 = vcmp.ge.f32.partialorder %v13637_v56, 0.0 }
 0x3f1   : > { %v13768_v23 = vpop.eup %8112  ;;  %v5672_v5 = vsel %vm4648_vm14, %v8109_v60, %v5160_v0  ;;  %v5161_v31 = vmul.f32 %v8111_v13, %v13696_v8  ;;  %8130 = vpow2.f32 %v2524_v14  ;;  %v1591_v52 = vsub.f32 0.0, %v1079_v55  ;;  %v13847_v55 = vld [vmem:[%s8712_s30 + $0xda0] sm:$0xff] }
 0x3f2   : > { %v13773_v44 = vpop.eup %8114  ;;  %6184 = vst [vmem:[%s8863_s17 + $0xcf0] sm:$0xff] %v5672_v5  ;;  %v3118_v50 = vadd.f32 1.0, %v13768_v23  ;;  %8132 = vpow2.f32 %v2526_v34  ;;  %v1080_v63 = vand.u32 2147483647, %v13779_v32  ;;  %vm4653_vm3 = vcmp.ge.f32.partialorder %v13646_v29, 0.0 }
 0x3f3   : > { %v13781_v22 = vpop.eup %8116  ;;  %v5673_v43 = vsel %vm4649_vm15, %v8111_v13, %v5161_v31  ;;  %v3119_v8 = vadd.f32 1.0, %v13773_v44  ;;  %v1081_v57 = vand.u32 2147483647, %v13788_v1  ;;  %v2532_v41 = vmul.f32 1.442695, %v1591_v52 }
 0x3f4   : > { %6185 = vst [vmem:[%s8863_s17 + $0xcf8] sm:$0xff] %v5673_v43  ;;  %8134 = vrcp.f32 %v3118_v50  ;;  %v3120_v15 = vadd.f32 1.0, %v13781_v22  ;;  %v1592_v28 = vsub.f32 0.0, %v1080_v63  ;;  %v1082_v60 = vand.u32 2147483647, %v13802_v51 }
 0x3f5   : > { %v8119_v46 = vpop.eup %8118  ;;  %8136 = vrcp.f32 %v3119_v8  ;;  %v1593_v45 = vsub.f32 0.0, %v1081_v57  ;;  %vm4654_vm4 = vcmp.ge.f32.partialorder %v13665_v58, 0.0  ;;  %v1083_v20 = vand.u32 2147483647, %v13810_v27 }
 0x3f6   : > { %v8121_v37 = vpop.eup %8120  ;;  %v5162_v47 = vmul.f32 %v8119_v46, %v13714_v36  ;;  %8138 = vrcp.f32 %v3120_v15  ;;  %v2534_v39 = vmul.f32 1.442695, %v1592_v28  ;;  %v1594_v9 = vsub.f32 0.0, %v1082_v60 }
 0x3f7   : > { %v13798_v4 = vpop.eup %8122  ;;  %v5163_v21 = vmul.f32 %v8121_v37, %v13722_v6  ;;  %8140 = vpow2.f32 %v2528_v49  ;;  %v2536_v40 = vmul.f32 1.442695, %v1593_v45  ;;  %v1595_v34 = vsub.f32 0.0, %v1083_v20 }
 0x3f8   : > { %v13804_v25 = vpop.eup %8124  ;;  %v5674_v36 = vsel %vm4650_vm0, %v8119_v46, %v5162_v47  ;;  %v3121_v26 = vadd.f32 1.0, %v13798_v4  ;;  %8142 = vpow2.f32 %v2530_v38  ;;  %vm4655_vm5 = vcmp.ge.f32.partialorder %v13673_v24, 0.0 }
 0x3f9   : > { %v8127_v7 = vpop.eup %8126  ;;  %6186 = vst [vmem:[%s8863_s17 + $0xd00] sm:$0xff] %v5674_v36  ;;  %v5675_v6 = vsel %vm4651_vm1, %v8121_v37, %v5163_v21  ;;  %v3122_v35 = vadd.f32 1.0, %v13804_v25  ;;  %8144 = vpow2.f32 %v2532_v41  ;;  %v2538_v56 = vmul.f32 1.442695, %v1594_v9  ;;  %v13873_v41 = vld [vmem:[%s8712_s30 + $0xdb0] sm:$0xff] }
 0x3fa   : > { %v8129_v11 = vpop.eup %8128  ;;  %6187 = vst [vmem:[%s8863_s17 + $0xd08] sm:$0xff] %v5675_v6  ;;  %v5164_v3 = vmul.f32 %v8127_v7, %v13740_v53  ;;  %8146 = vrcp.f32 %v3121_v26  ;;  %v1084_v31 = vand.u32 2147483647, %v13825_v17  ;;  %vm4656_vm6 = vcmp.ge.f32.partialorder %v13683_v19, 0.0 }
 0x3fb   : > { %v13819_v62 = vpop.eup %8130  ;;  %v5165_v16 = vmul.f32 %v8129_v11, %v13748_v59  ;;  %8148 = vrcp.f32 %v3122_v35  ;;  %v2540_v50 = vmul.f32 1.442695, %v1595_v34  ;;  %v1085_v49 = vand.u32 2147483647, %v13837_v2 }
 0x3fc   : > { %v13827_v0 = vpop.eup %8132  ;;  %v5676_v53 = vsel %vm4652_vm2, %v8127_v7, %v5164_v3  ;;  %v3123_v14 = vadd.f32 1.0, %v13819_v62  ;;  %8150 = vpow2.f32 %v2534_v39  ;;  %v1596_v8 = vsub.f32 0.0, %v1084_v31 }
 0x3fd   : > { %6188 = vst [vmem:[%s8863_s17 + $0xd10] sm:$0xff] %v5676_v53  ;;  %v5677_v59 = vsel %vm4653_vm3, %v8129_v11, %v5165_v16  ;;  %v3124_v13 = vadd.f32 1.0, %v13827_v0  ;;  %8152 = vpow2.f32 %v2536_v40  ;;  %vm4657_vm7 = vcmp.ge.f32.partialorder %v13694_v18, 0.0  ;;  %v13890_v16 = vld [vmem:[%s8712_s30 + $0xdb8] sm:$0xff] }
 0x3fe   : > { %v8135_v5 = vpop.eup %8134  ;;  %6189 = vst [vmem:[%s8863_s17 + $0xd18] sm:$0xff] %v5677_v59  ;;  %8154 = vrcp.f32 %v3123_v14  ;;  %vm4658_vm8 = vcmp.ge.f32.partialorder %v13702_v30, 0.0  ;;  %v1597_v63 = vsub.f32 0.0, %v1085_v49  ;;  %v2542_v57 = vmul.f32 1.442695, %v1596_v8 }
 0x3ff   : > { %v8137_v33 = vpop.eup %8136  ;;  %v5166_v29 = vmul.f32 %v8135_v5, %v13768_v23  ;;  %8156 = vrcp.f32 %v3124_v13  ;;  %v1086_v21 = vand.u32 2147483647, %v13847_v55  ;;  %vm4659_vm9 = vcmp.ge.f32.partialorder %v13720_v61, 0.0 }
 0x400   : > { %v8139_v10 = vpop.eup %8138  ;;  %v5167_v43 = vmul.f32 %v8137_v33, %v13773_v44  ;;  %8158 = vpow2.f32 %v2538_v56  ;;  %v13856_v44 = vld [vmem:[%s8712_s30 + $0xda8] sm:$0xff]  ;;  %v2544_v36 = vmul.f32 1.442695, %v1597_v63  ;;  %v1088_v11 = vand.u32 2147483647, %v13873_v41 }
 0x401   : > { %v13849_v15 = vpop.eup %8140  ;;  %v5678_v23 = vsel %vm4654_vm4, %v8135_v5, %v5166_v29  ;;  %v5168_v38 = vmul.f32 %v8139_v10, %v13781_v22  ;;  %8160 = vpow2.f32 %v2540_v50  ;;  %v1087_v26 = vand.u32 2147483647, %v13856_v44  ;;  %v13905_v5 = vld [vmem:[%s8712_s30 + $0xdc0] sm:$0xff]  ;;  %v13908_v56 = vld [vmem:[%s8712_s30 + $0xdc8] sm:$0xff] }
 0x402   : > { %v13858_v46 = vpop.eup %8142  ;;  %6190 = vst [vmem:[%s8863_s17 + $0xd20] sm:$0xff] %v5678_v23  ;;  %v5679_v52 = vsel %vm4655_vm5, %v8137_v33, %v5167_v43  ;;  %v3125_v58 = vadd.f32 1.0, %v13849_v15  ;;  %v1598_v7 = vsub.f32 0.0, %v1086_v21  ;;  %vm4660_vm10 = vcmp.ge.f32.partialorder %v13729_v42, 0.0 }
 0x403   : > { %v13865_v37 = vpop.eup %8144  ;;  %6191 = vst [vmem:[%s8863_s17 + $0xd28] sm:$0xff] %v5679_v52  ;;  %v5680_v22 = vsel %vm4656_vm6, %v8139_v10, %v5168_v38  ;;  %v3126_v47 = vadd.f32 1.0, %v13858_v46  ;;  %v1599_v39 = vsub.f32 0.0, %v1087_v26  ;;  %v1600_v59 = vsub.f32 0.0, %v1088_v11  ;;  %v13941_v26 = vld [vmem:[%s8712_s30 + $0xde0] sm:$0xff] }
 0x404   : > { %v8147_v24 = vpop.eup %8146  ;;  %6192 = vst [vmem:[%s8863_s17 + $0xd30] sm:$0xff] %v5680_v22  ;;  %8162 = vrcp.f32 %v3125_v58  ;;  %v3127_v28 = vadd.f32 1.0, %v13865_v37  ;;  %v2546_v60 = vmul.f32 1.442695, %v1598_v7  ;;  %vm4661_vm11 = vcmp.ge.f32.partialorder %v13746_v48, 0.0  ;;  %v13930_v22 = vld [vmem:[%s8712_s30 + $0xdd8] sm:$0xff] }
 0x405   : > { %v8149_v45 = vpop.eup %8148  ;;  %v5169_v19 = vmul.f32 %v8147_v24, %v13798_v4  ;;  %8164 = vrcp.f32 %v3126_v47  ;;  %v2548_v14 = vmul.f32 1.442695, %v1599_v39  ;;  %v1089_v34 = vand.u32 2147483647, %v13890_v16 }
 0x406   : > { %v13880_v6 = vpop.eup %8150  ;;  %v5170_v35 = vmul.f32 %v8149_v45, %v13804_v25  ;;  %8166 = vrcp.f32 %v3127_v28  ;;  %v2550_v29 = vmul.f32 1.442695, %v1600_v59  ;;  %vm4662_vm12 = vcmp.ge.f32.partialorder %v13754_v54, 0.0  ;;  %v13971_v59 = vld [vmem:[%s8712_s30 + $0xdf0] sm:$0xff] }
 0x407   : > { %v13884_v3 = vpop.eup %8152  ;;  %v5681_v40 = vsel %vm4657_vm7, %v8147_v24, %v5169_v19  ;;  %v3128_v4 = vadd.f32 1.0, %v13880_v6  ;;  %8168 = vpow2.f32 %v2542_v57  ;;  %v1601_v43 = vsub.f32 0.0, %v1089_v34 }
 0x408   : > { %v8155_v20 = vpop.eup %8154  ;;  %6193 = vst [vmem:[%s8863_s17 + $0xd38] sm:$0xff] %v5681_v40  ;;  %v5682_v25 = vsel %vm4658_vm8, %v8149_v45, %v5170_v35  ;;  %v3129_v53 = vadd.f32 1.0, %v13884_v3  ;;  %8170 = vpow2.f32 %v2544_v36  ;;  %v1090_v61 = vand.u32 2147483647, %v13905_v5  ;;  %v13951_v35 = vld [vmem:[%s8712_s30 + $0xde8] sm:$0xff] }
 0x409   : > { %v8157_v9 = vpop.eup %8156  ;;  %6194 = vst [vmem:[%s8863_s17 + $0xd40] sm:$0xff] %v5682_v25  ;;  %v5171_v18 = vmul.f32 %v8155_v20, %v13819_v62  ;;  %8172 = vrcp.f32 %v3128_v4  ;;  %v1091_v8 = vand.u32 2147483647, %v13908_v56  ;;  %vm4663_vm13 = vcmp.ge.f32.partialorder %v13766_v12, 0.0 }
 0x40a   : > { %v13899_v13 = vpop.eup %8158  ;;  %v5172_v30 = vmul.f32 %v8157_v9, %v13827_v0  ;;  %8174 = vrcp.f32 %v3129_v53  ;;  %v13916_v0 = vld [vmem:[%s8712_s30 + $0xdd0] sm:$0xff]  ;;  %v2552_v23 = vmul.f32 1.442695, %v1601_v43  ;;  %v1602_v58 = vsub.f32 0.0, %v1090_v61  ;;  %v13985_v61 = vld [vmem:[%s8712_s30 + $0xdf8] sm:$0xff] }
 0x40b   : > { %v13910_v62 = vpop.eup %8160  ;;  %v5683_v31 = vsel %vm4659_vm9, %v8155_v20, %v5171_v18  ;;  %v3130_v33 = vadd.f32 1.0, %v13899_v13  ;;  %8176 = vpow2.f32 %v2546_v60  ;;  %v1092_v42 = vand.u32 2147483647, %v13916_v0 }
 0x40c   : > { %6195 = vst [vmem:[%s8863_s17 + $0xd48] sm:$0xff] %v5683_v31  ;;  %v5684_v50 = vsel %vm4660_vm10, %v8157_v9, %v5172_v30  ;;  %v3131_v10 = vadd.f32 1.0, %v13910_v62  ;;  %8178 = vpow2.f32 %v2548_v14  ;;  %v1603_v63 = vsub.f32 0.0, %v1091_v8 }
 0x40d   : > { %6196 = vst [vmem:[%s8863_s17 + $0xd50] sm:$0xff] %v5684_v50  ;;  %8180 = vrcp.f32 %v3130_v33  ;;  %vm4664_vm14 = vcmp.ge.f32.partialorder %v13779_v32, 0.0  ;;  %v1604_v21 = vsub.f32 0.0, %v1092_v42  ;;  %vm4665_vm15 = vcmp.ge.f32.partialorder %v13788_v1, 0.0  ;;  %v13993_v42 = vld [vmem:[%s8712_s30 + $0xe00] sm:$0xff] }
 0x40e   : > { %v8163_v49 = vpop.eup %8162  ;;  %8182 = vrcp.f32 %v3131_v10  ;;  %v2554_v36 = vmul.f32 1.442695, %v1602_v58  ;;  %v2556_v7 = vmul.f32 1.442695, %v1603_v63  ;;  %v1093_v48 = vand.u32 2147483647, %v13930_v22 }
 0x40f   : > { %v8165_v38 = vpop.eup %8164  ;;  %v5173_v52 = vmul.f32 %v8163_v49, %v13849_v15  ;;  %8184 = vpow2.f32 %v2550_v29  ;;  %v2558_v40 = vmul.f32 1.442695, %v1604_v21  ;;  %v1094_v20 = vand.u32 2147483647, %v13941_v26  ;;  %v14000_v58 = vld [vmem:[%s8712_s30 + $0xe08] sm:$0xff] }
 0x410   : > { %v8167_v47 = vpop.eup %8166  ;;  %v5174_v57 = vmul.f32 %v8165_v38, %v13858_v46  ;;  %8186 = vpow2.f32 %v2552_v23  ;;  %v1605_v60 = vsub.f32 0.0, %v1093_v48  ;;  %vm4666_vm0 = vcmp.ge.f32.partialorder %v13802_v51, 0.0 }
 0x411   : > { %v13934_v24 = vpop.eup %8168  ;;  %v5685_v15 = vsel %vm4661_vm11, %v8163_v49, %v5173_v52  ;;  %v5175_v28 = vmul.f32 %v8167_v47, %v13865_v37  ;;  %8188 = vpow2.f32 %v2554_v36  ;;  %v1095_v12 = vand.u32 2147483647, %v13951_v35  ;;  %v14013_v36 = vld [vmem:[%s8712_s30 + $0xe10] sm:$0xff] }
 0x412   : > { %v13943_v46 = vpop.eup %8170  ;;  %6197 = vst [vmem:[%s8863_s17 + $0xd58] sm:$0xff] %v5685_v15  ;;  %v5686_v45 = vsel %vm4662_vm12, %v8165_v38, %v5174_v57  ;;  %v3132_v19 = vadd.f32 1.0, %v13934_v24  ;;  %v2560_v18 = vmul.f32 1.442695, %v1605_v60  ;;  %v1606_v31 = vsub.f32 0.0, %v1094_v20  ;;  %v14027_v20 = vld [vmem:[%s8712_s30 + $0xe18] sm:$0xff] }
 0x413   : > { %v8173_v37 = vpop.eup %8172  ;;  %6198 = vst [vmem:[%s8863_s17 + $0xd60] sm:$0xff] %v5686_v45  ;;  %v5687_v39 = vsel %vm4663_vm13, %v8167_v47, %v5175_v28  ;;  %v3133_v11 = vadd.f32 1.0, %v13943_v46  ;;  %vm4667_vm1 = vcmp.ge.f32.partialorder %v13810_v27, 0.0  ;;  %v1607_v29 = vsub.f32 0.0, %v1095_v12 }
 0x414   : > { %v8175_v4 = vpop.eup %8174  ;;  %6199 = vst [vmem:[%s8863_s17 + $0xd68] sm:$0xff] %v5687_v39  ;;  %v5176_v54 = vmul.f32 %v8173_v37, %v13880_v6  ;;  %8190 = vrcp.f32 %v3132_v19  ;;  %v2562_v10 = vmul.f32 1.442695, %v1606_v31  ;;  %v1096_v43 = vand.u32 2147483647, %v13971_v59 }
 0x415   : > { %v13960_v25 = vpop.eup %8176  ;;  %v5177_v53 = vmul.f32 %v8175_v4, %v13884_v3  ;;  %8192 = vrcp.f32 %v3133_v11  ;;  %v2564_v23 = vmul.f32 1.442695, %v1607_v29  ;;  %vm4668_vm2 = vcmp.ge.f32.partialorder %v13825_v17, 0.0  ;;  %v14050_v29 = vld [vmem:[%s8712_s30 + $0xe28] sm:$0xff] }
 0x416   : > { %v13965_v14 = vpop.eup %8178  ;;  %v5688_v6 = vsel %vm4664_vm14, %v8173_v37, %v5176_v54  ;;  %v3134_v9 = vadd.f32 1.0, %v13960_v25  ;;  %8194 = vpow2.f32 %v2556_v7  ;;  %v1608_v52 = vsub.f32 0.0, %v1096_v43 }
 0x417   : > { %v8181_v30 = vpop.eup %8180  ;;  %6200 = vst [vmem:[%s8863_s17 + $0xd70] sm:$0xff] %v5688_v6  ;;  %v5689_v3 = vsel %vm4665_vm15, %v8175_v4, %v5177_v53  ;;  %v3135_v34 = vadd.f32 1.0, %v13965_v14  ;;  %8196 = vpow2.f32 %v2558_v40  ;;  %vm4669_vm3 = vcmp.ge.f32.partialorder %v13837_v2, 0.0 }
 0x418   : > { %v8183_v33 = vpop.eup %8182  ;;  %6201 = vst [vmem:[%s8863_s17 + $0xd78] sm:$0xff] %v5689_v3  ;;  %v5178_v32 = vmul.f32 %v8181_v30, %v13899_v13  ;;  %8198 = vrcp.f32 %v3134_v9  ;;  %v1097_v51 = vand.u32 2147483647, %v13985_v61  ;;  %vm4670_vm4 = vcmp.ge.f32.partialorder %v13847_v55, 0.0 }
 0x419   : > { %v13980_v50 = vpop.eup %8184  ;;  %v5179_v1 = vmul.f32 %v8183_v33, %v13910_v62  ;;  %8200 = vrcp.f32 %v3135_v34  ;;  %v2566_v27 = vmul.f32 1.442695, %v1608_v52  ;;  %v1098_v47 = vand.u32 2147483647, %v13993_v42  ;;  %v14042_v34 = vld [vmem:[%s8712_s30 + $0xe20] sm:$0xff] }
 0x41a   : > { %v13987_v8 = vpop.eup %8186  ;;  %v5690_v13 = vsel %vm4666_vm0, %v8181_v30, %v5178_v32  ;;  %v3136_v49 = vadd.f32 1.0, %v13980_v50  ;;  %8202 = vpow2.f32 %v2560_v18  ;;  %v1609_v15 = vsub.f32 0.0, %v1097_v51 }
 0x41b   : > { %6202 = vst [vmem:[%s8863_s17 + $0xd80] sm:$0xff] %v5690_v13  ;;  %v5691_v62 = vsel %vm4667_vm1, %v8183_v33, %v5179_v1  ;;  %v3137_v38 = vadd.f32 1.0, %v13987_v8  ;;  %8204 = vpow2.f32 %v2562_v10  ;;  %v14006_v63 = vpop.eup %8188  ;;  %v1099_v28 = vand.u32 2147483647, %v14000_v58 }
 0x41c   : > { %6203 = vst [vmem:[%s8863_s17 + $0xd88] sm:$0xff] %v5691_v62  ;;  %8206 = vrcp.f32 %v3136_v49  ;;  %v3138_v21 = vadd.f32 1.0, %v14006_v63  ;;  %vm4671_vm5 = vcmp.ge.f32.partialorder %v13856_v44, 0.0  ;;  %v1610_v7 = vsub.f32 0.0, %v1098_v47  ;;  %v14070_v47 = vld [vmem:[%s8712_s30 + $0xe30] sm:$0xff] }
 0x41d   : > { %8208 = vrcp.f32 %v3137_v38  ;;  %v2568_v39 = vmul.f32 1.442695, %v1609_v15  ;;  %v1611_v11 = vsub.f32 0.0, %v1099_v28  ;;  %v1100_v60 = vand.u32 2147483647, %v14013_v36  ;;  %v14077_v28 = vld [vmem:[%s8712_s30 + $0xe38] sm:$0xff] }
 0x41e   : > { %v8191_v57 = vpop.eup %8190  ;;  %8210 = vpow2.f32 %v2564_v23  ;;  %v2570_v54 = vmul.f32 1.442695, %v1610_v7  ;;  %vm4672_vm6 = vcmp.ge.f32.partialorder %v13873_v41, 0.0  ;;  %vm4673_vm7 = vcmp.ge.f32.partialorder %v13890_v16, 0.0 }
 0x41f   : > { %v8193_v45 = vpop.eup %8192  ;;  %v5180_v19 = vmul.f32 %v8191_v57, %v13934_v24  ;;  %8212 = vpow2.f32 %v2566_v27  ;;  %v2572_v6 = vmul.f32 1.442695, %v1611_v11  ;;  %v1612_v18 = vsub.f32 0.0, %v1100_v60 }
 0x420   : > { %v14017_v48 = vpop.eup %8194  ;;  %v5181_v37 = vmul.f32 %v8193_v45, %v13943_v46  ;;  %8214 = vrcp.f32 %v3138_v21  ;;  %v1101_v3 = vand.u32 2147483647, %v14027_v20  ;;  %vm4674_vm8 = vcmp.ge.f32.partialorder %v13905_v5, 0.0 }
 0x421   : > { %v14020_v40 = vpop.eup %8196  ;;  %v5692_v4 = vsel %vm4668_vm2, %v8191_v57, %v5180_v19  ;;  %v3139_v24 = vadd.f32 1.0, %v14017_v48  ;;  %8216 = vpow2.f32 %v2568_v39  ;;  %v2574_v32 = vmul.f32 1.442695, %v1612_v18 }
 0x422   : > { %v8199_v53 = vpop.eup %8198  ;;  %6204 = vst [vmem:[%s8863_s17 + $0xd90] sm:$0xff] %v5692_v4  ;;  %v5693_v46 = vsel %vm4669_vm3, %v8193_v45, %v5181_v37  ;;  %v3140_v12 = vadd.f32 1.0, %v14020_v40  ;;  %v1613_v43 = vsub.f32 0.0, %v1101_v3  ;;  %v1102_v49 = vand.u32 2147483647, %v14042_v34  ;;  %v14087_v37 = vld [vmem:[%s8712_s30 + $0xe40] sm:$0xff] }
 0x423   : > { %v8201_v9 = vpop.eup %8200  ;;  %6205 = vst [vmem:[%s8863_s17 + $0xd98] sm:$0xff] %v5693_v46  ;;  %v5182_v17 = vmul.f32 %v8199_v53, %v13960_v25  ;;  %8218 = vrcp.f32 %v3139_v24  ;;  %v1103_v38 = vand.u32 2147483647, %v14050_v29  ;;  %vm4675_vm9 = vcmp.ge.f32.partialorder %v13908_v56, 0.0 }
 0x424   : > { %v14036_v30 = vpop.eup %8202  ;;  %v5183_v2 = vmul.f32 %v8201_v9, %v13965_v14  ;;  %8220 = vrcp.f32 %v3140_v12  ;;  %v2576_v62 = vmul.f32 1.442695, %v1613_v43  ;;  %v1614_v27 = vsub.f32 0.0, %v1102_v49 }
 0x425   : > { %v14044_v31 = vpop.eup %8204  ;;  %v5694_v25 = vsel %vm4670_vm4, %v8199_v53, %v5182_v17  ;;  %v3141_v33 = vadd.f32 1.0, %v14036_v30  ;;  %8222 = vpow2.f32 %v2570_v54  ;;  %v1615_v15 = vsub.f32 0.0, %v1103_v38 }
 0x426   : > { %v8207_v14 = vpop.eup %8206  ;;  %6206 = vst [vmem:[%s8863_s17 + $0xda0] sm:$0xff] %v5694_v25  ;;  %v5695_v1 = vsel %vm4671_vm5, %v8201_v9, %v5183_v2  ;;  %v3142_v10 = vadd.f32 1.0, %v14044_v31  ;;  %8224 = vpow2.f32 %v2572_v6  ;;  %v2578_v45 = vmul.f32 1.442695, %v1614_v27  ;;  %v14101_v6 = vld [vmem:[%s8712_s30 + $0xe48] sm:$0xff]  ;;  %v14110_v2 = vld [vmem:[%s8712_s30 + $0xe50] sm:$0xff] }
 0x427   : > { %v8209_v13 = vpop.eup %8208  ;;  %6207 = vst [vmem:[%s8863_s17 + $0xda8] sm:$0xff] %v5695_v1  ;;  %v5184_v55 = vmul.f32 %v8207_v14, %v13980_v50  ;;  %8226 = vrcp.f32 %v3141_v33  ;;  %vm4676_vm10 = vcmp.ge.f32.partialorder %v13916_v0, 0.0  ;;  %v2580_v16 = vmul.f32 1.442695, %v1615_v15  ;;  %v14145_v15 = vld [vmem:[%s8712_s30 + $0xe60] sm:$0xff] }
 0x428   : > { %v14060_v23 = vpop.eup %8210  ;;  %v5185_v44 = vmul.f32 %v8209_v13, %v13987_v8  ;;  %8228 = vrcp.f32 %v3142_v10  ;;  %v1104_v7 = vand.u32 2147483647, %v14070_v47  ;;  %v1105_v4 = vand.u32 2147483647, %v14077_v28 }
 0x429   : > { %v14064_v52 = vpop.eup %8212  ;;  %v5696_v50 = vsel %vm4672_vm6, %v8207_v14, %v5184_v55  ;;  %v3143_v51 = vadd.f32 1.0, %v14060_v23  ;;  %8230 = vpow2.f32 %v2574_v32  ;;  %vm4677_vm11 = vcmp.ge.f32.partialorder %v13930_v22, 0.0 }
 0x42a   : > { %v8215_v57 = vpop.eup %8214  ;;  %6208 = vst [vmem:[%s8863_s17 + $0xdb0] sm:$0xff] %v5696_v50  ;;  %v5697_v8 = vsel %vm4673_vm7, %v8209_v13, %v5185_v44  ;;  %v3144_v21 = vadd.f32 1.0, %v14064_v52  ;;  %8232 = vpow2.f32 %v2576_v62  ;;  %v1616_v60 = vsub.f32 0.0, %v1104_v7  ;;  %v14130_v62 = vld [vmem:[%s8712_s30 + $0xe58] sm:$0xff]  ;;  %v14153_v7 = vld [vmem:[%s8712_s30 + $0xe68] sm:$0xff] }
 0x42b   : > { %6209 = vst [vmem:[%s8863_s17 + $0xdb8] sm:$0xff] %v5697_v8  ;;  %v5186_v41 = vmul.f32 %v8215_v57, %v14006_v63  ;;  %8234 = vrcp.f32 %v3143_v51  ;;  %v14082_v19 = vpop.eup %8216  ;;  %v1617_v46 = vsub.f32 0.0, %v1105_v4  ;;  %v1106_v12 = vand.u32 2147483647, %v14087_v37  ;;  %v14160_v4 = vld [vmem:[%s8712_s30 + $0xe70] sm:$0xff] }
 0x42c   : > { %8236 = vrcp.f32 %v3144_v21  ;;  %v3145_v11 = vadd.f32 1.0, %v14082_v19  ;;  %vm4678_vm12 = vcmp.ge.f32.partialorder %v13941_v26, 0.0  ;;  %v2582_v18 = vmul.f32 1.442695, %v1616_v60  ;;  %v14169_v60 = vld [vmem:[%s8712_s30 + $0xe78] sm:$0xff] }
 0x42d   : > { %v8219_v39 = vpop.eup %8218  ;;  %v5698_v63 = vsel %vm4674_vm8, %v8215_v57, %v5186_v41  ;;  %8238 = vpow2.f32 %v2578_v45  ;;  %v2584_v33 = vmul.f32 1.442695, %v1617_v46  ;;  %v1618_v32 = vsub.f32 0.0, %v1106_v12 }
 0x42e   : > { %v8221_v24 = vpop.eup %8220  ;;  %6210 = vst [vmem:[%s8863_s17 + $0xdc0] sm:$0xff] %v5698_v63  ;;  %v5187_v54 = vmul.f32 %v8219_v39, %v14017_v48  ;;  %8240 = vpow2.f32 %v2580_v16  ;;  %vm4679_vm13 = vcmp.ge.f32.partialorder %v13951_v35, 0.0  ;;  %v1107_v1 = vand.u32 2147483647, %v14101_v6 }
 0x42f   : > { %v14096_v53 = vpop.eup %8222  ;;  %v5188_v5 = vmul.f32 %v8221_v24, %v14020_v40  ;;  %8242 = vrcp.f32 %v3145_v11  ;;  %v2586_v43 = vmul.f32 1.442695, %v1618_v32  ;;  %v1108_v13 = vand.u32 2147483647, %v14110_v2  ;;  %v14182_v32 = vld [vmem:[%s8712_s30 + $0xe80] sm:$0xff] }
 0x430   : > { %v14103_v9 = vpop.eup %8224  ;;  %v5699_v48 = vsel %vm4675_vm9, %v8219_v39, %v5187_v54  ;;  %v3146_v17 = vadd.f32 1.0, %v14096_v53  ;;  %v1619_v44 = vsub.f32 0.0, %v1107_v1  ;;  %vm4680_vm14 = vcmp.ge.f32.partialorder %v13971_v59, 0.0 }
 0x431   : > { %v8227_v40 = vpop.eup %8226  ;;  %6211 = vst [vmem:[%s8863_s17 + $0xdc8] sm:$0xff] %v5699_v48  ;;  %v5700_v3 = vsel %vm4676_vm10, %v8221_v24, %v5188_v5  ;;  %v3147_v25 = vadd.f32 1.0, %v14103_v9  ;;  %v1620_v51 = vsub.f32 0.0, %v1108_v13  ;;  %vm4681_vm15 = vcmp.ge.f32.partialorder %v13985_v61, 0.0 }
 0x432   : > { %v8229_v14 = vpop.eup %8228  ;;  %6212 = vst [vmem:[%s8863_s17 + $0xdd0] sm:$0xff] %v5700_v3  ;;  %v5189_v56 = vmul.f32 %v8227_v40, %v14036_v30  ;;  %8244 = vrcp.f32 %v3146_v17  ;;  %v2588_v57 = vmul.f32 1.442695, %v1619_v44  ;;  %v1109_v21 = vand.u32 2147483647, %v14130_v62 }
 0x433   : > { %v14120_v10 = vpop.eup %8230  ;;  %v5190_v0 = vmul.f32 %v8229_v14, %v14044_v31  ;;  %8246 = vrcp.f32 %v3147_v25  ;;  %v2590_v16 = vmul.f32 1.442695, %v1620_v51  ;;  %vm4682_vm0 = vcmp.ge.f32.partialorder %v13993_v42, 0.0 }
 0x434   : > { %v14124_v55 = vpop.eup %8232  ;;  %v5701_v30 = vsel %vm4677_vm11, %v8227_v40, %v5189_v56  ;;  %v3148_v49 = vadd.f32 1.0, %v14120_v10  ;;  %8248 = vpow2.f32 %v2582_v18  ;;  %v1621_v11 = vsub.f32 0.0, %v1109_v21 }
 0x435   : > { %v8235_v38 = vpop.eup %8234  ;;  %6213 = vst [vmem:[%s8863_s17 + $0xdd8] sm:$0xff] %v5701_v30  ;;  %v5702_v31 = vsel %vm4678_vm12, %v8229_v14, %v5190_v0  ;;  %v3149_v50 = vadd.f32 1.0, %v14124_v55  ;;  %8250 = vpow2.f32 %v2584_v33  ;;  %v1110_v24 = vand.u32 2147483647, %v14145_v15  ;;  %v14191_v0 = vld [vmem:[%s8712_s30 + $0xe88] sm:$0xff] }
 0x436   : > { %v8237_v27 = vpop.eup %8236  ;;  %6214 = vst [vmem:[%s8863_s17 + $0xde0] sm:$0xff] %v5702_v31  ;;  %v5191_v22 = vmul.f32 %v8235_v38, %v14060_v23  ;;  %8252 = vrcp.f32 %v3148_v49  ;;  %vm4683_vm1 = vcmp.ge.f32.partialorder %v14000_v58, 0.0  ;;  %v2592_v59 = vmul.f32 1.442695, %v1621_v11  ;;  %v14225_v11 = vld [vmem:[%s8712_s30 + $0xe98] sm:$0xff] }
 0x437   : > { %v14139_v8 = vpop.eup %8238  ;;  %v5192_v26 = vmul.f32 %v8237_v27, %v14064_v52  ;;  %8254 = vrcp.f32 %v3149_v50  ;;  %v1111_v54 = vand.u32 2147483647, %v14153_v7  ;;  %v1112_v12 = vand.u32 2147483647, %v14160_v4 }
 0x438   : > { %v14147_v41 = vpop.eup %8240  ;;  %v5703_v23 = vsel %vm4679_vm13, %v8235_v38, %v5191_v22  ;;  %v3150_v45 = vadd.f32 1.0, %v14139_v8  ;;  %8256 = vpow2.f32 %v2586_v43  ;;  %vm4684_vm2 = vcmp.ge.f32.partialorder %v14013_v36, 0.0 }
 0x439   : > { %v8243_v52 = vpop.eup %8242  ;;  %6215 = vst [vmem:[%s8863_s17 + $0xde8] sm:$0xff] %v5703_v23  ;;  %v5704_v39 = vsel %vm4680_vm14, %v8237_v27, %v5192_v26  ;;  %v3151_v63 = vadd.f32 1.0, %v14147_v41  ;;  %8258 = vpow2.f32 %v2588_v57  ;;  %v1623_v18 = vsub.f32 0.0, %v1111_v54  ;;  %v14211_v57 = vld [vmem:[%s8712_s30 + $0xe90] sm:$0xff]  ;;  %v14233_v54 = vld [vmem:[%s8712_s30 + $0xea0] sm:$0xff] }
 0x43a   : > { %6216 = vst [vmem:[%s8863_s17 + $0xdf0] sm:$0xff] %v5704_v39  ;;  %v5193_v35 = vmul.f32 %v8243_v52, %v14082_v19  ;;  %8260 = vrcp.f32 %v3150_v45  ;;  %v1622_v19 = vsub.f32 0.0, %v1110_v24  ;;  %v1624_v25 = vsub.f32 0.0, %v1112_v12 }
 0x43b   : > { %8262 = vrcp.f32 %v3151_v63  ;;  %v1113_v33 = vand.u32 2147483647, %v14169_v60  ;;  %vm4685_vm3 = vcmp.ge.f32.partialorder %v14027_v20, 0.0  ;;  %v2596_v1 = vmul.f32 1.442695, %v1623_v18 }
 0x43c   : > { %v8245_v5 = vpop.eup %8244  ;;  %v5705_v46 = vsel %vm4681_vm15, %v8243_v52, %v5193_v35  ;;  %8264 = vpow2.f32 %v2590_v16  ;;  %v2594_v3 = vmul.f32 1.442695, %v1622_v19  ;;  %v2598_v30 = vmul.f32 1.442695, %v1624_v25  ;;  %v14240_v19 = vld [vmem:[%s8712_s30 + $0xea8] sm:$0xff]  ;;  %v14253_v25 = vld [vmem:[%s8712_s30 + $0xeb0] sm:$0xff] }
 0x43d   : > { %v8247_v48 = vpop.eup %8246  ;;  %6217 = vst [vmem:[%s8863_s17 + $0xdf8] sm:$0xff] %v5705_v46  ;;  %v5194_v17 = vmul.f32 %v8245_v5, %v14096_v53  ;;  %8266 = vpow2.f32 %v2592_v59  ;;  %v1625_v44 = vsub.f32 0.0, %v1113_v33  ;;  %v1114_v38 = vand.u32 2147483647, %v14182_v32 }
 0x43e   : > { %v14177_v40 = vpop.eup %8248  ;;  %v5195_v61 = vmul.f32 %v8247_v48, %v14103_v9  ;;  %8268 = vpow2.f32 %v2594_v3  ;;  %vm4686_vm4 = vcmp.ge.f32.partialorder %v14042_v34, 0.0  ;;  %v1115_v58 = vand.u32 2147483647, %v14191_v0 }
 0x43f   : > { %v14184_v14 = vpop.eup %8250  ;;  %v5706_v53 = vsel %vm4682_vm0, %v8245_v5, %v5194_v17  ;;  %v3152_v56 = vadd.f32 1.0, %v14177_v40  ;;  %v2600_v22 = vmul.f32 1.442695, %v1625_v44  ;;  %v1626_v23 = vsub.f32 0.0, %v1114_v38  ;;  %v14267_v38 = vld [vmem:[%s8712_s30 + $0xeb8] sm:$0xff] }
 0x440   : > { %v8253_v9 = vpop.eup %8252  ;;  %6218 = vst [vmem:[%s8863_s17 + $0xe00] sm:$0xff] %v5706_v53  ;;  %v5707_v43 = vsel %vm4683_vm1, %v8247_v48, %v5195_v61  ;;  %v3153_v13 = vadd.f32 1.0, %v14184_v14  ;;  %vm4687_vm5 = vcmp.ge.f32.partialorder %v14050_v29, 0.0  ;;  %v1627_v16 = vsub.f32 0.0, %v1115_v58 }
 0x441   : > { %v8255_v49 = vpop.eup %8254  ;;  %6219 = vst [vmem:[%s8863_s17 + $0xe08] sm:$0xff] %v5707_v43  ;;  %v5196_v42 = vmul.f32 %v8253_v9, %v14120_v10  ;;  %8270 = vrcp.f32 %v3152_v56  ;;  %v2602_v39 = vmul.f32 1.442695, %v1626_v23  ;;  %v1116_v63 = vand.u32 2147483647, %v14211_v57 }
 0x442   : > { %v14200_v31 = vpop.eup %8256  ;;  %v5197_v50 = vmul.f32 %v8255_v49, %v14124_v55  ;;  %8272 = vrcp.f32 %v3153_v13  ;;  %v2604_v59 = vmul.f32 1.442695, %v1627_v16  ;;  %vm4688_vm6 = vcmp.ge.f32.partialorder %v14070_v47, 0.0  ;;  %v14290_v16 = vld [vmem:[%s8712_s30 + $0xec8] sm:$0xff] }
 0x443   : > { %v14205_v51 = vpop.eup %8258  ;;  %v5708_v10 = vsel %vm4684_vm2, %v8253_v9, %v5196_v42  ;;  %v3154_v27 = vadd.f32 1.0, %v14200_v31  ;;  %8274 = vpow2.f32 %v2596_v1  ;;  %v1628_v46 = vsub.f32 0.0, %v1116_v63 }
 0x444   : > { %v8261_v26 = vpop.eup %8260  ;;  %6220 = vst [vmem:[%s8863_s17 + $0xe10] sm:$0xff] %v5708_v10  ;;  %v5709_v55 = vsel %vm4685_vm3, %v8255_v49, %v5197_v50  ;;  %v3155_v21 = vadd.f32 1.0, %v14205_v51  ;;  %8276 = vpow2.f32 %v2598_v30  ;;  %vm4689_vm7 = vcmp.ge.f32.partialorder %v14077_v28, 0.0 }
 0x445   : > { %v8263_v45 = vpop.eup %8262  ;;  %6221 = vst [vmem:[%s8863_s17 + $0xe18] sm:$0xff] %v5709_v55  ;;  %v5198_v36 = vmul.f32 %v8261_v26, %v14139_v8  ;;  %8278 = vrcp.f32 %v3154_v27  ;;  %v1117_v34 = vand.u32 2147483647, %v14225_v11  ;;  %vm4690_vm8 = vcmp.ge.f32.partialorder %v14087_v37, 0.0 }
 0x446   : > { %v14220_v52 = vpop.eup %8264  ;;  %v5199_v20 = vmul.f32 %v8263_v45, %v14147_v41  ;;  %8280 = vrcp.f32 %v3155_v21  ;;  %v2606_v29 = vmul.f32 1.442695, %v1628_v46  ;;  %v1118_v48 = vand.u32 2147483647, %v14233_v54  ;;  %v14282_v21 = vld [vmem:[%s8712_s30 + $0xec0] sm:$0xff] }
 0x447   : > { %v14227_v35 = vpop.eup %8266  ;;  %v5710_v8 = vsel %vm4686_vm4, %v8261_v26, %v5198_v36  ;;  %v3156_v24 = vadd.f32 1.0, %v14220_v52  ;;  %8282 = vpow2.f32 %v2600_v22  ;;  %v1629_v61 = vsub.f32 0.0, %v1117_v34 }
 0x448   : > { %6222 = vst [vmem:[%s8863_s17 + $0xe20] sm:$0xff] %v5710_v8  ;;  %v5711_v41 = vsel %vm4687_vm5, %v8263_v45, %v5199_v20  ;;  %v3157_v5 = vadd.f32 1.0, %v14227_v35  ;;  %8284 = vpow2.f32 %v2602_v39  ;;  %v14246_v12 = vpop.eup %8268  ;;  %v1119_v3 = vand.u32 2147483647, %v14240_v19 }
 0x449   : > { %6223 = vst [vmem:[%s8863_s17 + $0xe28] sm:$0xff] %v5711_v41  ;;  %8286 = vrcp.f32 %v3156_v24  ;;  %v3158_v18 = vadd.f32 1.0, %v14246_v12  ;;  %vm4691_vm9 = vcmp.ge.f32.partialorder %v14101_v6, 0.0  ;;  %v1630_v56 = vsub.f32 0.0, %v1118_v48  ;;  %v14310_v48 = vld [vmem:[%s8712_s30 + $0xed0] sm:$0xff] }
 0x44a   : > { %8288 = vrcp.f32 %v3157_v5  ;;  %v2608_v43 = vmul.f32 1.442695, %v1629_v61  ;;  %v1631_v13 = vsub.f32 0.0, %v1119_v3  ;;  %v1120_v44 = vand.u32 2147483647, %v14253_v25  ;;  %v14317_v3 = vld [vmem:[%s8712_s30 + $0xed8] sm:$0xff] }
 0x44b   : > { %v8271_v17 = vpop.eup %8270  ;;  %8290 = vpow2.f32 %v2604_v59  ;;  %v2610_v42 = vmul.f32 1.442695, %v1630_v56  ;;  %vm4692_vm10 = vcmp.ge.f32.partialorder %v14110_v2, 0.0  ;;  %vm4693_vm11 = vcmp.ge.f32.partialorder %v14130_v62, 0.0 }
 0x44c   : > { %v8273_v33 = vpop.eup %8272  ;;  %v5200_v53 = vmul.f32 %v8271_v17, %v14177_v40  ;;  %8292 = vpow2.f32 %v2606_v29  ;;  %v2612_v10 = vmul.f32 1.442695, %v1631_v13  ;;  %v1632_v22 = vsub.f32 0.0, %v1120_v44 }
 0x44d   : > { %v14257_v1 = vpop.eup %8274  ;;  %v5201_v9 = vmul.f32 %v8273_v33, %v14184_v14  ;;  %8294 = vrcp.f32 %v3158_v18  ;;  %v1121_v55 = vand.u32 2147483647, %v14267_v38  ;;  %vm4694_vm12 = vcmp.ge.f32.partialorder %v14145_v15, 0.0 }
 0x44e   : > { %v14260_v30 = vpop.eup %8276  ;;  %v5712_v49 = vsel %vm4688_vm6, %v8271_v17, %v5200_v53  ;;  %v3159_v40 = vadd.f32 1.0, %v14257_v1  ;;  %8296 = vpow2.f32 %v2608_v43  ;;  %v2614_v36 = vmul.f32 1.442695, %v1632_v22 }
 0x44f   : > { %v8279_v50 = vpop.eup %8278  ;;  %6224 = vst [vmem:[%s8863_s17 + $0xe30] sm:$0xff] %v5712_v49  ;;  %v5713_v14 = vsel %vm4689_vm7, %v8273_v33, %v5201_v9  ;;  %v3160_v58 = vadd.f32 1.0, %v14260_v30  ;;  %v1633_v63 = vsub.f32 0.0, %v1121_v55  ;;  %v1122_v24 = vand.u32 2147483647, %v14282_v21  ;;  %v14327_v9 = vld [vmem:[%s8712_s30 + $0xee0] sm:$0xff] }
 0x450   : > { %v8281_v27 = vpop.eup %8280  ;;  %6225 = vst [vmem:[%s8863_s17 + $0xe38] sm:$0xff] %v5713_v14  ;;  %v5202_v47 = vmul.f32 %v8279_v50, %v14200_v31  ;;  %8298 = vrcp.f32 %v3159_v40  ;;  %v1123_v5 = vand.u32 2147483647, %v14290_v16  ;;  %vm4695_vm13 = vcmp.ge.f32.partialorder %v14153_v7, 0.0 }
 0x451   : > { %v14276_v26 = vpop.eup %8282  ;;  %v5203_v28 = vmul.f32 %v8281_v27, %v14205_v51  ;;  %8300 = vrcp.f32 %v3160_v58  ;;  %v2616_v41 = vmul.f32 1.442695, %v1633_v63  ;;  %v1634_v29 = vsub.f32 0.0, %v1122_v24 }
 0x452   : > { %v14284_v23 = vpop.eup %8284  ;;  %v5714_v31 = vsel %vm4690_vm8, %v8279_v50, %v5202_v47  ;;  %v3161_v45 = vadd.f32 1.0, %v14276_v26  ;;  %8302 = vpow2.f32 %v2610_v42  ;;  %v1635_v61 = vsub.f32 0.0, %v1123_v5 }
 0x453   : > { %v8287_v51 = vpop.eup %8286  ;;  %6226 = vst [vmem:[%s8863_s17 + $0xe40] sm:$0xff] %v5714_v31  ;;  %v5715_v20 = vsel %vm4691_vm9, %v8281_v27, %v5203_v28  ;;  %v3162_v39 = vadd.f32 1.0, %v14284_v23  ;;  %8304 = vpow2.f32 %v2612_v10  ;;  %v2618_v33 = vmul.f32 1.442695, %v1634_v29  ;;  %v14341_v10 = vld [vmem:[%s8712_s30 + $0xee8] sm:$0xff]  ;;  %v14350_v28 = vld [vmem:[%s8712_s30 + $0xef0] sm:$0xff] }
 0x454   : > { %v8289_v8 = vpop.eup %8288  ;;  %6227 = vst [vmem:[%s8863_s17 + $0xe48] sm:$0xff] %v5715_v20  ;;  %v5204_v37 = vmul.f32 %v8287_v51, %v14220_v52  ;;  %8306 = vrcp.f32 %v3161_v45  ;;  %vm4696_vm14 = vcmp.ge.f32.partialorder %v14160_v4, 0.0  ;;  %v2620_v62 = vmul.f32 1.442695, %v1635_v61  ;;  %v14385_v61 = vld [vmem:[%s8712_s30 + $0xf00] sm:$0xff] }
 0x455   : > { %v14300_v59 = vpop.eup %8290  ;;  %v5205_v6 = vmul.f32 %v8289_v8, %v14227_v35  ;;  %8308 = vrcp.f32 %v3162_v39  ;;  %v1124_v56 = vand.u32 2147483647, %v14310_v48  ;;  %v1125_v49 = vand.u32 2147483647, %v14317_v3 }
 0x456   : > { %v14304_v46 = vpop.eup %8292  ;;  %v5716_v52 = vsel %vm4692_vm10, %v8287_v51, %v5204_v37  ;;  %v3163_v34 = vadd.f32 1.0, %v14300_v59  ;;  %8310 = vpow2.f32 %v2614_v36  ;;  %vm4697_vm15 = vcmp.ge.f32.partialorder %v14169_v60, 0.0 }
 0x457   : > { %v8295_v17 = vpop.eup %8294  ;;  %6228 = vst [vmem:[%s8863_s17 + $0xe50] sm:$0xff] %v5716_v52  ;;  %v5717_v35 = vsel %vm4693_vm11, %v8289_v8, %v5205_v6  ;;  %v3164_v18 = vadd.f32 1.0, %v14304_v46  ;;  %8312 = vpow2.f32 %v2616_v41  ;;  %v1636_v44 = vsub.f32 0.0, %v1124_v56  ;;  %v14370_v41 = vld [vmem:[%s8712_s30 + $0xef8] sm:$0xff]  ;;  %v14393_v56 = vld [vmem:[%s8712_s30 + $0xf08] sm:$0xff] }
 0x458   : > { %6229 = vst [vmem:[%s8863_s17 + $0xe58] sm:$0xff] %v5717_v35  ;;  %v5206_v2 = vmul.f32 %v8295_v17, %v14246_v12  ;;  %8314 = vrcp.f32 %v3163_v34  ;;  %v14322_v53 = vpop.eup %8296  ;;  %v1637_v14 = vsub.f32 0.0, %v1125_v49  ;;  %v1126_v58 = vand.u32 2147483647, %v14327_v9  ;;  %v14400_v49 = vld [vmem:[%s8712_s30 + $0xf10] sm:$0xff] }
 0x459   : > { %8316 = vrcp.f32 %v3164_v18  ;;  %v3165_v13 = vadd.f32 1.0, %v14322_v53  ;;  %vm4698_vm0 = vcmp.ge.f32.partialorder %v14182_v32, 0.0  ;;  %v2622_v22 = vmul.f32 1.442695, %v1636_v44  ;;  %v14409_v44 = vld [vmem:[%s8712_s30 + $0xf18] sm:$0xff] }
 0x45a   : > { %v8299_v43 = vpop.eup %8298  ;;  %v5718_v12 = vsel %vm4694_vm12, %v8295_v17, %v5206_v2  ;;  %8318 = vpow2.f32 %v2618_v33  ;;  %v2624_v45 = vmul.f32 1.442695, %v1637_v14  ;;  %v1638_v36 = vsub.f32 0.0, %v1126_v58 }
 0x45b   : > { %v8301_v40 = vpop.eup %8300  ;;  %6230 = vst [vmem:[%s8863_s17 + $0xe60] sm:$0xff] %v5718_v12  ;;  %v5207_v42 = vmul.f32 %v8299_v43, %v14257_v1  ;;  %8320 = vpow2.f32 %v2620_v62  ;;  %vm4699_vm1 = vcmp.ge.f32.partialorder %v14191_v0, 0.0  ;;  %v1127_v20 = vand.u32 2147483647, %v14341_v10 }
 0x45c   : > { %v14336_v50 = vpop.eup %8302  ;;  %v5208_v15 = vmul.f32 %v8301_v40, %v14260_v30  ;;  %8322 = vrcp.f32 %v3165_v13  ;;  %v2626_v63 = vmul.f32 1.442695, %v1638_v36  ;;  %v1128_v8 = vand.u32 2147483647, %v14350_v28  ;;  %v14422_v36 = vld [vmem:[%s8712_s30 + $0xf20] sm:$0xff] }
 0x45d   : > { %v14343_v27 = vpop.eup %8304  ;;  %v5719_v1 = vsel %vm4695_vm13, %v8299_v43, %v5207_v42  ;;  %v3166_v47 = vadd.f32 1.0, %v14336_v50  ;;  %v1639_v6 = vsub.f32 0.0, %v1127_v20  ;;  %vm4700_vm2 = vcmp.ge.f32.partialorder %v14211_v57, 0.0 }
 0x45e   : > { %v8307_v30 = vpop.eup %8306  ;;  %6231 = vst [vmem:[%s8863_s17 + $0xe68] sm:$0xff] %v5719_v1  ;;  %v5720_v55 = vsel %vm4696_vm14, %v8301_v40, %v5208_v15  ;;  %v3167_v31 = vadd.f32 1.0, %v14343_v27  ;;  %v1640_v34 = vsub.f32 0.0, %v1128_v8  ;;  %vm4701_vm3 = vcmp.ge.f32.partialorder %v14225_v11, 0.0 }
 0x45f   : > { %v8309_v51 = vpop.eup %8308  ;;  %6232 = vst [vmem:[%s8863_s17 + $0xe70] sm:$0xff] %v5720_v55  ;;  %v5209_v7 = vmul.f32 %v8307_v30, %v14276_v26  ;;  %8324 = vrcp.f32 %v3166_v47  ;;  %v2628_v17 = vmul.f32 1.442695, %v1639_v6  ;;  %v1129_v18 = vand.u32 2147483647, %v14370_v41 }
 0x460   : > { %v14360_v39 = vpop.eup %8310  ;;  %v5210_v4 = vmul.f32 %v8309_v51, %v14284_v23  ;;  %8326 = vrcp.f32 %v3167_v31  ;;  %v2630_v62 = vmul.f32 1.442695, %v1640_v34  ;;  %vm4702_vm4 = vcmp.ge.f32.partialorder %v14233_v54, 0.0 }
 0x461   : > { %v14364_v37 = vpop.eup %8312  ;;  %v5721_v26 = vsel %vm4697_vm15, %v8307_v30, %v5209_v7  ;;  %v3168_v24 = vadd.f32 1.0, %v14360_v39  ;;  %8328 = vpow2.f32 %v2622_v22  ;;  %v1641_v13 = vsub.f32 0.0, %v1129_v18 }
 0x462   : > { %v8315_v5 = vpop.eup %8314  ;;  %6233 = vst [vmem:[%s8863_s17 + $0xe78] sm:$0xff] %v5721_v26  ;;  %v5722_v23 = vsel %vm4698_vm0, %v8309_v51, %v5210_v4  ;;  %v3169_v52 = vadd.f32 1.0, %v14364_v37  ;;  %8330 = vpow2.f32 %v2624_v45  ;;  %v1130_v40 = vand.u32 2147483647, %v14385_v61  ;;  %v14431_v4 = vld [vmem:[%s8712_s30 + $0xf28] sm:$0xff] }
 0x463   : > { %v8317_v29 = vpop.eup %8316  ;;  %6234 = vst [vmem:[%s8863_s17 + $0xe80] sm:$0xff] %v5722_v23  ;;  %v5211_v60 = vmul.f32 %v8315_v5, %v14300_v59  ;;  %8332 = vrcp.f32 %v3168_v24  ;;  %vm4703_vm5 = vcmp.ge.f32.partialorder %v14240_v19, 0.0  ;;  %v2632_v57 = vmul.f32 1.442695, %v1641_v13  ;;  %v14465_v13 = vld [vmem:[%s8712_s30 + $0xf38] sm:$0xff] }
 0x464   : > { %v14379_v35 = vpop.eup %8318  ;;  %v5212_v32 = vmul.f32 %v8317_v29, %v14304_v46  ;;  %8334 = vrcp.f32 %v3169_v52  ;;  %v1131_v42 = vand.u32 2147483647, %v14393_v56  ;;  %v1132_v58 = vand.u32 2147483647, %v14400_v49 }
 0x465   : > { %v14387_v2 = vpop.eup %8320  ;;  %v5723_v59 = vsel %vm4699_vm1, %v8315_v5, %v5211_v60  ;;  %v3170_v33 = vadd.f32 1.0, %v14379_v35  ;;  %8336 = vpow2.f32 %v2626_v63  ;;  %vm4704_vm6 = vcmp.ge.f32.partialorder %v14253_v25, 0.0 }
 0x466   : > { %v8323_v46 = vpop.eup %8322  ;;  %6235 = vst [vmem:[%s8863_s17 + $0xe88] sm:$0xff] %v5723_v59  ;;  %v5724_v43 = vsel %vm4700_vm2, %v8317_v29, %v5212_v32  ;;  %v3171_v12 = vadd.f32 1.0, %v14387_v2  ;;  %8338 = vpow2.f32 %v2628_v17  ;;  %v1643_v22 = vsub.f32 0.0, %v1131_v42  ;;  %v14451_v17 = vld [vmem:[%s8712_s30 + $0xf30] sm:$0xff]  ;;  %v14473_v42 = vld [vmem:[%s8712_s30 + $0xf40] sm:$0xff] }
 0x467   : > { %6236 = vst [vmem:[%s8863_s17 + $0xe90] sm:$0xff] %v5724_v43  ;;  %v5213_v0 = vmul.f32 %v8323_v46, %v14322_v53  ;;  %8340 = vrcp.f32 %v3170_v33  ;;  %v1642_v53 = vsub.f32 0.0, %v1130_v40  ;;  %v1644_v31 = vsub.f32 0.0, %v1132_v58 }
 0x468   : > { %8342 = vrcp.f32 %v3171_v12  ;;  %v1133_v45 = vand.u32 2147483647, %v14409_v44  ;;  %vm4705_vm7 = vcmp.ge.f32.partialorder %v14267_v38, 0.0  ;;  %v2636_v20 = vmul.f32 1.442695, %v1643_v22 }
 0x469   : > { %v8325_v15 = vpop.eup %8324  ;;  %v5725_v14 = vsel %vm4701_vm3, %v8323_v46, %v5213_v0  ;;  %8344 = vpow2.f32 %v2630_v62  ;;  %v2634_v55 = vmul.f32 1.442695, %v1642_v53  ;;  %v2638_v26 = vmul.f32 1.442695, %v1644_v31  ;;  %v14480_v53 = vld [vmem:[%s8712_s30 + $0xf48] sm:$0xff]  ;;  %v14493_v31 = vld [vmem:[%s8712_s30 + $0xf50] sm:$0xff] }
 0x46a   : > { %v8327_v1 = vpop.eup %8326  ;;  %6237 = vst [vmem:[%s8863_s17 + $0xe98] sm:$0xff] %v5725_v14  ;;  %v5214_v47 = vmul.f32 %v8325_v15, %v14336_v50  ;;  %8346 = vpow2.f32 %v2632_v57  ;;  %v1645_v6 = vsub.f32 0.0, %v1133_v45  ;;  %v1134_v5 = vand.u32 2147483647, %v14422_v36 }
 0x46b   : > { %v14417_v30 = vpop.eup %8328  ;;  %v5215_v11 = vmul.f32 %v8327_v1, %v14343_v27  ;;  %8348 = vpow2.f32 %v2634_v55  ;;  %vm4706_vm8 = vcmp.ge.f32.partialorder %v14282_v21, 0.0  ;;  %v1135_v19 = vand.u32 2147483647, %v14431_v4 }
 0x46c   : > { %v14424_v51 = vpop.eup %8330  ;;  %v5726_v50 = vsel %vm4702_vm4, %v8325_v15, %v5214_v47  ;;  %v3172_v7 = vadd.f32 1.0, %v14417_v30  ;;  %v2640_v60 = vmul.f32 1.442695, %v1645_v6  ;;  %v1646_v59 = vsub.f32 0.0, %v1134_v5  ;;  %v14507_v5 = vld [vmem:[%s8712_s30 + $0xf58] sm:$0xff] }
 0x46d   : > { %v8333_v27 = vpop.eup %8332  ;;  %6238 = vst [vmem:[%s8863_s17 + $0xea0] sm:$0xff] %v5726_v50  ;;  %v5727_v63 = vsel %vm4703_vm5, %v8327_v1, %v5215_v11  ;;  %v3173_v8 = vadd.f32 1.0, %v14424_v51  ;;  %vm4707_vm9 = vcmp.ge.f32.partialorder %v14290_v16, 0.0  ;;  %v1647_v62 = vsub.f32 0.0, %v1135_v19 }
 0x46e   : > { %v8335_v24 = vpop.eup %8334  ;;  %6239 = vst [vmem:[%s8863_s17 + $0xea8] sm:$0xff] %v5727_v63  ;;  %v5216_v54 = vmul.f32 %v8333_v27, %v14360_v39  ;;  %8350 = vrcp.f32 %v3172_v7  ;;  %v2642_v43 = vmul.f32 1.442695, %v1646_v59  ;;  %v1136_v12 = vand.u32 2147483647, %v14451_v17 }
 0x46f   : > { %v14440_v23 = vpop.eup %8336  ;;  %v5217_v52 = vmul.f32 %v8335_v24, %v14364_v37  ;;  %8352 = vrcp.f32 %v3173_v8  ;;  %v2644_v57 = vmul.f32 1.442695, %v1647_v62  ;;  %vm4708_vm10 = vcmp.ge.f32.partialorder %v14310_v48, 0.0  ;;  %v14530_v62 = vld [vmem:[%s8712_s30 + $0xf68] sm:$0xff] }
 0x470   : > { %v14445_v34 = vpop.eup %8338  ;;  %v5728_v39 = vsel %vm4704_vm6, %v8333_v27, %v5216_v54  ;;  %v3174_v29 = vadd.f32 1.0, %v14440_v23  ;;  %8354 = vpow2.f32 %v2636_v20  ;;  %v1648_v14 = vsub.f32 0.0, %v1136_v12 }
 0x471   : > { %v8341_v32 = vpop.eup %8340  ;;  %6240 = vst [vmem:[%s8863_s17 + $0xeb0] sm:$0xff] %v5728_v39  ;;  %v5729_v37 = vsel %vm4705_vm7, %v8335_v24, %v5217_v52  ;;  %v3175_v18 = vadd.f32 1.0, %v14445_v34  ;;  %8356 = vpow2.f32 %v2638_v26  ;;  %vm4709_vm11 = vcmp.ge.f32.partialorder %v14317_v3, 0.0 }
 0x472   : > { %v8343_v33 = vpop.eup %8342  ;;  %6241 = vst [vmem:[%s8863_s17 + $0xeb8] sm:$0xff] %v5729_v37  ;;  %v5218_v25 = vmul.f32 %v8341_v32, %v14379_v35  ;;  %8358 = vrcp.f32 %v3174_v29  ;;  %v1137_v21 = vand.u32 2147483647, %v14465_v13  ;;  %vm4710_vm12 = vcmp.ge.f32.partialorder %v14327_v9, 0.0 }
 0x473   : > { %v14460_v46 = vpop.eup %8344  ;;  %v5219_v38 = vmul.f32 %v8343_v33, %v14387_v2  ;;  %8360 = vrcp.f32 %v3175_v18  ;;  %v2646_v16 = vmul.f32 1.442695, %v1648_v14  ;;  %v1138_v1 = vand.u32 2147483647, %v14473_v42  ;;  %v14522_v18 = vld [vmem:[%s8712_s30 + $0xf60] sm:$0xff] }
 0x474   : > { %v14467_v0 = vpop.eup %8346  ;;  %v5730_v35 = vsel %vm4706_vm8, %v8341_v32, %v5218_v25  ;;  %v3176_v40 = vadd.f32 1.0, %v14460_v46  ;;  %8362 = vpow2.f32 %v2640_v60  ;;  %v1649_v11 = vsub.f32 0.0, %v1137_v21 }
 0x475   : > { %6242 = vst [vmem:[%s8863_s17 + $0xec0] sm:$0xff] %v5730_v35  ;;  %v5731_v2 = vsel %vm4707_vm9, %v8343_v33, %v5219_v38  ;;  %v3177_v15 = vadd.f32 1.0, %v14467_v0  ;;  %8364 = vpow2.f32 %v2642_v43  ;;  %v14486_v58 = vpop.eup %8348  ;;  %v1139_v55 = vand.u32 2147483647, %v14480_v53 }
 0x476   : > { %6243 = vst [vmem:[%s8863_s17 + $0xec8] sm:$0xff] %v5731_v2  ;;  %8366 = vrcp.f32 %v3176_v40  ;;  %v3178_v22 = vadd.f32 1.0, %v14486_v58  ;;  %vm4711_vm13 = vcmp.ge.f32.partialorder %v14341_v10, 0.0  ;;  %v1650_v7 = vsub.f32 0.0, %v1138_v1  ;;  %v14550_v1 = vld [vmem:[%s8712_s30 + $0xf70] sm:$0xff] }
 0x477   : > { %8368 = vrcp.f32 %v3177_v15  ;;  %v2648_v63 = vmul.f32 1.442695, %v1649_v11  ;;  %v1651_v8 = vsub.f32 0.0, %v1139_v55  ;;  %v1140_v6 = vand.u32 2147483647, %v14493_v31  ;;  %v14557_v55 = vld [vmem:[%s8712_s30 + $0xf78] sm:$0xff] }
 0x478   : > { %v8351_v47 = vpop.eup %8350  ;;  %8370 = vpow2.f32 %v2644_v57  ;;  %v2650_v54 = vmul.f32 1.442695, %v1650_v7  ;;  %vm4712_vm14 = vcmp.ge.f32.partialorder %v14350_v28, 0.0  ;;  %vm4713_vm15 = vcmp.ge.f32.partialorder %v14370_v41, 0.0 }
 0x479   : > { %v8353_v45 = vpop.eup %8352  ;;  %v5220_v50 = vmul.f32 %v8351_v47, %v14417_v30  ;;  %8372 = vpow2.f32 %v2646_v16  ;;  %v2652_v39 = vmul.f32 1.442695, %v1651_v8  ;;  %v1652_v60 = vsub.f32 0.0, %v1140_v6 }
 0x47a   : > { %v14497_v20 = vpop.eup %8354  ;;  %v5221_v27 = vmul.f32 %v8353_v45, %v14424_v51  ;;  %8374 = vrcp.f32 %v3178_v22  ;;  %v1141_v37 = vand.u32 2147483647, %v14507_v5  ;;  %vm4714_vm0 = vcmp.ge.f32.partialorder %v14385_v61, 0.0 }
 0x47b   : > { %v14500_v26 = vpop.eup %8356  ;;  %v5732_v24 = vsel %vm4708_vm10, %v8351_v47, %v5220_v50  ;;  %v3179_v30 = vadd.f32 1.0, %v14497_v20  ;;  %8376 = vpow2.f32 %v2648_v63  ;;  %v2654_v25 = vmul.f32 1.442695, %v1652_v60 }
 0x47c   : > { %v8359_v52 = vpop.eup %8358  ;;  %6244 = vst [vmem:[%s8863_s17 + $0xed0] sm:$0xff] %v5732_v24  ;;  %v5733_v51 = vsel %vm4709_vm11, %v8353_v45, %v5221_v27  ;;  %v3180_v19 = vadd.f32 1.0, %v14500_v26  ;;  %v1653_v12 = vsub.f32 0.0, %v1141_v37  ;;  %v1142_v40 = vand.u32 2147483647, %v14522_v18  ;;  %v14567_v27 = vld [vmem:[%s8712_s30 + $0xf80] sm:$0xff] }
 0x47d   : > { %v8361_v29 = vpop.eup %8360  ;;  %6245 = vst [vmem:[%s8863_s17 + $0xed8] sm:$0xff] %v5733_v51  ;;  %v5222_v48 = vmul.f32 %v8359_v52, %v14440_v23  ;;  %8378 = vrcp.f32 %v3179_v30  ;;  %v1143_v15 = vand.u32 2147483647, %v14530_v62  ;;  %vm4715_vm1 = vcmp.ge.f32.partialorder %v14393_v56, 0.0 }
 0x47e   : > { %v14516_v32 = vpop.eup %8362  ;;  %v5223_v3 = vmul.f32 %v8361_v29, %v14445_v34  ;;  %8380 = vrcp.f32 %v3180_v19  ;;  %v2656_v2 = vmul.f32 1.442695, %v1653_v12  ;;  %v1654_v16 = vsub.f32 0.0, %v1142_v40 }
 0x47f   : > { %v14524_v59 = vpop.eup %8364  ;;  %v5734_v23 = vsel %vm4710_vm12, %v8359_v52, %v5222_v48  ;;  %v3181_v33 = vadd.f32 1.0, %v14516_v32  ;;  %8382 = vpow2.f32 %v2650_v54  ;;  %v1655_v11 = vsub.f32 0.0, %v1143_v15 }
 0x480   : > { %v8367_v34 = vpop.eup %8366  ;;  %6246 = vst [vmem:[%s8863_s17 + $0xee0] sm:$0xff] %v5734_v23  ;;  %v5735_v38 = vsel %vm4711_vm13, %v8361_v29, %v5223_v3  ;;  %v3182_v43 = vadd.f32 1.0, %v14524_v59  ;;  %8384 = vpow2.f32 %v2652_v39  ;;  %v2658_v45 = vmul.f32 1.442695, %v1654_v16  ;;  %v14581_v39 = vld [vmem:[%s8712_s30 + $0xf88] sm:$0xff]  ;;  %v14590_v3 = vld [vmem:[%s8712_s30 + $0xf90] sm:$0xff] }
 0x481   : > { %v8369_v35 = vpop.eup %8368  ;;  %6247 = vst [vmem:[%s8863_s17 + $0xee8] sm:$0xff] %v5735_v38  ;;  %v5224_v9 = vmul.f32 %v8367_v34, %v14460_v46  ;;  %8386 = vrcp.f32 %v3181_v33  ;;  %vm4716_vm2 = vcmp.ge.f32.partialorder %v14400_v49, 0.0  ;;  %v2660_v41 = vmul.f32 1.442695, %v1655_v11  ;;  %v14625_v11 = vld [vmem:[%s8712_s30 + $0xfa0] sm:$0xff] }
 0x482   : > { %v14540_v57 = vpop.eup %8370  ;;  %v5225_v10 = vmul.f32 %v8369_v35, %v14467_v0  ;;  %8388 = vrcp.f32 %v3182_v43  ;;  %v1144_v7 = vand.u32 2147483647, %v14550_v1  ;;  %v1145_v24 = vand.u32 2147483647, %v14557_v55 }
 0x483   : > { %v14544_v14 = vpop.eup %8372  ;;  %v5736_v46 = vsel %vm4712_vm14, %v8367_v34, %v5224_v9  ;;  %v3183_v21 = vadd.f32 1.0, %v14540_v57  ;;  %8390 = vpow2.f32 %v2654_v25  ;;  %vm4717_vm3 = vcmp.ge.f32.partialorder %v14409_v44, 0.0 }
 0x484   : > { %v8375_v47 = vpop.eup %8374  ;;  %6248 = vst [vmem:[%s8863_s17 + $0xef0] sm:$0xff] %v5736_v46  ;;  %v5737_v0 = vsel %vm4713_vm15, %v8369_v35, %v5225_v10  ;;  %v3184_v22 = vadd.f32 1.0, %v14544_v14  ;;  %8392 = vpow2.f32 %v2656_v2  ;;  %v1656_v6 = vsub.f32 0.0, %v1144_v7  ;;  %v14610_v2 = vld [vmem:[%s8712_s30 + $0xf98] sm:$0xff]  ;;  %v14633_v7 = vld [vmem:[%s8712_s30 + $0xfa8] sm:$0xff] }
 0x485   : > { %6249 = vst [vmem:[%s8863_s17 + $0xef8] sm:$0xff] %v5737_v0  ;;  %v5226_v28 = vmul.f32 %v8375_v47, %v14486_v58  ;;  %8394 = vrcp.f32 %v3183_v21  ;;  %v14562_v50 = vpop.eup %8376  ;;  %v1657_v51 = vsub.f32 0.0, %v1145_v24  ;;  %v1146_v19 = vand.u32 2147483647, %v14567_v27  ;;  %v14640_v24 = vld [vmem:[%s8712_s30 + $0xfb0] sm:$0xff] }
 0x486   : > { %8396 = vrcp.f32 %v3184_v22  ;;  %v3185_v8 = vadd.f32 1.0, %v14562_v50  ;;  %vm4718_vm4 = vcmp.ge.f32.partialorder %v14422_v36, 0.0  ;;  %v2662_v60 = vmul.f32 1.442695, %v1656_v6  ;;  %v14649_v6 = vld [vmem:[%s8712_s30 + $0xfb8] sm:$0xff] }
 0x487   : > { %v8379_v63 = vpop.eup %8378  ;;  %v5738_v58 = vsel %vm4714_vm0, %v8375_v47, %v5226_v28  ;;  %8398 = vpow2.f32 %v2658_v45  ;;  %v2664_v33 = vmul.f32 1.442695, %v1657_v51  ;;  %v1658_v25 = vsub.f32 0.0, %v1146_v19 }
 0x488   : > { %v8381_v30 = vpop.eup %8380  ;;  %6250 = vst [vmem:[%s8863_s17 + $0xf00] sm:$0xff] %v5738_v58  ;;  %v5227_v54 = vmul.f32 %v8379_v63, %v14497_v20  ;;  %8400 = vpow2.f32 %v2660_v41  ;;  %vm4719_vm5 = vcmp.ge.f32.partialorder %v14431_v4, 0.0  ;;  %v1147_v38 = vand.u32 2147483647, %v14581_v39 }
 0x489   : > { %v14576_v52 = vpop.eup %8382  ;;  %v5228_v61 = vmul.f32 %v8381_v30, %v14500_v26  ;;  %8402 = vrcp.f32 %v3185_v8  ;;  %v2666_v12 = vmul.f32 1.442695, %v1658_v25  ;;  %v1148_v35 = vand.u32 2147483647, %v14590_v3  ;;  %v14662_v25 = vld [vmem:[%s8712_s30 + $0xfc0] sm:$0xff] }
 0x48a   : > { %v14583_v29 = vpop.eup %8384  ;;  %v5739_v20 = vsel %vm4715_vm1, %v8379_v63, %v5227_v54  ;;  %v3186_v48 = vadd.f32 1.0, %v14576_v52  ;;  %v1659_v10 = vsub.f32 0.0, %v1147_v38  ;;  %vm4720_vm6 = vcmp.ge.f32.partialorder %v14451_v17, 0.0 }
 0x48b   : > { %v8387_v26 = vpop.eup %8386  ;;  %6251 = vst [vmem:[%s8863_s17 + $0xf08] sm:$0xff] %v5739_v20  ;;  %v5740_v37 = vsel %vm4716_vm2, %v8381_v30, %v5228_v61  ;;  %v3187_v23 = vadd.f32 1.0, %v14583_v29  ;;  %v1660_v21 = vsub.f32 0.0, %v1148_v35  ;;  %vm4721_vm7 = vcmp.ge.f32.partialorder %v14465_v13, 0.0 }
 0x48c   : > { %v8389_v34 = vpop.eup %8388  ;;  %6252 = vst [vmem:[%s8863_s17 + $0xf10] sm:$0xff] %v5740_v37  ;;  %v5229_v56 = vmul.f32 %v8387_v26, %v14516_v32  ;;  %8404 = vrcp.f32 %v3186_v48  ;;  %v2668_v47 = vmul.f32 1.442695, %v1659_v10  ;;  %v1149_v22 = vand.u32 2147483647, %v14610_v2 }
 0x48d   : > { %v14600_v43 = vpop.eup %8390  ;;  %v5230_v49 = vmul.f32 %v8389_v34, %v14524_v59  ;;  %8406 = vrcp.f32 %v3187_v23  ;;  %v2670_v41 = vmul.f32 1.442695, %v1660_v21  ;;  %vm4722_vm8 = vcmp.ge.f32.partialorder %v14473_v42, 0.0 }
 0x48e   : > { %v14604_v9 = vpop.eup %8392  ;;  %v5741_v32 = vsel %vm4717_vm3, %v8387_v26, %v5229_v56  ;;  %v3188_v40 = vadd.f32 1.0, %v14600_v43  ;;  %8408 = vpow2.f32 %v2662_v60  ;;  %v1661_v8 = vsub.f32 0.0, %v1149_v22 }
 0x48f   : > { %v8395_v15 = vpop.eup %8394  ;;  %6253 = vst [vmem:[%s8863_s17 + $0xf18] sm:$0xff] %v5741_v32  ;;  %v5742_v59 = vsel %vm4718_vm4, %v8389_v34, %v5230_v49  ;;  %v3189_v46 = vadd.f32 1.0, %v14604_v9  ;;  %8410 = vpow2.f32 %v2664_v33  ;;  %v1150_v30 = vand.u32 2147483647, %v14625_v11  ;;  %v14671_v49 = vld [vmem:[%s8712_s30 + $0xfc8] sm:$0xff] }
 0x490   : > { %v8397_v16 = vpop.eup %8396  ;;  %6254 = vst [vmem:[%s8863_s17 + $0xf20] sm:$0xff] %v5742_v59  ;;  %v5231_v44 = vmul.f32 %v8395_v15, %v14540_v57  ;;  %8412 = vrcp.f32 %v3188_v40  ;;  %vm4723_vm9 = vcmp.ge.f32.partialorder %v14480_v53, 0.0  ;;  %v2672_v17 = vmul.f32 1.442695, %v1661_v8  ;;  %v14705_v8 = vld [vmem:[%s8712_s30 + $0xfd8] sm:$0xff] }
 0x491   : > { %v14619_v0 = vpop.eup %8398  ;;  %v5232_v36 = vmul.f32 %v8397_v16, %v14544_v14  ;;  %8414 = vrcp.f32 %v3189_v46  ;;  %v1151_v54 = vand.u32 2147483647, %v14633_v7  ;;  %v1152_v19 = vand.u32 2147483647, %v14640_v24 }
 0x492   : > { %v14627_v28 = vpop.eup %8400  ;;  %v5743_v57 = vsel %vm4719_vm5, %v8395_v15, %v5231_v44  ;;  %v3190_v45 = vadd.f32 1.0, %v14619_v0  ;;  %8416 = vpow2.f32 %v2666_v12  ;;  %vm4724_vm10 = vcmp.ge.f32.partialorder %v14493_v31, 0.0 }
 0x493   : > { %v8403_v14 = vpop.eup %8402  ;;  %6255 = vst [vmem:[%s8863_s17 + $0xf28] sm:$0xff] %v5743_v57  ;;  %v5744_v63 = vsel %vm4720_vm6, %v8397_v16, %v5232_v36  ;;  %v3191_v58 = vadd.f32 1.0, %v14627_v28  ;;  %8418 = vpow2.f32 %v2668_v47  ;;  %v1663_v60 = vsub.f32 0.0, %v1151_v54  ;;  %v14691_v47 = vld [vmem:[%s8712_s30 + $0xfd0] sm:$0xff]  ;;  %v14713_v54 = vld [vmem:[%s8712_s30 + $0xfe0] sm:$0xff] }
 0x494   : > { %6256 = vst [vmem:[%s8863_s17 + $0xf30] sm:$0xff] %v5744_v63  ;;  %v5233_v4 = vmul.f32 %v8403_v14, %v14562_v50  ;;  %8420 = vrcp.f32 %v3190_v45  ;;  %v1662_v50 = vsub.f32 0.0, %v1150_v30  ;;  %v1664_v23 = vsub.f32 0.0, %v1152_v19 }
 0x495   : > { %8422 = vrcp.f32 %v3191_v58  ;;  %v1153_v33 = vand.u32 2147483647, %v14649_v6  ;;  %vm4725_vm11 = vcmp.ge.f32.partialorder %v14507_v5, 0.0  ;;  %v2676_v38 = vmul.f32 1.442695, %v1663_v60 }
 0x496   : > { %v8405_v61 = vpop.eup %8404  ;;  %v5745_v51 = vsel %vm4721_vm7, %v8403_v14, %v5233_v4  ;;  %8424 = vpow2.f32 %v2670_v41  ;;  %v2674_v37 = vmul.f32 1.442695, %v1662_v50  ;;  %v2678_v32 = vmul.f32 1.442695, %v1664_v23  ;;  %v14720_v50 = vld [vmem:[%s8712_s30 + $0xfe8] sm:$0xff]  ;;  %v14732_v23 = vld [vmem:[%s8712_s30 + $0xff0] sm:$0xff] }
 0x497   : > { %v8407_v20 = vpop.eup %8406  ;;  %6257 = vst [vmem:[%s8863_s17 + $0xf38] sm:$0xff] %v5745_v51  ;;  %v5234_v48 = vmul.f32 %v8405_v61, %v14576_v52  ;;  %8426 = vpow2.f32 %v2672_v17  ;;  %v1665_v10 = vsub.f32 0.0, %v1153_v33  ;;  %v1154_v15 = vand.u32 2147483647, %v14662_v25 }
 0x498   : > { %v14657_v26 = vpop.eup %8408  ;;  %v5235_v13 = vmul.f32 %v8407_v20, %v14583_v29  ;;  %8428 = vpow2.f32 %v2674_v37  ;;  %vm4726_vm12 = vcmp.ge.f32.partialorder %v14522_v18, 0.0  ;;  %v1155_v53 = vand.u32 2147483647, %v14671_v49 }
 0x499   : > { %v14664_v34 = vpop.eup %8410  ;;  %v5746_v52 = vsel %vm4722_vm8, %v8405_v61, %v5234_v48  ;;  %v3192_v56 = vadd.f32 1.0, %v14657_v26  ;;  %v2680_v44 = vmul.f32 1.442695, %v1665_v10  ;;  %v1666_v57 = vsub.f32 0.0, %v1154_v15  ;;  %v14746_v15 = vld [vmem:[%s8712_s30 + $0xff8] sm:$0xff] }
 0x49a   : > { %v8413_v29 = vpop.eup %8412  ;;  %6258 = vst [vmem:[%s8863_s17 + $0xf40] sm:$0xff] %v5746_v52  ;;  %v5747_v12 = vsel %vm4723_vm9, %v8407_v20, %v5235_v13  ;;  %v3193_v35 = vadd.f32 1.0, %v14664_v34  ;;  %vm4727_vm13 = vcmp.ge.f32.partialorder %v14530_v62, 0.0  ;;  %v1667_v41 = vsub.f32 0.0, %v1155_v53 }
 0x49b   : > { %v8415_v40 = vpop.eup %8414  ;;  %6259 = vst [vmem:[%s8863_s17 + $0xf48] sm:$0xff] %v5747_v12  ;;  %v5236_v42 = vmul.f32 %v8413_v29, %v14600_v43  ;;  %8430 = vrcp.f32 %v3192_v56  ;;  %v2682_v63 = vmul.f32 1.442695, %v1666_v57  ;;  %v1156_v58 = vand.u32 2147483647, %v14691_v47 }
 0x49c   : > { %v14680_v59 = vpop.eup %8416  ;;  %v5237_v46 = vmul.f32 %v8415_v40, %v14604_v9  ;;  %8432 = vrcp.f32 %v3193_v35  ;;  %v2684_v17 = vmul.f32 1.442695, %v1667_v41  ;;  %vm4728_vm14 = vcmp.ge.f32.partialorder %v14550_v1, 0.0 }
 0x49d   : > { %v14685_v21 = vpop.eup %8418  ;;  %v5748_v43 = vsel %vm4724_vm10, %v8413_v29, %v5236_v42  ;;  %v3194_v16 = vadd.f32 1.0, %v14680_v59  ;;  %8434 = vpow2.f32 %v2676_v38  ;;  %v1668_v51 = vsub.f32 0.0, %v1156_v58 }
 0x49e   : > { %v8421_v36 = vpop.eup %8420  ;;  %6260 = vst [vmem:[%s8863_s17 + $0xf50] sm:$0xff] %v5748_v43  ;;  %v5749_v9 = vsel %vm4725_vm11, %v8415_v40, %v5237_v46  ;;  %v3195_v22 = vadd.f32 1.0, %v14685_v21  ;;  %8436 = vpow2.f32 %v2678_v32  ;;  %v1157_v18 = vand.u32 2147483647, %v14705_v8 }
 0x49f   : > { %v8423_v45 = vpop.eup %8422  ;;  %6261 = vst [vmem:[%s8863_s17 + $0xf58] sm:$0xff] %v5749_v9  ;;  %v5238_v31 = vmul.f32 %v8421_v36, %v14619_v0  ;;  %8438 = vrcp.f32 %v3194_v16  ;;  %vm4729_vm15 = vcmp.ge.f32.partialorder %v14557_v55, 0.0  ;;  %v2686_v62 = vmul.f32 1.442695, %v1668_v51 }
 0x4a0   : > { %v14700_v14 = vpop.eup %8424  ;;  %v5239_v5 = vmul.f32 %v8423_v45, %v14627_v28  ;;  %8440 = vrcp.f32 %v3195_v22  ;;  %v1158_v20 = vand.u32 2147483647, %v14713_v54  ;;  %v1669_v13 = vsub.f32 0.0, %v1157_v18 }
 0x4a1   : > { %v14707_v4 = vpop.eup %8426  ;;  %v5750_v0 = vsel %vm4726_vm12, %v8421_v36, %v5238_v31  ;;  %v3196_v30 = vadd.f32 1.0, %v14700_v14  ;;  %8442 = vpow2.f32 %v2680_v44  ;;  %v1159_v37 = vand.u32 2147483647, %v14720_v50 }
 0x4a2   : > { %6262 = vst [vmem:[%s8863_s17 + $0xf60] sm:$0xff] %v5750_v0  ;;  %v5751_v28 = vsel %vm4727_vm13, %v8423_v45, %v5239_v5  ;;  %v3197_v61 = vadd.f32 1.0, %v14707_v4  ;;  %8444 = vpow2.f32 %v2682_v63  ;;  %v14725_v19 = vpop.eup %8428  ;;  %vm4730_vm0 = vcmp.ge.f32.partialorder %v14567_v27, 0.0 }
 0x4a3   : > { %6263 = vst [vmem:[%s8863_s17 + $0xf68] sm:$0xff] %v5751_v28  ;;  %8446 = vrcp.f32 %v3196_v30  ;;  %v3198_v60 = vadd.f32 1.0, %v14725_v19  ;;  %v1670_v56 = vsub.f32 0.0, %v1158_v20  ;;  %v2688_v12 = vmul.f32 1.442695, %v1669_v13 }
 0x4a4   : > { %8448 = vrcp.f32 %v3197_v61  ;;  %v1671_v35 = vsub.f32 0.0, %v1159_v37  ;;  %v1160_v10 = vand.u32 2147483647, %v14732_v23  ;;  %vm4731_vm1 = vcmp.ge.f32.partialorder %v14581_v39, 0.0 }
 0x4a5   : > { %v8431_v48 = vpop.eup %8430  ;;  %8450 = vpow2.f32 %v2684_v17  ;;  %v2690_v42 = vmul.f32 1.442695, %v1670_v56  ;;  %vm4732_vm2 = vcmp.ge.f32.partialorder %v14590_v3, 0.0  ;;  %v1161_v55 = vand.u32 2147483647, %v14746_v15 }
 0x4a6   : > { %v8433_v33 = vpop.eup %8432  ;;  %v5240_v52 = vmul.f32 %v8431_v48, %v14657_v26  ;;  %8452 = vpow2.f32 %v2686_v62  ;;  %v2692_v43 = vmul.f32 1.442695, %v1671_v35  ;;  %v1672_v44 = vsub.f32 0.0, %v1160_v10 }
 0x4a7   : > { %v14736_v38 = vpop.eup %8434  ;;  %v5241_v29 = vmul.f32 %v8433_v33, %v14664_v34  ;;  %8454 = vrcp.f32 %v3198_v60  ;;  %vm4733_vm3 = vcmp.ge.f32.partialorder %v14610_v2, 0.0  ;;  %vm4734_vm4 = vcmp.ge.f32.partialorder %v14625_v11, 0.0 }
 0x4a8   : > { %v14739_v32 = vpop.eup %8436  ;;  %v5752_v40 = vsel %vm4728_vm14, %v8431_v48, %v5240_v52  ;;  %v3199_v26 = vadd.f32 1.0, %v14736_v38  ;;  %8456 = vpow2.f32 %v2688_v12  ;;  %vm4735_vm5 = vcmp.ge.f32.partialorder %v14633_v7, 0.0 }
 0x4a9   : > { %v8439_v46 = vpop.eup %8438  ;;  %6264 = vst [vmem:[%s8863_s17 + $0xf70] sm:$0xff] %v5752_v40  ;;  %v5753_v34 = vsel %vm4729_vm15, %v8433_v33, %v5241_v29  ;;  %v3200_v53 = vadd.f32 1.0, %v14739_v32  ;;  %vm4736_vm6 = vcmp.ge.f32.partialorder %v14640_v24, 0.0  ;;  %vm4737_vm7 = vcmp.ge.f32.partialorder %v14649_v6, 0.0 }
 0x4aa   : > { %v8441_v16 = vpop.eup %8440  ;;  %6265 = vst [vmem:[%s8863_s17 + $0xf78] sm:$0xff] %v5753_v34  ;;  %v5242_v1 = vmul.f32 %v8439_v46, %v14680_v59  ;;  %8458 = vrcp.f32 %v3199_v26  ;;  %v2694_v59 = vmul.f32 1.442695, %v1672_v44  ;;  %vm4738_vm8 = vcmp.ge.f32.partialorder %v14662_v25, 0.0 }
 0x4ab   : > { %v8443_v36 = vpop.eup %8442  ;;  %v5243_v9 = vmul.f32 %v8441_v16, %v14685_v21  ;;  %8460 = vrcp.f32 %v3200_v53  ;;  %v1673_v21 = vsub.f32 0.0, %v1161_v55  ;;  %vm4739_vm9 = vcmp.ge.f32.partialorder %v14671_v49, 0.0 }
 0x4ac   : > { %v8445_v22 = vpop.eup %8444  ;;  %v5754_v57 = vsel %vm4730_vm0, %v8439_v46, %v5242_v1  ;;  %v3201_v45 = vadd.f32 1.0, %v8443_v36  ;;  %8462 = vpow2.f32 %v2690_v42  ;;  %vm4740_vm10 = vcmp.ge.f32.partialorder %v14691_v47, 0.0 }
 0x4ad   : > { %v8447_v31 = vpop.eup %8446  ;;  %6266 = vst [vmem:[%s8863_s17 + $0xf80] sm:$0xff] %v5754_v57  ;;  %v5755_v39 = vsel %vm4731_vm1, %v8441_v16, %v5243_v9  ;;  %v3202_v41 = vadd.f32 1.0, %v8445_v22  ;;  %8464 = vpow2.f32 %v2692_v43  ;;  %v2696_v0 = vmul.f32 1.442695, %v1673_v21 }
 0x4ae   : > { %v8449_v5 = vpop.eup %8448  ;;  %6267 = vst [vmem:[%s8863_s17 + $0xf88] sm:$0xff] %v5755_v39  ;;  %v5244_v63 = vmul.f32 %v8447_v31, %v14700_v14  ;;  %8466 = vrcp.f32 %v3201_v45  ;;  %vm4741_vm11 = vcmp.ge.f32.partialorder %v14705_v8, 0.0  ;;  %vm4742_vm12 = vcmp.ge.f32.partialorder %v14713_v54, 0.0 }
 0x4af   : > { %v8451_v27 = vpop.eup %8450  ;;  %v5245_v58 = vmul.f32 %v8449_v5, %v14707_v4  ;;  %8468 = vrcp.f32 %v3202_v41  ;;  %vm4743_vm13 = vcmp.ge.f32.partialorder %v14720_v50, 0.0  ;;  %vm4744_vm14 = vcmp.ge.f32.partialorder %v14732_v23, 0.0 }
 0x4b0   : > { %v8453_v30 = vpop.eup %8452  ;;  %v5756_v17 = vsel %vm4732_vm2, %v8447_v31, %v5244_v63  ;;  %v3203_v28 = vadd.f32 1.0, %v8451_v27  ;;  %8470 = vpow2.f32 %v2694_v59  ;;  %vm4745_vm15 = vcmp.ge.f32.partialorder %v14746_v15, 0.0 }
 0x4b1   : > { %v8455_v61 = vpop.eup %8454  ;;  %6268 = vst [vmem:[%s8863_s17 + $0xf90] sm:$0xff] %v5756_v17  ;;  %v5757_v51 = vsel %vm4733_vm3, %v8449_v5, %v5245_v58  ;;  %v3204_v2 = vadd.f32 1.0, %v8453_v30  ;;  %8472 = vpow2.f32 %v2696_v0 }
 0x4b2   : > { %6269 = vst [vmem:[%s8863_s17 + $0xf98] sm:$0xff] %v5757_v51  ;;  %v5246_v14 = vmul.f32 %v8455_v61, %v14725_v19  ;;  %8474 = vrcp.f32 %v3203_v28  ;;  %v8457_v4 = vpop.eup %8456 }
 0x4b3   : > { %8476 = vrcp.f32 %v3204_v2  ;;  %v3205_v62 = vadd.f32 1.0, %v8457_v4 }
 0x4b4   : > { %v8459_v18 = vpop.eup %8458  ;;  %v5758_v3 = vsel %vm4734_vm4, %v8455_v61, %v5246_v14 }
 0x4b5   : > { %v8461_v20 = vpop.eup %8460  ;;  %6270 = vst [vmem:[%s8863_s17 + $0xfa0] sm:$0xff] %v5758_v3  ;;  %v5247_v48 = vmul.f32 %v8459_v18, %v14736_v38  ;;  %8478 = vrcp.f32 %v3205_v62 }
 0x4b6   : > { %v8463_v11 = vpop.eup %8462  ;;  %v5248_v60 = vmul.f32 %v8461_v20, %v14739_v32 }
 0x4b7   : > { %v8465_v19 = vpop.eup %8464  ;;  %v5759_v13 = vsel %vm4735_vm5, %v8459_v18, %v5247_v48  ;;  %v3206_v37 = vadd.f32 1.0, %v8463_v11 }
 0x4b8   : > { %v8467_v33 = vpop.eup %8466  ;;  %6271 = vst [vmem:[%s8863_s17 + $0xfa8] sm:$0xff] %v5759_v13  ;;  %v5760_v52 = vsel %vm4736_vm6, %v8461_v20, %v5248_v60  ;;  %v3207_v7 = vadd.f32 1.0, %v8465_v19 }
 0x4b9   : > { %v8469_v56 = vpop.eup %8468  ;;  %6272 = vst [vmem:[%s8863_s17 + $0xfb0] sm:$0xff] %v5760_v52  ;;  %v5249_v38 = vmul.f32 %v8467_v33, %v8443_v36  ;;  %8480 = vrcp.f32 %v3206_v37 }
 0x4ba   : > { %v8471_v24 = vpop.eup %8470  ;;  %v5250_v29 = vmul.f32 %v8469_v56, %v8445_v22  ;;  %8482 = vrcp.f32 %v3207_v7 }
 0x4bb   : > { %v8473_v12 = vpop.eup %8472  ;;  %v5761_v35 = vsel %vm4737_vm7, %v8467_v33, %v5249_v38  ;;  %v3208_v32 = vadd.f32 1.0, %v8471_v24 }
 0x4bc   : > { %v8475_v40 = vpop.eup %8474  ;;  %6273 = vst [vmem:[%s8863_s17 + $0xfb8] sm:$0xff] %v5761_v35  ;;  %v5762_v26 = vsel %vm4738_vm8, %v8469_v56, %v5250_v29  ;;  %v3209_v6 = vadd.f32 1.0, %v8473_v12 }
 0x4bd   : > { %v8477_v42 = vpop.eup %8476  ;;  %6274 = vst [vmem:[%s8863_s17 + $0xfc0] sm:$0xff] %v5762_v26  ;;  %v5251_v10 = vmul.f32 %v8475_v40, %v8451_v27  ;;  %8484 = vrcp.f32 %v3208_v32 }
 0x4be   : > { %v5252_v25 = vmul.f32 %v8477_v42, %v8453_v30  ;;  %8486 = vrcp.f32 %v3209_v6 }
 0x4bf   : > { %v5763_v46 = vsel %vm4739_vm9, %v8475_v40, %v5251_v10  ;;  %v8479_v34 = vpop.eup %8478 }
 0x4c0   : > { %6275 = vst [vmem:[%s8863_s17 + $0xfc8] sm:$0xff] %v5763_v46  ;;  %v5764_v53 = vsel %vm4740_vm10, %v8477_v42, %v5252_v25  ;;  %v5253_v49 = vmul.f32 %v8479_v34, %v8457_v4 }
 0x4c1   : > { %6276 = vst [vmem:[%s8863_s17 + $0xfd0] sm:$0xff] %v5764_v53 }
 0x4c2   : > { %v5765_v16 = vsel %vm4741_vm11, %v8479_v34, %v5253_v49 }
 0x4c3   : > { %v8481_v43 = vpop.eup %8480  ;;  %6277 = vst [vmem:[%s8863_s17 + $0xfd8] sm:$0xff] %v5765_v16 }
 0x4c4   : > { %v8483_v47 = vpop.eup %8482  ;;  %v5254_v1 = vmul.f32 %v8481_v43, %v8463_v11 }
 0x4c5   : > { %v5255_v44 = vmul.f32 %v8483_v47, %v8465_v19 }
 0x4c6   : > { %v5766_v36 = vsel %vm4742_vm12, %v8481_v43, %v5254_v1 }
 0x4c7   : > { %v8485_v8 = vpop.eup %8484  ;;  %6278 = vst [vmem:[%s8863_s17 + $0xfe0] sm:$0xff] %v5766_v36  ;;  %v5767_v9 = vsel %vm4743_vm13, %v8483_v47, %v5255_v44 }
 0x4c8   : > { %v8487_v55 = vpop.eup %8486  ;;  %6279 = vst [vmem:[%s8863_s17 + $0xfe8] sm:$0xff] %v5767_v9  ;;  %v5256_v54 = vmul.f32 %v8485_v8, %v8471_v24 }
 0x4c9   : > { %v5257_v22 = vmul.f32 %v8487_v55, %v8473_v12 }
 0x4ca   : > { %v5768_v50 = vsel %vm4744_vm14, %v8485_v8, %v5256_v54 }
 0x4cb   : > { %6280 = vst [vmem:[%s8863_s17 + $0xff0] sm:$0xff] %v5768_v50  ;;  %v5769_v57 = vsel %vm4745_vm15, %v8487_v55, %v5257_v22 }
 0x4cc   : > { %6281 = vst [vmem:[%s8863_s17 + $0xff8] sm:$0xff] %v5769_v57 }
 0x4cd   : > { %8531 = shalt.err (!%p8528_p2)
}
 0x4ce   : > { %s8532_s13 = scalar_lea.hbm %s14799_s2, 65536  ;;  %s8536_s20 = scalar_lea.hbm %s14848_s1, 131072 }
 0x4cf   : > { %p8533_p4 = scmp.ne.s32.totalorder %s14799_s2, %s8532_s13  ;;  %p8537_p9 = scmp.lt.u32.totalorder %s14799_s2, %s14848_s1 }
 0x4d0   : > { %p8538_p1 = scmp.lt.u32.totalorder %s8536_s20, %s8532_s13  ;;  %p8540_p6 = scmp.lt.u32.totalorder %s8532_s13, %s14799_s2 }
 0x4d1   : > { %p8534_p5 = pnand %p8533_p4, %p14855_p11 }
 0x4d2   : > { %p8539_p3 = por %p8538_p1, %p8537_p9 }
 0x4d3   : > { %p8535_p7 = pneg %p8534_p5 }
 0x4d4   : > { %p8541_p12 = por %p8540_p6, %p8539_p3 }
 0x4d6   : > { %p8542_p13 = pnand %p8541_p12, %p8535_p7 }
 0x4d8   : > { %8545 = shalt.err (!%p8542_p13)
}
 0x4d9   : > { %s8590_s24 = smov 512   ;;  %s8591_s26 = smov 32  }
 0x4da   : > { %6392 = dma.vmem_to_hbm [thread:$0]  (%p14855_p11), %s14801_s27, 65536, %s14799_s2, %s6283_s10, %s8590_s24, %s8590_s24, %s8591_s26  }
 0x4db PF: > { %s6312_s30 = sand.u32 1, %s8572_s6   ;;  %p14856_p8 = scmp.ne.s32.totalorder %s14853_s19, 0 }
 0x4dc   : > { %p14857_p10 = scmp.ge.s32.totalorder %s8584_s9, 2  ;;  %s6313_s17 = scalar_lea.sflag [#allocation4], %s6312_s30 }
 0x4de   : > { %p6399_p0 = pnand %p14857_p10, %p14856_p8 }
 0x4e0   : > { %8567 = dma.done.wait (!%p6399_p0), %s6313_s17, 65536  }
 0x4e1   : > { %8569 = vsyncadd (!%p6399_p0), %s6313_s17, 4294901760  ;;  %p14_p2 = scmp.ge.s32.totalorder %s8627_s12, 4   ;;  %s14858_s6 = smov %s8576_s7 }
 0x4e2   : > { %s14859_s7 = smov %s8580_s8  ;;  %s14860_s8 = smov %s8639_s15 }
 0x4e3   : > { %s14861_s9 = smov %s8627_s12  ;;  %16 = sbr.rel (!%p14_p2) target bundleno = 5 (0x5), region = 69 }
 0x4ea   :  { %6318 = vsyncpa [#allocation3], 1 }
 0x4eb   :  { %6320 = vsyncpa [#allocation3 + $0x1], 1 }
 0x4ec   :  { %6321 = vsyncpa [#allocation4], 1 }
 0x4ed   :  { %6323 = vsyncpa [#allocation4 + $0x1], 1 }

</bundles_post_ra>
